<compile_context>
chip_gen: v5e
topology: v5e:2x2
jax: 0.10.0
libtpu: 0.0.40
codegen_flags: <defaults>
</compile_context>

<pallas_src>
import jax
import jax.numpy as jnp
from jax.experimental import pallas as pl
from jax.experimental.pallas import tpu as pltpu


# ----------------------------- Pallas kernels ------------------------------

def _conv_t_kernel(x_ref, w_ref, b_ref, o_ref, acc_ref):
    """Temporal Conv3d (k=(3,1,1), pad=(1,0,0)) as 3 accumulated MXU matmuls.

    x   : (T, HWt, Cin)        activations (cast to bf16 for the MXU)
    w   : (3, Cin, Cout) bf16  per-tap weights, tap order (t-1, t, t+1)
    b   : (1, Cout) f32
    o   : (T, HWt, Cout)
    acc : (T, HWt, Cout) f32   VMEM scratch accumulator
    """
    T, HWt, Cin = x_ref.shape
    Cout = w_ref.shape[-1]
    x2d = x_ref[...].astype(jnp.bfloat16).reshape(T * HWt, Cin)

    ctr = jnp.dot(x2d, w_ref[1], preferred_element_type=jnp.float32)
    acc_ref[...] = (ctr + b_ref[...].astype(jnp.float32)).reshape(T, HWt, Cout)
    if T > 1:
        # out[t] += x[t-1] @ w[0]   (valid for t >= 1)
        prv = jnp.dot(x2d[: (T - 1) * HWt], w_ref[0],
                      preferred_element_type=jnp.float32)
        acc_ref[pl.ds(1, T - 1)] += prv.reshape(T - 1, HWt, Cout)
        # out[t] += x[t+1] @ w[2]   (valid for t <= T-2)
        nxt = jnp.dot(x2d[HWt:], w_ref[2], preferred_element_type=jnp.float32)
        acc_ref[pl.ds(0, T - 1)] += nxt.reshape(T - 1, HWt, Cout)
    o_ref[...] = acc_ref[...].astype(o_ref.dtype)


def _proj_in_kernel(x_ref, w_ref, b_ref, x1_ref, x2_ref, psum_ref, acc_ref):
    """project_in conv: 3 accumulated matmuls vs. the fused (Cin, 2*hidden)
    weight, x1/x2 sliced from the f32 accumulator, fused GAP partial sums.

    x     : (T, HWt, Cin)
    w     : (3, Cin, 2*hidden) bf16,  b: (1, 2*hidden) f32
    x1/x2 : (T, HWt, hidden)   bf16 outputs
    psum  : (T, hidden) f32    sum of x1 over HW, accumulated over HW tiles
    acc   : (T, HWt, 2*hidden) f32 VMEM scratch
    """
    T, HWt, Cin = x_ref.shape
    two_h = w_ref.shape[-1]
    hidden = two_h // 2
    x2d = x_ref[...].astype(jnp.bfloat16).reshape(T * HWt, Cin)

    ctr = jnp.dot(x2d, w_ref[1], preferred_element_type=jnp.float32)
    acc_ref[...] = (ctr + b_ref[...].astype(jnp.float32)).reshape(T, HWt, two_h)
    if T > 1:
        prv = jnp.dot(x2d[: (T - 1) * HWt], w_ref[0],
                      preferred_element_type=jnp.float32)
        acc_ref[pl.ds(1, T - 1)] += prv.reshape(T - 1, HWt, two_h)
        nxt = jnp.dot(x2d[HWt:], w_ref[2], preferred_element_type=jnp.float32)
        acc_ref[pl.ds(0, T - 1)] += nxt.reshape(T - 1, HWt, two_h)

    a = acc_ref[...]
    a1 = a[..., :hidden]
    x1_ref[...] = a1.astype(x1_ref.dtype)
    x2_ref[...] = a[..., hidden:].astype(x2_ref.dtype)

    @pl.when(pl.program_id(1) == 0)
    def _():
        psum_ref[...] = jnp.zeros_like(psum_ref)
    psum_ref[...] += jnp.sum(a1, axis=1)


def _make_dyn_dw_gate_kernel(C, W):
    def kernel(x1_ref, x2_ref, kw_ref, dwb_ref, o_ref):
        """Per-(b, t) dynamic 3x3 depthwise conv on x1, gated by x2.

        Lane-dense layout: last axis is W*C (channel fastest within a pixel).
        x1/x2/o : (H, WC);  kw: (9, C) dyn taps (q = 3*i + j);  dwb: (1, C)
        """
        H, WC = x1_ref.shape
        x = x1_ref[...].astype(jnp.float32)
        # broadcast per-channel taps / bias to the W*C lane layout in-kernel
        kw = jnp.tile(kw_ref[...].astype(jnp.float32), (1, W))     # (9, WC)
        dwb = jnp.tile(dwb_ref[...].astype(jnp.float32), (1, W))   # (1, WC)

        lane = jax.lax.broadcasted_iota(jnp.int32, (H, WC), 1)
        row = jax.lax.broadcasted_iota(jnp.int32, (H, WC), 0)
        # x[., w-1] / x[., w+1]: XLU lane roll by +-C, zeroed at the W edges.
        xm = jnp.where(lane < C, 0.0, pltpu.roll(x, shift=C, axis=1))
        xp = jnp.where(lane >= WC - C, 0.0, pltpu.roll(x, shift=WC - C, axis=1))

        def tap(q):
            return kw[q:q + 1, :]                 # (1, WC), broadcast over H

        # i = 1 (same row)
        acc = x * tap(4) + dwb
        acc = acc + xm * tap(3) + xp * tap(5)
        # i = 0: contribution read from row h-1 (sublane roll down, zero at h=0)
        top = xm * tap(0) + x * tap(1) + xp * tap(2)
        acc = acc + jnp.where(row < 1, 0.0, pltpu.roll(top, shift=1, axis=0))
        # i = 2: contribution read from row h+1 (sublane roll up, zero at h=H-1)
        bot = xm * tap(6) + x * tap(7) + xp * tap(8)
        acc = acc + jnp.where(row >= H - 1, 0.0,
                              pltpu.roll(bot, shift=H - 1, axis=0))

        o_ref[...] = (acc * x2_ref[...].astype(jnp.float32)).astype(o_ref.dtype)
    return kernel


# ------------------------------ pallas wrappers -----------------------------

_VMEM_LIMIT = None


def _vmem_limit_bytes():
    """~half of physical VMEM: 64 MiB on 128 MiB parts (v5e/v6e), 32 MiB on v7x."""
    global _VMEM_LIMIT
    if _VMEM_LIMIT is None:
        try:
            cap = int(pltpu.get_tpu_info().vmem_capacity_bytes)
        except Exception:
            cap = 128 * 1024 * 1024
        _VMEM_LIMIT = max(32 * 1024 * 1024, min(cap // 2, 96 * 1024 * 1024))
    return _VMEM_LIMIT


def _pick_hw_tile(hw, per_row_bytes, budget_bytes):
    """Largest multiple-of-8 divisor of `hw` whose block footprint fits the
    byte budget; falls back to the full extent (always legal for BlockSpec)."""
    cap = min(hw, max(8, budget_bytes // max(per_row_bytes, 1)))
    cap = (cap // 8) * 8
    best = 0
    d = 8
    while d <= cap:
        if hw % d == 0:
            best = d
        d += 8
    return best if best else hw


def conv3d_temporal(x, w, b, out_dtype):
    """x: (B,T,HW,Cin); w: (3,Cin,Cout) bf16; b: (1,Cout) f32 -> (B,T,HW,Cout)."""
    B, T, HW, Cin = x.shape
    Cout = w.shape[-1]
    limit = _vmem_limit_bytes()
    out_b = jnp.dtype(out_dtype).itemsize
    per_row = T * (2 * x.dtype.itemsize * Cin       # input, double-buffered
                   + 2 * out_b * Cout               # output, double-buffered
                   + 4 * Cout)                      # f32 accumulator scratch
    HWt = _pick_hw_tile(HW, per_row, int(limit * 0.75))
    n_hw = HW // HWt
    cost = pl.CostEstimate(
        flops=2 * 3 * B * T * HW * Cin * Cout,
        transcendentals=0,
        bytes_accessed=int(B * T * HW * (x.dtype.itemsize * Cin + out_b * Cout)
                           + 3 * Cin * Cout * 2 + 4 * Cout))
    return pl.pallas_call(
        _conv_t_kernel,
        out_shape=jax.ShapeDtypeStruct((B, T, HW, Cout), out_dtype),
        grid_spec=pltpu.PrefetchScalarGridSpec(
            num_scalar_prefetch=0,
            grid=(B, n_hw),
            in_specs=[
                pl.BlockSpec((pl.Squeezed(), T, HWt, Cin),
                             lambda b_, h_: (b_, 0, h_, 0)),
                pl.BlockSpec((3, Cin, Cout), lambda b_, h_: (0, 0, 0)),
                pl.BlockSpec((1, Cout), lambda b_, h_: (0, 0)),
            ],
            out_specs=pl.BlockSpec((pl.Squeezed(), T, HWt, Cout),
                                   lambda b_, h_: (b_, 0, h_, 0)),
            scratch_shapes=[pltpu.VMEM((T, HWt, Cout), jnp.float32)],
        ),
        compiler_params=pltpu.CompilerParams(
            dimension_semantics=("parallel", "parallel"),
            vmem_limit_bytes=limit),
        cost_estimate=cost,
    )(x, w, b)


def project_in(x, w, b, hidden):
    """x: (B,T,HW,Cin); w: (3,Cin,2*hidden) bf16; b: (1,2*hidden) f32
    -> x1, x2: (B,T,HW,hidden) bf16, psum: (B,T,hidden) f32 (x1 summed over HW)."""
    B, T, HW, Cin = x.shape
    two_h = 2 * hidden
    limit = _vmem_limit_bytes()
    per_row = T * (2 * x.dtype.itemsize * Cin       # input, double-buffered
                   + 2 * 2 * two_h                  # x1+x2 bf16, double-buffered
                   + 4 * two_h)                     # f32 accumulator scratch
    HWt = _pick_hw_tile(HW, per_row, int(limit * 0.75))
    n_hw = HW // HWt
    cost = pl.CostEstimate(
        flops=2 * 3 * B * T * HW * Cin * two_h,
        transcendentals=0,
        bytes_accessed=int(B * T * HW * (x.dtype.itemsize * Cin + 2 * two_h)
                           + 3 * Cin * two_h * 2 + B * T * hidden * 4))
    out_shape = (
        jax.ShapeDtypeStruct((B, T, HW, hidden), jnp.bfloat16),
        jax.ShapeDtypeStruct((B, T, HW, hidden), jnp.bfloat16),
        jax.ShapeDtypeStruct((B, T, hidden), jnp.float32),
    )
    return pl.pallas_call(
        _proj_in_kernel,
        out_shape=out_shape,
        grid_spec=pltpu.PrefetchScalarGridSpec(
            num_scalar_prefetch=0,
            grid=(B, n_hw),
            in_specs=[
                pl.BlockSpec((pl.Squeezed(), T, HWt, Cin),
                             lambda b_, h_: (b_, 0, h_, 0)),
                pl.BlockSpec((3, Cin, two_h), lambda b_, h_: (0, 0, 0)),
                pl.BlockSpec((1, two_h), lambda b_, h_: (0, 0)),
            ],
            out_specs=(
                pl.BlockSpec((pl.Squeezed(), T, HWt, hidden),
                             lambda b_, h_: (b_, 0, h_, 0)),
                pl.BlockSpec((pl.Squeezed(), T, HWt, hidden),
                             lambda b_, h_: (b_, 0, h_, 0)),
                pl.BlockSpec((pl.Squeezed(), T, hidden),
                             lambda b_, h_: (b_, 0, 0)),      # GAP accumulator
            ),
            scratch_shapes=[pltpu.VMEM((T, HWt, two_h), jnp.float32)],
        ),
        compiler_params=pltpu.CompilerParams(
            dimension_semantics=("parallel", "arbitrary"),
            vmem_limit_bytes=limit),
        cost_estimate=cost,
    )(x, w, b)


def dyn_dw_gate(x1, x2, kw, dwb, C, W):
    """x1,x2: (B,T,H,WC) bf16; kw: (B,T,9,C) f32; dwb: (1,C) f32 -> (B,T,H,WC)."""
    B, T, H, WC = x1.shape
    cost = pl.CostEstimate(
        flops=20 * B * T * H * WC,
        transcendentals=0,
        bytes_accessed=int(3 * B * T * H * WC * x1.dtype.itemsize
                           + B * T * 9 * C * 4 + C * 4))
    # TODO(synk): on v5e add pipeline_mode=pl.Buffered(3) on the x1/x2 specs if
    # the HBM DMA shows up exposed in a trace; on v7x at very large H*WC this
    # kernel could additionally be tiled over H (needs a 1-row halo).
    return pl.pallas_call(
        _make_dyn_dw_gate_kernel(C, W),
        out_shape=jax.ShapeDtypeStruct((B, T, H, WC), x1.dtype),
        grid_spec=pltpu.PrefetchScalarGridSpec(
            num_scalar_prefetch=0,
            grid=(B, T),
            in_specs=[
                pl.BlockSpec((pl.Squeezed(), pl.Squeezed(), H, WC),
                             lambda b_, t_: (b_, t_, 0, 0)),
                pl.BlockSpec((pl.Squeezed(), pl.Squeezed(), H, WC),
                             lambda b_, t_: (b_, t_, 0, 0)),
                pl.BlockSpec((pl.Squeezed(), pl.Squeezed(), 9, C),
                             lambda b_, t_: (b_, t_, 0, 0)),
                pl.BlockSpec((1, C), lambda b_, t_: (0, 0)),
            ],
            out_specs=pl.BlockSpec((pl.Squeezed(), pl.Squeezed(), H, WC),
                                   lambda b_, t_: (b_, t_, 0, 0)),
        ),
        compiler_params=pltpu.CompilerParams(
            dimension_semantics=("parallel", "parallel"),
            vmem_limit_bytes=_vmem_limit_bytes()),
        cost_estimate=cost,
    )(x1, x2, kw, dwb)


# --------------------------- parameters / glue -----------------------------

def init_feedforward_params(key, dim, ffn_expansion_factor=2.0, reduction=4):
    hidden = int(dim * ffn_expansion_factor)
    red = max(hidden // reduction, 1)
    ks = jax.random.split(key, 8)
    s = 0.1
    p = {
        # project_in : Conv3d(dim -> 2*hidden, k=(3,1,1)), stored (kt, Cin, Cout)
        "w_in": s * jax.random.normal(ks[0], (3, dim, 2 * hidden), jnp.float32),
        "b_in": s * jax.random.normal(ks[1], (1, 2 * hidden), jnp.float32),
        # project_out: Conv3d(hidden -> dim, k=(3,1,1))
        "w_out": s * jax.random.normal(ks[2], (3, hidden, dim), jnp.float32),
        "b_out": s * jax.random.normal(ks[3], (1, dim), jnp.float32),
        # DynamicDWConv(hidden, 3, 1, hidden): kernel-generating MLP (1x1 convs)
        "w1": s * jax.random.normal(ks[4], (hidden, red), jnp.float32),
        "w2": s * jax.random.normal(ks[5], (red, hidden * 9), jnp.float32),
        "b2": s * jax.random.normal(ks[6], (hidden * 9,), jnp.float32),
        # BatchNorm2d (eval) of the kernel-generating branch (real params)
        "bn_mean": jnp.zeros((red,), jnp.float32),
        "bn_var": jnp.ones((red,), jnp.float32),
        "bn_gamma": jnp.ones((red,), jnp.float32),
        "bn_beta": jnp.zeros((red,), jnp.float32),
        # static depthwise bias of DynamicDWConv
        "dw_bias": s * jax.random.normal(ks[7], (1, hidden), jnp.float32),
    }
    return p, hidden


def feedforward_pallas(x_ncdhw, params, hidden):
    """x_ncdhw: (B, C, T, H, W) float32 -> (B, C, T, H, W) float32."""
    B, C, T, H, W = x_ncdhw.shape
    HW = H * W
    x = jnp.transpose(x_ncdhw, (0, 2, 3, 4, 1)).reshape(B, T, HW, C)

    # project_in: fused (Cin, 2*hidden) weight per temporal tap, bf16 MXU
    # operands, bf16 x1/x2 intermediates, fused GAP partial sums.
    x1, x2, psum = project_in(x, params["w_in"].astype(jnp.bfloat16),
                              params["b_in"], hidden)

    # DynamicDWConv kernel generation: tiny MLP on pooled features (plain JAX).
    pooled = psum / float(HW)                                   # (B, T, hidden)
    h1 = pooled @ params["w1"]                                  # 1x1 conv, no bias
    h1 = (h1 - params["bn_mean"]) / jnp.sqrt(params["bn_var"] + 1e-5)
    h1 = h1 * params["bn_gamma"] + params["bn_beta"]            # BN (eval)
    h1 = jnp.maximum(h1, 0.0)                                   # ReLU
    h2 = h1 @ params["w2"] + params["b2"]                       # 1x1 conv, +bias
    dynw = h2.reshape(B, T, hidden, 9).transpose(0, 1, 3, 2)    # (B, T, 9, hidden)

    # lane-dense (H, W*hidden) per-(b, t) layout for the depthwise + gate
    # kernel; dyn weights stay (B,T,9,hidden) in HBM, tiled to W*hidden in-kernel.
    WC = W * hidden
    x1r = x1.reshape(B, T, H, WC)                               # free HBM reshape
    x2r = x2.reshape(B, T, H, WC)
    gated = dyn_dw_gate(x1r, x2r, dynw, params["dw_bias"], hidden, W)

    # project_out (bf16 operands, f32 output).
    # TODO(synk): on 128-MiB-VMEM parts this call could be fused with
    # dyn_dw_gate per (b, t) block to skip one HBM round trip of `gated`.
    out = conv3d_temporal(gated.reshape(B, T, HW, hidden),
                          params["w_out"].astype(jnp.bfloat16),
                          params["b_out"], out_dtype=x_ncdhw.dtype)
    return out.reshape(B, T, H, W, C).transpose(0, 4, 1, 2, 3)


# --------------------------- pure-JAX reference ----------------------------

def feedforward_ref(x_ncdhw, params, hidden):
    B, C, T, H, W = x_ncdhw.shape
    x = jnp.transpose(x_ncdhw, (0, 2, 3, 4, 1))                 # (B, T, H, W, C)

    def conv_t(z, w, b):
        zp = jnp.pad(z, ((0, 0), (1, 1), (0, 0), (0, 0), (0, 0)))
        return (jnp.einsum("bthwc,co->bthwo", zp[:, :-2], w[0])
                + jnp.einsum("bthwc,co->bthwo", zp[:, 1:-1], w[1])
                + jnp.einsum("bthwc,co->bthwo", zp[:, 2:], w[2])
                + b.reshape(1, 1, 1, 1, -1))

    y = conv_t(x, params["w_in"], params["b_in"])
    x1, x2 = y[..., :hidden], y[..., hidden:]

    pooled = jnp.mean(x1, axis=(2, 3))
    h1 = pooled @ params["w1"]
    h1 = (h1 - params["bn_mean"]) / jnp.sqrt(params["bn_var"] + 1e-5)
    h1 = h1 * params["bn_gamma"] + params["bn_beta"]
    h1 = jnp.maximum(h1, 0.0)
    dynw = (h1 @ params["w2"] + params["b2"]).reshape(B, T, hidden, 3, 3)

    x1p = jnp.pad(x1, ((0, 0), (0, 0), (1, 1), (1, 1), (0, 0)))
    dw = jnp.zeros_like(x1)
    for i in range(3):
        for j in range(3):
            dw = dw + x1p[:, :, i:i + H, j:j + W, :] * dynw[:, :, :, i, j][:, :, None, None, :]
    dw = dw + params["dw_bias"].reshape(1, 1, 1, 1, hidden)

    out = conv_t(dw * x2, params["w_out"], params["b_out"])
    return jnp.transpose(out, (0, 4, 1, 2, 3))


# --------------------------------- main -------------------------------------

if __name__ == "__main__":
    key = jax.random.PRNGKey(0)
    kx, kp = jax.random.split(key)

    # hidden = 32 -> W*hidden = 512 (lane-dense multiple of 128).
    # TODO(synk): real deployments should pad the channel dims (Cin / hidden)
    # to >=128 so the matmul stores are unmasked lane-dense vst's.
    B, dim, T, H, W = 2, 16, 4, 16, 16
    x = jax.random.normal(kx, (B, dim, T, H, W), jnp.float32)
    params, hidden = init_feedforward_params(kp, dim, ffn_expansion_factor=2.0)

    fwd = jax.jit(lambda v: feedforward_pallas(v, params, hidden))
    out = jax.block_until_ready(fwd(x))

    ref = feedforward_ref(x, params, hidden)
    assert out.shape == (B, dim, T, H, W), out.shape
    max_err = float(jnp.max(jnp.abs(out - ref)))
    # bf16 MXU operands + bf16 HBM intermediates (f32 accumulation) -> looser
    # tolerance than the previous all-f32 path.
    assert jnp.allclose(out, ref, atol=4e-2, rtol=4e-2), f"max abs err = {max_err}"
    print("KERNEL_OK")
</pallas_src>

<mosaic_0001>
module attributes {stable_mosaic.version = 11 : i64} {
  func.func @_proj_in_kernel(%arg0: i32, %arg1: i32, %arg2: memref<1x4x256x16xf32, #tpu.memory_space<vmem>>, %arg3: memref<3x16x64xbf16, #tpu.memory_space<vmem>>, %arg4: memref<1x64xf32, #tpu.memory_space<vmem>>, %arg5: memref<1x4x256x32xbf16, #tpu.memory_space<vmem>>, %arg6: memref<1x4x256x32xbf16, #tpu.memory_space<vmem>>, %arg7: memref<1x4x32xf32, #tpu.memory_space<vmem>>, %arg8: memref<4x256x64xf32, #tpu.memory_space<vmem>>) attributes {dimension_semantics = [#tpu.dimension_semantics<parallel>, #tpu.dimension_semantics<arbitrary>], iteration_bounds = array<i64: 2, 1>, scalar_prefetch = 0 : i64, scratch_operands = 1 : i64, tpu.core_type = #tpu.core_type<tc>, window_params = [{transform_indices = @transform_0, window_bounds = array<i64: 1, 4, 256, 16>}, {pipeline_mode = #tpu.pipeline_mode<synchronous>, transform_indices = @transform_1, window_bounds = array<i64: 3, 16, 64>}, {pipeline_mode = #tpu.pipeline_mode<synchronous>, transform_indices = @transform_2, window_bounds = array<i64: 1, 64>}, {transform_indices = @transform_3, window_bounds = array<i64: 1, 4, 256, 32>}, {transform_indices = @transform_4, window_bounds = array<i64: 1, 4, 256, 32>}, {transform_indices = @transform_5, window_bounds = array<i64: 1, 4, 32>}]} {
    %c0 = arith.constant 0 : index
    %c0_0 = arith.constant 0 : index
    %c0_1 = arith.constant 0 : index
    %c0_2 = arith.constant 0 : index
    %0 = vector.load %arg2[%c0, %c0_0, %c0_1, %c0_2] : memref<1x4x256x16xf32, #tpu.memory_space<vmem>>, vector<1x4x256x16xf32>
    %1 = vector.shape_cast %0 : vector<1x4x256x16xf32> to vector<4x256x16xf32>
    %2 = arith.truncf %1 : vector<4x256x16xf32> to vector<4x256x16xbf16>
    %3 = vector.shape_cast %2 : vector<4x256x16xbf16> to vector<1024x16xbf16>
    %c1 = arith.constant 1 : index
    %c0_3 = arith.constant 0 : index
    %c0_4 = arith.constant 0 : index
    %4 = vector.load %arg3[%c1, %c0_3, %c0_4] : memref<3x16x64xbf16, #tpu.memory_space<vmem>>, vector<1x16x64xbf16>
    %5 = vector.shape_cast %4 : vector<1x16x64xbf16> to vector<16x64xbf16>
    %cst = arith.constant dense<0.000000e+00> : vector<1024x64xf32>
    %6 = tpu.matmul %3, %5, %cst {dimension_numbers = #tpu.dot_dimension_numbers<[1], [0], [0], [1], [0, 0, 1, 1], [], []>} : vector<1024x16xbf16>, vector<16x64xbf16>, vector<1024x64xf32> -> vector<1024x64xf32>
    %c0_5 = arith.constant 0 : index
    %c0_6 = arith.constant 0 : index
    %7 = vector.load %arg4[%c0_5, %c0_6] : memref<1x64xf32, #tpu.memory_space<vmem>>, vector<1x64xf32>
    %8 = vector.broadcast %7 : vector<1x64xf32> to vector<1024x64xf32>
    %9 = arith.addf %6, %8 : vector<1024x64xf32>
    %10 = vector.shape_cast %9 : vector<1024x64xf32> to vector<4x256x64xf32>
    %c0_7 = arith.constant 0 : index
    %c0_8 = arith.constant 0 : index
    %c0_9 = arith.constant 0 : index
    %11 = vector.load %arg8[%c0_7, %c0_8, %c0_9] : memref<4x256x64xf32, #tpu.memory_space<vmem>>, vector<4x256x64xf32>
    tpu.vector_store %arg8[%c0_7, %c0_8, %c0_9], %10 {strides = array<i32>} : memref<4x256x64xf32, #tpu.memory_space<vmem>>, vector<4x256x64xf32>,
    %12 = vector.extract_strided_slice %3 {offsets = [0, 0], sizes = [768, 16], strides = [1, 1]} : vector<1024x16xbf16> to vector<768x16xbf16>
    %c0_10 = arith.constant 0 : index
    %c0_11 = arith.constant 0 : index
    %c0_12 = arith.constant 0 : index
    %13 = vector.load %arg3[%c0_10, %c0_11, %c0_12] : memref<3x16x64xbf16, #tpu.memory_space<vmem>>, vector<1x16x64xbf16>
    %14 = vector.shape_cast %13 : vector<1x16x64xbf16> to vector<16x64xbf16>
    %cst_13 = arith.constant dense<0.000000e+00> : vector<768x64xf32>
    %15 = tpu.matmul %12, %14, %cst_13 {dimension_numbers = #tpu.dot_dimension_numbers<[1], [0], [0], [1], [0, 0, 1, 1], [], []>} : vector<768x16xbf16>, vector<16x64xbf16>, vector<768x64xf32> -> vector<768x64xf32>
    %c1_14 = arith.constant 1 : index
    %c0_15 = arith.constant 0 : index
    %c0_16 = arith.constant 0 : index
    %16 = vector.load %arg8[%c1_14, %c0_15, %c0_16] : memref<4x256x64xf32, #tpu.memory_space<vmem>>, vector<3x256x64xf32>
    %17 = vector.shape_cast %15 : vector<768x64xf32> to vector<3x256x64xf32>
    %18 = arith.addf %16, %17 : vector<3x256x64xf32>
    %c1_17 = arith.constant 1 : index
    %c0_18 = arith.constant 0 : index
    %c0_19 = arith.constant 0 : index
    %19 = vector.load %arg8[%c1_17, %c0_18, %c0_19] : memref<4x256x64xf32, #tpu.memory_space<vmem>>, vector<3x256x64xf32>
    tpu.vector_store %arg8[%c1_17, %c0_18, %c0_19], %18 {strides = array<i32>} : memref<4x256x64xf32, #tpu.memory_space<vmem>>, vector<3x256x64xf32>,
    %20 = vector.extract_strided_slice %3 {offsets = [256, 0], sizes = [768, 16], strides = [1, 1]} : vector<1024x16xbf16> to vector<768x16xbf16>
    %c2 = arith.constant 2 : index
    %c0_20 = arith.constant 0 : index
    %c0_21 = arith.constant 0 : index
    %21 = vector.load %arg3[%c2, %c0_20, %c0_21] : memref<3x16x64xbf16, #tpu.memory_space<vmem>>, vector<1x16x64xbf16>
    %22 = vector.shape_cast %21 : vector<1x16x64xbf16> to vector<16x64xbf16>
    %cst_22 = arith.constant dense<0.000000e+00> : vector<768x64xf32>
    %23 = tpu.matmul %20, %22, %cst_22 {dimension_numbers = #tpu.dot_dimension_numbers<[1], [0], [0], [1], [0, 0, 1, 1], [], []>} : vector<768x16xbf16>, vector<16x64xbf16>, vector<768x64xf32> -> vector<768x64xf32>
    %c0_23 = arith.constant 0 : index
    %c0_24 = arith.constant 0 : index
    %c0_25 = arith.constant 0 : index
    %24 = vector.load %arg8[%c0_23, %c0_24, %c0_25] : memref<4x256x64xf32, #tpu.memory_space<vmem>>, vector<3x256x64xf32>
    %25 = vector.shape_cast %23 : vector<768x64xf32> to vector<3x256x64xf32>
    %26 = arith.addf %24, %25 : vector<3x256x64xf32>
    %c0_26 = arith.constant 0 : index
    %c0_27 = arith.constant 0 : index
    %c0_28 = arith.constant 0 : index
    %27 = vector.load %arg8[%c0_26, %c0_27, %c0_28] : memref<4x256x64xf32, #tpu.memory_space<vmem>>, vector<3x256x64xf32>
    tpu.vector_store %arg8[%c0_26, %c0_27, %c0_28], %26 {strides = array<i32>} : memref<4x256x64xf32, #tpu.memory_space<vmem>>, vector<3x256x64xf32>,
    %c0_29 = arith.constant 0 : index
    %c0_30 = arith.constant 0 : index
    %c0_31 = arith.constant 0 : index
    %28 = vector.load %arg8[%c0_29, %c0_30, %c0_31] : memref<4x256x64xf32, #tpu.memory_space<vmem>>, vector<4x256x64xf32>
    %29 = vector.extract_strided_slice %28 {offsets = [0, 0, 0], sizes = [4, 256, 32], strides = [1, 1, 1]} : vector<4x256x64xf32> to vector<4x256x32xf32>
    %30 = arith.truncf %29 : vector<4x256x32xf32> to vector<4x256x32xbf16>
    %c0_32 = arith.constant 0 : index
    %c0_33 = arith.constant 0 : index
    %c0_34 = arith.constant 0 : index
    %c0_35 = arith.constant 0 : index
    %31 = vector.load %arg5[%c0_32, %c0_33, %c0_34, %c0_35] : memref<1x4x256x32xbf16, #tpu.memory_space<vmem>>, vector<1x4x256x32xbf16>
    %32 = vector.shape_cast %31 : vector<1x4x256x32xbf16> to vector<4x256x32xbf16>
    %33 = vector.shape_cast %30 : vector<4x256x32xbf16> to vector<1x4x256x32xbf16>
    tpu.vector_store %arg5[%c0_32, %c0_33, %c0_34, %c0_35], %33 {strides = array<i32>} : memref<1x4x256x32xbf16, #tpu.memory_space<vmem>>, vector<1x4x256x32xbf16>,
    %34 = vector.extract_strided_slice %28 {offsets = [0, 0, 32], sizes = [4, 256, 32], strides = [1, 1, 1]} : vector<4x256x64xf32> to vector<4x256x32xf32>
    %35 = arith.truncf %34 : vector<4x256x32xf32> to vector<4x256x32xbf16>
    %c0_36 = arith.constant 0 : index
    %c0_37 = arith.constant 0 : index
    %c0_38 = arith.constant 0 : index
    %c0_39 = arith.constant 0 : index
    %36 = vector.load %arg6[%c0_36, %c0_37, %c0_38, %c0_39] : memref<1x4x256x32xbf16, #tpu.memory_space<vmem>>, vector<1x4x256x32xbf16>
    %37 = vector.shape_cast %36 : vector<1x4x256x32xbf16> to vector<4x256x32xbf16>
    %38 = vector.shape_cast %35 : vector<4x256x32xbf16> to vector<1x4x256x32xbf16>
    tpu.vector_store %arg6[%c0_36, %c0_37, %c0_38, %c0_39], %38 {strides = array<i32>} : memref<1x4x256x32xbf16, #tpu.memory_space<vmem>>, vector<1x4x256x32xbf16>,
    %c0_i32 = arith.constant 0 : i32
    %39 = arith.cmpi eq, %arg1, %c0_i32 : i32
    %40 = arith.extui %39 : i1 to i32
    %c0_i32_40 = arith.constant 0 : i32
    %41 = arith.cmpi ne, %40, %c0_i32_40 : i32
    scf.if %41 {
      %cst_48 = arith.constant 0.000000e+00 : f32
      %49 = vector.broadcast %cst_48 : f32 to vector<4x32xf32>
      %c0_49 = arith.constant 0 : index
      %c0_50 = arith.constant 0 : index
      %c0_51 = arith.constant 0 : index
      %50 = vector.load %arg7[%c0_49, %c0_50, %c0_51] : memref<1x4x32xf32, #tpu.memory_space<vmem>>, vector<1x4x32xf32>
      %51 = vector.shape_cast %50 : vector<1x4x32xf32> to vector<4x32xf32>
      %52 = vector.shape_cast %49 : vector<4x32xf32> to vector<1x4x32xf32>
      tpu.vector_store %arg7[%c0_49, %c0_50, %c0_51], %52 {strides = array<i32>} : memref<1x4x32xf32, #tpu.memory_space<vmem>>, vector<1x4x32xf32>,
    } else {
    }
    %c0_41 = arith.constant 0 : index
    %c0_42 = arith.constant 0 : index
    %c0_43 = arith.constant 0 : index
    %42 = vector.load %arg7[%c0_41, %c0_42, %c0_43] : memref<1x4x32xf32, #tpu.memory_space<vmem>>, vector<1x4x32xf32>
    %43 = vector.shape_cast %42 : vector<1x4x32xf32> to vector<4x32xf32>
    %cst_44 = arith.constant dense<0.000000e+00> : vector<4x32xf32>
    %44 = vector.multi_reduction <add>, %29, %cst_44 [1] : vector<4x256x32xf32> to vector<4x32xf32>
    %45 = arith.addf %43, %44 : vector<4x32xf32>
    %c0_45 = arith.constant 0 : index
    %c0_46 = arith.constant 0 : index
    %c0_47 = arith.constant 0 : index
    %46 = vector.load %arg7[%c0_45, %c0_46, %c0_47] : memref<1x4x32xf32, #tpu.memory_space<vmem>>, vector<1x4x32xf32>
    %47 = vector.shape_cast %46 : vector<1x4x32xf32> to vector<4x32xf32>
    %48 = vector.shape_cast %45 : vector<4x32xf32> to vector<1x4x32xf32>
    tpu.vector_store %arg7[%c0_45, %c0_46, %c0_47], %48 {strides = array<i32>} : memref<1x4x32xf32, #tpu.memory_space<vmem>>, vector<1x4x32xf32>,
    return
  }
  func.func @transform_0(%arg0: i32, %arg1: i32) -> (i32, i32, i32, i32) {
    %c0_i32 = arith.constant 0 : i32
    %c0_i32_0 = arith.constant 0 : i32
    %c0_i32_1 = arith.constant 0 : i32
    return %arg0, %c0_i32, %arg1, %c0_i32_0 : i32, i32, i32, i32
  }
  func.func @transform_1(%arg0: i32, %arg1: i32) -> (i32, i32, i32) {
    %c0_i32 = arith.constant 0 : i32
    %c0_i32_0 = arith.constant 0 : i32
    %c0_i32_1 = arith.constant 0 : i32
    %c0_i32_2 = arith.constant 0 : i32
    return %c0_i32, %c0_i32_0, %c0_i32_1 : i32, i32, i32
  }
  func.func @transform_2(%arg0: i32, %arg1: i32) -> (i32, i32) {
    %c0_i32 = arith.constant 0 : i32
    %c0_i32_0 = arith.constant 0 : i32
    %c0_i32_1 = arith.constant 0 : i32
    return %c0_i32, %c0_i32_0 : i32, i32
  }
  func.func @transform_3(%arg0: i32, %arg1: i32) -> (i32, i32, i32, i32) {
    %c0_i32 = arith.constant 0 : i32
    %c0_i32_0 = arith.constant 0 : i32
    %c0_i32_1 = arith.constant 0 : i32
    return %arg0, %c0_i32, %arg1, %c0_i32_0 : i32, i32, i32, i32
  }
  func.func @transform_4(%arg0: i32, %arg1: i32) -> (i32, i32, i32, i32) {
    %c0_i32 = arith.constant 0 : i32
    %c0_i32_0 = arith.constant 0 : i32
    %c0_i32_1 = arith.constant 0 : i32
    return %arg0, %c0_i32, %arg1, %c0_i32_0 : i32, i32, i32, i32
  }
  func.func @transform_5(%arg0: i32, %arg1: i32) -> (i32, i32, i32) {
    %c0_i32 = arith.constant 0 : i32
    %c0_i32_0 = arith.constant 0 : i32
    %c0_i32_1 = arith.constant 0 : i32
    return %arg0, %c0_i32, %c0_i32_0 : i32, i32, i32
  }
}

module attributes {stable_mosaic.version = 11 : i64} {
  func.func @kernel(%arg0: i32, %arg1: i32, %arg2: memref<1x1x16x512xbf16, #tpu.memory_space<vmem>>, %arg3: memref<1x1x16x512xbf16, #tpu.memory_space<vmem>>, %arg4: memref<1x1x9x32xf32, #tpu.memory_space<vmem>>, %arg5: memref<1x32xf32, #tpu.memory_space<vmem>>, %arg6: memref<1x1x16x512xbf16, #tpu.memory_space<vmem>>) attributes {dimension_semantics = [#tpu.dimension_semantics<parallel>, #tpu.dimension_semantics<parallel>], iteration_bounds = array<i64: 2, 4>, scalar_prefetch = 0 : i64, scratch_operands = 0 : i64, tpu.core_type = #tpu.core_type<tc>, window_params = [{transform_indices = @transform_0, window_bounds = array<i64: 1, 1, 16, 512>}, {transform_indices = @transform_1, window_bounds = array<i64: 1, 1, 16, 512>}, {transform_indices = @transform_2, window_bounds = array<i64: 1, 1, 9, 32>}, {pipeline_mode = #tpu.pipeline_mode<synchronous>, transform_indices = @transform_3, window_bounds = array<i64: 1, 32>}, {transform_indices = @transform_4, window_bounds = array<i64: 1, 1, 16, 512>}]} {
    %c0 = arith.constant 0 : index
    %c0_0 = arith.constant 0 : index
    %c0_1 = arith.constant 0 : index
    %c0_2 = arith.constant 0 : index
    %0 = vector.load %arg2[%c0, %c0_0, %c0_1, %c0_2] : memref<1x1x16x512xbf16, #tpu.memory_space<vmem>>, vector<1x1x16x512xbf16>
    %1 = vector.shape_cast %0 : vector<1x1x16x512xbf16> to vector<16x512xbf16>
    %2 = arith.extf %1 : vector<16x512xbf16> to vector<16x512xf32>
    %c0_3 = arith.constant 0 : index
    %c0_4 = arith.constant 0 : index
    %c0_5 = arith.constant 0 : index
    %c0_6 = arith.constant 0 : index
    %3 = vector.load %arg4[%c0_3, %c0_4, %c0_5, %c0_6] : memref<1x1x9x32xf32, #tpu.memory_space<vmem>>, vector<1x1x9x32xf32>
    %4 = vector.shape_cast %3 : vector<1x1x9x32xf32> to vector<9x32xf32>
    %5 = tpu.concatenate %4, %4, %4, %4, %4, %4, %4, %4, %4, %4, %4, %4, %4, %4, %4, %4 in 1 : vector<9x32xf32>, vector<9x32xf32>, vector<9x32xf32>, vector<9x32xf32>, vector<9x32xf32>, vector<9x32xf32>, vector<9x32xf32>, vector<9x32xf32>, vector<9x32xf32>, vector<9x32xf32>, vector<9x32xf32>, vector<9x32xf32>, vector<9x32xf32>, vector<9x32xf32>, vector<9x32xf32>, vector<9x32xf32> -> vector<9x512xf32>
    %c0_7 = arith.constant 0 : index
    %c0_8 = arith.constant 0 : index
    %6 = vector.load %arg5[%c0_7, %c0_8] : memref<1x32xf32, #tpu.memory_space<vmem>>, vector<1x32xf32>
    %7 = tpu.concatenate %6, %6, %6, %6, %6, %6, %6, %6, %6, %6, %6, %6, %6, %6, %6, %6 in 1 : vector<1x32xf32>, vector<1x32xf32>, vector<1x32xf32>, vector<1x32xf32>, vector<1x32xf32>, vector<1x32xf32>, vector<1x32xf32>, vector<1x32xf32>, vector<1x32xf32>, vector<1x32xf32>, vector<1x32xf32>, vector<1x32xf32>, vector<1x32xf32>, vector<1x32xf32>, vector<1x32xf32>, vector<1x32xf32> -> vector<1x512xf32>
    %8 = tpu.iota {dimensions = array<i32: 1>} : vector<16x512xi32>
    %9 = tpu.iota {dimensions = array<i32: 0>} : vector<16x512xi32>
    %c32_i32 = arith.constant 32 : i32
    %10 = vector.broadcast %c32_i32 : i32 to vector<16x512xi32>
    %11 = arith.cmpi slt, %8, %10 : vector<16x512xi32>
    %c32_i32_9 = arith.constant 32 : i32
    %12 = tpu.dynamic_rotate %2 by %c32_i32_9 dim 1 : vector<16x512xf32>, i32 -> vector<16x512xf32>
    %cst = arith.constant 0.000000e+00 : f32
    %13 = vector.broadcast %cst : f32 to vector<16x512xf32>
    %14 = arith.select %11, %13, %12 : vector<16x512xi1>, vector<16x512xf32>
    %c480_i32 = arith.constant 480 : i32
    %15 = vector.broadcast %c480_i32 : i32 to vector<16x512xi32>
    %16 = arith.cmpi sge, %8, %15 : vector<16x512xi32>
    %c480_i32_10 = arith.constant 480 : i32
    %17 = tpu.dynamic_rotate %2 by %c480_i32_10 dim 1 : vector<16x512xf32>, i32 -> vector<16x512xf32>
    %cst_11 = arith.constant 0.000000e+00 : f32
    %18 = vector.broadcast %cst_11 : f32 to vector<16x512xf32>
    %19 = arith.select %16, %18, %17 : vector<16x512xi1>, vector<16x512xf32>
    %20 = vector.extract_strided_slice %5 {offsets = [4, 0], sizes = [1, 512], strides = [1, 1]} : vector<9x512xf32> to vector<1x512xf32>
    %21 = vector.broadcast %20 : vector<1x512xf32> to vector<16x512xf32>
    %22 = arith.mulf %2, %21 : vector<16x512xf32>
    %23 = vector.broadcast %7 : vector<1x512xf32> to vector<16x512xf32>
    %24 = arith.addf %22, %23 : vector<16x512xf32>
    %25 = vector.extract_strided_slice %5 {offsets = [3, 0], sizes = [1, 512], strides = [1, 1]} : vector<9x512xf32> to vector<1x512xf32>
    %26 = vector.broadcast %25 : vector<1x512xf32> to vector<16x512xf32>
    %27 = arith.mulf %14, %26 : vector<16x512xf32>
    %28 = arith.addf %24, %27 : vector<16x512xf32>
    %29 = vector.extract_strided_slice %5 {offsets = [5, 0], sizes = [1, 512], strides = [1, 1]} : vector<9x512xf32> to vector<1x512xf32>
    %30 = vector.broadcast %29 : vector<1x512xf32> to vector<16x512xf32>
    %31 = arith.mulf %19, %30 : vector<16x512xf32>
    %32 = arith.addf %28, %31 : vector<16x512xf32>
    %33 = vector.extract_strided_slice %5 {offsets = [0, 0], sizes = [1, 512], strides = [1, 1]} : vector<9x512xf32> to vector<1x512xf32>
    %34 = vector.broadcast %33 : vector<1x512xf32> to vector<16x512xf32>
    %35 = arith.mulf %14, %34 : vector<16x512xf32>
    %36 = vector.extract_strided_slice %5 {offsets = [1, 0], sizes = [1, 512], strides = [1, 1]} : vector<9x512xf32> to vector<1x512xf32>
    %37 = vector.broadcast %36 : vector<1x512xf32> to vector<16x512xf32>
    %38 = arith.mulf %2, %37 : vector<16x512xf32>
    %39 = arith.addf %35, %38 : vector<16x512xf32>
    %40 = vector.extract_strided_slice %5 {offsets = [2, 0], sizes = [1, 512], strides = [1, 1]} : vector<9x512xf32> to vector<1x512xf32>
    %41 = vector.broadcast %40 : vector<1x512xf32> to vector<16x512xf32>
    %42 = arith.mulf %19, %41 : vector<16x512xf32>
    %43 = arith.addf %39, %42 : vector<16x512xf32>
    %c1_i32 = arith.constant 1 : i32
    %44 = vector.broadcast %c1_i32 : i32 to vector<16x512xi32>
    %45 = arith.cmpi slt, %9, %44 : vector<16x512xi32>
    %c1_i32_12 = arith.constant 1 : i32
    %46 = tpu.dynamic_rotate %43 by %c1_i32_12 dim 0 : vector<16x512xf32>, i32 -> vector<16x512xf32>
    %cst_13 = arith.constant 0.000000e+00 : f32
    %47 = vector.broadcast %cst_13 : f32 to vector<16x512xf32>
    %48 = arith.select %45, %47, %46 : vector<16x512xi1>, vector<16x512xf32>
    %49 = arith.addf %32, %48 : vector<16x512xf32>
    %50 = vector.extract_strided_slice %5 {offsets = [6, 0], sizes = [1, 512], strides = [1, 1]} : vector<9x512xf32> to vector<1x512xf32>
    %51 = vector.broadcast %50 : vector<1x512xf32> to vector<16x512xf32>
    %52 = arith.mulf %14, %51 : vector<16x512xf32>
    %53 = vector.extract_strided_slice %5 {offsets = [7, 0], sizes = [1, 512], strides = [1, 1]} : vector<9x512xf32> to vector<1x512xf32>
    %54 = vector.broadcast %53 : vector<1x512xf32> to vector<16x512xf32>
    %55 = arith.mulf %2, %54 : vector<16x512xf32>
    %56 = arith.addf %52, %55 : vector<16x512xf32>
    %57 = vector.extract_strided_slice %5 {offsets = [8, 0], sizes = [1, 512], strides = [1, 1]} : vector<9x512xf32> to vector<1x512xf32>
    %58 = vector.broadcast %57 : vector<1x512xf32> to vector<16x512xf32>
    %59 = arith.mulf %19, %58 : vector<16x512xf32>
    %60 = arith.addf %56, %59 : vector<16x512xf32>
    %c15_i32 = arith.constant 15 : i32
    %61 = vector.broadcast %c15_i32 : i32 to vector<16x512xi32>
    %62 = arith.cmpi sge, %9, %61 : vector<16x512xi32>
    %c15_i32_14 = arith.constant 15 : i32
    %63 = tpu.dynamic_rotate %60 by %c15_i32_14 dim 0 : vector<16x512xf32>, i32 -> vector<16x512xf32>
    %cst_15 = arith.constant 0.000000e+00 : f32
    %64 = vector.broadcast %cst_15 : f32 to vector<16x512xf32>
    %65 = arith.select %62, %64, %63 : vector<16x512xi1>, vector<16x512xf32>
    %66 = arith.addf %49, %65 : vector<16x512xf32>
    %c0_16 = arith.constant 0 : index
    %c0_17 = arith.constant 0 : index
    %c0_18 = arith.constant 0 : index
    %c0_19 = arith.constant 0 : index
    %67 = vector.load %arg3[%c0_16, %c0_17, %c0_18, %c0_19] : memref<1x1x16x512xbf16, #tpu.memory_space<vmem>>, vector<1x1x16x512xbf16>
    %68 = vector.shape_cast %67 : vector<1x1x16x512xbf16> to vector<16x512xbf16>
    %69 = arith.extf %68 : vector<16x512xbf16> to vector<16x512xf32>
    %70 = arith.mulf %66, %69 : vector<16x512xf32>
    %71 = arith.truncf %70 : vector<16x512xf32> to vector<16x512xbf16>
    %c0_20 = arith.constant 0 : index
    %c0_21 = arith.constant 0 : index
    %c0_22 = arith.constant 0 : index
    %c0_23 = arith.constant 0 : index
    %72 = vector.load %arg6[%c0_20, %c0_21, %c0_22, %c0_23] : memref<1x1x16x512xbf16, #tpu.memory_space<vmem>>, vector<1x1x16x512xbf16>
    %73 = vector.shape_cast %72 : vector<1x1x16x512xbf16> to vector<16x512xbf16>
    %74 = vector.shape_cast %71 : vector<16x512xbf16> to vector<1x1x16x512xbf16>
    tpu.vector_store %arg6[%c0_20, %c0_21, %c0_22, %c0_23], %74 {strides = array<i32>} : memref<1x1x16x512xbf16, #tpu.memory_space<vmem>>, vector<1x1x16x512xbf16>,
    return
  }
  func.func @transform_0(%arg0: i32, %arg1: i32) -> (i32, i32, i32, i32) {
    %c0_i32 = arith.constant 0 : i32
    %c0_i32_0 = arith.constant 0 : i32
    %c0_i32_1 = arith.constant 0 : i32
    return %arg0, %arg1, %c0_i32, %c0_i32_0 : i32, i32, i32, i32
  }
  func.func @transform_1(%arg0: i32, %arg1: i32) -> (i32, i32, i32, i32) {
    %c0_i32 = arith.constant 0 : i32
    %c0_i32_0 = arith.constant 0 : i32
    %c0_i32_1 = arith.constant 0 : i32
    return %arg0, %arg1, %c0_i32, %c0_i32_0 : i32, i32, i32, i32
  }
  func.func @transform_2(%arg0: i32, %arg1: i32) -> (i32, i32, i32, i32) {
    %c0_i32 = arith.constant 0 : i32
    %c0_i32_0 = arith.constant 0 : i32
    %c0_i32_1 = arith.constant 0 : i32
    return %arg0, %arg1, %c0_i32, %c0_i32_0 : i32, i32, i32, i32
  }
  func.func @transform_3(%arg0: i32, %arg1: i32) -> (i32, i32) {
    %c0_i32 = arith.constant 0 : i32
    %c0_i32_0 = arith.constant 0 : i32
    %c0_i32_1 = arith.constant 0 : i32
    return %c0_i32, %c0_i32_0 : i32, i32
  }
  func.func @transform_4(%arg0: i32, %arg1: i32) -> (i32, i32, i32, i32) {
    %c0_i32 = arith.constant 0 : i32
    %c0_i32_0 = arith.constant 0 : i32
    %c0_i32_1 = arith.constant 0 : i32
    return %arg0, %arg1, %c0_i32, %c0_i32_0 : i32, i32, i32, i32
  }
}

module attributes {stable_mosaic.version = 11 : i64} {
  func.func @_conv_t_kernel(%arg0: i32, %arg1: i32, %arg2: memref<1x4x256x32xbf16, #tpu.memory_space<vmem>>, %arg3: memref<3x32x16xbf16, #tpu.memory_space<vmem>>, %arg4: memref<1x16xf32, #tpu.memory_space<vmem>>, %arg5: memref<1x4x256x16xf32, #tpu.memory_space<vmem>>, %arg6: memref<4x256x16xf32, #tpu.memory_space<vmem>>) attributes {dimension_semantics = [#tpu.dimension_semantics<parallel>, #tpu.dimension_semantics<parallel>], iteration_bounds = array<i64: 2, 1>, scalar_prefetch = 0 : i64, scratch_operands = 1 : i64, tpu.core_type = #tpu.core_type<tc>, window_params = [{transform_indices = @transform_0, window_bounds = array<i64: 1, 4, 256, 32>}, {pipeline_mode = #tpu.pipeline_mode<synchronous>, transform_indices = @transform_1, window_bounds = array<i64: 3, 32, 16>}, {pipeline_mode = #tpu.pipeline_mode<synchronous>, transform_indices = @transform_2, window_bounds = array<i64: 1, 16>}, {transform_indices = @transform_3, window_bounds = array<i64: 1, 4, 256, 16>}]} {
    %c0 = arith.constant 0 : index
    %c0_0 = arith.constant 0 : index
    %c0_1 = arith.constant 0 : index
    %c0_2 = arith.constant 0 : index
    %0 = vector.load %arg2[%c0, %c0_0, %c0_1, %c0_2] : memref<1x4x256x32xbf16, #tpu.memory_space<vmem>>, vector<1x4x256x32xbf16>
    %1 = vector.shape_cast %0 : vector<1x4x256x32xbf16> to vector<4x256x32xbf16>
    %2 = vector.shape_cast %1 : vector<4x256x32xbf16> to vector<1024x32xbf16>
    %c1 = arith.constant 1 : index
    %c0_3 = arith.constant 0 : index
    %c0_4 = arith.constant 0 : index
    %3 = vector.load %arg3[%c1, %c0_3, %c0_4] : memref<3x32x16xbf16, #tpu.memory_space<vmem>>, vector<1x32x16xbf16>
    %4 = vector.shape_cast %3 : vector<1x32x16xbf16> to vector<32x16xbf16>
    %cst = arith.constant dense<0.000000e+00> : vector<1024x16xf32>
    %5 = tpu.matmul %2, %4, %cst {dimension_numbers = #tpu.dot_dimension_numbers<[1], [0], [0], [1], [0, 0, 1, 1], [], []>} : vector<1024x32xbf16>, vector<32x16xbf16>, vector<1024x16xf32> -> vector<1024x16xf32>
    %c0_5 = arith.constant 0 : index
    %c0_6 = arith.constant 0 : index
    %6 = vector.load %arg4[%c0_5, %c0_6] : memref<1x16xf32, #tpu.memory_space<vmem>>, vector<1x16xf32>
    %7 = vector.broadcast %6 : vector<1x16xf32> to vector<1024x16xf32>
    %8 = arith.addf %5, %7 : vector<1024x16xf32>
    %9 = vector.shape_cast %8 : vector<1024x16xf32> to vector<4x256x16xf32>
    %c0_7 = arith.constant 0 : index
    %c0_8 = arith.constant 0 : index
    %c0_9 = arith.constant 0 : index
    %10 = vector.load %arg6[%c0_7, %c0_8, %c0_9] : memref<4x256x16xf32, #tpu.memory_space<vmem>>, vector<4x256x16xf32>
    tpu.vector_store %arg6[%c0_7, %c0_8, %c0_9], %9 {strides = array<i32>} : memref<4x256x16xf32, #tpu.memory_space<vmem>>, vector<4x256x16xf32>,
    %11 = vector.extract_strided_slice %2 {offsets = [0, 0], sizes = [768, 32], strides = [1, 1]} : vector<1024x32xbf16> to vector<768x32xbf16>
    %c0_10 = arith.constant 0 : index
    %c0_11 = arith.constant 0 : index
    %c0_12 = arith.constant 0 : index
    %12 = vector.load %arg3[%c0_10, %c0_11, %c0_12] : memref<3x32x16xbf16, #tpu.memory_space<vmem>>, vector<1x32x16xbf16>
    %13 = vector.shape_cast %12 : vector<1x32x16xbf16> to vector<32x16xbf16>
    %cst_13 = arith.constant dense<0.000000e+00> : vector<768x16xf32>
    %14 = tpu.matmul %11, %13, %cst_13 {dimension_numbers = #tpu.dot_dimension_numbers<[1], [0], [0], [1], [0, 0, 1, 1], [], []>} : vector<768x32xbf16>, vector<32x16xbf16>, vector<768x16xf32> -> vector<768x16xf32>
    %c1_14 = arith.constant 1 : index
    %c0_15 = arith.constant 0 : index
    %c0_16 = arith.constant 0 : index
    %15 = vector.load %arg6[%c1_14, %c0_15, %c0_16] : memref<4x256x16xf32, #tpu.memory_space<vmem>>, vector<3x256x16xf32>
    %16 = vector.shape_cast %14 : vector<768x16xf32> to vector<3x256x16xf32>
    %17 = arith.addf %15, %16 : vector<3x256x16xf32>
    %c1_17 = arith.constant 1 : index
    %c0_18 = arith.constant 0 : index
    %c0_19 = arith.constant 0 : index
    %18 = vector.load %arg6[%c1_17, %c0_18, %c0_19] : memref<4x256x16xf32, #tpu.memory_space<vmem>>, vector<3x256x16xf32>
    tpu.vector_store %arg6[%c1_17, %c0_18, %c0_19], %17 {strides = array<i32>} : memref<4x256x16xf32, #tpu.memory_space<vmem>>, vector<3x256x16xf32>,
    %19 = vector.extract_strided_slice %2 {offsets = [256, 0], sizes = [768, 32], strides = [1, 1]} : vector<1024x32xbf16> to vector<768x32xbf16>
    %c2 = arith.constant 2 : index
    %c0_20 = arith.constant 0 : index
    %c0_21 = arith.constant 0 : index
    %20 = vector.load %arg3[%c2, %c0_20, %c0_21] : memref<3x32x16xbf16, #tpu.memory_space<vmem>>, vector<1x32x16xbf16>
    %21 = vector.shape_cast %20 : vector<1x32x16xbf16> to vector<32x16xbf16>
    %cst_22 = arith.constant dense<0.000000e+00> : vector<768x16xf32>
    %22 = tpu.matmul %19, %21, %cst_22 {dimension_numbers = #tpu.dot_dimension_numbers<[1], [0], [0], [1], [0, 0, 1, 1], [], []>} : vector<768x32xbf16>, vector<32x16xbf16>, vector<768x16xf32> -> vector<768x16xf32>
    %c0_23 = arith.constant 0 : index
    %c0_24 = arith.constant 0 : index
    %c0_25 = arith.constant 0 : index
    %23 = vector.load %arg6[%c0_23, %c0_24, %c0_25] : memref<4x256x16xf32, #tpu.memory_space<vmem>>, vector<3x256x16xf32>
    %24 = vector.shape_cast %22 : vector<768x16xf32> to vector<3x256x16xf32>
    %25 = arith.addf %23, %24 : vector<3x256x16xf32>
    %c0_26 = arith.constant 0 : index
    %c0_27 = arith.constant 0 : index
    %c0_28 = arith.constant 0 : index
    %26 = vector.load %arg6[%c0_26, %c0_27, %c0_28] : memref<4x256x16xf32, #tpu.memory_space<vmem>>, vector<3x256x16xf32>
    tpu.vector_store %arg6[%c0_26, %c0_27, %c0_28], %25 {strides = array<i32>} : memref<4x256x16xf32, #tpu.memory_space<vmem>>, vector<3x256x16xf32>,
    %c0_29 = arith.constant 0 : index
    %c0_30 = arith.constant 0 : index
    %c0_31 = arith.constant 0 : index
    %27 = vector.load %arg6[%c0_29, %c0_30, %c0_31] : memref<4x256x16xf32, #tpu.memory_space<vmem>>, vector<4x256x16xf32>
    %c0_32 = arith.constant 0 : index
    %c0_33 = arith.constant 0 : index
    %c0_34 = arith.constant 0 : index
    %c0_35 = arith.constant 0 : index
    %28 = vector.load %arg5[%c0_32, %c0_33, %c0_34, %c0_35] : memref<1x4x256x16xf32, #tpu.memory_space<vmem>>, vector<1x4x256x16xf32>
    %29 = vector.shape_cast %28 : vector<1x4x256x16xf32> to vector<4x256x16xf32>
    %30 = vector.shape_cast %27 : vector<4x256x16xf32> to vector<1x4x256x16xf32>
    tpu.vector_store %arg5[%c0_32, %c0_33, %c0_34, %c0_35], %30 {strides = array<i32>} : memref<1x4x256x16xf32, #tpu.memory_space<vmem>>, vector<1x4x256x16xf32>,
    return
  }
  func.func @transform_0(%arg0: i32, %arg1: i32) -> (i32, i32, i32, i32) {
    %c0_i32 = arith.constant 0 : i32
    %c0_i32_0 = arith.constant 0 : i32
    %c0_i32_1 = arith.constant 0 : i32
    return %arg0, %c0_i32, %arg1, %c0_i32_0 : i32, i32, i32, i32
  }
  func.func @transform_1(%arg0: i32, %arg1: i32) -> (i32, i32, i32) {
    %c0_i32 = arith.constant 0 : i32
    %c0_i32_0 = arith.constant 0 : i32
    %c0_i32_1 = arith.constant 0 : i32
    %c0_i32_2 = arith.constant 0 : i32
    return %c0_i32, %c0_i32_0, %c0_i32_1 : i32, i32, i32
  }
  func.func @transform_2(%arg0: i32, %arg1: i32) -> (i32, i32) {
    %c0_i32 = arith.constant 0 : i32
    %c0_i32_0 = arith.constant 0 : i32
    %c0_i32_1 = arith.constant 0 : i32
    return %c0_i32, %c0_i32_0 : i32, i32
  }
  func.func @transform_3(%arg0: i32, %arg1: i32) -> (i32, i32, i32, i32) {
    %c0_i32 = arith.constant 0 : i32
    %c0_i32_0 = arith.constant 0 : i32
    %c0_i32_1 = arith.constant 0 : i32
    return %arg0, %c0_i32, %arg1, %c0_i32_0 : i32, i32, i32, i32
  }
}

</mosaic_0001>

<bundles_post_ra>
// kernel: _lambda_.4
= control target key start
LH: loop header
LB: loop body
LE: loop exit
PB: predicated region body
PF: predicated region fallthrough
CT: control target
= control target key end

     0   :  { %s984_s15 = smov 0   ;;  %s986_s16 = smov 0   ;;  %s1431_s0 = inlined_call_operand.vmem [shape: bf16[2,4,16,512], index: 0, kind: input, shape index: {}]   ;;  %s1432_s1 = inlined_call_operand.vmem [shape: bf16[2,4,16,512], index: 1, kind: input, shape index: {}]   ;;  %s1433_s2 = inlined_call_operand.vmem [shape: f32[2,4,9,32], index: 2, kind: input, shape index: {}]   ;;  %s1434_s3 = inlined_call_operand.vmem [shape: f32[1,32], index: 3, kind: input, shape index: {}]   ;;  %s1435_s4 = inlined_call_operand.vmem [shape: bf16[2,4,16,512], index: 4, kind: output, shape index: {}]  }
   0x1   :  { %s988_s17 = smov 0   ;;  %s990_s18 = smov 0  }
   0x2   :  { %s992_s19 = smov 0  }
   0x3 LB: > { %s23_s20 = sadd.s32 1, %s946_s17  ;;  %s26_s21 = sadd.s32 1, %s950_s18  ;;  %s954_s19 = sphi %s992_s19, %s14_s19   ;;  %s950_s18 = sphi %s990_s18, %s1440_s18   ;;  %s946_s17 = sphi %s988_s17, %s1439_s17   ;;  %s942_s16 = sphi %s986_s16, %s1438_s16   ;;  %s938_s15 = sphi %s984_s15, %s1437_s15  }
   0x4   : > { %p24_p0 = scmp.ge.s32.totalorder %s23_s20, 4  ;;  %p817_p1 = scmp.ge.s32.totalorder %s954_s19, 1 }
   0x5   : > { %p214_p2 = scmp.lt.s32.totalorder %s954_s19, 9 }
   0x6   : > { %s1442_s20 = smov (%p24_p0, %s23_s20), 0  ;;  %s1444_s21 = smov (!%p24_p0, %s26_s21), %s950_s18 }
   0x7   : > { %p215_p3 = pnand %p817_p1, %p214_p2  ;;  %p28_p4 = scmp.ge.s32.totalorder %s1444_s21, 2 }
   0x8   : > { %p266_p5 = scmp.lt.s32.totalorder (!%p215_p3), %s942_s16, 1  ;;  %p268_p6 = scmp.lt.s32.totalorder (!%p215_p3), %s938_s15, 3 }
   0x9   : > { %s1446_s21 = smov (%p28_p4, %s1444_s21), 0  ;;  %218 = sbr.rel (%p215_p3) target bundleno = 213 (0xd5), region = 36 }
   0xa   : > { %s956_s7 = smov (!%p215_p3), 96   ;;  %s957_s8 = smov (!%p215_p3), 64  }
   0xb   : > { %s958_s9 = smov (!%p215_p3), 32  }
   0xe   : > { %s1448_s16 = smov (!%p266_p5, %s942_s16), 1  ;;  %s1450_s15 = smov (!%p268_p6, %s938_s15), 3  ;;  %v915_v10 = vld [vmem:[%s1434_s3] ss:$0 sm:$0xff]  ;;  %vm336_vm0 = vcmask 261120   ;;  %vm339_vm1 = vcmask 523264   ;;  %v360_v28 = vlaneseq }
   0xf   : > { %s825_s22 = sshll.u32 %s1448_s16, 3  ;;  %s819_s23 = sshll.u32 %s1448_s16, 5  ;;  %v345_v26 = vld [vmem:[%s1434_s3] sm:$0x1]  ;;  %vm342_vm2 = vcmask 785408  }
  0x10   : > { %s818_s24 = sshll.u32 %s1450_s15, 3  ;;  %s824_s25 = sshll.u32 %s1450_s15, 1  ;;  %v1076_v34 = vand.u32 127, %v360_v28 }
  0x11   : > { %s290_s26 = sadd.s32 %s825_s22, %s824_s25  ;;  %s272_s27 = sadd.s32 %s819_s23, %s818_s24 }
  0x12   : > { %s826_s28 = sshll.u32 %s290_s26, 3  ;;  %s1017_s6 = sshll.u32 %s272_s27, 2  ;;  %vm368_vm3 = vcmp.lt.s32.totalorder %v1076_v34, 32  ;;  %vm424_vm4 = vcmp.lt.s32.totalorder %v1076_v34, 96 }
  0x13   : > { %s292_s5 = scalar_lea.vmem %s1433_s2, %s826_s28  ;;  %s274_s12 = scalar_lea.vmem %s1431_s0, %s1017_s6 }
  0x14   : > { %v314_v0 = vld [vmem:[%s292_s5] sm:$0xff]  ;;  %v315_v1 = vld [vmem:[%s292_s5 + $0x8] sm:$0x1]  ;;  %v305_v3 = vld [vmem:[%s274_s12 + $0x18] sm:$0xff]  ;;  %s1066_s24 = scalar_lea.vmem %s1432_s1, %s1017_s6  ;;  %s1367_s27 = scalar_lea.vmem %s1435_s4, %s1017_s6 }
  0x15   : > { %330 = vrot.lane.b32.xlu2 %v314_v0, %s956_s7  ;;  %324 = vrot.lane.b32.xlu1 %v314_v0, %s957_s8  ;;  %v303_v2 = vld [vmem:[%s274_s12 + $0x8] sm:$0xff]  ;;  %v302_v4 = vld [vmem:[%s274_s12] sm:$0xff]  ;;  %v1027_v7 = vunpack.c.h.bf16 %v305_v3  ;;  %v1042_v14 = vunpack.c.l.bf16 %v305_v3 }
  0x16   : > { %318 = vrot.lane.b32.xlu0 %v314_v0, %s958_s9  ;;  %v304_v5 = vld [vmem:[%s274_s12 + $0x10] sm:$0xff]  ;;  %v1025_v6 = vunpack.c.h.bf16 %v303_v2  ;;  %v1029_v8 = vunpack.c.l.bf16 %v302_v4  ;;  %v1040_v13 = vunpack.c.l.bf16 %v303_v2  ;;  %v1044_v15 = vunpack.c.h.bf16 %v302_v4  ;;  %v1071_v31 = vld [vmem:[%s1066_s24 + $0x8] sm:$0xff]  ;;  %v1074_v32 = vld [vmem:[%s1066_s24 + $0x18] sm:$0xff] }
  0x17   : > { %v1031_v9 = vunpack.c.l.bf16 %v304_v5  ;;  %v1046_v16 = vunpack.c.h.bf16 %v304_v5  ;;  %v655_v39 = vunpack.c.h.bf16 %v1071_v31  ;;  %v659_v40 = vunpack.c.h.bf16 %v1074_v32 }
  0x18   : > { %v880_v11 = vpack.i.bf16 %v1027_v7, %v1025_v6  ;;  %v890_v17 = vpack.i.bf16 %v1042_v14, %v1040_v13 }
  0x19   : > { %v875_v12 = vpack.i.bf16 %v1031_v9, %v1029_v8  ;;  %v885_v18 = vpack.i.bf16 %v1046_v16, %v1044_v15 }
  0x1d   : > { %332 = vrot.lane.b32.xlu2 %v315_v1, %s956_s7  ;;  %326 = vrot.lane.b32.xlu1 %v315_v1, %s957_s8 }
  0x1e   : > { %320 = vrot.lane.b32.xlu0 %v315_v1, %s958_s9 }
  0x25   : > { %348 = vrot.lane.b32.xlu2 %v915_v10, %s958_s9  ;;  %881 = vrot.lane.b32.xlu1 %v880_v11, %s958_s9 }
  0x26   : > { %876 = vrot.lane.b32.xlu0 %v875_v12, %s958_s9 }
  0x2d   : > { %351 = vrot.lane.b32.xlu2 %v915_v10, %s957_s8  ;;  %891 = vrot.lane.b32.xlu1 %v890_v17, %s958_s9 }
  0x2e   : > { %886 = vrot.lane.b32.xlu0 %v885_v18, %s958_s9 }
  0x35   : > { %354 = vrot.lane.b32.xlu2 %v915_v10, %s956_s7  ;;  %901 = vrot.lane.b32.xlu1 %v880_v11, %s956_s7 }
  0x36   : > { %896 = vrot.lane.b32.xlu0 %v875_v12, %s956_s7 }
  0x3d   : > { %911 = vrot.lane.b32.xlu1 %v890_v17, %s956_s7 }
  0x3e   : > { %906 = vrot.lane.b32.xlu0 %v885_v18, %s956_s7 }
  0x6f   : > { %v331_v19 = vpop.permute.xlu2 %330 }
  0x77   : > { %v333_v20 = vpop.permute.xlu2 %332 }
  0x7f   : > { %v349_v21 = vpop.permute.xlu2 %348 }
  0x80   : > { %v357_v29 = vsel %vm336_vm0, %v345_v26, %v349_v21 }
  0x87   : > { %v352_v22 = vpop.permute.xlu2 %351  ;;  %v325_v23 = vpop.permute.xlu1 %324 }
  0x88   : > { %v319_v24 = vpop.permute.xlu0 %318  ;;  %v358_v35 = vsel %vm339_vm1, %v357_v29, %v352_v22  ;;  %v1150_v22 = vshrl.u32 %v360_v28, 7 }
  0x89   : > { %v337_v25 = vsel %vm336_vm0, %v314_v0, %v319_v24 }
  0x8a   : > { %v340_v27 = vsel %vm339_vm1, %v337_v25, %v325_v23  ;;  %vm536_vm6 = vcmp.lt.s32.totalorder %v1150_v22, 1  ;;  %vm623_vm7 = vcmp.lt.s32.totalorder %v1150_v22, 7 }
  0x8b   : > { %v343_v30 = vsel %vm342_vm2, %v340_v27, %v331_v19 }
  0x8c   : > { %v441_v36 = vperm.slane %v343_v30, 4  ;;  %v502_v41 = vperm.slane %v343_v30, 1  ;;  %v579_v42 = vperm.slane %v343_v30, 7  ;;  %v1083_v45 = vperm.slane %v343_v30, 3 }
  0x8d   : > { %v1085_v46 = vperm.slane %v343_v30, 5  ;;  %v1088_v47 = vperm.slane %v343_v30, 0  ;;  %v1090_v48 = vperm.slane %v343_v30, 2  ;;  %v1092_v49 = vperm.slane %v343_v30, 6 }
  0x8e   : > { %v445_v50 = vmul.f32 %v441_v36, %v1025_v6  ;;  %v449_v52 = vmul.f32 %v441_v36, %v1027_v7  ;;  %v443_v53 = vmul.f32 %v441_v36, %v1044_v15  ;;  %v444_v54 = vmul.f32 %v441_v36, %v1040_v13 }
  0x8f   : > { %v355_v33 = vpop.permute.xlu2 %354  ;;  %v327_v37 = vpop.permute.xlu1 %326  ;;  %v1100_v56 = vmul.f32 %v502_v41, %v1025_v6  ;;  %v1103_v57 = vmul.f32 %v502_v41, %v1027_v7  ;;  %v1106_v58 = vmul.f32 %v579_v42, %v1025_v6  ;;  %v1109_v59 = vmul.f32 %v579_v42, %v1027_v7 }
  0x90   : > { %v321_v38 = vpop.permute.xlu0 %320  ;;  %v359_v44 = vsel %vm342_vm2, %v358_v35, %v355_v33  ;;  %v447_v60 = vmul.f32 %v441_v36, %v1046_v16  ;;  %v448_v61 = vmul.f32 %v441_v36, %v1042_v14  ;;  %v1114_v62 = vmul.f32 %v502_v41, %v1044_v15 }
  0x91   : > { %v338_v43 = vsel %vm336_vm0, %v315_v1, %v321_v38  ;;  %v450_v55 = vperm.slane %v359_v44, 0  ;;  %v1120_v2 = vmul.f32 %v502_v41, %v1040_v13  ;;  %v1123_v3 = vmul.f32 %v502_v41, %v1046_v16 }
  0x92   : > { %v341_v51 = vsel %vm339_vm1, %v338_v43, %v327_v37  ;;  %v1126_v4 = vmul.f32 %v502_v41, %v1042_v14  ;;  %v1135_v17 = vmul.f32 %v579_v42, %v1044_v15  ;;  %v1138_v18 = vmul.f32 %v579_v42, %v1040_v13 }
  0x93   : > { %v344_v63 = vsel %vm342_vm2, %v341_v51, %v333_v20  ;;  %v1130_v11 = vadd.f32 %v450_v55, %v445_v50  ;;  %v1132_v12 = vadd.f32 %v450_v55, %v449_v52  ;;  %v1148_v21 = vadd.f32 %v450_v55, %v443_v53 }
  0x94   : > { %v1152_v23 = vperm.slane %v344_v63, 0  ;;  %v1154_v15 = vadd.f32 %v450_v55, %v444_v54  ;;  %v1156_v13 = vadd.f32 %v450_v55, %v447_v60  ;;  %v1158_v24 = vadd.f32 %v450_v55, %v448_v61 }
  0x95   : > { %v1165_v27 = vmul.f32 %v579_v42, %v1046_v16  ;;  %v446_v28 = vmul.f32 %v441_v36, %v1031_v9  ;;  %v586_v29 = vmul.f32 %v579_v42, %v1042_v14  ;;  %v1170_v30 = vadd.s32 384, %v1076_v34 }
  0x96   : > { %v507_v33 = vmul.f32 %v502_v41, %v1031_v9  ;;  %v442_v35 = vmul.f32 %v441_v36, %v1029_v8  ;;  %v1175_v37 = vadd.s32 8, %v1150_v22  ;;  %v584_v43 = vmul.f32 %v579_v42, %v1031_v9 }
  0x97   : > { %v882_v0 = vpop.permute.xlu1 %881  ;;  %v455_v38 = vadd.f32 %v450_v55, %v446_v28  ;;  %v503_v16 = vmul.f32 %v502_v41, %v1029_v8  ;;  %v580_v53 = vmul.f32 %v579_v42, %v1029_v8  ;;  %v658_v42 = vunpack.c.l.bf16 %v1074_v32 }
  0x98   : > { %v1117_v1 = vpop.permute.xlu0 %876  ;;  %v884_v5 = vunpack.i.h.bf16 %v882_v0  ;;  %v883_v6 = vunpack.i.l.bf16 %v882_v0  ;;  %v451_v52 = vadd.f32 %v450_v55, %v442_v35  ;;  %vm407_vm5 = vcmp.ge.s32.totalorder %v1170_v30, 480 }
  0x99   : > { %v879_v7 = vunpack.i.h.bf16 %v1117_v1  ;;  %v878_v10 = vunpack.i.l.bf16 %v1117_v1  ;;  %vm614_vm8 = vcmp.ge.s32.totalorder %v1175_v37, 15  ;;  %v1436_v34 = vunpack.c.l.bf16 %v1071_v31 }
  0x9b   : > { %v395_v19 = vsel %vm368_vm3, %v884_v5, %v879_v7  ;;  %v394_v20 = vsel %vm368_vm3, %v883_v6, %v878_v10 }
  0x9c   : > { %v400_v25 = vsel %vm368_vm3, 0.0, %v395_v19  ;;  %v396_v26 = vsel %vm368_vm3, 0.0, %v394_v20 }
  0x9d   : > { %v464_v44 = vmul.f32 %v1083_v45, %v400_v25  ;;  %v460_v50 = vmul.f32 %v1083_v45, %v396_v26  ;;  %v498_v63 = vmul.f32 %v1088_v47, %v400_v25  ;;  %v575_v0 = vmul.f32 %v1092_v49, %v400_v25 }
  0x9e   : > { %v494_v9 = vmul.f32 %v1088_v47, %v396_v26  ;;  %v571_v41 = vmul.f32 %v1092_v49, %v396_v26 }
  0x9f   : > { %v892_v14 = vpop.permute.xlu1 %891  ;;  %v1197_v28 = vadd.f32 %v460_v50, %v451_v52  ;;  %v1199_v26 = vadd.f32 %v464_v44, %v455_v38  ;;  %v1212_v50 = vadd.f32 %v584_v43, %v575_v0 }
  0xa0   : > { %v887_v51 = vpop.permute.xlu0 %886  ;;  %v894_v54 = vunpack.i.h.bf16 %v892_v14  ;;  %v893_v60 = vunpack.i.l.bf16 %v892_v14 }
  0xa1   : > { %v889_v36 = vunpack.i.h.bf16 %v887_v51  ;;  %v888_v61 = vunpack.i.l.bf16 %v887_v51  ;;  %v1206_v51 = vadd.f32 %v503_v16, %v494_v9 }
  0xa2   : > { %v389_v19 = vsel %vm368_vm3, %v894_v54, %v884_v5  ;;  %v388_v55 = vsel %vm368_vm3, %v893_v60, %v883_v6 }
  0xa3   : > { %v391_v20 = vsel %vm368_vm3, %v889_v36, %v894_v54  ;;  %v390_v25 = vsel %vm368_vm3, %v888_v61, %v893_v60  ;;  %v467_v5 = vmul.f32 %v1083_v45, %v389_v19  ;;  %v501_v6 = vmul.f32 %v1088_v47, %v389_v19 }
  0xa4   : > { %v578_v35 = vmul.f32 %v1092_v49, %v389_v19  ;;  %v463_v14 = vmul.f32 %v1083_v45, %v388_v55  ;;  %v1208_v54 = vadd.f32 %v507_v33, %v498_v63  ;;  %v1210_v60 = vadd.f32 %v580_v53, %v571_v41 }
  0xa5   : > { %v497_v38 = vmul.f32 %v1088_v47, %v388_v55  ;;  %v574_v44 = vmul.f32 %v1092_v49, %v388_v55  ;;  %v466_v52 = vmul.f32 %v1083_v45, %v391_v20  ;;  %v500_v19 = vmul.f32 %v1088_v47, %v391_v20 }
  0xa6   : > { %v577_v8 = vmul.f32 %v1092_v49, %v391_v20  ;;  %v392_v33 = vsel %vm368_vm3, %v878_v10, %v888_v61  ;;  %v393_v43 = vsel %vm368_vm3, %v879_v7, %v889_v36  ;;  %v462_v16 = vmul.f32 %v1083_v45, %v390_v25 }
  0xa7   : > { %v902_v53 = vpop.permute.xlu1 %901  ;;  %v475_v63 = vadd.f32 %v467_v5, %v1132_v12  ;;  %v518_v0 = vadd.f32 %v1103_v57, %v501_v6  ;;  %v595_v9 = vadd.f32 %v1109_v59, %v578_v35  ;;  %v471_v41 = vadd.f32 %v463_v14, %v1130_v11 }
  0xa8   : > { %v461_v55 = vmul.f32 %v1083_v45, %v392_v33  ;;  %v465_v10 = vmul.f32 %v1083_v45, %v393_v43  ;;  %v495_v1 = vmul.f32 %v1088_v47, %v392_v33  ;;  %v496_v61 = vmul.f32 %v1088_v47, %v390_v25  ;;  %v1236_v7 = vpop.permute.xlu0 %896 }
  0xa9   : > { %v514_v36 = vadd.f32 %v1100_v56, %v497_v38  ;;  %v591_v12 = vadd.f32 %v1106_v58, %v574_v44  ;;  %v1241_v57 = vadd.f32 %v466_v52, %v1158_v24  ;;  %v1244_v59 = vadd.f32 %v1126_v4, %v500_v19 }
  0xaa   : > { %v1246_v11 = vadd.f32 %v586_v29, %v577_v8  ;;  %v1249_v45 = vadd.f32 %v462_v16, %v1154_v15  ;;  %v499_v20 = vmul.f32 %v1088_v47, %v393_v43  ;;  %v572_v5 = vmul.f32 %v1092_v49, %v392_v33 }
  0xab   : > { %v904_v6 = vunpack.i.h.bf16 %v902_v53  ;;  %v903_v35 = vunpack.i.l.bf16 %v902_v53  ;;  %v899_v56 = vunpack.i.h.bf16 %v1236_v7  ;;  %v898_v58 = vunpack.i.l.bf16 %v1236_v7 }
  0xac   : > { %v1258_v4 = vadd.f32 %v461_v55, %v1148_v21  ;;  %v1261_v15 = vadd.f32 %v465_v10, %v1156_v13  ;;  %v1264_v47 = vadd.f32 %v1114_v62, %v495_v1  ;;  %v513_v24 = vadd.f32 %v1120_v2, %v496_v61 }
  0xad   : > { %v573_v29 = vmul.f32 %v1092_v49, %v390_v25  ;;  %v576_v8 = vmul.f32 %v1092_v49, %v393_v43  ;;  %v432_v21 = vsel %vm424_vm4, %v904_v6, %v899_v56  ;;  %v431_v13 = vsel %vm424_vm4, %v903_v35, %v898_v58 }
  0xae   : > { %v1279_v62 = vadd.f32 %v1123_v3, %v499_v20  ;;  %v1282_v2 = vadd.f32 %v1135_v17, %v572_v5  ;;  %v440_v25 = vsel %vm407_vm5, 0.0, %v432_v21  ;;  %v436_v49 = vsel %vm407_vm5, 0.0, %v431_v13 }
  0xaf   : > { %v912_v14 = vpop.permute.xlu1 %911  ;;  %v484_v38 = vmul.f32 %v1085_v46, %v440_v25  ;;  %v527_v44 = vmul.f32 %v1090_v48, %v440_v25  ;;  %v604_v52 = vmul.f32 %v1152_v23, %v440_v25  ;;  %v480_v19 = vmul.f32 %v1085_v46, %v436_v49 }
  0xb0   : > { %v523_v3 = vmul.f32 %v1090_v48, %v436_v49  ;;  %v600_v17 = vmul.f32 %v1152_v23, %v436_v49  ;;  %v914_v33 = vunpack.i.h.bf16 %v912_v14  ;;  %v913_v43 = vunpack.i.l.bf16 %v912_v14 }
  0xb1   : > { %v590_v16 = vadd.f32 %v1138_v18, %v573_v29  ;;  %v1296_v30 = vadd.f32 %v1165_v27, %v576_v8  ;;  %v535_v53 = vadd.f32 %v527_v44, %v518_v0  ;;  %v612_v55 = vadd.f32 %v604_v52, %v595_v9  ;;  %v907_v29 = vpop.permute.xlu0 %906 }
  0xb2   : > { %v531_v10 = vadd.f32 %v523_v3, %v514_v36  ;;  %v608_v1 = vadd.f32 %v600_v17, %v591_v12  ;;  %v425_v61 = vsel %vm424_vm4, %v913_v43, %v903_v35  ;;  %v426_v20 = vsel %vm424_vm4, %v914_v33, %v904_v6 }
  0xb3   : > { %v492_v5 = vadd.f32 %v484_v38, %v475_v63  ;;  %v545_v21 = vrot.slane %v535_v53, 7  ;;  %v622_v13 = vrot.slane %v612_v55, 1  ;;  %v488_v25 = vadd.f32 %v480_v19, %v471_v41 }
  0xb4   : > { %v541_v49 = vrot.slane %v531_v10, 7  ;;  %v618_v14 = vrot.slane %v608_v1, 1  ;;  %v522_v18 = vmul.f32 %v1090_v48, %v425_v61  ;;  %v526_v27 = vmul.f32 %v1090_v48, %v426_v20 }
  0xb5   : > { %v479_v0 = vmul.f32 %v1085_v46, %v425_v61  ;;  %v483_v9 = vmul.f32 %v1085_v46, %v426_v20  ;;  %v599_v36 = vmul.f32 %v1152_v23, %v425_v61  ;;  %v603_v12 = vmul.f32 %v1152_v23, %v426_v20 }
  0xb6   : > { %v549_v63 = vsel %vm536_vm6, %v541_v49, %v545_v21  ;;  %v553_v41 = vsel %vm536_vm6, %v545_v21, %v541_v49  ;;  %v627_v6 = vsel %vm623_vm7, %v618_v14, %v622_v13  ;;  %v631_v35 = vsel %vm623_vm7, %v622_v13, %v618_v14 }
  0xb7   : > { %v557_v8 = vsel %vm536_vm6, 0.0, %v553_v41  ;;  %v569_v38 = vadd.f32 %v549_v63, %v492_v5  ;;  %v639_v44 = vsel %vm614_vm8, 0.0, %v631_v35  ;;  %v530_v52 = vadd.f32 %v522_v18, %v513_v24 }
  0xb8   : > { %v565_v19 = vadd.f32 %v557_v8, %v488_v25  ;;  %v534_v3 = vadd.f32 %v526_v27, %v1244_v59  ;;  %v607_v17 = vadd.f32 %v599_v36, %v590_v16  ;;  %v611_v53 = vadd.f32 %v603_v12, %v1246_v11 }
  0xb9   : > { %v647_v55 = vadd.f32 %v639_v44, %v569_v38  ;;  %v540_v10 = vrot.slane %v530_v52, 7  ;;  %v909_v1 = vunpack.i.h.bf16 %v907_v29  ;;  %v908_v61 = vunpack.i.l.bf16 %v907_v29 }
  0xba   : > { %v643_v20 = vadd.f32 %v627_v6, %v565_v19  ;;  %v544_v21 = vrot.slane %v534_v3, 7  ;;  %v617_v13 = vrot.slane %v607_v17, 1  ;;  %v621_v49 = vrot.slane %v611_v53, 1 }
  0xbb   : > { %v667_v5 = vmul.f32 %v659_v40, %v647_v55  ;;  %v487_v14 = vadd.f32 %v479_v0, %v1249_v45  ;;  %v491_v24 = vadd.f32 %v483_v9, %v1241_v57  ;;  %v428_v59 = vsel %vm424_vm4, %v909_v1, %v914_v33 }
  0xbc   : > { %v548_v11 = vsel %vm536_vm6, %v540_v10, %v544_v21  ;;  %v552_v16 = vsel %vm536_vm6, %v544_v21, %v540_v10  ;;  %v427_v25 = vsel %vm424_vm4, %v908_v61, %v913_v43  ;;  %v429_v40 = vsel %vm424_vm4, %v898_v58, %v908_v61  ;;  %v648_v21 = vld [vmem:[%s1066_s24] sm:$0xff] }
  0xbd   : > { %v556_v57 = vsel %vm536_vm6, 0.0, %v552_v16  ;;  %v568_v45 = vadd.f32 %v548_v11, %v491_v24  ;;  %v630_v33 = vsel %vm623_vm7, %v621_v49, %v617_v13  ;;  %v482_v18 = vmul.f32 %v1085_v46, %v428_v59 }
  0xbe   : > { %v663_v27 = vmul.f32 %v655_v39, %v643_v20  ;;  %v564_v0 = vadd.f32 %v556_v57, %v487_v14  ;;  %v626_v43 = vsel %vm623_vm7, %v617_v13, %v621_v49  ;;  %v638_v58 = vsel %vm614_vm8, 0.0, %v630_v33 }
  0xbf   : > { %v646_v9 = vadd.f32 %v638_v58, %v568_v45  ;;  %v525_v36 = vmul.f32 %v1090_v48, %v428_v59  ;;  %v430_v12 = vsel %vm424_vm4, %v899_v56, %v909_v1  ;;  %v477_v63 = vmul.f32 %v1085_v46, %v429_v40 }
  0xc0   : > { %v642_v41 = vadd.f32 %v626_v43, %v564_v0  ;;  %v602_v39 = vmul.f32 %v1152_v23, %v428_v59  ;;  %v478_v6 = vmul.f32 %v1085_v46, %v427_v25  ;;  %v520_v35 = vmul.f32 %v1090_v48, %v429_v40 }
  0xc1   : > { %v666_v29 = vmul.f32 %v658_v42, %v646_v9  ;;  %v481_v8 = vmul.f32 %v1085_v46, %v430_v12  ;;  %v490_v38 = vadd.f32 %v482_v18, %v1261_v15  ;;  %v521_v7 = vmul.f32 %v1090_v48, %v427_v25 }
  0xc2   : > { %v662_v56 = vmul.f32 %v1436_v34, %v642_v41  ;;  %v485_v44 = vadd.f32 %v477_v63, %v1197_v28  ;;  %v524_v32 = vmul.f32 %v1090_v48, %v430_v12  ;;  %v528_v46 = vadd.f32 %v520_v35, %v1206_v51 }
  0xc3   : > { %v671_v42 = vpack.c.bf16 %v667_v5, %v666_v29  ;;  %v529_v15 = vadd.f32 %v521_v7, %v1264_v47  ;;  %v533_v52 = vadd.f32 %v525_v36, %v1279_v62  ;;  %v597_v19 = vmul.f32 %v1152_v23, %v429_v40 }
  0xc4   : > { %v669_v3 = vpack.c.bf16 %v663_v27, %v662_v56  ;;  %v532_v17 = vadd.f32 %v524_v32, %v1208_v54  ;;  %v538_v31 = vrot.slane %v528_v46, 7  ;;  %v598_v53 = vmul.f32 %v1152_v23, %v427_v25 }
  0xc5   : > { %675 = vst [vmem:[%s1367_s27 + $0x18] sm:$0xff] %v671_v42  ;;  %v539_v28 = vrot.slane %v529_v15, 7  ;;  %v543_v48 = vrot.slane %v533_v52, 7  ;;  %v601_v51 = vmul.f32 %v1152_v23, %v430_v12  ;;  %v605_v55 = vadd.f32 %v597_v19, %v1210_v60  ;;  %v650_v60 = vld [vmem:[%s1066_s24 + $0x10] sm:$0xff] }
  0xc6   : > { %673 = vst [vmem:[%s1367_s27 + $0x8] sm:$0xff] %v669_v3  ;;  %v486_v47 = vadd.f32 %v478_v6, %v1258_v4  ;;  %v542_v62 = vrot.slane %v532_v17, 7  ;;  %v606_v10 = vadd.f32 %v598_v53, %v1282_v2  ;;  %v610_v54 = vadd.f32 %v602_v39, %v1296_v30 }
  0xc7   : > { %v489_v1 = vadd.f32 %v481_v8, %v1199_v26  ;;  %v547_v61 = vsel %vm536_vm6, %v539_v28, %v543_v48  ;;  %v551_v20 = vsel %vm536_vm6, %v543_v48, %v539_v28  ;;  %v609_v23 = vadd.f32 %v601_v51, %v1212_v50 }
  0xc8   : > { %v546_v4 = vsel %vm536_vm6, %v538_v31, %v542_v62  ;;  %v550_v2 = vsel %vm536_vm6, %v542_v62, %v538_v31  ;;  %v555_v30 = vsel %vm536_vm6, 0.0, %v551_v20  ;;  %v615_v26 = vrot.slane %v605_v55, 1 }
  0xc9   : > { %v554_v13 = vsel %vm536_vm6, 0.0, %v550_v2  ;;  %v563_v49 = vadd.f32 %v555_v30, %v486_v47  ;;  %v567_v5 = vadd.f32 %v547_v61, %v490_v38  ;;  %v616_v14 = vrot.slane %v606_v10, 1 }
  0xca   : > { %v562_v24 = vadd.f32 %v554_v13, %v485_v44  ;;  %v566_v50 = vadd.f32 %v546_v4, %v489_v1  ;;  %v619_v59 = vrot.slane %v609_v23, 1  ;;  %v620_v11 = vrot.slane %v610_v54, 1 }
  0xcb   : > { %v652_v16 = vunpack.c.l.bf16 %v648_v21  ;;  %v653_v25 = vunpack.c.h.bf16 %v648_v21  ;;  %v656_v40 = vunpack.c.l.bf16 %v650_v60  ;;  %v657_v57 = vunpack.c.h.bf16 %v650_v60 }
  0xcc   : > { %v624_v45 = vsel %vm623_vm7, %v615_v26, %v619_v59  ;;  %v625_v33 = vsel %vm623_vm7, %v616_v14, %v620_v11  ;;  %v628_v18 = vsel %vm623_vm7, %v619_v59, %v615_v26  ;;  %v629_v27 = vsel %vm623_vm7, %v620_v11, %v616_v14 }
  0xcd   : > { %v636_v0 = vsel %vm614_vm8, 0.0, %v628_v18  ;;  %v637_v43 = vsel %vm614_vm8, 0.0, %v629_v27  ;;  %v640_v58 = vadd.f32 %v624_v45, %v562_v24  ;;  %v641_v9 = vadd.f32 %v625_v33, %v563_v49 }
  0xce   : > { %v644_v36 = vadd.f32 %v636_v0, %v566_v50  ;;  %v645_v12 = vadd.f32 %v637_v43, %v567_v5 }
  0xcf   : > { %v660_v63 = vmul.f32 %v652_v16, %v640_v58  ;;  %v661_v41 = vmul.f32 %v653_v25, %v641_v9 }
  0xd0   : > { %v664_v39 = vmul.f32 %v656_v40, %v644_v36  ;;  %v665_v6 = vmul.f32 %v657_v57, %v645_v12 }
  0xd1   : > { %v668_v35 = vpack.c.bf16 %v661_v41, %v660_v63 }
  0xd2   : > { %v670_v29 = vpack.c.bf16 %v665_v6, %v664_v39 }
  0xd3   : > { %672 = vst [vmem:[%s1367_s27] sm:$0xff] %v668_v35 }
  0xd4   : > { %674 = vst [vmem:[%s1367_s27 + $0x10] sm:$0xff] %v670_v29 }
  0xd5 PF: > { %s14_s19 = sadd.s32 1, %s954_s19   ;;  %s1437_s15 = smov %s946_s17 }
  0xd6   : > { %p11_p7 = scmp.ge.s32.totalorder %s14_s19, 10   ;;  %s1438_s16 = smov %s950_s18 }
  0xd7   : > { %s1439_s17 = smov %s1442_s20  ;;  %s1440_s18 = smov %s1446_s21 }
  0xd8   :  { %13 = sbr.rel (!%p11_p7) target bundleno = 3 (0x3), region = 72 }

// kernel: _lambda_.3
= control target key start
LH: loop header
LB: loop body
LE: loop exit
PB: predicated region body
PF: predicated region fallthrough
CT: control target
= control target key end

     0   :  { %s4424_s18 = smov 0   ;;  %s4426_s19 = smov 0   ;;  %s6543_s0 = inlined_call_operand.vmem [shape: f32[2,4,256,16], index: 0, kind: input, shape index: {}]   ;;  %s6544_s1 = inlined_call_operand.vmem [shape: bf16[3,16,64], index: 1, kind: input, shape index: {}]   ;;  %s6545_s2 = inlined_call_operand.vmem [shape: f32[1,64], index: 2, kind: input, shape index: {}]   ;;  %s6546_s3 = inlined_call_operand.vmem [shape: bf16[2,4,256,32], index: 3, kind: output, shape index: {0}]   ;;  %s6547_s4 = inlined_call_operand.vmem [shape: bf16[2,4,256,32], index: 4, kind: output, shape index: {1}]   ;;  %s6548_s5 = inlined_call_operand.vmem [shape: f32[2,4,32], index: 5, kind: output, shape index: {2}]  }
   0x1   :  { %s4428_s20 = smov 0  }
   0x2 LB: > { %s28_s21 = sadd.s32 1, %s4386_s19  ;;  %p4124_p0 = scmp.ge.s32.totalorder %s4390_s20, 1  ;;  %s4390_s20 = sphi %s4428_s20, %s16_s20   ;;  %s4386_s19 = sphi %s4426_s19, %s6616_s19   ;;  %s4382_s18 = sphi %s4424_s18, %s6615_s18  }
   0x3   : > { %p30_p1 = scmp.ge.s32.totalorder %s28_s21, 2  ;;  %p215_p2 = scmp.lt.s32.totalorder %s4390_s20, 3 }
   0x5   : > { %s6618_s21 = smov (%p30_p1, %s28_s21), 0  ;;  %p216_p3 = pnand %p4124_p0, %p215_p2 }
   0x7   : > { %219 = sbr.rel (%p216_p3) target bundleno = 961 (0x3c1), region = 32 }
   0xc   : > { %v4313_v0 = vld [vmem:[%s6544_s1 + $0x8] sm:$0xff]  ;;  %v4314_v1 = vld [vmem:[%s6544_s1] sm:$0xff]  ;;  %p265_p4 = scmp.lt.s32.totalorder %s4382_s18, 1  ;;  %v4315_v2 = vld [vmem:[%s6544_s1 + $0x10] sm:$0xff]  ;;  %vm888_vm0 = vcmask 130048   ;;  %vm1410_vm1 = vcmask 523264  }
   0xd   : > { %1088 = vmatpush.bf16.msra.mxu0 %v4313_v0  ;;  %4316 = vmatpush.bf16.msra.mxu3 %v4313_v0  ;;  %vm2887_vm2 = vcmask 257024   ;;  %s4392_s13 = smov 96   ;;  %vm3662_vm3 = vcmask 261120   ;;  %vm3943_vm4 = vcmask 1041409   ;;  %vm3945_vm5 = vcmask 1042434  }
   0xe   : > { %s6620_s18 = smov (!%p265_p4, %s4382_s18), 1  ;;  %1554 = vmatpush.bf16.msra.mxu1 %v4314_v1  ;;  %2101 = vmatpush.bf16.msra.mxu2 %v4315_v2  ;;  %vm3947_vm6 = vcmask 1043459  }
   0xf   : > { %s4310_s28 = sshll.u32 %s6620_s18, 10  ;;  %s4311_s9 = sshll.u32 %s6620_s18, 9 }
  0x10   : > { %s4457_s6 = scalar_lea.vmem %s6543_s0, %s4310_s28  ;;  %s4648_s12 = scalar_lea.vmem %s6546_s3, %s4311_s9 }
  0x11   : > { %4317 = vmatpush.bf16.msrb.mxu3 %v4314_v1  ;;  %v299_v3 = vld [vmem:[%s4457_s6] sm:$0xff]  ;;  %v300_v4 = vld [vmem:[%s4457_s6 + $0x8] sm:$0xff]  ;;  %v301_v24 = vld [vmem:[%s4457_s6 + $0x10] sm:$0xff]  ;;  %s4933_s16 = scalar_lea.vmem %s6547_s4, %s4311_s9  ;;  %s4131_s29 = sshll.u32 %s6620_s18, 2 }
  0x12   : > { %v379_v5 = vld [vmem:[%s4457_s6 + $0x280] sm:$0xff]  ;;  %v427_v6 = vpack.c.bf16 %v299_v3, %v299_v3  ;;  %v428_v7 = vpack.c.bf16 %v300_v4, %v300_v4  ;;  %v380_v8 = vld [vmem:[%s4457_s6 + $0x288] sm:$0xff]  ;;  %v302_v25 = vld [vmem:[%s4457_s6 + $0x18] sm:$0xff]  ;;  %v429_v30 = vpack.c.bf16 %v301_v24, %v301_v24  ;;  %s6422_s7 = scalar_lea.vmem %s6548_s5, %s4131_s29 }
  0x13   : > { %v507_v9 = vpack.c.bf16 %v379_v5, %v379_v5  ;;  %v331_v10 = vld [vmem:[%s4457_s6 + $0x100] sm:$0xff]  ;;  %v332_v11 = vld [vmem:[%s4457_s6 + $0x108] sm:$0xff]  ;;  %v508_v12 = vpack.c.bf16 %v380_v8, %v380_v8  ;;  %v381_v26 = vld [vmem:[%s4457_s6 + $0x290] sm:$0xff]  ;;  %v430_v31 = vpack.c.bf16 %v302_v25, %v302_v25 }
  0x14   : > { %v459_v13 = vpack.c.bf16 %v331_v10, %v331_v10  ;;  %v460_v14 = vpack.c.bf16 %v332_v11, %v332_v11  ;;  %v690_v15 = vunpack.c.l.b16 %v427_v6  ;;  %v691_v16 = vunpack.c.l.b16 %v428_v7  ;;  %v382_v27 = vld [vmem:[%s4457_s6 + $0x298] sm:$0xff]  ;;  %v333_v28 = vld [vmem:[%s4457_s6 + $0x110] sm:$0xff]  ;;  %v303_v45 = vld [vmem:[%s4457_s6 + $0x20] sm:$0xff] }
  0x15   : > { %v770_v17 = vunpack.c.l.b16 %v507_v9  ;;  %v771_v18 = vunpack.c.l.b16 %v508_v12  ;;  %v334_v29 = vld [vmem:[%s4457_s6 + $0x118] sm:$0xff]  ;;  %v509_v32 = vpack.c.bf16 %v381_v26, %v381_v26  ;;  %v510_v33 = vpack.c.bf16 %v382_v27, %v382_v27  ;;  %v304_v46 = vld [vmem:[%s4457_s6 + $0x28] sm:$0xff]  ;;  %v383_v47 = vld [vmem:[%s4457_s6 + $0x2a0] sm:$0xff] }
  0x16   : > { %v722_v19 = vunpack.c.l.b16 %v459_v13  ;;  %v723_v20 = vunpack.c.l.b16 %v460_v14  ;;  %v818_v21 = vpack.c.b16 %v691_v16, %v690_v15  ;;  %v461_v34 = vpack.c.bf16 %v333_v28, %v333_v28  ;;  %v384_v48 = vld [vmem:[%s4457_s6 + $0x2a8] sm:$0xff]  ;;  %v335_v49 = vld [vmem:[%s4457_s6 + $0x120] sm:$0xff]  ;;  %v306_v3 = vld [vmem:[%s4457_s6 + $0x38] sm:$0xff] }
  0x17   : > { %v4465_v22 = vpack.c.b16 %v771_v18, %v770_v17  ;;  %v462_v35 = vpack.c.bf16 %v334_v29, %v334_v29  ;;  %v692_v36 = vunpack.c.l.b16 %v429_v30  ;;  %v693_v37 = vunpack.c.l.b16 %v430_v31  ;;  %v336_v50 = vld [vmem:[%s4457_s6 + $0x128] sm:$0xff]  ;;  %v385_v4 = vld [vmem:[%s4457_s6 + $0x2b0] sm:$0xff]  ;;  %v386_v5 = vld [vmem:[%s4457_s6 + $0x2b8] sm:$0xff] }
  0x18   : > { %v4467_v23 = vpack.c.b16 %v723_v20, %v722_v19  ;;  %4138 = vmatmul.msk.bf16.vlgmr.msra.gmra.mxu0 %vm888_vm0, %v818_v21  ;;  %4206 = vmatmul.msk.bf16.vlgmr.msra.gmra.mxu1 %vm888_vm0, %v818_v21  ;;  %v772_v38 = vunpack.c.l.b16 %v509_v32  ;;  %v773_v39 = vunpack.c.l.b16 %v510_v33  ;;  %v724_v40 = vunpack.c.l.b16 %v461_v34  ;;  %v337_v6 = vld [vmem:[%s4457_s6 + $0x130] sm:$0xff]  ;;  %v338_v7 = vld [vmem:[%s4457_s6 + $0x138] sm:$0xff]  ;;  %v307_v25 = vld [vmem:[%s4457_s6 + $0x40] sm:$0xff] }
  0x19   : > { %4178 = vmatmul.msk.bf16.vlgmr.msra.gmra.mxu3 %vm888_vm0, %v4465_v22  ;;  %v725_v41 = vunpack.c.l.b16 %v462_v35  ;;  %v819_v42 = vpack.c.b16 %v693_v37, %v692_v36  ;;  %v431_v51 = vpack.c.bf16 %v303_v45, %v303_v45  ;;  %v432_v52 = vpack.c.bf16 %v304_v46, %v304_v46  ;;  %v308_v26 = vld [vmem:[%s4457_s6 + $0x48] sm:$0xff]  ;;  %v387_v27 = vld [vmem:[%s4457_s6 + $0x2c0] sm:$0xff] }
  0x1a   : > { %4260 = vmatmul.msk.bf16.vlgmr.msra.gmra.mxu2 %vm888_vm0, %v4467_v23  ;;  %4318 = vmatpush.bf16.msra.mxu3 %v4315_v2  ;;  %v4481_v43 = vpack.c.b16 %v773_v39, %v772_v38  ;;  %v511_v53 = vpack.c.bf16 %v383_v47, %v383_v47  ;;  %v512_v54 = vpack.c.bf16 %v384_v48, %v384_v48  ;;  %v305_v2 = vld [vmem:[%s4457_s6 + $0x30] sm:$0xff]  ;;  %v388_v28 = vld [vmem:[%s4457_s6 + $0x2c8] sm:$0xff]  ;;  %v339_v29 = vld [vmem:[%s4457_s6 + $0x140] sm:$0xff] }
  0x1b   : > { %v4483_v44 = vpack.c.b16 %v725_v41, %v724_v40  ;;  %v463_v55 = vpack.c.bf16 %v335_v49, %v335_v49  ;;  %v464_v56 = vpack.c.bf16 %v336_v50, %v336_v50  ;;  %v694_v57 = vunpack.c.l.b16 %v431_v51  ;;  %v340_v30 = vld [vmem:[%s4457_s6 + $0x148] sm:$0xff]  ;;  %v309_v48 = vld [vmem:[%s4457_s6 + $0x50] sm:$0xff]  ;;  %v310_v49 = vld [vmem:[%s4457_s6 + $0x58] sm:$0xff] }
  0x1c   : > { %v695_v58 = vunpack.c.l.b16 %v432_v52  ;;  %v774_v59 = vunpack.c.l.b16 %v511_v53  ;;  %v775_v60 = vunpack.c.l.b16 %v512_v54  ;;  %v433_v8 = vpack.c.bf16 %v305_v2, %v305_v2  ;;  %v389_v50 = vld [vmem:[%s4457_s6 + $0x2d0] sm:$0xff]  ;;  %v390_v51 = vld [vmem:[%s4457_s6 + $0x2d8] sm:$0xff] }
  0x1d   : > { %v726_v61 = vunpack.c.l.b16 %v463_v55  ;;  %v727_v62 = vunpack.c.l.b16 %v464_v56  ;;  %v434_v9 = vpack.c.bf16 %v306_v3, %v306_v3  ;;  %v513_v10 = vpack.c.bf16 %v385_v4, %v385_v4  ;;  %v341_v52 = vld [vmem:[%s4457_s6 + $0x150] sm:$0xff]  ;;  %v342_v53 = vld [vmem:[%s4457_s6 + $0x158] sm:$0xff] }
  0x1e   : > { %v820_v63 = vpack.c.b16 %v695_v58, %v694_v57  ;;  %v4497_v0 = vpack.c.b16 %v775_v60, %v774_v59  ;;  %v514_v11 = vpack.c.bf16 %v386_v5, %v386_v5  ;;  %v465_v12 = vpack.c.bf16 %v337_v6, %v337_v6 }
  0x1f   : > { %v4499_v1 = vpack.c.b16 %v727_v62, %v726_v61  ;;  %v466_v13 = vpack.c.bf16 %v338_v7, %v338_v7  ;;  %v696_v14 = vunpack.c.l.b16 %v433_v8  ;;  %v697_v15 = vunpack.c.l.b16 %v434_v9  ;;  %v311_v7 = vld [vmem:[%s4457_s6 + $0x60] sm:$0xff]  ;;  %v312_v8 = vld [vmem:[%s4457_s6 + $0x68] sm:$0xff] }
  0x20   : > { %v776_v16 = vunpack.c.l.b16 %v513_v10  ;;  %v777_v17 = vunpack.c.l.b16 %v514_v11  ;;  %v728_v18 = vunpack.c.l.b16 %v465_v12  ;;  %v435_v31 = vpack.c.bf16 %v307_v25, %v307_v25  ;;  %v391_v9 = vld [vmem:[%s4457_s6 + $0x2e0] sm:$0xff]  ;;  %v392_v10 = vld [vmem:[%s4457_s6 + $0x2e8] sm:$0xff] }
  0x21   : > { %v729_v19 = vunpack.c.l.b16 %v466_v13  ;;  %v821_v20 = vpack.c.b16 %v697_v15, %v696_v14  ;;  %v436_v32 = vpack.c.bf16 %v308_v26, %v308_v26  ;;  %v515_v33 = vpack.c.bf16 %v387_v27, %v387_v27  ;;  %v343_v11 = vld [vmem:[%s4457_s6 + $0x160] sm:$0xff]  ;;  %v344_v12 = vld [vmem:[%s4457_s6 + $0x168] sm:$0xff] }
  0x22   : > { %v4513_v21 = vpack.c.b16 %v777_v17, %v776_v16  ;;  %v516_v34 = vpack.c.bf16 %v388_v28, %v388_v28  ;;  %v467_v35 = vpack.c.bf16 %v339_v29, %v339_v29  ;;  %v468_v36 = vpack.c.bf16 %v340_v30, %v340_v30 }
  0x23   : > { %v4515_v24 = vpack.c.b16 %v729_v19, %v728_v18  ;;  %v698_v37 = vunpack.c.l.b16 %v435_v31  ;;  %v699_v38 = vunpack.c.l.b16 %v436_v32  ;;  %v778_v39 = vunpack.c.l.b16 %v515_v33  ;;  %v313_v32 = vld [vmem:[%s4457_s6 + $0x70] sm:$0xff]  ;;  %v314_v33 = vld [vmem:[%s4457_s6 + $0x78] sm:$0xff] }
  0x24   : > { %v779_v40 = vunpack.c.l.b16 %v516_v34  ;;  %v730_v41 = vunpack.c.l.b16 %v467_v35  ;;  %v437_v54 = vpack.c.bf16 %v309_v48, %v309_v48  ;;  %v438_v55 = vpack.c.bf16 %v310_v49, %v310_v49  ;;  %v393_v34 = vld [vmem:[%s4457_s6 + $0x2f0] sm:$0xff]  ;;  %v394_v35 = vld [vmem:[%s4457_s6 + $0x2f8] sm:$0xff] }
  0x25   : > { %v822_v45 = vpack.c.b16 %v699_v38, %v698_v37  ;;  %v517_v56 = vpack.c.bf16 %v389_v50, %v389_v50  ;;  %v518_v57 = vpack.c.bf16 %v390_v51, %v390_v51  ;;  %v469_v58 = vpack.c.bf16 %v341_v52, %v341_v52  ;;  %v346_v37 = vld [vmem:[%s4457_s6 + $0x178] sm:$0xff] }
  0x26   : > { %v4529_v46 = vpack.c.b16 %v779_v40, %v778_v39  ;;  %v470_v59 = vpack.c.bf16 %v342_v53, %v342_v53  ;;  %v700_v60 = vunpack.c.l.b16 %v437_v54  ;;  %v701_v61 = vunpack.c.l.b16 %v438_v55 }
  0x27   : > { %v780_v62 = vunpack.c.l.b16 %v517_v56  ;;  %v732_v2 = vunpack.c.l.b16 %v469_v58  ;;  %v439_v13 = vpack.c.bf16 %v311_v7, %v311_v7  ;;  %v440_v14 = vpack.c.bf16 %v312_v8, %v312_v8  ;;  %v316_v58 = vld [vmem:[%s4457_s6 + $0x88] sm:$0xff] }
  0x28   : > { %4139 = vmatmul.msk.bf16.gmra.mxu0 %vm888_vm0, %v819_v42  ;;  %4207 = vmatmul.msk.bf16.gmra.mxu1 %vm888_vm0, %v819_v42  ;;  %v731_v42 = vunpack.c.l.b16 %v468_v36  ;;  %v733_v3 = vunpack.c.l.b16 %v470_v59  ;;  %v823_v4 = vpack.c.b16 %v701_v61, %v700_v60  ;;  %v519_v15 = vpack.c.bf16 %v391_v9, %v391_v9  ;;  %v345_v36 = vld [vmem:[%s4457_s6 + $0x170] sm:$0xff]  ;;  %v395_v59 = vld [vmem:[%s4457_s6 + $0x300] sm:$0xff]  ;;  %v396_v60 = vld [vmem:[%s4457_s6 + $0x308] sm:$0xff] }
  0x29   : > { %4179 = vmatmul.msk.bf16.gmra.mxu3 %vm888_vm0, %v4481_v43  ;;  %v520_v16 = vpack.c.bf16 %v392_v10, %v392_v10  ;;  %v471_v17 = vpack.c.bf16 %v343_v11, %v343_v11  ;;  %v472_v18 = vpack.c.bf16 %v344_v12, %v344_v12  ;;  %v702_v19 = vunpack.c.l.b16 %v439_v13  ;;  %v347_v61 = vld [vmem:[%s4457_s6 + $0x180] sm:$0xff] }
  0x2a   : > { %4261 = vmatmul.msk.bf16.gmra.mxu2 %vm888_vm0, %v4483_v44  ;;  %v4531_v47 = vpack.c.b16 %v731_v42, %v730_v41  ;;  %v4547_v6 = vpack.c.b16 %v733_v3, %v732_v2  ;;  %v782_v25 = vunpack.c.l.b16 %v519_v15  ;;  %v441_v38 = vpack.c.bf16 %v313_v32, %v313_v32  ;;  %v4596_v15 = vld [vmem:[%s6545_s2] ss:$0 sm:$0xff]  ;;  %v349_v32 = vld [vmem:[%s4457_s6 + $0x190] sm:$0xff] }
  0x2b   : > { %v783_v26 = vunpack.c.l.b16 %v520_v16  ;;  %v734_v27 = vunpack.c.l.b16 %v471_v17  ;;  %v735_v28 = vunpack.c.l.b16 %v472_v18  ;;  %v442_v39 = vpack.c.bf16 %v314_v33, %v314_v33  ;;  %v350_v33 = vld [vmem:[%s4457_s6 + $0x198] sm:$0xff] }
  0x2c   : > { %v521_v40 = vpack.c.bf16 %v393_v34, %v393_v34  ;;  %v522_v41 = vpack.c.bf16 %v394_v35, %v394_v35  ;;  %v473_v42 = vpack.c.bf16 %v345_v36, %v345_v36  ;;  %v704_v48 = vunpack.c.l.b16 %v441_v38 }
  0x2d   : > { %v4561_v30 = vpack.c.b16 %v783_v26, %v782_v25  ;;  %v4563_v31 = vpack.c.b16 %v735_v28, %v734_v27  ;;  %v705_v49 = vunpack.c.l.b16 %v442_v39  ;;  %v444_v2 = vpack.c.bf16 %v316_v58, %v316_v58  ;;  %v317_v26 = vld [vmem:[%s4457_s6 + $0x90] sm:$0xff]  ;;  %v318_v27 = vld [vmem:[%s4457_s6 + $0x98] sm:$0xff] }
  0x2e   : > { %v784_v50 = vunpack.c.l.b16 %v521_v40  ;;  %v785_v51 = vunpack.c.l.b16 %v522_v41  ;;  %v736_v52 = vunpack.c.l.b16 %v473_v42  ;;  %v523_v3 = vpack.c.bf16 %v395_v59, %v395_v59  ;;  %v397_v28 = vld [vmem:[%s4457_s6 + $0x310] sm:$0xff] }
  0x2f   : > { %v825_v54 = vpack.c.b16 %v705_v49, %v704_v48  ;;  %v475_v7 = vpack.c.bf16 %v347_v61, %v347_v61  ;;  %v707_v10 = vunpack.c.l.b16 %v444_v2  ;;  %v445_v36 = vpack.c.bf16 %v317_v26, %v317_v26  ;;  %v352_v26 = vld [vmem:[%s4457_s6 + $0x1a8] sm:$0xff] }
  0x30   : > { %v4577_v55 = vpack.c.b16 %v785_v51, %v784_v50  ;;  %v786_v11 = vunpack.c.l.b16 %v523_v3  ;;  %v525_v38 = vpack.c.bf16 %v397_v28, %v397_v28  ;;  %v478_v48 = vpack.c.bf16 %v350_v33, %v350_v33 }
  0x31   : > { %v738_v13 = vunpack.c.l.b16 %v475_v7 }
  0x32   : > { %v741_v59 = vunpack.c.l.b16 %v478_v48 }
  0x38   : > { %4140 = vmatmul.msk.bf16.gmra.mxu0 %vm888_vm0, %v820_v63  ;;  %4208 = vmatmul.msk.bf16.gmra.mxu1 %vm888_vm0, %v820_v63  ;;  %v781_v63 = vunpack.c.l.b16 %v518_v57  ;;  %v315_v57 = vld [vmem:[%s4457_s6 + $0x80] sm:$0xff] }
  0x39   : > { %4180 = vmatmul.msk.bf16.gmra.mxu3 %vm888_vm0, %v4497_v0 }
  0x3a   : > { %4262 = vmatmul.msk.bf16.gmra.mxu2 %vm888_vm0, %v4499_v1  ;;  %v4545_v5 = vpack.c.b16 %v781_v63, %v780_v62  ;;  %v348_v62 = vld [vmem:[%s4457_s6 + $0x188] sm:$0xff]  ;;  %v443_v63 = vpack.c.bf16 %v315_v57, %v315_v57 }
  0x3b   : > { %v476_v8 = vpack.c.bf16 %v348_v62, %v348_v62 }
  0x3c   : > { %v706_v9 = vunpack.c.l.b16 %v443_v63 }
  0x3e   : > { %v826_v16 = vpack.c.b16 %v707_v10, %v706_v9 }
  0x48   : > { %4141 = vmatmul.msk.bf16.gmra.mxu0 %vm888_vm0, %v821_v20  ;;  %4209 = vmatmul.msk.bf16.gmra.mxu1 %vm888_vm0, %v821_v20  ;;  %v703_v20 = vunpack.c.l.b16 %v440_v14  ;;  %v739_v14 = vunpack.c.l.b16 %v476_v8 }
  0x49   : > { %4181 = vmatmul.msk.bf16.gmra.mxu3 %vm888_vm0, %v4513_v21 }
  0x4a   : > { %4263 = vmatmul.msk.bf16.gmra.mxu2 %vm888_vm0, %v4515_v24  ;;  %v824_v29 = vpack.c.b16 %v703_v20, %v702_v19  ;;  %v4602_v20 = vpack.c.b16 %v739_v14, %v738_v13  ;;  %v320_v13 = vld [vmem:[%s4457_s6 + $0xa8] sm:$0xff]  ;;  %v399_v14 = vld [vmem:[%s4457_s6 + $0x320] sm:$0xff] }
  0x4b   : > { %v527_v33 = vpack.c.bf16 %v399_v14, %v399_v14 }
  0x58   : > { %4142 = vmatmul.msk.bf16.gmra.mxu0 %vm888_vm0, %v822_v45  ;;  %4210 = vmatmul.msk.bf16.gmra.mxu1 %vm888_vm0, %v822_v45  ;;  %v474_v45 = vpack.c.bf16 %v346_v37, %v346_v37  ;;  %v446_v37 = vpack.c.bf16 %v318_v27, %v318_v27 }
  0x59   : > { %4182 = vmatmul.msk.bf16.gmra.mxu3 %vm888_vm0, %v4529_v46 }
  0x5a   : > { %4264 = vmatmul.msk.bf16.gmra.mxu2 %vm888_vm0, %v4531_v47  ;;  %v737_v53 = vunpack.c.l.b16 %v474_v45  ;;  %v477_v45 = vpack.c.bf16 %v349_v32, %v349_v32  ;;  %v448_v32 = vpack.c.bf16 %v320_v13, %v320_v13 }
  0x5c   : > { %v4579_v56 = vpack.c.b16 %v737_v53, %v736_v52  ;;  %v708_v52 = vunpack.c.l.b16 %v445_v36  ;;  %v709_v53 = vunpack.c.l.b16 %v446_v37  ;;  %v740_v58 = vunpack.c.l.b16 %v477_v45 }
  0x5e   : > { %v827_v62 = vpack.c.b16 %v709_v53, %v708_v52  ;;  %v4630_v7 = vpack.c.b16 %v741_v59, %v740_v58 }
  0x68   : > { %4143 = vmatmul.msk.bf16.gmra.mxu0 %vm888_vm0, %v823_v4  ;;  %4211 = vmatmul.msk.bf16.gmra.mxu1 %vm888_vm0, %v823_v4  ;;  %v524_v4 = vpack.c.bf16 %v396_v60, %v396_v60 }
  0x69   : > { %4183 = vmatmul.msk.bf16.gmra.mxu3 %vm888_vm0, %v4545_v5 }
  0x6a   : > { %4265 = vmatmul.msk.bf16.gmra.mxu2 %vm888_vm0, %v4547_v6  ;;  %v787_v12 = vunpack.c.l.b16 %v524_v4 }
  0x6c   : > { %v4600_v19 = vpack.c.b16 %v787_v12, %v786_v11  ;;  %v319_v11 = vld [vmem:[%s4457_s6 + $0xa0] sm:$0xff] }
  0x78   : > { %4144 = vmatmul.msk.bf16.gmra.mxu0 %vm888_vm0, %v824_v29  ;;  %4212 = vmatmul.msk.bf16.gmra.mxu1 %vm888_vm0, %v824_v29  ;;  %v398_v29 = vld [vmem:[%s4457_s6 + $0x318] sm:$0xff] }
  0x79   : > { %4184 = vmatmul.msk.bf16.gmra.mxu3 %vm888_vm0, %v4561_v30  ;;  %v526_v42 = vpack.c.bf16 %v398_v29, %v398_v29  ;;  %v447_v29 = vpack.c.bf16 %v319_v11, %v319_v11 }
  0x7a   : > { %4266 = vmatmul.msk.bf16.gmra.mxu2 %vm888_vm0, %v4563_v31 }
  0x7b   : > { %v789_v57 = vunpack.c.l.b16 %v526_v42  ;;  %v710_v48 = vunpack.c.l.b16 %v447_v29  ;;  %v402_v29 = vld [vmem:[%s4457_s6 + $0x338] sm:$0xff] }
  0x88   : > { %4145 = vmatmul.msk.bf16.gmra.mxu0 %vm888_vm0, %v825_v54  ;;  %4213 = vmatmul.msk.bf16.gmra.mxu1 %vm888_vm0, %v825_v54  ;;  %v788_v54 = vunpack.c.l.b16 %v525_v38 }
  0x89   : > { %4185 = vmatmul.msk.bf16.gmra.mxu3 %vm888_vm0, %v4577_v55 }
  0x8a   : > { %4267 = vmatmul.msk.bf16.gmra.mxu2 %vm888_vm0, %v4579_v56  ;;  %v4628_v4 = vpack.c.b16 %v789_v57, %v788_v54 }
  0x8c   : > { %6563 = vst [vmem:[#allocation3_spill] sm:$0xff] %v4628_v4 }
  0x95   : > { %v1090_v17 = vpop.f32.mrf.mxu0  ;;  %v4598_v18 = vpop.f32.mrf.mxu1 }
  0x96   : > { %v1091_v25 = vadd.f32 %v4596_v15, %v1090_v17  ;;  %v400_v17 = vld [vmem:[%s4457_s6 + $0x328] sm:$0xff] }
  0x97   : > { %v528_v37 = vpack.c.bf16 %v400_v17, %v400_v17 }
  0x98   : > { %1411 = vst.msk [vmem:[#allocation2] sm:$0xff] %vm1410_vm1, %v1091_v25  ;;  %4146 = vmatmul.msk.bf16.gmra.mxu0 %vm888_vm0, %v826_v16  ;;  %4214 = vmatmul.msk.bf16.gmra.mxu1 %vm888_vm0, %v826_v16  ;;  %v351_v25 = vld [vmem:[%s4457_s6 + $0x1a0] sm:$0xff] }
  0x99   : > { %4186 = vmatmul.msk.bf16.gmra.mxu3 %vm888_vm0, %v4600_v19  ;;  %v479_v38 = vpack.c.bf16 %v351_v25, %v351_v25  ;;  %v791_v52 = vunpack.c.l.b16 %v528_v37  ;;  %v322_v25 = vld [vmem:[%s4457_s6 + $0xb8] sm:$0xff] }
  0x9a   : > { %4268 = vmatmul.msk.bf16.gmra.mxu2 %vm888_vm0, %v4602_v20 }
  0x9b   : > { %v742_v53 = vunpack.c.l.b16 %v479_v38 }
  0x9c   : > { %v1290_v34 = vpop.f32.mrf.mxu3 }
  0x9d   : > { %v2103_v35 = vpop.f32.mrf.mxu2  ;;  %v1291_v39 = vadd.f32 %v4596_v15, %v1290_v34  ;;  %v1092_v40 = vpop.f32.mrf.mxu0 }
  0x9e   : > { %v4619_v41 = vpop.f32.mrf.mxu1  ;;  %v1093_v49 = vadd.f32 %v4596_v15, %v1092_v40 }
  0x9f   : > { %1491 = vst.msk [vmem:[#allocation2 + $0x280] sm:$0xff] %vm1410_vm1, %v1291_v39  ;;  %v2343_v50 = vld [vmem:[#allocation2] sm:$0xff]  ;;  %v480_v39 = vpack.c.bf16 %v352_v26, %v352_v26  ;;  %v401_v26 = vld [vmem:[%s4457_s6 + $0x330] sm:$0xff] }
  0xa0   : > { %1412 = vst.msk [vmem:[#allocation2 + $0x8] sm:$0xff] %vm1410_vm1, %v1093_v49  ;;  %v2439_v51 = vadd.f32 %v2343_v50, %v2103_v35  ;;  %v711_v49 = vunpack.c.l.b16 %v448_v32  ;;  %v353_v32 = vld [vmem:[%s4457_s6 + $0x1b0] sm:$0xff] }
  0xa1   : > { %v743_v54 = vunpack.c.l.b16 %v480_v39  ;;  %v450_v39 = vpack.c.bf16 %v322_v25, %v322_v25 }
  0xa2   : > { %2535 = vst.msk [vmem:[#allocation2] sm:$0xff] %vm1410_vm1, %v2439_v51  ;;  %v790_v51 = vunpack.c.l.b16 %v527_v33  ;;  %v354_v33 = vld [vmem:[%s4457_s6 + $0x1b8] sm:$0xff] }
  0xa3   : > { %v4676_v11 = vpack.c.b16 %v743_v54, %v742_v53 }
  0xa4   : > { %v1292_v60 = vpop.f32.mrf.mxu3 }
  0xa5   : > { %v2105_v61 = vpop.f32.mrf.mxu2  ;;  %v1293_v63 = vadd.f32 %v4596_v15, %v1292_v60  ;;  %v1095_v2 = vpop.f32.mrf.mxu0 }
  0xa6   : > { %v4626_v3 = vpop.f32.mrf.mxu1  ;;  %v1096_v8 = vadd.f32 %v4596_v15, %v1095_v2 }
  0xa7   : > { %1492 = vst.msk [vmem:[#allocation2 + $0x288] sm:$0xff] %vm1410_vm1, %v1293_v63  ;;  %v2344_v9 = vld [vmem:[#allocation2 + $0x8] sm:$0xff]  ;;  %v828_v63 = vpack.c.b16 %v711_v49, %v710_v48  ;;  %v530_v49 = vpack.c.bf16 %v402_v29, %v402_v29 }
  0xa8   : > { %1413 = vst.msk [vmem:[#allocation2 + $0x10] sm:$0xff] %vm1410_vm1, %v1096_v8  ;;  %v2440_v10 = vadd.f32 %v2344_v9, %v2105_v61  ;;  %4147 = vmatmul.msk.bf16.gmra.mxu0 %vm888_vm0, %v827_v62  ;;  %4215 = vmatmul.msk.bf16.gmra.mxu1 %vm888_vm0, %v827_v62 }
  0xa9   : > { %4187 = vmatmul.msk.bf16.gmra.mxu3 %vm888_vm0, %v4628_v4  ;;  %v2631_v12 = vld [vmem:[#allocation2] sm:$0xff] }
  0xaa   : > { %4269 = vmatmul.msk.bf16.gmra.mxu2 %vm888_vm0, %v4630_v7  ;;  %2536 = vst.msk [vmem:[#allocation2 + $0x8] sm:$0xff] %vm1410_vm1, %v2440_v10  ;;  %v2759_v16 = vpack.c.bf16 %v2631_v12, %v2631_v12  ;;  %v3663_v57 = vsel %vm3662_vm3, %v2631_v12, 0.0  ;;  %v4674_v10 = vpack.c.b16 %v791_v52, %v790_v51  ;;  %v482_v51 = vpack.c.bf16 %v354_v33, %v354_v33 }
  0xac   : > { %v1295_v27 = vpop.f32.mrf.mxu3  ;;  %3144 = vrot.lane.b32.xlu0 %v2759_v16, %s4392_s13  ;;  %2888 = vst.msk [vmem:[%s4648_s12] sm:$0xf] %vm2887_vm2, %v2759_v16  ;;  %v321_v16 = vld [vmem:[%s4457_s6 + $0xb0] sm:$0xff] }
  0xad   : > { %v2108_v28 = vpop.f32.mrf.mxu2  ;;  %v1296_v34 = vadd.f32 %v4596_v15, %v1295_v27  ;;  %v1097_v35 = vpop.f32.mrf.mxu0  ;;  %6564 = vst [vmem:[#allocation4_spill] sm:$0xff] %v4674_v10  ;;  %v449_v38 = vpack.c.bf16 %v321_v16, %v321_v16 }
  0xae   : > { %v4660_v36 = vpop.f32.mrf.mxu1  ;;  %v1098_v40 = vadd.f32 %v4596_v15, %v1097_v35 }
  0xaf   : > { %1493 = vst.msk [vmem:[#allocation2 + $0x290] sm:$0xff] %vm1410_vm1, %v1296_v34  ;;  %v2345_v42 = vld [vmem:[#allocation2 + $0x10] sm:$0xff] }
  0xb0   : > { %1414 = vst.msk [vmem:[#allocation2 + $0x18] sm:$0xff] %vm1410_vm1, %v1098_v40  ;;  %v2441_v45 = vadd.f32 %v2345_v42, %v2108_v28  ;;  %v529_v40 = vpack.c.bf16 %v401_v26, %v401_v26 }
  0xb1   : > { %v2632_v50 = vld [vmem:[#allocation2 + $0x8] sm:$0xff] }
  0xb2   : > { %v3664_v58 = vsel %vm3662_vm3, %v2632_v50, 0.0  ;;  %2537 = vst.msk [vmem:[#allocation2 + $0x10] sm:$0xff] %vm1410_vm1, %v2441_v45  ;;  %v2760_v59 = vpack.c.bf16 %v2632_v50, %v2632_v50  ;;  %v481_v50 = vpack.c.bf16 %v353_v32, %v353_v32 }
  0xb3   : > { %v3665_v60 = vadd.f32 %v3664_v58, %v3663_v57  ;;  %v712_v57 = vunpack.c.l.b16 %v449_v38  ;;  %v713_v58 = vunpack.c.l.b16 %v450_v39  ;;  %v403_v38 = vld [vmem:[%s4457_s6 + $0x340] sm:$0xff] }
  0xb4   : > { %v1297_v61 = vpop.f32.mrf.mxu3  ;;  %2889 = vst.msk [vmem:[%s4648_s12 + $0x4] sm:$0xf] %vm2887_vm2, %v2760_v59  ;;  %3146 = vrot.lane.b32.xlu0 %v2760_v59, %s4392_s13 }
  0xb5   : > { %v2110_v62 = vpop.f32.mrf.mxu2  ;;  %v1298_v2 = vadd.f32 %v4596_v15, %v1297_v61  ;;  %v1100_v8 = vpop.f32.mrf.mxu0  ;;  %v793_v61 = vunpack.c.l.b16 %v530_v49  ;;  %v829_v16 = vpack.c.b16 %v713_v58, %v712_v57  ;;  %v356_v49 = vld [vmem:[%s4457_s6 + $0x1c8] sm:$0xff]  ;;  %v531_v57 = vpack.c.bf16 %v403_v38, %v403_v38 }
  0xb6   : > { %v4672_v9 = vpop.f32.mrf.mxu1  ;;  %v1101_v12 = vadd.f32 %v4596_v15, %v1100_v8 }
  0xb7   : > { %1494 = vst.msk [vmem:[#allocation2 + $0x298] sm:$0xff] %vm1410_vm1, %v1298_v2  ;;  %v2346_v13 = vld [vmem:[#allocation2 + $0x18] sm:$0xff] }
  0xb8   : > { %1415 = vst.msk [vmem:[#allocation2 + $0x20] sm:$0xff] %vm1410_vm1, %v1101_v12  ;;  %v2442_v14 = vadd.f32 %v2346_v13, %v2110_v62  ;;  %4148 = vmatmul.msk.bf16.gmra.mxu0 %vm888_vm0, %v828_v63  ;;  %4216 = vmatmul.msk.bf16.gmra.mxu1 %vm888_vm0, %v828_v63  ;;  %v744_v62 = vunpack.c.l.b16 %v481_v50  ;;  %v745_v63 = vunpack.c.l.b16 %v482_v51 }
  0xb9   : > { %4188 = vmatmul.msk.bf16.gmra.mxu3 %vm888_vm0, %v4674_v10  ;;  %v2633_v17 = vld [vmem:[#allocation2 + $0x10] sm:$0xff] }
  0xba   : > { %4270 = vmatmul.msk.bf16.gmra.mxu2 %vm888_vm0, %v4676_v11  ;;  %2538 = vst.msk [vmem:[#allocation2 + $0x18] sm:$0xff] %vm1410_vm1, %v2442_v14  ;;  %v2761_v27 = vpack.c.bf16 %v2633_v17, %v2633_v17  ;;  %v3666_v28 = vsel %vm3662_vm3, %v2633_v17, 0.0 }
  0xbb   : > { %v3667_v34 = vadd.f32 %v3666_v28, %v3665_v60  ;;  %v792_v60 = vunpack.c.l.b16 %v529_v40  ;;  %v4714_v28 = vpack.c.b16 %v745_v63, %v744_v62  ;;  %v484_v63 = vpack.c.bf16 %v356_v49, %v356_v49 }
  0xbc   : > { %v1300_v35 = vpop.f32.mrf.mxu3  ;;  %3148 = vrot.lane.b32.xlu1 %v2761_v27, %s4392_s13  ;;  %2890 = vst.msk [vmem:[%s4648_s12 + $0x8] sm:$0xf] %vm2887_vm2, %v2761_v27 }
  0xbd   : > { %v2113_v37 = vpop.f32.mrf.mxu2  ;;  %v1301_v42 = vadd.f32 %v4596_v15, %v1300_v35  ;;  %v1102_v45 = vpop.f32.mrf.mxu0  ;;  %v4712_v27 = vpack.c.b16 %v793_v61, %v792_v60 }
  0xbe   : > { %v4699_v48 = vpop.f32.mrf.mxu1  ;;  %v1103_v52 = vadd.f32 %v4596_v15, %v1102_v45  ;;  %v355_v45 = vld [vmem:[%s4457_s6 + $0x1c0] sm:$0xff] }
  0xbf   : > { %1495 = vst.msk [vmem:[#allocation2 + $0x2a0] sm:$0xff] %vm1410_vm1, %v1301_v42  ;;  %v2347_v53 = vld [vmem:[#allocation2 + $0x20] sm:$0xff]  ;;  %v404_v42 = vld [vmem:[%s4457_s6 + $0x348] sm:$0xff]  ;;  %v483_v62 = vpack.c.bf16 %v355_v45, %v355_v45 }
  0xc0   : > { %1416 = vst.msk [vmem:[#allocation2 + $0x28] sm:$0xff] %vm1410_vm1, %v1103_v52  ;;  %v2443_v54 = vadd.f32 %v2347_v53, %v2113_v37  ;;  %v324_v37 = vld [vmem:[%s4457_s6 + $0xc8] sm:$0xff]  ;;  %v532_v61 = vpack.c.bf16 %v404_v42, %v404_v42 }
  0xc1   : > { %v2634_v59 = vld [vmem:[#allocation2 + $0x18] sm:$0xff]  ;;  %6565 = vst [vmem:[#allocation5_spill] sm:$0xff] %v4712_v27 }
  0xc2   : > { %2539 = vst.msk [vmem:[#allocation2 + $0x20] sm:$0xff] %vm1410_vm1, %v2443_v54  ;;  %v2762_v2 = vpack.c.bf16 %v2634_v59, %v2634_v59  ;;  %v3668_v8 = vsel %vm3662_vm3, %v2634_v59, 0.0  ;;  %v452_v54 = vpack.c.bf16 %v324_v37, %v324_v37 }
  0xc3   : > { %v3669_v12 = vadd.f32 %v3668_v8, %v3667_v34  ;;  %v323_v34 = vld [vmem:[%s4457_s6 + $0xc0] sm:$0xff] }
  0xc4   : > { %v1302_v13 = vpop.f32.mrf.mxu3  ;;  %2891 = vst.msk [vmem:[%s4648_s12 + $0xc] sm:$0xf] %vm2887_vm2, %v2762_v2  ;;  %3150 = vrot.lane.b32.xlu1 %v2762_v2, %s4392_s13  ;;  %v451_v53 = vpack.c.bf16 %v323_v34, %v323_v34 }
  0xc5   : > { %v2115_v14 = vpop.f32.mrf.mxu2  ;;  %v1303_v17 = vadd.f32 %v4596_v15, %v1302_v13  ;;  %v1105_v25 = vpop.f32.mrf.mxu0 }
  0xc6   : > { %v4710_v26 = vpop.f32.mrf.mxu1  ;;  %v1106_v29 = vadd.f32 %v4596_v15, %v1105_v25  ;;  %v714_v13 = vunpack.c.l.b16 %v451_v53  ;;  %v795_v25 = vunpack.c.l.b16 %v532_v61 }
  0xc7   : > { %1496 = vst.msk [vmem:[#allocation2 + $0x2a8] sm:$0xff] %vm1410_vm1, %v1303_v17  ;;  %v2348_v32 = vld [vmem:[#allocation2 + $0x28] sm:$0xff]  ;;  %v794_v17 = vunpack.c.l.b16 %v531_v57 }
  0xc8   : > { %1417 = vst.msk [vmem:[#allocation2 + $0x30] sm:$0xff] %vm1410_vm1, %v1106_v29  ;;  %v2444_v33 = vadd.f32 %v2348_v32, %v2115_v14  ;;  %4149 = vmatmul.msk.bf16.gmra.mxu0 %vm888_vm0, %v829_v16  ;;  %4217 = vmatmul.msk.bf16.gmra.mxu1 %vm888_vm0, %v829_v16  ;;  %v715_v14 = vunpack.c.l.b16 %v452_v54  ;;  %v746_v29 = vunpack.c.l.b16 %v483_v62  ;;  %v747_v32 = vunpack.c.l.b16 %v484_v63  ;;  %v325_v54 = vld [vmem:[%s4457_s6 + $0xd0] sm:$0xff]  ;;  %v406_v63 = vld [vmem:[%s4457_s6 + $0x358] sm:$0xff] }
  0xc9   : > { %4189 = vmatmul.msk.bf16.gmra.mxu3 %vm888_vm0, %v4712_v27  ;;  %v2635_v35 = vld [vmem:[#allocation2 + $0x20] sm:$0xff]  ;;  %v4750_v49 = vpack.c.b16 %v795_v25, %v794_v17 }
  0xca   : > { %4271 = vmatmul.msk.bf16.gmra.mxu2 %vm888_vm0, %v4714_v28  ;;  %2540 = vst.msk [vmem:[#allocation2 + $0x28] sm:$0xff] %vm1410_vm1, %v2444_v33  ;;  %v2763_v39 = vpack.c.bf16 %v2635_v35, %v2635_v35  ;;  %v3670_v40 = vsel %vm3662_vm3, %v2635_v35, 0.0 }
  0xcb   : > { %v3671_v50 = vadd.f32 %v3670_v40, %v3669_v12  ;;  %6566 = vst [vmem:[#allocation6_spill] sm:$0xff] %v4750_v49 }
  0xcc   : > { %v1305_v51 = vpop.f32.mrf.mxu3  ;;  %3152 = vrot.lane.b32.xlu2 %v2763_v39, %s4392_s13  ;;  %2892 = vst.msk [vmem:[%s4648_s12 + $0x10] sm:$0xf] %vm2887_vm2, %v2763_v39  ;;  %v830_v39 = vpack.c.b16 %v715_v14, %v714_v13 }
  0xcd   : > { %v2118_v52 = vpop.f32.mrf.mxu2  ;;  %v1306_v58 = vadd.f32 %v4596_v15, %v1305_v51  ;;  %v1107_v59 = vpop.f32.mrf.mxu0  ;;  %v4752_v51 = vpack.c.b16 %v747_v32, %v746_v29 }
  0xce   : > { %v4737_v60 = vpop.f32.mrf.mxu1  ;;  %v1108_v2 = vadd.f32 %v4596_v15, %v1107_v59  ;;  %v405_v59 = vld [vmem:[%s4457_s6 + $0x350] sm:$0xff] }
  0xcf   : > { %1497 = vst.msk [vmem:[#allocation2 + $0x2b0] sm:$0xff] %vm1410_vm1, %v1306_v58  ;;  %v2349_v8 = vld [vmem:[#allocation2 + $0x30] sm:$0xff]  ;;  %v326_v58 = vld [vmem:[%s4457_s6 + $0xd8] sm:$0xff]  ;;  %v533_v25 = vpack.c.bf16 %v405_v59, %v405_v59 }
  0xd0   : > { %1418 = vst.msk [vmem:[#allocation2 + $0x38] sm:$0xff] %vm1410_vm1, %v1108_v2  ;;  %v2445_v12 = vadd.f32 %v2349_v8, %v2118_v52  ;;  %v357_v2 = vld [vmem:[%s4457_s6 + $0x1d0] sm:$0xff]  ;;  %v358_v8 = vld [vmem:[%s4457_s6 + $0x1d8] sm:$0xff]  ;;  %v454_v17 = vpack.c.bf16 %v326_v58, %v326_v58 }
  0xd1   : > { %v2636_v16 = vld [vmem:[#allocation2 + $0x28] sm:$0xff] }
  0xd2   : > { %2541 = vst.msk [vmem:[#allocation2 + $0x30] sm:$0xff] %vm1410_vm1, %v2445_v12  ;;  %v2764_v33 = vpack.c.bf16 %v2636_v16, %v2636_v16  ;;  %v3672_v34 = vsel %vm3662_vm3, %v2636_v16, 0.0  ;;  %v453_v16 = vpack.c.bf16 %v325_v54, %v325_v54 }
  0xd3   : > { %v3673_v35 = vadd.f32 %v3672_v34, %v3671_v50  ;;  %v534_v34 = vpack.c.bf16 %v406_v63, %v406_v63 }
  0xd4   : > { %v1307_v37 = vpop.f32.mrf.mxu3  ;;  %2893 = vst.msk [vmem:[%s4648_s12 + $0x14] sm:$0xf] %vm2887_vm2, %v2764_v33  ;;  %3154 = vrot.lane.b32.xlu2 %v2764_v33, %s4392_s13 }
  0xd5   : > { %v2120_v38 = vpop.f32.mrf.mxu2  ;;  %v1308_v40 = vadd.f32 %v4596_v15, %v1307_v37  ;;  %v1110_v42 = vpop.f32.mrf.mxu0  ;;  %v485_v37 = vpack.c.bf16 %v357_v2, %v357_v2  ;;  %v797_v54 = vunpack.c.l.b16 %v534_v34  ;;  %v327_v34 = vld [vmem:[%s4457_s6 + $0xe0] sm:$0xff] }
  0xd6   : > { %v4748_v45 = vpop.f32.mrf.mxu1  ;;  %v1111_v50 = vadd.f32 %v4596_v15, %v1110_v42  ;;  %v716_v42 = vunpack.c.l.b16 %v453_v16 }
  0xd7   : > { %1498 = vst.msk [vmem:[#allocation2 + $0x2b8] sm:$0xff] %vm1410_vm1, %v1308_v40  ;;  %v2350_v52 = vld [vmem:[#allocation2 + $0x38] sm:$0xff] }
  0xd8   : > { %1419 = vst.msk [vmem:[#allocation2 + $0x40] sm:$0xff] %vm1410_vm1, %v1111_v50  ;;  %v2446_v53 = vadd.f32 %v2350_v52, %v2120_v38  ;;  %4150 = vmatmul.msk.bf16.gmra.mxu0 %vm888_vm0, %v830_v39  ;;  %4218 = vmatmul.msk.bf16.gmra.mxu1 %vm888_vm0, %v830_v39  ;;  %v486_v38 = vpack.c.bf16 %v358_v8, %v358_v8  ;;  %v717_v50 = vunpack.c.l.b16 %v454_v17 }
  0xd9   : > { %4190 = vmatmul.msk.bf16.gmra.mxu3 %vm888_vm0, %v4750_v49  ;;  %v2637_v57 = vld [vmem:[#allocation2 + $0x30] sm:$0xff] }
  0xda   : > { %4272 = vmatmul.msk.bf16.gmra.mxu2 %vm888_vm0, %v4752_v51  ;;  %2542 = vst.msk [vmem:[#allocation2 + $0x38] sm:$0xff] %vm1410_vm1, %v2446_v53  ;;  %v2765_v61 = vpack.c.bf16 %v2637_v57, %v2637_v57  ;;  %v3674_v62 = vsel %vm3662_vm3, %v2637_v57, 0.0  ;;  %v796_v53 = vunpack.c.l.b16 %v533_v25  ;;  %v748_v57 = vunpack.c.l.b16 %v485_v37 }
  0xdb   : > { %v3675_v12 = vadd.f32 %v3674_v62, %v3673_v35  ;;  %v749_v58 = vunpack.c.l.b16 %v486_v38  ;;  %v831_v8 = vpack.c.b16 %v717_v50, %v716_v42  ;;  %v328_v38 = vld [vmem:[%s4457_s6 + $0xe8] sm:$0xff]  ;;  %v359_v50 = vld [vmem:[%s4457_s6 + $0x1e0] sm:$0xff] }
  0xdc   : > { %v1310_v13 = vpop.f32.mrf.mxu3  ;;  %2894 = vst.msk [vmem:[%s4648_s12 + $0x18] sm:$0xf] %vm2887_vm2, %v2765_v61  ;;  %3156 = vrot.lane.b32.xlu0 %v2765_v61, %s4392_s13  ;;  %v4788_v17 = vpack.c.b16 %v797_v54, %v796_v53  ;;  %v408_v42 = vld [vmem:[%s4457_s6 + $0x368] sm:$0xff] }
  0xdd   : > { %v2123_v14 = vpop.f32.mrf.mxu2  ;;  %v1311_v29 = vadd.f32 %v4596_v15, %v1310_v13  ;;  %v1112_v32 = vpop.f32.mrf.mxu0  ;;  %v4790_v25 = vpack.c.b16 %v749_v58, %v748_v57  ;;  %v455_v58 = vpack.c.bf16 %v327_v34, %v327_v34 }
  0xde   : > { %v4775_v33 = vpop.f32.mrf.mxu1  ;;  %v1113_v39 = vadd.f32 %v4596_v15, %v1112_v32  ;;  %6567 = vst [vmem:[#allocation7_spill] sm:$0xff] %v4788_v17 }
  0xdf   : > { %1499 = vst.msk [vmem:[#allocation2 + $0x2c0] sm:$0xff] %vm1410_vm1, %v1311_v29  ;;  %v2351_v35 = vld [vmem:[#allocation2 + $0x40] sm:$0xff]  ;;  %v718_v34 = vunpack.c.l.b16 %v455_v58 }
  0xe0   : > { %1420 = vst.msk [vmem:[#allocation2 + $0x48] sm:$0xff] %vm1410_vm1, %v1113_v39  ;;  %v2447_v40 = vadd.f32 %v2351_v35, %v2123_v14  ;;  %v407_v39 = vld [vmem:[%s4457_s6 + $0x360] sm:$0xff] }
  0xe1   : > { %v2638_v52 = vld [vmem:[#allocation2 + $0x38] sm:$0xff] }
  0xe2   : > { %2543 = vst.msk [vmem:[#allocation2 + $0x40] sm:$0xff] %vm1410_vm1, %v2447_v40  ;;  %v2766_v59 = vpack.c.bf16 %v2638_v52, %v2638_v52  ;;  %v3676_v61 = vsel %vm3662_vm3, %v2638_v52, 0.0  ;;  %v360_v52 = vld [vmem:[%s4457_s6 + $0x1e8] sm:$0xff] }
  0xe3   : > { %v3677_v62 = vadd.f32 %v3676_v61, %v3675_v12  ;;  %v535_v61 = vpack.c.bf16 %v407_v39, %v407_v39 }
  0xe4   : > { %v1312_v63 = vpop.f32.mrf.mxu3  ;;  %2895 = vst.msk [vmem:[%s4648_s12 + $0x1c] sm:$0xf] %vm2887_vm2, %v2766_v59  ;;  %3158 = vrot.lane.b32.xlu1 %v2766_v59, %s4392_s13  ;;  %v456_v59 = vpack.c.bf16 %v328_v38, %v328_v38 }
  0xe5   : > { %v2125_v2 = vpop.f32.mrf.mxu2  ;;  %v1313_v13 = vadd.f32 %v4596_v15, %v1312_v63  ;;  %v1115_v14 = vpop.f32.mrf.mxu0  ;;  %v798_v39 = vunpack.c.l.b16 %v535_v61 }
  0xe6   : > { %v4786_v16 = vpop.f32.mrf.mxu1  ;;  %v1116_v12 = vadd.f32 %v4596_v15, %v1115_v14  ;;  %v487_v14 = vpack.c.bf16 %v359_v50, %v359_v50 }
  0xe7   : > { %1500 = vst.msk [vmem:[#allocation2 + $0x2c8] sm:$0xff] %vm1410_vm1, %v1313_v13  ;;  %v2352_v29 = vld [vmem:[#allocation2 + $0x48] sm:$0xff]  ;;  %v536_v13 = vpack.c.bf16 %v408_v42, %v408_v42 }
  0xe8   : > { %1421 = vst.msk [vmem:[#allocation2 + $0x50] sm:$0xff] %vm1410_vm1, %v1116_v12  ;;  %v2448_v32 = vadd.f32 %v2352_v29, %v2125_v2  ;;  %4151 = vmatmul.msk.bf16.gmra.mxu0 %vm888_vm0, %v831_v8  ;;  %4219 = vmatmul.msk.bf16.gmra.mxu1 %vm888_vm0, %v831_v8  ;;  %v488_v12 = vpack.c.bf16 %v360_v52, %v360_v52 }
  0xe9   : > { %4191 = vmatmul.msk.bf16.gmra.mxu3 %vm888_vm0, %v4788_v17  ;;  %v2639_v37 = vld [vmem:[#allocation2 + $0x40] sm:$0xff] }
  0xea   : > { %4273 = vmatmul.msk.bf16.gmra.mxu2 %vm888_vm0, %v4790_v25  ;;  %2544 = vst.msk [vmem:[#allocation2 + $0x48] sm:$0xff] %vm1410_vm1, %v2448_v32  ;;  %v2767_v35 = vpack.c.bf16 %v2639_v37, %v2639_v37  ;;  %v3678_v40 = vsel %vm3662_vm3, %v2639_v37, 0.0  ;;  %v719_v37 = vunpack.c.l.b16 %v456_v59 }
  0xeb   : > { %v3679_v53 = vadd.f32 %v3678_v40, %v3677_v62  ;;  %v750_v40 = vunpack.c.l.b16 %v487_v14 }
  0xec   : > { %v1315_v54 = vpop.f32.mrf.mxu3  ;;  %2896 = vst.msk [vmem:[%s4648_s12 + $0x20] sm:$0xf] %vm2887_vm2, %v2767_v35  ;;  %3160 = vrot.lane.b32.xlu2 %v2767_v35, %s4392_s13  ;;  %v799_v35 = vunpack.c.l.b16 %v536_v13  ;;  %v832_v58 = vpack.c.b16 %v719_v37, %v718_v34  ;;  %v330_v34 = vld [vmem:[%s4457_s6 + $0xf8] sm:$0xff]  ;;  %v409_v37 = vld [vmem:[%s4457_s6 + $0x370] sm:$0xff] }
  0xed   : > { %v2128_v57 = vpop.f32.mrf.mxu2  ;;  %v1316_v63 = vadd.f32 %v4596_v15, %v1315_v54  ;;  %v1117_v2 = vpop.f32.mrf.mxu0  ;;  %v751_v54 = vunpack.c.l.b16 %v488_v12 }
  0xee   : > { %v4813_v8 = vpop.f32.mrf.mxu1  ;;  %v1118_v29 = vadd.f32 %v4596_v15, %v1117_v2  ;;  %v4826_v13 = vpack.c.b16 %v799_v35, %v798_v39  ;;  %v410_v35 = vld [vmem:[%s4457_s6 + $0x378] sm:$0xff] }
  0xef   : > { %1501 = vst.msk [vmem:[#allocation2 + $0x2d0] sm:$0xff] %vm1410_vm1, %v1316_v63  ;;  %v2353_v62 = vld [vmem:[#allocation2 + $0x50] sm:$0xff]  ;;  %v4828_v14 = vpack.c.b16 %v751_v54, %v750_v40  ;;  %v362_v54 = vld [vmem:[%s4457_s6 + $0x1f8] sm:$0xff] }
  0xf0   : > { %1422 = vst.msk [vmem:[#allocation2 + $0x58] sm:$0xff] %vm1410_vm1, %v1118_v29  ;;  %v2449_v32 = vadd.f32 %v2353_v62, %v2128_v57  ;;  %v329_v62 = vld [vmem:[%s4457_s6 + $0xf0] sm:$0xff] }
  0xf1   : > { %v2640_v38 = vld [vmem:[#allocation2 + $0x48] sm:$0xff]  ;;  %6568 = vst [vmem:[#allocation8_spill] sm:$0xff] %v4826_v13  ;;  %v361_v40 = vld [vmem:[%s4457_s6 + $0x1f0] sm:$0xff] }
  0xf2   : > { %2545 = vst.msk [vmem:[#allocation2 + $0x50] sm:$0xff] %vm1410_vm1, %v2449_v32  ;;  %v2768_v42 = vpack.c.bf16 %v2640_v38, %v2640_v38  ;;  %v3680_v50 = vsel %vm3662_vm3, %v2640_v38, 0.0 }
  0xf3   : > { %v3681_v52 = vadd.f32 %v3680_v50, %v3679_v53 }
  0xf4   : > { %v1317_v2 = vpop.f32.mrf.mxu3  ;;  %2897 = vst.msk [vmem:[%s4648_s12 + $0x24] sm:$0xf] %vm2887_vm2, %v2768_v42  ;;  %3162 = vrot.lane.b32.xlu0 %v2768_v42, %s4392_s13 }
  0xf5   : > { %v2130_v57 = vpop.f32.mrf.mxu2  ;;  %v1318_v59 = vadd.f32 %v4596_v15, %v1317_v2  ;;  %v1120_v61 = vpop.f32.mrf.mxu0 }
  0xf6   : > { %v4824_v63 = vpop.f32.mrf.mxu1  ;;  %v1121_v53 = vadd.f32 %v4596_v15, %v1120_v61 }
  0xf7   : > { %1502 = vst.msk [vmem:[#allocation2 + $0x2d8] sm:$0xff] %vm1410_vm1, %v1318_v59  ;;  %v2354_v12 = vld [vmem:[#allocation2 + $0x58] sm:$0xff]  ;;  %v537_v59 = vpack.c.bf16 %v409_v37, %v409_v37 }
  0xf8   : > { %1423 = vst.msk [vmem:[#allocation2 + $0x60] sm:$0xff] %vm1410_vm1, %v1121_v53  ;;  %v2450_v29 = vadd.f32 %v2354_v12, %v2130_v57  ;;  %4152 = vmatmul.msk.bf16.gmra.mxu0 %vm888_vm0, %v832_v58  ;;  %4220 = vmatmul.msk.bf16.gmra.mxu1 %vm888_vm0, %v832_v58  ;;  %v457_v57 = vpack.c.bf16 %v329_v62, %v329_v62 }
  0xf9   : > { %4192 = vmatmul.msk.bf16.gmra.mxu3 %vm888_vm0, %v4826_v13  ;;  %v2641_v32 = vld [vmem:[#allocation2 + $0x50] sm:$0xff]  ;;  %v458_v58 = vpack.c.bf16 %v330_v34, %v330_v34  ;;  %v490_v13 = vpack.c.bf16 %v362_v54, %v362_v54 }
  0xfa   : > { %4274 = vmatmul.msk.bf16.gmra.mxu2 %vm888_vm0, %v4828_v14  ;;  %2546 = vst.msk [vmem:[#allocation2 + $0x58] sm:$0xff] %vm1410_vm1, %v2450_v29  ;;  %v2769_v38 = vpack.c.bf16 %v2641_v32, %v2641_v32  ;;  %v3682_v39 = vsel %vm3662_vm3, %v2641_v32, 0.0  ;;  %v538_v29 = vpack.c.bf16 %v410_v35, %v410_v35  ;;  %v489_v32 = vpack.c.bf16 %v361_v40, %v361_v40 }
  0xfb   : > { %v3683_v42 = vadd.f32 %v3682_v39, %v3681_v52  ;;  %v720_v62 = vunpack.c.l.b16 %v457_v57  ;;  %v721_v34 = vunpack.c.l.b16 %v458_v58  ;;  %v800_v39 = vunpack.c.l.b16 %v537_v59 }
  0xfc   : > { %v1320_v50 = vpop.f32.mrf.mxu3  ;;  %2898 = vst.msk [vmem:[%s4648_s12 + $0x28] sm:$0xf] %vm2887_vm2, %v2769_v38  ;;  %3164 = vrot.lane.b32.xlu1 %v2769_v38, %s4392_s13  ;;  %v752_v49 = vunpack.c.l.b16 %v489_v32  ;;  %v753_v27 = vunpack.c.l.b16 %v490_v13 }
  0xfd   : > { %v2133_v2 = vpop.f32.mrf.mxu2  ;;  %v1321_v61 = vadd.f32 %v4596_v15, %v1320_v50  ;;  %v1122_v53 = vpop.f32.mrf.mxu0  ;;  %v801_v50 = vunpack.c.l.b16 %v538_v29 }
  0xfe   : > { %v4851_v12 = vpop.f32.mrf.mxu1  ;;  %v1123_v17 = vadd.f32 %v4596_v15, %v1122_v53 }
  0xff   : > { %1503 = vst.msk [vmem:[#allocation2 + $0x2e0] sm:$0xff] %vm1410_vm1, %v1321_v61  ;;  %v2355_v52 = vld [vmem:[#allocation2 + $0x60] sm:$0xff]  ;;  %v4864_v13 = vpack.c.b16 %v801_v50, %v800_v39  ;;  %v4866_v61 = vpack.c.b16 %v753_v27, %v752_v49 }
 0x100   : > { %1424 = vst.msk [vmem:[#allocation2 + $0x68] sm:$0xff] %vm1410_vm1, %v1123_v17  ;;  %v2451_v38 = vadd.f32 %v2355_v52, %v2133_v2  ;;  %v833_v2 = vpack.c.b16 %v721_v34, %v720_v62  ;;  %v411_v49 = vld [vmem:[%s4457_s6 + $0x380] sm:$0xff]  ;;  %v412_v62 = vld [vmem:[%s4457_s6 + $0x388] sm:$0xff] }
 0x101   : > { %v2642_v37 = vld [vmem:[#allocation2 + $0x58] sm:$0xff]  ;;  %6569 = vst [vmem:[#allocation9_spill] sm:$0xff] %v4864_v13  ;;  %v363_v34 = vld [vmem:[%s4457_s6 + $0x200] sm:$0xff] }
 0x102   : > { %2547 = vst.msk [vmem:[#allocation2 + $0x60] sm:$0xff] %vm1410_vm1, %v2451_v38  ;;  %v2770_v35 = vpack.c.bf16 %v2642_v37, %v2642_v37  ;;  %v3684_v40 = vsel %vm3662_vm3, %v2642_v37, 0.0  ;;  %v364_v37 = vld [vmem:[%s4457_s6 + $0x208] sm:$0xff] }
 0x103   : > { %v3685_v54 = vadd.f32 %v3684_v40, %v3683_v42  ;;  %v539_v40 = vpack.c.bf16 %v411_v49, %v411_v49 }
 0x104   : > { %v1322_v53 = vpop.f32.mrf.mxu3  ;;  %2899 = vst.msk [vmem:[%s4648_s12 + $0x2c] sm:$0xf] %vm2887_vm2, %v2770_v35  ;;  %3166 = vrot.lane.b32.xlu2 %v2770_v35, %s4392_s13 }
 0x105   : > { %v2135_v17 = vpop.f32.mrf.mxu2  ;;  %v1323_v57 = vadd.f32 %v4596_v15, %v1322_v53  ;;  %v1125_v58 = vpop.f32.mrf.mxu0 }
 0x106   : > { %v4862_v59 = vpop.f32.mrf.mxu1  ;;  %v1126_v42 = vadd.f32 %v4596_v15, %v1125_v58  ;;  %v491_v58 = vpack.c.bf16 %v363_v34, %v363_v34 }
 0x107   : > { %1504 = vst.msk [vmem:[#allocation2 + $0x2e8] sm:$0xff] %vm1410_vm1, %v1323_v57  ;;  %v2356_v29 = vld [vmem:[#allocation2 + $0x68] sm:$0xff]  ;;  %v540_v57 = vpack.c.bf16 %v412_v62, %v412_v62 }
 0x108   : > { %1425 = vst.msk [vmem:[#allocation2 + $0x70] sm:$0xff] %vm1410_vm1, %v1126_v42  ;;  %v2452_v32 = vadd.f32 %v2356_v29, %v2135_v17  ;;  %4153 = vmatmul.msk.bf16.gmra.mxu0 %vm888_vm0, %v833_v2  ;;  %4221 = vmatmul.msk.bf16.gmra.mxu1 %vm888_vm0, %v833_v2  ;;  %v492_v42 = vpack.c.bf16 %v364_v37, %v364_v37 }
 0x109   : > { %4193 = vmatmul.msk.bf16.gmra.mxu3 %vm888_vm0, %v4864_v13  ;;  %v2643_v27 = vld [vmem:[#allocation2 + $0x60] sm:$0xff]  ;;  %v803_v49 = vunpack.c.l.b16 %v540_v57 }
 0x10a   : > { %4275 = vmatmul.msk.bf16.gmra.mxu2 %vm888_vm0, %v4866_v61  ;;  %2548 = vst.msk [vmem:[#allocation2 + $0x68] sm:$0xff] %vm1410_vm1, %v2452_v32  ;;  %v2771_v52 = vpack.c.bf16 %v2643_v27, %v2643_v27  ;;  %v3686_v38 = vsel %vm3662_vm3, %v2643_v27, 0.0 }
 0x10b   : > { %v3687_v39 = vadd.f32 %v3686_v38, %v3685_v54  ;;  %v754_v38 = vunpack.c.l.b16 %v491_v58 }
 0x10c   : > { %v1325_v50 = vpop.f32.mrf.mxu3  ;;  %2900 = vst.msk [vmem:[%s4648_s12 + $0x30] sm:$0xf] %vm2887_vm2, %v2771_v52  ;;  %3168 = vrot.lane.b32.xlu0 %v2771_v52, %s4392_s13  ;;  %v802_v52 = vunpack.c.l.b16 %v539_v40 }
 0x10d   : > { %v2138_v35 = vpop.f32.mrf.mxu2  ;;  %v1326_v53 = vadd.f32 %v4596_v15, %v1325_v50  ;;  %v1127_v17 = vpop.f32.mrf.mxu0  ;;  %v755_v50 = vunpack.c.l.b16 %v492_v42 }
 0x10e   : > { %v4887_v2 = vpop.f32.mrf.mxu1  ;;  %v1128_v29 = vadd.f32 %v4596_v15, %v1127_v17  ;;  %v4900_v57 = vpack.c.b16 %v803_v49, %v802_v52  ;;  %v414_v52 = vld [vmem:[%s4457_s6 + $0x398] sm:$0xff]  ;;  %v365_v49 = vld [vmem:[%s4457_s6 + $0x210] sm:$0xff] }
 0x10f   : > { %1505 = vst.msk [vmem:[#allocation2 + $0x2f0] sm:$0xff] %vm1410_vm1, %v1326_v53  ;;  %v2357_v54 = vld [vmem:[#allocation2 + $0x70] sm:$0xff]  ;;  %v4902_v58 = vpack.c.b16 %v755_v50, %v754_v38  ;;  %v366_v38 = vld [vmem:[%s4457_s6 + $0x218] sm:$0xff] }
 0x110   : > { %1426 = vst.msk [vmem:[#allocation2 + $0x78] sm:$0xff] %vm1410_vm1, %v1128_v29  ;;  %v2453_v32 = vadd.f32 %v2357_v54, %v2138_v35  ;;  %v413_v54 = vld [vmem:[%s4457_s6 + $0x390] sm:$0xff] }
 0x111   : > { %v2644_v27 = vld [vmem:[#allocation2 + $0x68] sm:$0xff] }
 0x112   : > { %2549 = vst.msk [vmem:[#allocation2 + $0x70] sm:$0xff] %vm1410_vm1, %v2453_v32  ;;  %v2772_v13 = vpack.c.bf16 %v2644_v27, %v2644_v27  ;;  %v3688_v62 = vsel %vm3662_vm3, %v2644_v27, 0.0 }
 0x113   : > { %v3689_v34 = vadd.f32 %v3688_v62, %v3687_v39 }
 0x114   : > { %v1327_v37 = vpop.f32.mrf.mxu3  ;;  %2901 = vst.msk [vmem:[%s4648_s12 + $0x34] sm:$0xf] %vm2887_vm2, %v2772_v13  ;;  %3170 = vrot.lane.b32.xlu1 %v2772_v13, %s4392_s13 }
 0x115   : > { %v2140_v53 = vpop.f32.mrf.mxu2  ;;  %v1328_v35 = vadd.f32 %v4596_v15, %v1327_v37  ;;  %v1130_v17 = vpop.f32.mrf.mxu0  ;;  %v541_v37 = vpack.c.bf16 %v413_v54, %v413_v54 }
 0x116   : > { %v4898_v40 = vpop.f32.mrf.mxu1  ;;  %v1131_v39 = vadd.f32 %v4596_v15, %v1130_v17 }
 0x117   : > { %1506 = vst.msk [vmem:[#allocation2 + $0x2f8] sm:$0xff] %vm1410_vm1, %v1328_v35  ;;  %v2358_v42 = vld [vmem:[#allocation2 + $0x78] sm:$0xff] }
 0x118   : > { %1427 = vst.msk [vmem:[#allocation2 + $0x80] sm:$0xff] %vm1410_vm1, %v1131_v39  ;;  %v2454_v13 = vadd.f32 %v2358_v42, %v2140_v53  ;;  %4154 = vmatmul.msk.bf16.gmra.mxu0 %vm888_vm0, %v4467_v23  ;;  %4222 = vmatmul.msk.bf16.gmra.mxu1 %vm888_vm0, %v4467_v23  ;;  %v542_v39 = vpack.c.bf16 %v414_v52, %v414_v52  ;;  %v804_v52 = vunpack.c.l.b16 %v541_v37 }
 0x119   : > { %4194 = vmatmul.msk.bf16.gmra.mxu3 %vm888_vm0, %v4900_v57  ;;  %v2645_v29 = vld [vmem:[#allocation2 + $0x70] sm:$0xff]  ;;  %v493_v42 = vpack.c.bf16 %v365_v49, %v365_v49 }
 0x11a   : > { %4276 = vmatmul.msk.bf16.gmra.mxu2 %vm888_vm0, %v4902_v58  ;;  %2550 = vst.msk [vmem:[#allocation2 + $0x78] sm:$0xff] %vm1410_vm1, %v2454_v13  ;;  %v2773_v32 = vpack.c.bf16 %v2645_v29, %v2645_v29  ;;  %v3690_v27 = vsel %vm3662_vm3, %v2645_v29, 0.0  ;;  %v494_v13 = vpack.c.bf16 %v366_v38, %v366_v38  ;;  %v805_v49 = vunpack.c.l.b16 %v542_v39 }
 0x11b   : > { %v3691_v50 = vadd.f32 %v3690_v27, %v3689_v34  ;;  %v756_v38 = vunpack.c.l.b16 %v493_v42 }
 0x11c   : > { %v1330_v62 = vpop.f32.mrf.mxu3  ;;  %2902 = vst.msk [vmem:[%s4648_s12 + $0x38] sm:$0xf] %vm2887_vm2, %v2773_v32  ;;  %3172 = vrot.lane.b32.xlu2 %v2773_v32, %s4392_s13  ;;  %v4947_v39 = vpack.c.b16 %v805_v49, %v804_v52  ;;  %v416_v49 = vld [vmem:[%s4457_s6 + $0x3a8] sm:$0xff] }
 0x11d   : > { %v2143_v23 = vpop.f32.mrf.mxu2  ;;  %v1331_v53 = vadd.f32 %v4596_v15, %v1330_v62  ;;  %v1132_v35 = vpop.f32.mrf.mxu0  ;;  %v757_v62 = vunpack.c.l.b16 %v494_v13 }
 0x11e   : > { %v4925_v17 = vpop.f32.mrf.mxu1  ;;  %v1133_v29 = vadd.f32 %v4596_v15, %v1132_v35  ;;  %v3145_v34 = vpop.permute.xlu0 %3144  ;;  %6572 = vst [vmem:[#allocation12_spill] sm:$0xff] %v4947_v39 }
 0x11f   : > { %6570 = vst [vmem:[#allocation10_spill] sm:$0xff] %v4925_v17  ;;  %v2359_v54 = vld [vmem:[#allocation2 + $0x80] sm:$0xff]  ;;  %v4949_v42 = vpack.c.b16 %v757_v62, %v756_v38  ;;  %v368_v62 = vld [vmem:[%s4457_s6 + $0x228] sm:$0xff] }
 0x120   : > { %1507 = vst.msk [vmem:[#allocation2 + $0x300] sm:$0xff] %vm1410_vm1, %v1331_v53  ;;  %v2455_v32 = vadd.f32 %v2359_v54, %v2143_v23  ;;  %v367_v38 = vld [vmem:[%s4457_s6 + $0x220] sm:$0xff] }
 0x121   : > { %1428 = vst.msk [vmem:[#allocation2 + $0x88] sm:$0xff] %vm1410_vm1, %v1133_v29  ;;  %v2646_v27 = vld [vmem:[#allocation2 + $0x78] sm:$0xff] }
 0x122   : > { %3528 = vst.msk [vmem:[%s4933_s16] sm:$0xf] %vm2887_vm2, %v3145_v34  ;;  %v2774_v35 = vpack.c.bf16 %v2646_v27, %v2646_v27  ;;  %v3692_v10 = vsel %vm3662_vm3, %v2646_v27, 0.0 }
 0x123   : > { %2551 = vst.msk [vmem:[#allocation2 + $0x80] sm:$0xff] %vm1410_vm1, %v2455_v32  ;;  %v3693_v4 = vadd.f32 %v3692_v10, %v3691_v50  ;;  %v4954_v10 = vld [vmem:[%s6545_s2] ss:$0 sm:$0xff] }
 0x124   : > { %v1332_v17 = vpop.f32.mrf.mxu3  ;;  %2903 = vst.msk [vmem:[%s4648_s12 + $0x3c] sm:$0xf] %vm2887_vm2, %v2774_v35  ;;  %3174 = vrot.lane.b32.xlu0 %v2774_v35, %s4392_s13  ;;  %v415_v32 = vld [vmem:[%s4457_s6 + $0x3a0] sm:$0xff] }
 0x125   : > { %v2145_v53 = vpop.f32.mrf.mxu2  ;;  %v1333_v23 = vadd.f32 %v4596_v15, %v1332_v17  ;;  %v1135_v29 = vpop.f32.mrf.mxu0  ;;  %6573 = vst [vmem:[#allocation13_spill] sm:$0xff] %v4949_v42 }
 0x126   : > { %v4945_v37 = vpop.f32.mrf.mxu1  ;;  %v1136_v50 = vadd.f32 %v4954_v10, %v1135_v29  ;;  %v3153_v13 = vpop.permute.xlu2 %3152 }
 0x127   : > { %6571 = vst [vmem:[#allocation11_spill] sm:$0xff] %v4945_v37  ;;  %v3147_v15 = vpop.permute.xlu0 %3146 }
 0x128   : > { %1508 = vst.msk [vmem:[#allocation2 + $0x308] sm:$0xff] %vm1410_vm1, %v1333_v23  ;;  %v2360_v17 = vld [vmem:[#allocation2 + $0x88] sm:$0xff]  ;;  %4155 = vmatmul.msk.bf16.gmra.mxu0 %vm888_vm0, %v4483_v44  ;;  %4223 = vmatmul.msk.bf16.gmra.mxu1 %vm888_vm0, %v4483_v44  ;;  %v543_v23 = vpack.c.bf16 %v415_v32, %v415_v32 }
 0x129   : > { %1429 = vst.msk [vmem:[#allocation2 + $0x90] sm:$0xff] %vm1410_vm1, %v1136_v50  ;;  %v2456_v34 = vadd.f32 %v2360_v17, %v2145_v53  ;;  %4195 = vmatmul.msk.bf16.gmra.mxu3 %vm888_vm0, %v4947_v39  ;;  %v495_v17 = vpack.c.bf16 %v367_v38, %v367_v38 }
 0x12a   : > { %3532 = vst.msk [vmem:[%s4933_s16 + $0x10] sm:$0xf] %vm2887_vm2, %v3153_v13  ;;  %v2647_v54 = vld [vmem:[#allocation2 + $0x80] sm:$0xff]  ;;  %4277 = vmatmul.msk.bf16.gmra.mxu2 %vm888_vm0, %v4949_v42 }
 0x12b   : > { %3529 = vst.msk [vmem:[%s4933_s16 + $0x4] sm:$0xf] %vm2887_vm2, %v3147_v15  ;;  %v2775_v27 = vpack.c.bf16 %v2647_v54, %v2647_v54  ;;  %v3694_v52 = vsel %vm3662_vm3, %v2647_v54, 0.0  ;;  %v544_v15 = vpack.c.bf16 %v416_v49, %v416_v49  ;;  %v496_v54 = vpack.c.bf16 %v368_v62, %v368_v62 }
 0x12c   : > { %2552 = vst.msk [vmem:[#allocation2 + $0x88] sm:$0xff] %vm1410_vm1, %v2456_v34  ;;  %v3695_v44 = vadd.f32 %v3694_v52, %v3693_v4  ;;  %v1335_v35 = vpop.f32.mrf.mxu3 }
 0x12d   : > { %2904 = vst.msk [vmem:[%s4648_s12 + $0x40] sm:$0xf] %vm2887_vm2, %v2775_v27  ;;  %3176 = vrot.lane.b32.xlu1 %v2775_v27, %s4392_s13  ;;  %v2148_v53 = vpop.f32.mrf.mxu2  ;;  %v1336_v29 = vadd.f32 %v4954_v10, %v1335_v35  ;;  %v1137_v50 = vpop.f32.mrf.mxu0  ;;  %v806_v27 = vunpack.c.l.b16 %v543_v23  ;;  %v807_v35 = vunpack.c.l.b16 %v544_v15  ;;  %v759_v39 = vunpack.c.l.b16 %v496_v54 }
 0x12e   : > { %v4981_v13 = vpop.f32.mrf.mxu1  ;;  %v1138_v34 = vadd.f32 %v4954_v10, %v1137_v50  ;;  %v3155_v4 = vpop.permute.xlu2 %3154 }
 0x12f   : > { %6574 = vst [vmem:[#allocation14_spill] sm:$0xff] %v4981_v13  ;;  %v3149_v52 = vpop.permute.xlu1 %3148  ;;  %v758_v13 = vunpack.c.l.b16 %v495_v17  ;;  %v4998_v15 = vpack.c.b16 %v807_v35, %v806_v27 }
 0x130   : > { %1509 = vst.msk [vmem:[#allocation2 + $0x310] sm:$0xff] %vm1410_vm1, %v1336_v29  ;;  %v2361_v37 = vld [vmem:[#allocation2 + $0x90] sm:$0xff] }
 0x131   : > { %1430 = vst.msk [vmem:[#allocation2 + $0x98] sm:$0xff] %vm1410_vm1, %v1138_v34  ;;  %v2457_v32 = vadd.f32 %v2361_v37, %v2148_v53  ;;  %v5000_v17 = vpack.c.b16 %v759_v39, %v758_v13  ;;  %v417_v39 = vld [vmem:[%s4457_s6 + $0x3b0] sm:$0xff]  ;;  %v418_v13 = vld [vmem:[%s4457_s6 + $0x3b8] sm:$0xff] }
 0x132   : > { %3533 = vst.msk [vmem:[%s4933_s16 + $0x14] sm:$0xf] %vm2887_vm2, %v3155_v4 }
 0x133   : > { %3530 = vst.msk [vmem:[%s4933_s16 + $0x8] sm:$0xf] %vm2887_vm2, %v3149_v52  ;;  %v2648_v49 = vld [vmem:[#allocation2 + $0x88] sm:$0xff]  ;;  %v369_v52 = vld [vmem:[%s4457_s6 + $0x230] sm:$0xff] }
 0x134   : > { %2553 = vst.msk [vmem:[#allocation2 + $0x90] sm:$0xff] %vm1410_vm1, %v2457_v32  ;;  %v2776_v38 = vpack.c.bf16 %v2648_v49, %v2648_v49  ;;  %v3696_v62 = vsel %vm3662_vm3, %v2648_v49, 0.0  ;;  %v1337_v29 = vpop.f32.mrf.mxu3  ;;  %v370_v32 = vld [vmem:[%s4457_s6 + $0x238] sm:$0xff] }
 0x135   : > { %v3697_v50 = vadd.f32 %v3696_v62, %v3695_v44  ;;  %v2150_v42 = vpop.f32.mrf.mxu2  ;;  %v1338_v37 = vadd.f32 %v4954_v10, %v1337_v29  ;;  %v1140_v53 = vpop.f32.mrf.mxu0  ;;  %v545_v62 = vpack.c.bf16 %v417_v39, %v417_v39  ;;  %v546_v29 = vpack.c.bf16 %v418_v13, %v418_v13 }
 0x136   : > { %2905 = vst.msk [vmem:[%s4648_s12 + $0x44] sm:$0xf] %vm2887_vm2, %v2776_v38  ;;  %3178 = vrot.lane.b32.xlu2 %v2776_v38, %s4392_s13  ;;  %v4996_v23 = vpop.f32.mrf.mxu1  ;;  %v1141_v44 = vadd.f32 %v4954_v10, %v1140_v53 }
 0x137   : > { %6575 = vst [vmem:[#allocation15_spill] sm:$0xff] %v4996_v23  ;;  %v3151_v54 = vpop.permute.xlu1 %3150 }
 0x138   : > { %1510 = vst.msk [vmem:[#allocation2 + $0x318] sm:$0xff] %vm1410_vm1, %v1338_v37  ;;  %v2362_v34 = vld [vmem:[#allocation2 + $0x98] sm:$0xff]  ;;  %4156 = vmatmul.msk.bf16.gmra.mxu0 %vm888_vm0, %v4499_v1  ;;  %4224 = vmatmul.msk.bf16.gmra.mxu1 %vm888_vm0, %v4499_v1 }
 0x139   : > { %1431 = vst.msk [vmem:[#allocation2 + $0xa0] sm:$0xff] %vm1410_vm1, %v1141_v44  ;;  %v2458_v4 = vadd.f32 %v2362_v34, %v2150_v42  ;;  %4196 = vmatmul.msk.bf16.gmra.mxu3 %vm888_vm0, %v4998_v15  ;;  %v498_v34 = vpack.c.bf16 %v370_v32, %v370_v32 }
 0x13a   : > { %3531 = vst.msk [vmem:[%s4933_s16 + $0xc] sm:$0xf] %vm2887_vm2, %v3151_v54  ;;  %4278 = vmatmul.msk.bf16.gmra.mxu2 %vm888_vm0, %v5000_v17  ;;  %v497_v54 = vpack.c.bf16 %v369_v52, %v369_v52 }
 0x13b   : > { %2554 = vst.msk [vmem:[#allocation2 + $0x98] sm:$0xff] %vm1410_vm1, %v2458_v4  ;;  %v2649_v42 = vld [vmem:[#allocation2 + $0x90] sm:$0xff]  ;;  %v761_v23 = vunpack.c.l.b16 %v498_v34 }
 0x13c   : > { %v2777_v27 = vpack.c.bf16 %v2649_v42, %v2649_v42  ;;  %v3698_v35 = vsel %vm3662_vm3, %v2649_v42, 0.0  ;;  %v1340_v1 = vpop.f32.mrf.mxu3  ;;  %v808_v42 = vunpack.c.l.b16 %v545_v62 }
 0x13d   : > { %v3699_v49 = vadd.f32 %v3698_v35, %v3697_v50  ;;  %v2153_v38 = vpop.f32.mrf.mxu2  ;;  %v1341_v37 = vadd.f32 %v4954_v10, %v1340_v1  ;;  %v1142_v53 = vpop.f32.mrf.mxu0  ;;  %v809_v35 = vunpack.c.l.b16 %v546_v29  ;;  %v760_v1 = vunpack.c.l.b16 %v497_v54 }
 0x13e   : > { %2906 = vst.msk [vmem:[%s4648_s12 + $0x48] sm:$0xf] %vm2887_vm2, %v2777_v27  ;;  %3180 = vrot.lane.b32.xlu0 %v2777_v27, %s4392_s13  ;;  %v5025_v44 = vpop.f32.mrf.mxu1  ;;  %v1143_v4 = vadd.f32 %v4954_v10, %v1142_v53 }
 0x13f   : > { %6576 = vst [vmem:[#allocation16_spill] sm:$0xff] %v5025_v44  ;;  %v5038_v29 = vpack.c.b16 %v809_v35, %v808_v42  ;;  %v5040_v54 = vpack.c.b16 %v761_v23, %v760_v1  ;;  %v420_v42 = vld [vmem:[%s4457_s6 + $0x3c8] sm:$0xff]  ;;  %v371_v35 = vld [vmem:[%s4457_s6 + $0x240] sm:$0xff] }
 0x140   : > { %1511 = vst.msk [vmem:[#allocation2 + $0x320] sm:$0xff] %vm1410_vm1, %v1341_v37  ;;  %v2363_v50 = vld [vmem:[#allocation2 + $0xa0] sm:$0xff]  ;;  %v372_v1 = vld [vmem:[%s4457_s6 + $0x248] sm:$0xff] }
 0x141   : > { %1432 = vst.msk [vmem:[#allocation2 + $0xa8] sm:$0xff] %vm1410_vm1, %v1143_v4  ;;  %v2459_v39 = vadd.f32 %v2363_v50, %v2153_v38  ;;  %v419_v50 = vld [vmem:[%s4457_s6 + $0x3c0] sm:$0xff] }
 0x142   : > { %v2650_v13 = vld [vmem:[#allocation2 + $0x98] sm:$0xff]  ;;  %6578 = vst [vmem:[#allocation18_spill] sm:$0xff] %v5038_v29 }
 0x143   : > { %2555 = vst.msk [vmem:[#allocation2 + $0xa0] sm:$0xff] %vm1410_vm1, %v2459_v39  ;;  %v2778_v27 = vpack.c.bf16 %v2650_v13, %v2650_v13  ;;  %v3700_v52 = vsel %vm3662_vm3, %v2650_v13, 0.0 }
 0x144   : > { %v3701_v32 = vadd.f32 %v3700_v52, %v3699_v49  ;;  %v1342_v44 = vpop.f32.mrf.mxu3 }
 0x145   : > { %2907 = vst.msk [vmem:[%s4648_s12 + $0x4c] sm:$0xf] %vm2887_vm2, %v2778_v27  ;;  %3182 = vrot.lane.b32.xlu1 %v2778_v27, %s4392_s13  ;;  %v2155_v37 = vpop.f32.mrf.mxu2  ;;  %v1343_v38 = vadd.f32 %v4954_v10, %v1342_v44  ;;  %v1145_v53 = vpop.f32.mrf.mxu0 }
 0x146   : > { %v5036_v62 = vpop.f32.mrf.mxu1  ;;  %v1146_v34 = vadd.f32 %v4954_v10, %v1145_v53  ;;  %v3161_v49 = vpop.permute.xlu2 %3160 }
 0x147   : > { %6577 = vst [vmem:[#allocation17_spill] sm:$0xff] %v5036_v62 }
 0x148   : > { %1512 = vst.msk [vmem:[#allocation2 + $0x328] sm:$0xff] %vm1410_vm1, %v1343_v38  ;;  %v2364_v4 = vld [vmem:[#allocation2 + $0xa8] sm:$0xff]  ;;  %4157 = vmatmul.msk.bf16.gmra.mxu0 %vm888_vm0, %v4515_v24  ;;  %4225 = vmatmul.msk.bf16.gmra.mxu1 %vm888_vm0, %v4515_v24 }
 0x149   : > { %1433 = vst.msk [vmem:[#allocation2 + $0xb0] sm:$0xff] %vm1410_vm1, %v1146_v34  ;;  %v2460_v44 = vadd.f32 %v2364_v4, %v2155_v37  ;;  %4197 = vmatmul.msk.bf16.gmra.mxu3 %vm888_vm0, %v5038_v29  ;;  %v547_v37 = vpack.c.bf16 %v419_v50, %v419_v50  ;;  %v499_v4 = vpack.c.bf16 %v371_v35, %v371_v35 }
 0x14a   : > { %3536 = vst.msk [vmem:[%s4933_s16 + $0x20] sm:$0xf] %vm2887_vm2, %v3161_v49  ;;  %v2651_v23 = vld [vmem:[#allocation2 + $0xa0] sm:$0xff]  ;;  %4279 = vmatmul.msk.bf16.gmra.mxu2 %vm888_vm0, %v5040_v54  ;;  %v548_v49 = vpack.c.bf16 %v420_v42, %v420_v42 }
 0x14b   : > { %2556 = vst.msk [vmem:[#allocation2 + $0xa8] sm:$0xff] %vm1410_vm1, %v2460_v44  ;;  %v2779_v39 = vpack.c.bf16 %v2651_v23, %v2651_v23  ;;  %v3702_v13 = vsel %vm3662_vm3, %v2651_v23, 0.0  ;;  %v500_v44 = vpack.c.bf16 %v372_v1, %v372_v1  ;;  %v762_v29 = vunpack.c.l.b16 %v499_v4 }
 0x14c   : > { %v3703_v27 = vadd.f32 %v3702_v13, %v3701_v32  ;;  %v1345_v24 = vpop.f32.mrf.mxu3  ;;  %v810_v13 = vunpack.c.l.b16 %v547_v37 }
 0x14d   : > { %2908 = vst.msk [vmem:[%s4648_s12 + $0x50] sm:$0xf] %vm2887_vm2, %v2779_v39  ;;  %3184 = vrot.lane.b32.xlu2 %v2779_v39, %s4392_s13  ;;  %v2158_v52 = vpop.f32.mrf.mxu2  ;;  %v1346_v38 = vadd.f32 %v4954_v10, %v1345_v24  ;;  %v1147_v53 = vpop.f32.mrf.mxu0  ;;  %v811_v24 = vunpack.c.l.b16 %v548_v49 }
 0x14e   : > { %v5065_v34 = vpop.f32.mrf.mxu1  ;;  %v1148_v23 = vadd.f32 %v4954_v10, %v1147_v53  ;;  %v3157_v62 = vpop.permute.xlu0 %3156 }
 0x14f   : > { %6579 = vst [vmem:[#allocation19_spill] sm:$0xff] %v5065_v34  ;;  %v763_v34 = vunpack.c.l.b16 %v500_v44  ;;  %v5080_v49 = vpack.c.b16 %v811_v24, %v810_v13  ;;  %v422_v13 = vld [vmem:[%s4457_s6 + $0x3d8] sm:$0xff]  ;;  %v373_v24 = vld [vmem:[%s4457_s6 + $0x250] sm:$0xff] }
 0x150   : > { %1513 = vst.msk [vmem:[#allocation2 + $0x330] sm:$0xff] %vm1410_vm1, %v1346_v38  ;;  %v2365_v32 = vld [vmem:[#allocation2 + $0xb0] sm:$0xff] }
 0x151   : > { %1434 = vst.msk [vmem:[#allocation2 + $0xb8] sm:$0xff] %vm1410_vm1, %v1148_v23  ;;  %v2461_v39 = vadd.f32 %v2365_v32, %v2158_v52  ;;  %v5082_v4 = vpack.c.b16 %v763_v34, %v762_v29  ;;  %v421_v34 = vld [vmem:[%s4457_s6 + $0x3d0] sm:$0xff] }
 0x152   : > { %3534 = vst.msk [vmem:[%s4933_s16 + $0x18] sm:$0xf] %vm2887_vm2, %v3157_v62  ;;  %v2652_v50 = vld [vmem:[#allocation2 + $0xa8] sm:$0xff] }
 0x153   : > { %2557 = vst.msk [vmem:[#allocation2 + $0xb0] sm:$0xff] %vm1410_vm1, %v2461_v39  ;;  %v2780_v42 = vpack.c.bf16 %v2652_v50, %v2652_v50  ;;  %v3704_v35 = vsel %vm3662_vm3, %v2652_v50, 0.0 }
 0x154   : > { %v3705_v1 = vadd.f32 %v3704_v35, %v3703_v27  ;;  %v1347_v53 = vpop.f32.mrf.mxu3  ;;  %6581 = vst [vmem:[#allocation21_spill] sm:$0xff] %v5080_v49 }
 0x155   : > { %2909 = vst.msk [vmem:[%s4648_s12 + $0x54] sm:$0xf] %vm2887_vm2, %v2780_v42  ;;  %3186 = vrot.lane.b32.xlu0 %v2780_v42, %s4392_s13  ;;  %v2160_v52 = vpop.f32.mrf.mxu2  ;;  %v1348_v62 = vadd.f32 %v4954_v10, %v1347_v53  ;;  %v1150_v38 = vpop.f32.mrf.mxu0  ;;  %v374_v42 = vld [vmem:[%s4457_s6 + $0x258] sm:$0xff] }
 0x156   : > { %v5078_v37 = vpop.f32.mrf.mxu1  ;;  %v1151_v44 = vadd.f32 %v4954_v10, %v1150_v38  ;;  %v3159_v27 = vpop.permute.xlu1 %3158 }
 0x157   : > { %6580 = vst [vmem:[#allocation20_spill] sm:$0xff] %v5078_v37 }
 0x158   : > { %1514 = vst.msk [vmem:[#allocation2 + $0x338] sm:$0xff] %vm1410_vm1, %v1348_v62  ;;  %v2366_v23 = vld [vmem:[#allocation2 + $0xb8] sm:$0xff]  ;;  %4158 = vmatmul.msk.bf16.gmra.mxu0 %vm888_vm0, %v4531_v47  ;;  %4226 = vmatmul.msk.bf16.gmra.mxu1 %vm888_vm0, %v4531_v47 }
 0x159   : > { %1435 = vst.msk [vmem:[#allocation2 + $0xc0] sm:$0xff] %vm1410_vm1, %v1151_v44  ;;  %v2462_v32 = vadd.f32 %v2366_v23, %v2160_v52  ;;  %4198 = vmatmul.msk.bf16.gmra.mxu3 %vm888_vm0, %v5080_v49  ;;  %v549_v52 = vpack.c.bf16 %v421_v34, %v421_v34  ;;  %v501_v23 = vpack.c.bf16 %v373_v24, %v373_v24 }
 0x15a   : > { %3535 = vst.msk [vmem:[%s4933_s16 + $0x1c] sm:$0xf] %vm2887_vm2, %v3159_v27  ;;  %v2653_v29 = vld [vmem:[#allocation2 + $0xb0] sm:$0xff]  ;;  %4280 = vmatmul.msk.bf16.gmra.mxu2 %vm888_vm0, %v5082_v4  ;;  %v550_v27 = vpack.c.bf16 %v422_v13, %v422_v13 }
 0x15b   : > { %2558 = vst.msk [vmem:[#allocation2 + $0xb8] sm:$0xff] %vm1410_vm1, %v2462_v32  ;;  %v2781_v39 = vpack.c.bf16 %v2653_v29, %v2653_v29  ;;  %v3706_v50 = vsel %vm3662_vm3, %v2653_v29, 0.0  ;;  %v502_v32 = vpack.c.bf16 %v374_v42, %v374_v42  ;;  %v764_v49 = vunpack.c.l.b16 %v501_v23 }
 0x15c   : > { %v3707_v35 = vadd.f32 %v3706_v50, %v3705_v1  ;;  %v1350_v47 = vpop.f32.mrf.mxu3  ;;  %v812_v50 = vunpack.c.l.b16 %v549_v52 }
 0x15d   : > { %2910 = vst.msk [vmem:[%s4648_s12 + $0x58] sm:$0xf] %vm2887_vm2, %v2781_v39  ;;  %3188 = vrot.lane.b32.xlu1 %v2781_v39, %s4392_s13  ;;  %v2163_v53 = vpop.f32.mrf.mxu2  ;;  %v1351_v62 = vadd.f32 %v4954_v10, %v1350_v47  ;;  %v1152_v38 = vpop.f32.mrf.mxu0  ;;  %v813_v47 = vunpack.c.l.b16 %v550_v27 }
 0x15e   : > { %v5107_v44 = vpop.f32.mrf.mxu1  ;;  %v1153_v29 = vadd.f32 %v4954_v10, %v1152_v38  ;;  %v3167_v37 = vpop.permute.xlu2 %3166 }
 0x15f   : > { %6582 = vst [vmem:[#allocation22_spill] sm:$0xff] %v5107_v44  ;;  %v765_v44 = vunpack.c.l.b16 %v502_v32  ;;  %v5122_v27 = vpack.c.b16 %v813_v47, %v812_v50  ;;  %v424_v50 = vld [vmem:[%s4457_s6 + $0x3e8] sm:$0xff]  ;;  %v375_v47 = vld [vmem:[%s4457_s6 + $0x260] sm:$0xff] }
 0x160   : > { %1515 = vst.msk [vmem:[#allocation2 + $0x340] sm:$0xff] %vm1410_vm1, %v1351_v62  ;;  %v2367_v1 = vld [vmem:[#allocation2 + $0xc0] sm:$0xff] }
 0x161   : > { %1436 = vst.msk [vmem:[#allocation2 + $0xc8] sm:$0xff] %vm1410_vm1, %v1153_v29  ;;  %v2463_v39 = vadd.f32 %v2367_v1, %v2163_v53  ;;  %v5124_v23 = vpack.c.b16 %v765_v44, %v764_v49  ;;  %v423_v44 = vld [vmem:[%s4457_s6 + $0x3e0] sm:$0xff] }
 0x162   : > { %3539 = vst.msk [vmem:[%s4933_s16 + $0x2c] sm:$0xf] %vm2887_vm2, %v3167_v37  ;;  %v2654_v34 = vld [vmem:[#allocation2 + $0xb8] sm:$0xff] }
 0x163   : > { %2559 = vst.msk [vmem:[#allocation2 + $0xc0] sm:$0xff] %vm1410_vm1, %v2463_v39  ;;  %v2782_v13 = vpack.c.bf16 %v2654_v34, %v2654_v34  ;;  %v3708_v24 = vsel %vm3662_vm3, %v2654_v34, 0.0 }
 0x164   : > { %v3709_v42 = vadd.f32 %v3708_v24, %v3707_v35  ;;  %v1352_v38 = vpop.f32.mrf.mxu3  ;;  %6584 = vst [vmem:[#allocation24_spill] sm:$0xff] %v5122_v27 }
 0x165   : > { %2911 = vst.msk [vmem:[%s4648_s12 + $0x5c] sm:$0xf] %vm2887_vm2, %v2782_v13  ;;  %3190 = vrot.lane.b32.xlu2 %v2782_v13, %s4392_s13  ;;  %v2165_v53 = vpop.f32.mrf.mxu2  ;;  %v1353_v37 = vadd.f32 %v4954_v10, %v1352_v38  ;;  %v1155_v62 = vpop.f32.mrf.mxu0  ;;  %v376_v13 = vld [vmem:[%s4457_s6 + $0x268] sm:$0xff] }
 0x166   : > { %v5120_v52 = vpop.f32.mrf.mxu1  ;;  %v1156_v32 = vadd.f32 %v4954_v10, %v1155_v62  ;;  %v3163_v35 = vpop.permute.xlu0 %3162 }
 0x167   : > { %6583 = vst [vmem:[#allocation23_spill] sm:$0xff] %v5120_v52 }
 0x168   : > { %1516 = vst.msk [vmem:[#allocation2 + $0x348] sm:$0xff] %vm1410_vm1, %v1353_v37  ;;  %v2368_v29 = vld [vmem:[#allocation2 + $0xc8] sm:$0xff]  ;;  %4159 = vmatmul.msk.bf16.gmra.mxu0 %vm888_vm0, %v4547_v6  ;;  %4227 = vmatmul.msk.bf16.gmra.mxu1 %vm888_vm0, %v4547_v6 }
 0x169   : > { %1437 = vst.msk [vmem:[#allocation2 + $0xd0] sm:$0xff] %vm1410_vm1, %v1156_v32  ;;  %v2464_v1 = vadd.f32 %v2368_v29, %v2165_v53  ;;  %4199 = vmatmul.msk.bf16.gmra.mxu3 %vm888_vm0, %v5122_v27  ;;  %v551_v53 = vpack.c.bf16 %v423_v44, %v423_v44  ;;  %v503_v29 = vpack.c.bf16 %v375_v47, %v375_v47 }
 0x16a   : > { %3537 = vst.msk [vmem:[%s4933_s16 + $0x24] sm:$0xf] %vm2887_vm2, %v3163_v35  ;;  %v2655_v49 = vld [vmem:[#allocation2 + $0xc0] sm:$0xff]  ;;  %4281 = vmatmul.msk.bf16.gmra.mxu2 %vm888_vm0, %v5124_v23  ;;  %v552_v35 = vpack.c.bf16 %v424_v50, %v424_v50 }
 0x16b   : > { %2560 = vst.msk [vmem:[#allocation2 + $0xc8] sm:$0xff] %vm1410_vm1, %v2464_v1  ;;  %v2783_v39 = vpack.c.bf16 %v2655_v49, %v2655_v49  ;;  %v3710_v34 = vsel %vm3662_vm3, %v2655_v49, 0.0  ;;  %v504_v1 = vpack.c.bf16 %v376_v13, %v376_v13  ;;  %v766_v27 = vunpack.c.l.b16 %v503_v29 }
 0x16c   : > { %v3711_v24 = vadd.f32 %v3710_v34, %v3709_v42  ;;  %v1355_v6 = vpop.f32.mrf.mxu3  ;;  %v814_v34 = vunpack.c.l.b16 %v551_v53 }
 0x16d   : > { %2912 = vst.msk [vmem:[%s4648_s12 + $0x60] sm:$0xf] %vm2887_vm2, %v2783_v39  ;;  %3192 = vrot.lane.b32.xlu0 %v2783_v39, %s4392_s13  ;;  %v2168_v38 = vpop.f32.mrf.mxu2  ;;  %v1356_v37 = vadd.f32 %v4954_v10, %v1355_v6  ;;  %v1157_v62 = vpop.f32.mrf.mxu0  ;;  %v815_v6 = vunpack.c.l.b16 %v552_v35 }
 0x16e   : > { %v5149_v32 = vpop.f32.mrf.mxu1  ;;  %v1158_v49 = vadd.f32 %v4954_v10, %v1157_v62  ;;  %v3165_v52 = vpop.permute.xlu1 %3164 }
 0x16f   : > { %6585 = vst [vmem:[#allocation25_spill] sm:$0xff] %v5149_v32  ;;  %v767_v32 = vunpack.c.l.b16 %v504_v1  ;;  %v5164_v35 = vpack.c.b16 %v815_v6, %v814_v34  ;;  %v426_v34 = vld [vmem:[%s4457_s6 + $0x3f8] sm:$0xff]  ;;  %v377_v6 = vld [vmem:[%s4457_s6 + $0x270] sm:$0xff] }
 0x170   : > { %1517 = vst.msk [vmem:[#allocation2 + $0x350] sm:$0xff] %vm1410_vm1, %v1356_v37  ;;  %v2369_v42 = vld [vmem:[#allocation2 + $0xd0] sm:$0xff] }
 0x171   : > { %1438 = vst.msk [vmem:[#allocation2 + $0xd8] sm:$0xff] %vm1410_vm1, %v1158_v49  ;;  %v2465_v39 = vadd.f32 %v2369_v42, %v2168_v38  ;;  %v5166_v29 = vpack.c.b16 %v767_v32, %v766_v27  ;;  %v425_v32 = vld [vmem:[%s4457_s6 + $0x3f0] sm:$0xff] }
 0x172   : > { %3538 = vst.msk [vmem:[%s4933_s16 + $0x28] sm:$0xf] %vm2887_vm2, %v3165_v52  ;;  %v2656_v44 = vld [vmem:[#allocation2 + $0xc8] sm:$0xff] }
 0x173   : > { %2561 = vst.msk [vmem:[#allocation2 + $0xd0] sm:$0xff] %vm1410_vm1, %v2465_v39  ;;  %v2784_v50 = vpack.c.bf16 %v2656_v44, %v2656_v44  ;;  %v3712_v47 = vsel %vm3662_vm3, %v2656_v44, 0.0 }
 0x174   : > { %v3713_v13 = vadd.f32 %v3712_v47, %v3711_v24  ;;  %v1357_v62 = vpop.f32.mrf.mxu3  ;;  %6587 = vst [vmem:[#allocation27_spill] sm:$0xff] %v5164_v35 }
 0x175   : > { %2913 = vst.msk [vmem:[%s4648_s12 + $0x64] sm:$0xf] %vm2887_vm2, %v2784_v50  ;;  %3194 = vrot.lane.b32.xlu1 %v2784_v50, %s4392_s13  ;;  %v2170_v38 = vpop.f32.mrf.mxu2  ;;  %v1358_v52 = vadd.f32 %v4954_v10, %v1357_v62  ;;  %v1160_v37 = vpop.f32.mrf.mxu0  ;;  %v378_v50 = vld [vmem:[%s4457_s6 + $0x278] sm:$0xff] }
 0x176   : > { %v5162_v53 = vpop.f32.mrf.mxu1  ;;  %v1161_v1 = vadd.f32 %v4954_v10, %v1160_v37  ;;  %v3173_v24 = vpop.permute.xlu2 %3172 }
 0x177   : > { %6586 = vst [vmem:[#allocation26_spill] sm:$0xff] %v5162_v53 }
 0x178   : > { %1518 = vst.msk [vmem:[#allocation2 + $0x358] sm:$0xff] %vm1410_vm1, %v1358_v52  ;;  %v2370_v49 = vld [vmem:[#allocation2 + $0xd8] sm:$0xff]  ;;  %4160 = vmatmul.msk.bf16.gmra.mxu0 %vm888_vm0, %v4563_v31  ;;  %4228 = vmatmul.msk.bf16.gmra.mxu1 %vm888_vm0, %v4563_v31 }
 0x179   : > { %1439 = vst.msk [vmem:[#allocation2 + $0xe0] sm:$0xff] %vm1410_vm1, %v1161_v1  ;;  %v2466_v42 = vadd.f32 %v2370_v49, %v2170_v38  ;;  %4200 = vmatmul.msk.bf16.gmra.mxu3 %vm888_vm0, %v5164_v35  ;;  %v553_v38 = vpack.c.bf16 %v425_v32, %v425_v32  ;;  %v505_v49 = vpack.c.bf16 %v377_v6, %v377_v6 }
 0x17a   : > { %3542 = vst.msk [vmem:[%s4933_s16 + $0x38] sm:$0xf] %vm2887_vm2, %v3173_v24  ;;  %v2657_v27 = vld [vmem:[#allocation2 + $0xd0] sm:$0xff]  ;;  %4282 = vmatmul.msk.bf16.gmra.mxu2 %vm888_vm0, %v5166_v29  ;;  %v554_v24 = vpack.c.bf16 %v426_v34, %v426_v34 }
 0x17b   : > { %2562 = vst.msk [vmem:[#allocation2 + $0xd8] sm:$0xff] %vm1410_vm1, %v2466_v42  ;;  %v2785_v39 = vpack.c.bf16 %v2657_v27, %v2657_v27  ;;  %v3714_v44 = vsel %vm3662_vm3, %v2657_v27, 0.0  ;;  %v506_v42 = vpack.c.bf16 %v378_v50, %v378_v50  ;;  %v768_v35 = vunpack.c.l.b16 %v505_v49 }
 0x17c   : > { %v3715_v47 = vadd.f32 %v3714_v44, %v3713_v13  ;;  %v1360_v31 = vpop.f32.mrf.mxu3  ;;  %v816_v44 = vunpack.c.l.b16 %v553_v38 }
 0x17d   : > { %2914 = vst.msk [vmem:[%s4648_s12 + $0x68] sm:$0xf] %vm2887_vm2, %v2785_v39  ;;  %3196 = vrot.lane.b32.xlu2 %v2785_v39, %s4392_s13  ;;  %v2173_v62 = vpop.f32.mrf.mxu2  ;;  %v1361_v52 = vadd.f32 %v4954_v10, %v1360_v31  ;;  %v1162_v37 = vpop.f32.mrf.mxu0  ;;  %v817_v31 = vunpack.c.l.b16 %v554_v24 }
 0x17e   : > { %v5191_v1 = vpop.f32.mrf.mxu1  ;;  %v1163_v27 = vadd.f32 %v4954_v10, %v1162_v37  ;;  %v3169_v53 = vpop.permute.xlu0 %3168 }
 0x17f   : > { %6588 = vst [vmem:[#allocation28_spill] sm:$0xff] %v5191_v1  ;;  %v769_v1 = vunpack.c.l.b16 %v506_v42  ;;  %v5206_v24 = vpack.c.b16 %v817_v31, %v816_v44 }
 0x180   : > { %1519 = vst.msk [vmem:[#allocation2 + $0x360] sm:$0xff] %vm1410_vm1, %v1361_v52  ;;  %v2371_v13 = vld [vmem:[#allocation2 + $0xe0] sm:$0xff] }
 0x181   : > { %1440 = vst.msk [vmem:[#allocation2 + $0xe8] sm:$0xff] %vm1410_vm1, %v1163_v27  ;;  %v2467_v39 = vadd.f32 %v2371_v13, %v2173_v62  ;;  %v5208_v49 = vpack.c.b16 %v769_v1, %v768_v35 }
 0x182   : > { %3540 = vst.msk [vmem:[%s4933_s16 + $0x30] sm:$0xf] %vm2887_vm2, %v3169_v53  ;;  %v2658_v32 = vld [vmem:[#allocation2 + $0xd8] sm:$0xff] }
 0x183   : > { %2563 = vst.msk [vmem:[#allocation2 + $0xe0] sm:$0xff] %vm1410_vm1, %v2467_v39  ;;  %v2786_v34 = vpack.c.bf16 %v2658_v32, %v2658_v32  ;;  %v3716_v6 = vsel %vm3662_vm3, %v2658_v32, 0.0 }
 0x184   : > { %v3717_v50 = vadd.f32 %v3716_v6, %v3715_v47  ;;  %v1362_v37 = vpop.f32.mrf.mxu3 }
 0x185   : > { %2915 = vst.msk [vmem:[%s4648_s12 + $0x6c] sm:$0xf] %vm2887_vm2, %v2786_v34  ;;  %3198 = vrot.lane.b32.xlu0 %v2786_v34, %s4392_s13  ;;  %v2175_v62 = vpop.f32.mrf.mxu2  ;;  %v1363_v53 = vadd.f32 %v4954_v10, %v1362_v37  ;;  %v1165_v52 = vpop.f32.mrf.mxu0 }
 0x186   : > { %v5204_v38 = vpop.f32.mrf.mxu1  ;;  %v1166_v42 = vadd.f32 %v4954_v10, %v1165_v52  ;;  %v3171_v27 = vpop.permute.xlu1 %3170 }
 0x187   : > { %1520 = vst.msk [vmem:[#allocation2 + $0x368] sm:$0xff] %vm1410_vm1, %v1363_v53 }
 0x188   : > { %v2372_v47 = vld [vmem:[#allocation2 + $0xe8] sm:$0xff]  ;;  %1441 = vst.msk [vmem:[#allocation2 + $0xf0] sm:$0xff] %vm1410_vm1, %v1166_v42  ;;  %4161 = vmatmul.msk.bf16.gmra.mxu0 %vm888_vm0, %v4579_v56  ;;  %4229 = vmatmul.msk.bf16.gmra.mxu1 %vm888_vm0, %v4579_v56 }
 0x189   : > { %v2468_v13 = vadd.f32 %v2372_v47, %v2175_v62  ;;  %3541 = vst.msk [vmem:[%s4933_s16 + $0x34] sm:$0xf] %vm2887_vm2, %v3171_v27  ;;  %4201 = vmatmul.msk.bf16.gmra.mxu3 %vm888_vm0, %v5206_v24 }
 0x18a   : > { %v2659_v35 = vld [vmem:[#allocation2 + $0xe0] sm:$0xff]  ;;  %4283 = vmatmul.msk.bf16.gmra.mxu2 %vm888_vm0, %v5208_v49 }
 0x18b   : > { %2564 = vst.msk [vmem:[#allocation2 + $0xe8] sm:$0xff] %vm1410_vm1, %v2468_v13  ;;  %v2787_v1 = vpack.c.bf16 %v2659_v35, %v2659_v35  ;;  %v3718_v39 = vsel %vm3662_vm3, %v2659_v35, 0.0 }
 0x18c   : > { %v3719_v32 = vadd.f32 %v3718_v39, %v3717_v50  ;;  %v1365_v44 = vpop.f32.mrf.mxu3 }
 0x18d   : > { %2916 = vst.msk [vmem:[%s4648_s12 + $0x70] sm:$0xf] %vm2887_vm2, %v2787_v1  ;;  %3200 = vrot.lane.b32.xlu1 %v2787_v1, %s4392_s13  ;;  %v2178_v56 = vpop.f32.mrf.mxu2  ;;  %v1366_v31 = vadd.f32 %v4954_v10, %v1365_v44  ;;  %v1167_v34 = vpop.f32.mrf.mxu0 }
 0x18e   : > { %v5229_v6 = vpop.f32.mrf.mxu1  ;;  %v1168_v37 = vadd.f32 %v4954_v10, %v1167_v34 }
 0x18f   : > { %1521 = vst.msk [vmem:[#allocation2 + $0x370] sm:$0xff] %vm1410_vm1, %v1366_v31  ;;  %v2373_v53 = vld [vmem:[#allocation2 + $0xf0] sm:$0xff] }
 0x190   : > { %v3179_v62 = vpop.permute.xlu2 %3178  ;;  %1442 = vst.msk [vmem:[#allocation2 + $0xf8] sm:$0xff] %vm1410_vm1, %v1168_v37  ;;  %v2469_v50 = vadd.f32 %v2373_v53, %v2178_v56 }
 0x191   : > { %3545 = vst.msk [vmem:[%s4933_s16 + $0x44] sm:$0xf] %vm2887_vm2, %v3179_v62 }
 0x192   : > { %v2660_v52 = vld [vmem:[#allocation2 + $0xe8] sm:$0xff]  ;;  %2565 = vst.msk [vmem:[#allocation2 + $0xf0] sm:$0xff] %vm1410_vm1, %v2469_v50 }
 0x193   : > { %v2788_v42 = vpack.c.bf16 %v2660_v52, %v2660_v52  ;;  %v3720_v27 = vsel %vm3662_vm3, %v2660_v52, 0.0 }
 0x194   : > { %v3721_v47 = vadd.f32 %v3720_v27, %v3719_v32  ;;  %v1367_v13 = vpop.f32.mrf.mxu3 }
 0x195   : > { %2917 = vst.msk [vmem:[%s4648_s12 + $0x74] sm:$0xf] %vm2887_vm2, %v2788_v42  ;;  %3202 = vrot.lane.b32.xlu2 %v2788_v42, %s4392_s13  ;;  %v2180_v35 = vpop.f32.mrf.mxu2  ;;  %v1368_v1 = vadd.f32 %v4954_v10, %v1367_v13  ;;  %v1170_v39 = vpop.f32.mrf.mxu0 }
 0x196   : > { %v5242_v44 = vpop.f32.mrf.mxu1  ;;  %v1171_v56 = vadd.f32 %v4954_v10, %v1170_v39  ;;  %v3175_v31 = vpop.permute.xlu0 %3174 }
 0x197   : > { %1522 = vst.msk [vmem:[#allocation2 + $0x378] sm:$0xff] %vm1410_vm1, %v1368_v1  ;;  %v2374_v34 = vld [vmem:[#allocation2 + $0xf8] sm:$0xff] }
 0x198   : > { %1443 = vst.msk [vmem:[#allocation2 + $0x100] sm:$0xff] %vm1410_vm1, %v1171_v56  ;;  %v2470_v32 = vadd.f32 %v2374_v34, %v2180_v35  ;;  %4162 = vmatmul.msk.bf16.gmra.mxu0 %vm888_vm0, %v4602_v20  ;;  %4230 = vmatmul.msk.bf16.gmra.mxu1 %vm888_vm0, %v4602_v20 }
 0x199   : > { %3543 = vst.msk [vmem:[%s4933_s16 + $0x3c] sm:$0xf] %vm2887_vm2, %v3175_v31  ;;  %4246 = vmatmul.msk.bf16.vlgmr.msrb.gmra.mxu3 %vm888_vm0, %v4465_v22  ;;  %v2661_v37 = vld [vmem:[#allocation2 + $0xf0] sm:$0xff] }
 0x19a   : > { %4284 = vmatmul.msk.bf16.gmra.mxu2 %vm888_vm0, %v4465_v22  ;;  %2566 = vst.msk [vmem:[#allocation2 + $0xf8] sm:$0xff] %vm1410_vm1, %v2470_v32  ;;  %v2789_v62 = vpack.c.bf16 %v2661_v37, %v2661_v37  ;;  %v3722_v53 = vsel %vm3662_vm3, %v2661_v37, 0.0 }
 0x19b   : > { %v3723_v50 = vadd.f32 %v3722_v53, %v3721_v47 }
 0x19c   : > { %v1370_v52 = vpop.f32.mrf.mxu3  ;;  %2918 = vst.msk [vmem:[%s4648_s12 + $0x78] sm:$0xf] %vm2887_vm2, %v2789_v62  ;;  %3204 = vrot.lane.b32.xlu0 %v2789_v62, %s4392_s13 }
 0x19d   : > { %v2183_v20 = vpop.f32.mrf.mxu2  ;;  %v1371_v42 = vadd.f32 %v4954_v10, %v1370_v52  ;;  %v1172_v27 = vpop.f32.mrf.mxu0 }
 0x19e   : > { %v5263_v13 = vpop.f32.mrf.mxu1  ;;  %v1173_v22 = vadd.f32 %v4954_v10, %v1172_v27 }
 0x19f   : > { %v3177_v35 = vpop.permute.xlu1 %3176  ;;  %v1797_v1 = vld [vmem:[#allocation2 + $0x100] sm:$0xff]  ;;  %1523 = vst.msk [vmem:[#allocation2 + $0x380] sm:$0xff] %vm1410_vm1, %v1371_v42 }
 0x1a0   : > { %v1893_v47 = vadd.f32 %v1797_v1, %v4598_v18  ;;  %1444 = vst.msk [vmem:[#allocation2 + $0x108] sm:$0xff] %vm1410_vm1, %v1173_v22 }
 0x1a1   : > { %3544 = vst.msk [vmem:[%s4933_s16 + $0x40] sm:$0xf] %vm2887_vm2, %v3177_v35  ;;  %v2662_v39 = vld [vmem:[#allocation2 + $0xf8] sm:$0xff] }
 0x1a2   : > { %1989 = vst.msk [vmem:[#allocation2 + $0x100] sm:$0xff] %vm1410_vm1, %v1893_v47  ;;  %v2790_v56 = vpack.c.bf16 %v2662_v39, %v2662_v39  ;;  %v3724_v31 = vsel %vm3662_vm3, %v2662_v39, 0.0 }
 0x1a3   : > { %v5273_v34 = vadd.f32 %v3724_v31, %v3723_v50 }
 0x1a4   : > { %v1372_v32 = vpop.f32.mrf.mxu3  ;;  %2919 = vst.msk [vmem:[%s4648_s12 + $0x7c] sm:$0xf] %vm2887_vm2, %v2790_v56  ;;  %3206 = vrot.lane.b32.xlu1 %v2790_v56, %s4392_s13 }
 0x1a5   : > { %v2185_v37 = vpop.f32.mrf.mxu2  ;;  %v1373_v18 = vadd.f32 %v4954_v10, %v1372_v32  ;;  %v1175_v62 = vpop.f32.mrf.mxu0 }
 0x1a6   : > { %v5279_v53 = vpop.f32.mrf.mxu1  ;;  %v1176_v52 = vadd.f32 %v4954_v10, %v1175_v62 }
 0x1a7   : > { %v3185_v42 = vpop.permute.xlu2 %3184  ;;  %v1798_v27 = vld [vmem:[#allocation2 + $0x108] sm:$0xff]  ;;  %1524 = vst.msk [vmem:[#allocation2 + $0x388] sm:$0xff] %vm1410_vm1, %v1373_v18 }
 0x1a8   : > { %v1894_v50 = vadd.f32 %v1798_v27, %v4619_v41  ;;  %1445 = vst.msk [vmem:[#allocation2 + $0x110] sm:$0xff] %vm1410_vm1, %v1176_v52  ;;  %4163 = vmatmul.msk.bf16.gmra.mxu0 %vm888_vm0, %v4630_v7  ;;  %4231 = vmatmul.msk.bf16.gmra.mxu1 %vm888_vm0, %v4630_v7 }
 0x1a9   : > { %v2375_v22 = vld [vmem:[#allocation2 + $0x100] sm:$0xff]  ;;  %3548 = vst.msk [vmem:[%s4933_s16 + $0x50] sm:$0xf] %vm2887_vm2, %v3185_v42  ;;  %4247 = vmatmul.msk.bf16.gmra.mxu3 %vm888_vm0, %v4481_v43 }
 0x1aa   : > { %4285 = vmatmul.msk.bf16.gmra.mxu2 %vm888_vm0, %v4481_v43  ;;  %1990 = vst.msk [vmem:[#allocation2 + $0x108] sm:$0xff] %vm1410_vm1, %v1894_v50  ;;  %v2471_v41 = vadd.f32 %v2375_v22, %v2183_v20 }
 0x1ac   : > { %2567 = vst.msk [vmem:[#allocation2 + $0x100] sm:$0xff] %vm1410_vm1, %v2471_v41  ;;  %v1375_v35 = vpop.f32.mrf.mxu3 }
 0x1ad   : > { %v2188_v1 = vpop.f32.mrf.mxu2  ;;  %v1376_v47 = vadd.f32 %v4954_v10, %v1375_v35  ;;  %v1177_v7 = vpop.f32.mrf.mxu0 }
 0x1ae   : > { %v5298_v39 = vpop.f32.mrf.mxu1  ;;  %v1178_v56 = vadd.f32 %v4954_v10, %v1177_v7 }
 0x1af   : > { %v1799_v31 = vld [vmem:[#allocation2 + $0x110] sm:$0xff]  ;;  %1525 = vst.msk [vmem:[#allocation2 + $0x390] sm:$0xff] %vm1410_vm1, %v1376_v47 }
 0x1b0   : > { %v3181_v32 = vpop.permute.xlu0 %3180  ;;  %v1895_v43 = vadd.f32 %v1799_v31, %v4626_v3  ;;  %1446 = vst.msk [vmem:[#allocation2 + $0x118] sm:$0xff] %vm1410_vm1, %v1178_v56 }
 0x1b1   : > { %v2376_v20 = vld [vmem:[#allocation2 + $0x108] sm:$0xff]  ;;  %3546 = vst.msk [vmem:[%s4933_s16 + $0x48] sm:$0xf] %vm2887_vm2, %v3181_v32 }
 0x1b2   : > { %1991 = vst.msk [vmem:[#allocation2 + $0x110] sm:$0xff] %vm1410_vm1, %v1895_v43  ;;  %v2472_v18 = vadd.f32 %v2376_v20, %v2185_v37 }
 0x1b3   : > { %v2663_v62 = vld [vmem:[#allocation2 + $0x100] sm:$0xff] }
 0x1b4   : > { %2568 = vst.msk [vmem:[#allocation2 + $0x108] sm:$0xff] %vm1410_vm1, %v2472_v18  ;;  %v1377_v52 = vpop.f32.mrf.mxu3  ;;  %v2791_v42 = vpack.c.bf16 %v2663_v62, %v2663_v62  ;;  %v3732_v31 = vsel %vm3662_vm3, %v2663_v62, 0.0 }
 0x1b5   : > { %v2190_v27 = vpop.f32.mrf.mxu2  ;;  %v1378_v50 = vadd.f32 %v4954_v10, %v1377_v52  ;;  %v1180_v22 = vpop.f32.mrf.mxu0 }
 0x1b6   : > { %v5309_v41 = vpop.f32.mrf.mxu1  ;;  %v1181_v3 = vadd.f32 %v4954_v10, %v1180_v22  ;;  %2920 = vst.msk [vmem:[%s4648_s12 + $0x80] sm:$0xf] %vm2887_vm2, %v2791_v42  ;;  %3208 = vrot.lane.b32.xlu2 %v2791_v42, %s4392_s13 }
 0x1b7   : > { %v3183_v35 = vpop.permute.xlu1 %3182  ;;  %v1800_v37 = vld [vmem:[#allocation2 + $0x118] sm:$0xff]  ;;  %1526 = vst.msk [vmem:[#allocation2 + $0x398] sm:$0xff] %vm1410_vm1, %v1378_v50 }
 0x1b8   : > { %v1896_v47 = vadd.f32 %v1800_v37, %v4660_v36  ;;  %1447 = vst.msk [vmem:[#allocation2 + $0x120] sm:$0xff] %vm1410_vm1, %v1181_v3  ;;  %4164 = vmatmul.msk.bf16.gmra.mxu0 %vm888_vm0, %v4676_v11  ;;  %4232 = vmatmul.msk.bf16.gmra.mxu1 %vm888_vm0, %v4676_v11 }
 0x1b9   : > { %v2377_v7 = vld [vmem:[#allocation2 + $0x110] sm:$0xff]  ;;  %3547 = vst.msk [vmem:[%s4933_s16 + $0x4c] sm:$0xf] %vm2887_vm2, %v3183_v35  ;;  %4248 = vmatmul.msk.bf16.gmra.mxu3 %vm888_vm0, %v4497_v0 }
 0x1ba   : > { %4286 = vmatmul.msk.bf16.gmra.mxu2 %vm888_vm0, %v4497_v0  ;;  %1992 = vst.msk [vmem:[#allocation2 + $0x118] sm:$0xff] %vm1410_vm1, %v1896_v47  ;;  %v2473_v36 = vadd.f32 %v2377_v7, %v2188_v1 }
 0x1bb   : > { %v2664_v56 = vld [vmem:[#allocation2 + $0x108] sm:$0xff] }
 0x1bc   : > { %2569 = vst.msk [vmem:[#allocation2 + $0x110] sm:$0xff] %vm1410_vm1, %v2473_v36  ;;  %v1380_v32 = vpop.f32.mrf.mxu3  ;;  %v2792_v11 = vpack.c.bf16 %v2664_v56, %v2664_v56  ;;  %v3733_v43 = vsel %vm3662_vm3, %v2664_v56, 0.0 }
 0x1bd   : > { %v2193_v20 = vpop.f32.mrf.mxu2  ;;  %v1381_v18 = vadd.f32 %v4954_v10, %v1380_v32  ;;  %v1182_v52 = vpop.f32.mrf.mxu0  ;;  %v3734_v0 = vadd.f32 %v3733_v43, %v3732_v31 }
 0x1be   : > { %v5333_v42 = vpop.f32.mrf.mxu1  ;;  %v1183_v50 = vadd.f32 %v4954_v10, %v1182_v52  ;;  %2921 = vst.msk [vmem:[%s4648_s12 + $0x84] sm:$0xf] %vm2887_vm2, %v2792_v11  ;;  %3210 = vrot.lane.b32.xlu0 %v2792_v11, %s4392_s13 }
 0x1bf   : > { %v3191_v1 = vpop.permute.xlu2 %3190  ;;  %v1801_v62 = vld [vmem:[#allocation2 + $0x120] sm:$0xff]  ;;  %1527 = vst.msk [vmem:[#allocation2 + $0x3a0] sm:$0xff] %vm1410_vm1, %v1381_v18 }
 0x1c0   : > { %v1897_v22 = vadd.f32 %v1801_v62, %v4672_v9  ;;  %1448 = vst.msk [vmem:[#allocation2 + $0x128] sm:$0xff] %vm1410_vm1, %v1183_v50 }
 0x1c1   : > { %v2378_v3 = vld [vmem:[#allocation2 + $0x118] sm:$0xff]  ;;  %3551 = vst.msk [vmem:[%s4933_s16 + $0x5c] sm:$0xf] %vm2887_vm2, %v3191_v1 }
 0x1c2   : > { %1993 = vst.msk [vmem:[#allocation2 + $0x120] sm:$0xff] %vm1410_vm1, %v1897_v22  ;;  %v2474_v35 = vadd.f32 %v2378_v3, %v2190_v27  ;;  %v5373_v22 = vld [vmem:[%s6545_s2] ss:$0 sm:$0xff] }
 0x1c3   : > { %v2665_v37 = vld [vmem:[#allocation2 + $0x110] sm:$0xff] }
 0x1c4   : > { %2570 = vst.msk [vmem:[#allocation2 + $0x118] sm:$0xff] %vm1410_vm1, %v2474_v35  ;;  %v1382_v47 = vpop.f32.mrf.mxu3  ;;  %v2793_v7 = vpack.c.bf16 %v2665_v37, %v2665_v37  ;;  %v3735_v36 = vsel %vm3662_vm3, %v2665_v37, 0.0 }
 0x1c5   : > { %v2195_v56 = vpop.f32.mrf.mxu2  ;;  %v1383_v9 = vadd.f32 %v4954_v10, %v1382_v47  ;;  %v1185_v31 = vpop.f32.mrf.mxu0  ;;  %v3736_v11 = vadd.f32 %v3735_v36, %v3734_v0 }
 0x1c6   : > { %v5348_v32 = vpop.f32.mrf.mxu1  ;;  %v1186_v43 = vadd.f32 %v4954_v10, %v1185_v31  ;;  %2922 = vst.msk [vmem:[%s4648_s12 + $0x88] sm:$0xf] %vm2887_vm2, %v2793_v7  ;;  %3212 = vrot.lane.b32.xlu1 %v2793_v7, %s4392_s13 }
 0x1c7   : > { %v3187_v27 = vpop.permute.xlu0 %3186  ;;  %v1802_v18 = vld [vmem:[#allocation2 + $0x128] sm:$0xff]  ;;  %1528 = vst.msk [vmem:[#allocation2 + $0x3a8] sm:$0xff] %vm1410_vm1, %v1383_v9 }
 0x1c8   : > { %v1898_v52 = vadd.f32 %v1802_v18, %v4699_v48  ;;  %1449 = vst.msk [vmem:[#allocation2 + $0x130] sm:$0xff] %vm1410_vm1, %v1186_v43  ;;  %4165 = vmatmul.msk.bf16.gmra.mxu0 %vm888_vm0, %v4714_v28  ;;  %4233 = vmatmul.msk.bf16.gmra.mxu1 %vm888_vm0, %v4714_v28 }
 0x1c9   : > { %v2379_v0 = vld [vmem:[#allocation2 + $0x120] sm:$0xff]  ;;  %3549 = vst.msk [vmem:[%s4933_s16 + $0x54] sm:$0xf] %vm2887_vm2, %v3187_v27  ;;  %4249 = vmatmul.msk.bf16.gmra.mxu3 %vm888_vm0, %v4513_v21 }
 0x1ca   : > { %4287 = vmatmul.msk.bf16.gmra.mxu2 %vm888_vm0, %v4513_v21  ;;  %1994 = vst.msk [vmem:[#allocation2 + $0x128] sm:$0xff] %vm1410_vm1, %v1898_v52  ;;  %v2475_v48 = vadd.f32 %v2379_v0, %v2193_v20 }
 0x1cb   : > { %v2666_v10 = vld [vmem:[#allocation2 + $0x118] sm:$0xff] }
 0x1cc   : > { %2571 = vst.msk [vmem:[#allocation2 + $0x120] sm:$0xff] %vm1410_vm1, %v2475_v48  ;;  %v1385_v50 = vpop.f32.mrf.mxu3  ;;  %v2794_v1 = vpack.c.bf16 %v2666_v10, %v2666_v10  ;;  %v3737_v28 = vsel %vm3662_vm3, %v2666_v10, 0.0 }
 0x1cd   : > { %v2198_v62 = vpop.f32.mrf.mxu2  ;;  %v1386_v3 = vadd.f32 %v5373_v22, %v1385_v50  ;;  %v1187_v21 = vpop.f32.mrf.mxu0  ;;  %v3738_v20 = vadd.f32 %v3737_v28, %v3736_v11 }
 0x1ce   : > { %v5376_v35 = vpop.f32.mrf.mxu1  ;;  %v1188_v37 = vadd.f32 %v5373_v22, %v1187_v21  ;;  %2923 = vst.msk [vmem:[%s4648_s12 + $0x8c] sm:$0xf] %vm2887_vm2, %v2794_v1  ;;  %3214 = vrot.lane.b32.xlu2 %v2794_v1, %s4392_s13 }
 0x1cf   : > { %v3189_v47 = vpop.permute.xlu1 %3188  ;;  %v1803_v7 = vld [vmem:[#allocation2 + $0x130] sm:$0xff]  ;;  %1529 = vst.msk [vmem:[#allocation2 + $0x3b0] sm:$0xff] %vm1410_vm1, %v1386_v3 }
 0x1d0   : > { %v1899_v36 = vadd.f32 %v1803_v7, %v4710_v26  ;;  %1450 = vst.msk [vmem:[#allocation2 + $0x138] sm:$0xff] %vm1410_vm1, %v1188_v37 }
 0x1d1   : > { %v2380_v9 = vld [vmem:[#allocation2 + $0x128] sm:$0xff]  ;;  %3550 = vst.msk [vmem:[%s4933_s16 + $0x58] sm:$0xf] %vm2887_vm2, %v3189_v47 }
 0x1d2   : > { %1995 = vst.msk [vmem:[#allocation2 + $0x130] sm:$0xff] %vm1410_vm1, %v1899_v36  ;;  %v2476_v31 = vadd.f32 %v2380_v9, %v2195_v56 }
 0x1d3   : > { %v2667_v11 = vld [vmem:[#allocation2 + $0x120] sm:$0xff] }
 0x1d4   : > { %2572 = vst.msk [vmem:[#allocation2 + $0x128] sm:$0xff] %vm1410_vm1, %v2476_v31  ;;  %v1387_v43 = vpop.f32.mrf.mxu3  ;;  %v2795_v27 = vpack.c.bf16 %v2667_v11, %v2667_v11  ;;  %v3739_v18 = vsel %vm3662_vm3, %v2667_v11, 0.0 }
 0x1d5   : > { %v2200_v52 = vpop.f32.mrf.mxu2  ;;  %v1388_v26 = vadd.f32 %v5373_v22, %v1387_v43  ;;  %v1190_v0 = vpop.f32.mrf.mxu0  ;;  %v3740_v10 = vadd.f32 %v3739_v18, %v3738_v20 }
 0x1d6   : > { %v5391_v48 = vpop.f32.mrf.mxu1  ;;  %v1191_v50 = vadd.f32 %v5373_v22, %v1190_v0  ;;  %2924 = vst.msk [vmem:[%s4648_s12 + $0x90] sm:$0xf] %vm2887_vm2, %v2795_v27  ;;  %3216 = vrot.lane.b32.xlu0 %v2795_v27, %s4392_s13 }
 0x1d7   : > { %v3197_v1 = vpop.permute.xlu2 %3196  ;;  %v1804_v56 = vld [vmem:[#allocation2 + $0x138] sm:$0xff]  ;;  %1530 = vst.msk [vmem:[#allocation2 + $0x3b8] sm:$0xff] %vm1410_vm1, %v1388_v26 }
 0x1d8   : > { %v1900_v28 = vadd.f32 %v1804_v56, %v4737_v60  ;;  %1451 = vst.msk [vmem:[#allocation2 + $0x140] sm:$0xff] %vm1410_vm1, %v1191_v50  ;;  %4166 = vmatmul.msk.bf16.gmra.mxu0 %vm888_vm0, %v4752_v51  ;;  %4234 = vmatmul.msk.bf16.gmra.mxu1 %vm888_vm0, %v4752_v51 }
 0x1d9   : > { %v2381_v3 = vld [vmem:[#allocation2 + $0x130] sm:$0xff]  ;;  %3554 = vst.msk [vmem:[%s4933_s16 + $0x68] sm:$0xf] %vm2887_vm2, %v3197_v1  ;;  %4250 = vmatmul.msk.bf16.gmra.mxu3 %vm888_vm0, %v4529_v46 }
 0x1da   : > { %4288 = vmatmul.msk.bf16.gmra.mxu2 %vm888_vm0, %v4529_v46  ;;  %1996 = vst.msk [vmem:[#allocation2 + $0x138] sm:$0xff] %vm1410_vm1, %v1900_v28  ;;  %v2477_v60 = vadd.f32 %v2381_v3, %v2198_v62 }
 0x1db   : > { %v2668_v21 = vld [vmem:[#allocation2 + $0x128] sm:$0xff] }
 0x1dc   : > { %2573 = vst.msk [vmem:[#allocation2 + $0x130] sm:$0xff] %vm1410_vm1, %v2477_v60  ;;  %v1390_v20 = vpop.f32.mrf.mxu3  ;;  %v2796_v37 = vpack.c.bf16 %v2668_v21, %v2668_v21  ;;  %v3741_v51 = vsel %vm3662_vm3, %v2668_v21, 0.0 }
 0x1dd   : > { %v2203_v47 = vpop.f32.mrf.mxu2  ;;  %v1391_v7 = vadd.f32 %v5373_v22, %v1390_v20  ;;  %v1192_v36 = vpop.f32.mrf.mxu0  ;;  %v3742_v31 = vadd.f32 %v3741_v51, %v3740_v10 }
 0x1de   : > { %v5414_v9 = vpop.f32.mrf.mxu1  ;;  %v1193_v46 = vadd.f32 %v5373_v22, %v1192_v36  ;;  %2925 = vst.msk [vmem:[%s4648_s12 + $0x94] sm:$0xf] %vm2887_vm2, %v2796_v37  ;;  %3218 = vrot.lane.b32.xlu1 %v2796_v37, %s4392_s13 }
 0x1df   : > { %v3193_v62 = vpop.permute.xlu0 %3192  ;;  %v1805_v11 = vld [vmem:[#allocation2 + $0x140] sm:$0xff]  ;;  %1531 = vst.msk [vmem:[#allocation2 + $0x3c0] sm:$0xff] %vm1410_vm1, %v1391_v7 }
 0x1e0   : > { %v1901_v43 = vadd.f32 %v1805_v11, %v4748_v45  ;;  %1452 = vst.msk [vmem:[#allocation2 + $0x148] sm:$0xff] %vm1410_vm1, %v1193_v46 }
 0x1e1   : > { %v2382_v27 = vld [vmem:[#allocation2 + $0x138] sm:$0xff]  ;;  %3552 = vst.msk [vmem:[%s4933_s16 + $0x60] sm:$0xf] %vm2887_vm2, %v3193_v62 }
 0x1e2   : > { %1997 = vst.msk [vmem:[#allocation2 + $0x140] sm:$0xff] %vm1410_vm1, %v1901_v43  ;;  %v2478_v18 = vadd.f32 %v2382_v27, %v2200_v52 }
 0x1e3   : > { %v2669_v26 = vld [vmem:[#allocation2 + $0x130] sm:$0xff] }
 0x1e4   : > { %2574 = vst.msk [vmem:[#allocation2 + $0x138] sm:$0xff] %vm1410_vm1, %v2478_v18  ;;  %v1392_v0 = vpop.f32.mrf.mxu3  ;;  %v2797_v10 = vpack.c.bf16 %v2669_v26, %v2669_v26  ;;  %v3743_v50 = vsel %vm3662_vm3, %v2669_v26, 0.0 }
 0x1e5   : > { %v2205_v1 = vpop.f32.mrf.mxu2  ;;  %v1393_v45 = vadd.f32 %v5373_v22, %v1392_v0  ;;  %v1195_v56 = vpop.f32.mrf.mxu0  ;;  %v3744_v3 = vadd.f32 %v3743_v50, %v3742_v31 }
 0x1e6   : > { %v5429_v28 = vpop.f32.mrf.mxu1  ;;  %v1196_v60 = vadd.f32 %v5373_v22, %v1195_v56  ;;  %2926 = vst.msk [vmem:[%s4648_s12 + $0x98] sm:$0xf] %vm2887_vm2, %v2797_v10  ;;  %3220 = vrot.lane.b32.xlu2 %v2797_v10, %s4392_s13 }
 0x1e7   : > { %v3195_v52 = vpop.permute.xlu1 %3194  ;;  %v1806_v21 = vld [vmem:[#allocation2 + $0x148] sm:$0xff]  ;;  %1532 = vst.msk [vmem:[#allocation2 + $0x3c8] sm:$0xff] %vm1410_vm1, %v1393_v45 }
 0x1e8   : > { %v1902_v20 = vadd.f32 %v1806_v21, %v4775_v33  ;;  %1453 = vst.msk [vmem:[#allocation2 + $0x150] sm:$0xff] %vm1410_vm1, %v1196_v60  ;;  %4167 = vmatmul.msk.bf16.gmra.mxu0 %vm888_vm0, %v4790_v25  ;;  %4235 = vmatmul.msk.bf16.gmra.mxu1 %vm888_vm0, %v4790_v25 }
 0x1e9   : > { %v2383_v37 = vld [vmem:[#allocation2 + $0x140] sm:$0xff]  ;;  %3553 = vst.msk [vmem:[%s4933_s16 + $0x64] sm:$0xf] %vm2887_vm2, %v3195_v52  ;;  %4251 = vmatmul.msk.bf16.gmra.mxu3 %vm888_vm0, %v4545_v5 }
 0x1ea   : > { %4289 = vmatmul.msk.bf16.gmra.mxu2 %vm888_vm0, %v4545_v5  ;;  %1998 = vst.msk [vmem:[#allocation2 + $0x148] sm:$0xff] %vm1410_vm1, %v1902_v20  ;;  %v2479_v33 = vadd.f32 %v2383_v37, %v2203_v47 }
 0x1eb   : > { %v2670_v51 = vld [vmem:[#allocation2 + $0x138] sm:$0xff] }
 0x1ec   : > { %2575 = vst.msk [vmem:[#allocation2 + $0x140] sm:$0xff] %vm1410_vm1, %v2479_v33  ;;  %v1395_v7 = vpop.f32.mrf.mxu3  ;;  %v2798_v36 = vpack.c.bf16 %v2670_v51, %v2670_v51  ;;  %v3745_v25 = vsel %vm3662_vm3, %v2670_v51, 0.0 }
 0x1ed   : > { %v2208_v31 = vpop.f32.mrf.mxu2  ;;  %v1396_v46 = vadd.f32 %v5373_v22, %v1395_v7  ;;  %v1197_v62 = vpop.f32.mrf.mxu0  ;;  %v3746_v43 = vadd.f32 %v3745_v25, %v3744_v3 }
 0x1ee   : > { %v5452_v11 = vpop.f32.mrf.mxu1  ;;  %v1198_v5 = vadd.f32 %v5373_v22, %v1197_v62  ;;  %2927 = vst.msk [vmem:[%s4648_s12 + $0x9c] sm:$0xf] %vm2887_vm2, %v2798_v36  ;;  %3222 = vrot.lane.b32.xlu0 %v2798_v36, %s4392_s13 }
 0x1ef   : > { %v3203_v27 = vpop.permute.xlu2 %3202  ;;  %v1807_v47 = vld [vmem:[#allocation2 + $0x150] sm:$0xff]  ;;  %1533 = vst.msk [vmem:[#allocation2 + $0x3d0] sm:$0xff] %vm1410_vm1, %v1396_v46 }
 0x1f0   : > { %v1903_v18 = vadd.f32 %v1807_v47, %v4786_v16  ;;  %1454 = vst.msk [vmem:[#allocation2 + $0x158] sm:$0xff] %vm1410_vm1, %v1198_v5 }
 0x1f1   : > { %v2384_v26 = vld [vmem:[#allocation2 + $0x148] sm:$0xff]  ;;  %3557 = vst.msk [vmem:[%s4933_s16 + $0x74] sm:$0xf] %vm2887_vm2, %v3203_v27 }
 0x1f2   : > { %1999 = vst.msk [vmem:[#allocation2 + $0x150] sm:$0xff] %vm1410_vm1, %v1903_v18  ;;  %v2480_v0 = vadd.f32 %v2384_v26, %v2205_v1 }
 0x1f3   : > { %v2671_v10 = vld [vmem:[#allocation2 + $0x140] sm:$0xff] }
 0x1f4   : > { %2576 = vst.msk [vmem:[#allocation2 + $0x148] sm:$0xff] %vm1410_vm1, %v2480_v0  ;;  %v1397_v50 = vpop.f32.mrf.mxu3  ;;  %v2799_v45 = vpack.c.bf16 %v2671_v10, %v2671_v10  ;;  %v3747_v56 = vsel %vm3662_vm3, %v2671_v10, 0.0 }
 0x1f5   : > { %v2210_v3 = vpop.f32.mrf.mxu2  ;;  %v1398_v16 = vadd.f32 %v5373_v22, %v1397_v50  ;;  %v1200_v60 = vpop.f32.mrf.mxu0  ;;  %v3748_v21 = vadd.f32 %v3747_v56, %v3746_v43 }
 0x1f6   : > { %v5467_v52 = vpop.f32.mrf.mxu1  ;;  %v1201_v20 = vadd.f32 %v5373_v22, %v1200_v60  ;;  %2928 = vst.msk [vmem:[%s4648_s12 + $0xa0] sm:$0xf] %vm2887_vm2, %v2799_v45  ;;  %3224 = vrot.lane.b32.xlu1 %v2799_v45, %s4392_s13 }
 0x1f7   : > { %v3199_v1 = vpop.permute.xlu0 %3198  ;;  %v1808_v37 = vld [vmem:[#allocation2 + $0x158] sm:$0xff]  ;;  %1534 = vst.msk [vmem:[#allocation2 + $0x3d8] sm:$0xff] %vm1410_vm1, %v1398_v16 }
 0x1f8   : > { %v1904_v33 = vadd.f32 %v1808_v37, %v4813_v8  ;;  %1455 = vst.msk [vmem:[#allocation2 + $0x160] sm:$0xff] %vm1410_vm1, %v1201_v20  ;;  %4168 = vmatmul.msk.bf16.gmra.mxu0 %vm888_vm0, %v4828_v14  ;;  %4236 = vmatmul.msk.bf16.gmra.mxu1 %vm888_vm0, %v4828_v14 }
 0x1f9   : > { %v2385_v51 = vld [vmem:[#allocation2 + $0x150] sm:$0xff]  ;;  %3555 = vst.msk [vmem:[%s4933_s16 + $0x6c] sm:$0xf] %vm2887_vm2, %v3199_v1  ;;  %4252 = vmatmul.msk.bf16.gmra.mxu3 %vm888_vm0, %v4561_v30 }
 0x1fa   : > { %4290 = vmatmul.msk.bf16.gmra.mxu2 %vm888_vm0, %v4561_v30  ;;  %2000 = vst.msk [vmem:[#allocation2 + $0x158] sm:$0xff] %vm1410_vm1, %v1904_v33  ;;  %v2481_v8 = vadd.f32 %v2385_v51, %v2208_v31 }
 0x1fb   : > { %v2672_v7 = vld [vmem:[#allocation2 + $0x148] sm:$0xff] }
 0x1fc   : > { %2577 = vst.msk [vmem:[#allocation2 + $0x150] sm:$0xff] %vm1410_vm1, %v2481_v8  ;;  %v1400_v36 = vpop.f32.mrf.mxu3  ;;  %v2800_v25 = vpack.c.bf16 %v2672_v7, %v2672_v7  ;;  %v3749_v14 = vsel %vm3662_vm3, %v2672_v7, 0.0 }
 0x1fd   : > { %v2213_v46 = vpop.f32.mrf.mxu2  ;;  %v1401_v62 = vadd.f32 %v5373_v22, %v1400_v36  ;;  %v1202_v43 = vpop.f32.mrf.mxu0  ;;  %v3750_v27 = vadd.f32 %v3749_v14, %v3748_v21 }
 0x1fe   : > { %v5490_v5 = vpop.f32.mrf.mxu1  ;;  %v1203_v30 = vadd.f32 %v5373_v22, %v1202_v43  ;;  %2929 = vst.msk [vmem:[%s4648_s12 + $0xa4] sm:$0xf] %vm2887_vm2, %v2800_v25  ;;  %3226 = vrot.lane.b32.xlu2 %v2800_v25, %s4392_s13 }
 0x1ff   : > { %v3201_v31 = vpop.permute.xlu1 %3200  ;;  %v1809_v47 = vld [vmem:[#allocation2 + $0x160] sm:$0xff]  ;;  %1535 = vst.msk [vmem:[#allocation2 + $0x3e0] sm:$0xff] %vm1410_vm1, %v1401_v62 }
 0x200   : > { %v1905_v18 = vadd.f32 %v1809_v47, %v4824_v63  ;;  %1456 = vst.msk [vmem:[#allocation2 + $0x168] sm:$0xff] %vm1410_vm1, %v1203_v30 }
 0x201   : > { %v2386_v26 = vld [vmem:[#allocation2 + $0x158] sm:$0xff]  ;;  %3556 = vst.msk [vmem:[%s4933_s16 + $0x70] sm:$0xf] %vm2887_vm2, %v3201_v31 }
 0x202   : > { %2001 = vst.msk [vmem:[#allocation2 + $0x160] sm:$0xff] %vm1410_vm1, %v1905_v18  ;;  %v2482_v0 = vadd.f32 %v2386_v26, %v2210_v3 }
 0x203   : > { %v2673_v10 = vld [vmem:[#allocation2 + $0x150] sm:$0xff] }
 0x204   : > { %2578 = vst.msk [vmem:[#allocation2 + $0x158] sm:$0xff] %vm1410_vm1, %v2482_v0  ;;  %v1402_v50 = vpop.f32.mrf.mxu3  ;;  %v2801_v45 = vpack.c.bf16 %v2673_v10, %v2673_v10  ;;  %v3751_v56 = vsel %vm3662_vm3, %v2673_v10, 0.0 }
 0x205   : > { %v2215_v16 = vpop.f32.mrf.mxu2  ;;  %v1403_v60 = vadd.f32 %v5373_v22, %v1402_v50  ;;  %v1205_v63 = vpop.f32.mrf.mxu0  ;;  %v3752_v20 = vadd.f32 %v3751_v56, %v3750_v27 }
 0x206   : > { %v5505_v21 = vpop.f32.mrf.mxu1  ;;  %v1206_v1 = vadd.f32 %v5373_v22, %v1205_v63  ;;  %2930 = vst.msk [vmem:[%s4648_s12 + $0xa8] sm:$0xf] %vm2887_vm2, %v2801_v45  ;;  %3228 = vrot.lane.b32.xlu0 %v2801_v45, %s4392_s13  ;;  %v1845_v63 = vld [vmem:[#allocation2 + $0x280] sm:$0xff] }
 0x207   : > { %v1810_v3 = vld [vmem:[#allocation2 + $0x168] sm:$0xff]  ;;  %1536 = vst.msk [vmem:[#allocation2 + $0x3e8] sm:$0xff] %vm1410_vm1, %v1403_v60 }
 0x208   : > { %v1906_v37 = vadd.f32 %v1810_v3, %v4851_v12  ;;  %1457 = vst.msk [vmem:[#allocation2 + $0x170] sm:$0xff] %vm1410_vm1, %v1206_v1  ;;  %4169 = vmatmul.msk.bf16.gmra.mxu0 %vm888_vm0, %v4866_v61  ;;  %4237 = vmatmul.msk.bf16.gmra.mxu1 %vm888_vm0, %v4866_v61 }
 0x209   : > { %v2387_v33 = vld [vmem:[#allocation2 + $0x160] sm:$0xff]  ;;  %4253 = vmatmul.msk.bf16.gmra.mxu3 %vm888_vm0, %v4577_v55 }
 0x20a   : > { %4291 = vmatmul.msk.bf16.gmra.mxu2 %vm888_vm0, %v4577_v55  ;;  %2002 = vst.msk [vmem:[#allocation2 + $0x168] sm:$0xff] %vm1410_vm1, %v1906_v37  ;;  %v2483_v51 = vadd.f32 %v2387_v33, %v2213_v46 }
 0x20b   : > { %v2674_v12 = vld [vmem:[#allocation2 + $0x158] sm:$0xff] }
 0x20c   : > { %2579 = vst.msk [vmem:[#allocation2 + $0x160] sm:$0xff] %vm1410_vm1, %v2483_v51  ;;  %v1405_v8 = vpop.f32.mrf.mxu3  ;;  %v2802_v7 = vpack.c.bf16 %v2674_v12, %v2674_v12  ;;  %v3753_v36 = vsel %vm3662_vm3, %v2674_v12, 0.0 }
 0x20d   : > { %v2218_v61 = vpop.f32.mrf.mxu2  ;;  %v1406_v25 = vadd.f32 %v5373_v22, %v1405_v8  ;;  %v1207_v14 = vpop.f32.mrf.mxu0  ;;  %v3754_v43 = vadd.f32 %v3753_v36, %v3752_v20 }
 0x20e   : > { %v5526_v62 = vpop.f32.mrf.mxu1  ;;  %v1208_v55 = vadd.f32 %v5373_v22, %v1207_v14  ;;  %2931 = vst.msk [vmem:[%s4648_s12 + $0xac] sm:$0xf] %vm2887_vm2, %v2802_v7  ;;  %3230 = vrot.lane.b32.xlu1 %v2802_v7, %s4392_s13  ;;  %v3205_v46 = vpop.permute.xlu0 %3204 }
 0x20f   : > { %v1811_v27 = vld [vmem:[#allocation2 + $0x170] sm:$0xff]  ;;  %1537 = vst.msk [vmem:[#allocation2 + $0x3f0] sm:$0xff] %vm1410_vm1, %v1406_v25 }
 0x210   : > { %v1907_v30 = vadd.f32 %v1811_v27, %v4862_v59  ;;  %1458 = vst.msk [vmem:[#allocation2 + $0x178] sm:$0xff] %vm1410_vm1, %v1208_v55  ;;  %v3209_v31 = vpop.permute.xlu2 %3208  ;;  %v1846_v55 = vld [vmem:[#allocation2 + $0x288] sm:$0xff] }
 0x211   : > { %v2388_v47 = vld [vmem:[#allocation2 + $0x168] sm:$0xff]  ;;  %3558 = vst.msk [vmem:[%s4933_s16 + $0x78] sm:$0xf] %vm2887_vm2, %v3205_v46 }
 0x212   : > { %2003 = vst.msk [vmem:[#allocation2 + $0x170] sm:$0xff] %vm1410_vm1, %v1907_v30  ;;  %v2484_v18 = vadd.f32 %v2388_v47, %v2215_v16 }
 0x213   : > { %3560 = vst.msk [vmem:[%s4933_s16 + $0x80] sm:$0xf] %vm2887_vm2, %v3209_v31  ;;  %v2675_v26 = vld [vmem:[#allocation2 + $0x160] sm:$0xff] }
 0x214   : > { %2580 = vst.msk [vmem:[#allocation2 + $0x168] sm:$0xff] %vm1410_vm1, %v2484_v18  ;;  %v1407_v0 = vpop.f32.mrf.mxu3  ;;  %v2803_v10 = vpack.c.bf16 %v2675_v26, %v2675_v26  ;;  %v3755_v50 = vsel %vm3662_vm3, %v2675_v26, 0.0 }
 0x215   : > { %v2220_v59 = vpop.f32.mrf.mxu2  ;;  %v1408_v45 = vadd.f32 %v5373_v22, %v1407_v0  ;;  %v1210_v56 = vpop.f32.mrf.mxu0  ;;  %v3756_v20 = vadd.f32 %v3755_v50, %v3754_v43  ;;  %v1878_v0 = vld [vmem:[#allocation2 + $0x388] sm:$0xff] }
 0x216   : > { %v1676_v60 = vpop.f32.mrf.mxu1  ;;  %v1211_v1 = vadd.f32 %v5373_v22, %v1210_v56  ;;  %2932 = vst.msk [vmem:[%s4648_s12 + $0xb0] sm:$0xf] %vm2887_vm2, %v2803_v10  ;;  %3232 = vrot.lane.b32.xlu2 %v2803_v10, %s4392_s13  ;;  %v3207_v33 = vpop.permute.xlu1 %3206 }
 0x217   : > { %v1941_v3 = vadd.f32 %v1845_v63, %v1676_v60  ;;  %v1812_v16 = vld [vmem:[#allocation2 + $0x178] sm:$0xff]  ;;  %1538 = vst.msk [vmem:[#allocation2 + $0x3f8] sm:$0xff] %vm1410_vm1, %v1408_v45  ;;  %v1847_v63 = vld [vmem:[#allocation2 + $0x290] sm:$0xff] }
 0x218   : > { %v1908_v37 = vadd.f32 %v1812_v16, %v4887_v2  ;;  %1459 = vst.msk [vmem:[#allocation2 + $0x180] sm:$0xff] %vm1410_vm1, %v1211_v1  ;;  %4170 = vmatmul.msk.bf16.gmra.mxu0 %vm888_vm0, %v4902_v58  ;;  %4238 = vmatmul.msk.bf16.gmra.mxu1 %vm888_vm0, %v4902_v58  ;;  %v1877_v58 = vld [vmem:[#allocation2 + $0x380] sm:$0xff] }
 0x219   : > { %v2389_v51 = vld [vmem:[#allocation2 + $0x170] sm:$0xff]  ;;  %2037 = vst.msk [vmem:[#allocation2 + $0x280] sm:$0xff] %vm1410_vm1, %v1941_v3  ;;  %4300 = vmatmul.msk.bf16.vlgmr.msra.gmra.mxu3 %vm888_vm0, %v4900_v57 }
 0x21a   : > { %4292 = vmatmul.msk.bf16.gmra.mxu2 %vm888_vm0, %v4600_v19  ;;  %2004 = vst.msk [vmem:[#allocation2 + $0x178] sm:$0xff] %vm1410_vm1, %v1908_v37  ;;  %v2485_v2 = vadd.f32 %v2389_v51, %v2218_v61  ;;  %v6589_v37 = vld [vmem:[#allocation10_spill] sm:$0xff]  ;;  %v6590_v51 = vld [vmem:[#allocation13_spill] sm:$0xff] }
 0x21b   : > { %3559 = vst.msk [vmem:[%s4933_s16 + $0x7c] sm:$0xf] %vm2887_vm2, %v3207_v33  ;;  %v2676_v12 = vld [vmem:[#allocation2 + $0x168] sm:$0xff] }
 0x21c   : > { %2581 = vst.msk [vmem:[#allocation2 + $0x170] sm:$0xff] %vm1410_vm1, %v2485_v2  ;;  %v1756_v8 = vpop.f32.mrf.mxu3  ;;  %v2804_v7 = vpack.c.bf16 %v2676_v12, %v2676_v12  ;;  %v3757_v36 = vsel %vm3662_vm3, %v2676_v12, 0.0 }
 0x21d   : > { %v2223_v25 = vpop.f32.mrf.mxu2  ;;  %v1973_v14 = vadd.f32 %v1877_v58, %v1756_v8  ;;  %v1212_v57 = vpop.f32.mrf.mxu0  ;;  %v3758_v19 = vadd.f32 %v3757_v36, %v3756_v20  ;;  %v6591_v8 = vld [vmem:[#allocation12_spill] sm:$0xff]  ;;  %v6592_v58 = vld [vmem:[#allocation3_spill] sm:$0xff] }
 0x21e   : > { %v1678_v43 = vpop.f32.mrf.mxu1  ;;  %v1213_v46 = vadd.f32 %v5373_v22, %v1212_v57  ;;  %2933 = vst.msk [vmem:[%s4648_s12 + $0xb4] sm:$0xf] %vm2887_vm2, %v2804_v7  ;;  %3234 = vrot.lane.b32.xlu0 %v2804_v7, %s4392_s13 }
 0x21f   : > { %v1942_v61 = vadd.f32 %v1846_v55, %v1678_v43  ;;  %v1813_v27 = vld [vmem:[#allocation2 + $0x180] sm:$0xff]  ;;  %2069 = vst.msk [vmem:[#allocation2 + $0x380] sm:$0xff] %vm1410_vm1, %v1973_v14  ;;  %v1879_v43 = vld [vmem:[#allocation2 + $0x390] sm:$0xff] }
 0x220   : > { %v1909_v30 = vadd.f32 %v1813_v27, %v4898_v40  ;;  %1460 = vst.msk [vmem:[#allocation2 + $0x188] sm:$0xff] %vm1410_vm1, %v1213_v46 }
 0x221   : > { %v2390_v31 = vld [vmem:[#allocation2 + $0x178] sm:$0xff]  ;;  %2038 = vst.msk [vmem:[#allocation2 + $0x288] sm:$0xff] %vm1410_vm1, %v1942_v61 }
 0x222   : > { %2005 = vst.msk [vmem:[#allocation2 + $0x180] sm:$0xff] %vm1410_vm1, %v1909_v30  ;;  %v2486_v47 = vadd.f32 %v2390_v31, %v2220_v59  ;;  %v1848_v31 = vld [vmem:[#allocation2 + $0x298] sm:$0xff] }
 0x223   : > { %v2677_v18 = vld [vmem:[#allocation2 + $0x170] sm:$0xff] }
 0x224   : > { %2582 = vst.msk [vmem:[#allocation2 + $0x178] sm:$0xff] %vm1410_vm1, %v2486_v47  ;;  %v1758_v26 = vpop.f32.mrf.mxu3  ;;  %v2805_v10 = vpack.c.bf16 %v2677_v18, %v2677_v18  ;;  %v3759_v50 = vsel %vm3662_vm3, %v2677_v18, 0.0 }
 0x225   : > { %v2225_v45 = vpop.f32.mrf.mxu2  ;;  %v1974_v56 = vadd.f32 %v1878_v0, %v1758_v26  ;;  %v1215_v40 = vpop.f32.mrf.mxu0  ;;  %v3760_v20 = vadd.f32 %v3759_v50, %v3758_v19 }
 0x226   : > { %v1681_v60 = vpop.f32.mrf.mxu1  ;;  %v1216_v1 = vadd.f32 %v5373_v22, %v1215_v40  ;;  %2934 = vst.msk [vmem:[%s4648_s12 + $0xb8] sm:$0xf] %vm2887_vm2, %v2805_v10  ;;  %3236 = vrot.lane.b32.xlu1 %v2805_v10, %s4392_s13  ;;  %v2743_v59 = vld [vmem:[#allocation2 + $0x380] sm:$0xff] }
 0x227   : > { %v1943_v3 = vadd.f32 %v1847_v63, %v1681_v60  ;;  %v1814_v16 = vld [vmem:[#allocation2 + $0x188] sm:$0xff]  ;;  %2070 = vst.msk [vmem:[#allocation2 + $0x388] sm:$0xff] %vm1410_vm1, %v1974_v56  ;;  %v2871_v7 = vpack.c.bf16 %v2743_v59, %v2743_v59  ;;  %v6593_v10 = vld [vmem:[#allocation11_spill] sm:$0xff] }
 0x228   : > { %v1910_v33 = vadd.f32 %v1814_v16, %v6589_v37  ;;  %1461 = vst.msk [vmem:[#allocation2 + $0x190] sm:$0xff] %vm1410_vm1, %v1216_v1  ;;  %4171 = vmatmul.msk.bf16.gmra.mxu0 %vm888_vm0, %v6590_v51  ;;  %4239 = vmatmul.msk.bf16.gmra.mxu1 %vm888_vm0, %v6590_v51  ;;  %v3215_v2 = vpop.permute.xlu2 %3214 }
 0x229   : > { %v2391_v12 = vld [vmem:[#allocation2 + $0x180] sm:$0xff]  ;;  %2039 = vst.msk [vmem:[#allocation2 + $0x290] sm:$0xff] %vm1410_vm1, %v1943_v3  ;;  %4301 = vmatmul.msk.bf16.gmra.mxu3 %vm888_vm0, %v6591_v8  ;;  %v1880_v3 = vld [vmem:[#allocation2 + $0x398] sm:$0xff] }
 0x22a   : > { %4293 = vmatmul.msk.bf16.gmra.mxu2 %vm888_vm0, %v6592_v58  ;;  %2006 = vst.msk [vmem:[#allocation2 + $0x188] sm:$0xff] %vm1410_vm1, %v1910_v33  ;;  %v2487_v36 = vadd.f32 %v2391_v12, %v2223_v25  ;;  %v1849_v12 = vld [vmem:[#allocation2 + $0x2a0] sm:$0xff] }
 0x22b   : > { %3563 = vst.msk [vmem:[%s4933_s16 + $0x8c] sm:$0xf] %vm2887_vm2, %v3215_v2  ;;  %v2678_v14 = vld [vmem:[#allocation2 + $0x178] sm:$0xff] }
 0x22c   : > { %2583 = vst.msk [vmem:[#allocation2 + $0x180] sm:$0xff] %vm1410_vm1, %v2487_v36  ;;  %v1761_v57 = vpop.f32.mrf.mxu3  ;;  %v2806_v55 = vpack.c.bf16 %v2678_v14, %v2678_v14  ;;  %v3761_v19 = vsel %vm3662_vm3, %v2678_v14, 0.0  ;;  %v6594_v14 = vld [vmem:[#allocation14_spill] sm:$0xff] }
 0x22d   : > { %v2228_v46 = vpop.f32.mrf.mxu2  ;;  %v1975_v61 = vadd.f32 %v1879_v43, %v1761_v57  ;;  %v1217_v27 = vpop.f32.mrf.mxu0  ;;  %v3762_v47 = vadd.f32 %v3761_v19, %v3760_v20  ;;  %3000 = vst.msk [vmem:[%s4648_s12 + $0x1c0] sm:$0xf] %vm2887_vm2, %v2871_v7  ;;  %v6595_v19 = vld [vmem:[#allocation4_spill] sm:$0xff] }
 0x22e   : > { %v1683_v30 = vpop.f32.mrf.mxu1  ;;  %v1218_v25 = vadd.f32 %v5373_v22, %v1217_v27  ;;  %2935 = vst.msk [vmem:[%s4648_s12 + $0xbc] sm:$0xf] %vm2887_vm2, %v2806_v55  ;;  %3238 = vrot.lane.b32.xlu2 %v2806_v55, %s4392_s13  ;;  %3368 = vrot.lane.b32.xlu1 %v2871_v7, %s4392_s13  ;;  %v2744_v26 = vld [vmem:[#allocation2 + $0x388] sm:$0xff] }
 0x22f   : > { %v1944_v18 = vadd.f32 %v1848_v31, %v1683_v30  ;;  %v1815_v0 = vld [vmem:[#allocation2 + $0x190] sm:$0xff]  ;;  %2071 = vst.msk [vmem:[#allocation2 + $0x390] sm:$0xff] %vm1410_vm1, %v1975_v61  ;;  %v2872_v60 = vpack.c.bf16 %v2744_v26, %v2744_v26  ;;  %v1881_v31 = vld [vmem:[#allocation2 + $0x3a0] sm:$0xff] }
 0x230   : > { %v1911_v50 = vadd.f32 %v1815_v0, %v6593_v10  ;;  %1462 = vst.msk [vmem:[#allocation2 + $0x198] sm:$0xff] %vm1410_vm1, %v1218_v25  ;;  %v3211_v56 = vpop.permute.xlu0 %3210  ;;  %v1850_v10 = vld [vmem:[#allocation2 + $0x2a8] sm:$0xff] }
 0x231   : > { %v2392_v40 = vld [vmem:[#allocation2 + $0x188] sm:$0xff]  ;;  %2040 = vst.msk [vmem:[#allocation2 + $0x298] sm:$0xff] %vm1410_vm1, %v1944_v18 }
 0x232   : > { %2007 = vst.msk [vmem:[#allocation2 + $0x190] sm:$0xff] %vm1410_vm1, %v1911_v50  ;;  %v2488_v63 = vadd.f32 %v2392_v40, %v2225_v45 }
 0x233   : > { %3561 = vst.msk [vmem:[%s4933_s16 + $0x84] sm:$0xf] %vm2887_vm2, %v3211_v56  ;;  %v2679_v20 = vld [vmem:[#allocation2 + $0x180] sm:$0xff] }
 0x234   : > { %2584 = vst.msk [vmem:[#allocation2 + $0x188] sm:$0xff] %vm1410_vm1, %v2488_v63  ;;  %v1763_v1 = vpop.f32.mrf.mxu3  ;;  %v2807_v59 = vpack.c.bf16 %v2679_v20, %v2679_v20  ;;  %v3763_v16 = vsel %vm3662_vm3, %v2679_v20, 0.0  ;;  %v6596_v63 = vld [vmem:[#allocation15_spill] sm:$0xff] }
 0x235   : > { %v2230_v37 = vpop.f32.mrf.mxu2  ;;  %v1976_v33 = vadd.f32 %v1880_v3, %v1763_v1  ;;  %v1220_v51 = vpop.f32.mrf.mxu0  ;;  %3001 = vst.msk [vmem:[%s4648_s12 + $0x1c4] sm:$0xf] %vm2887_vm2, %v2872_v60  ;;  %v3764_v8 = vadd.f32 %v3763_v16, %v3762_v47 }
 0x236   : > { %v1686_v2 = vpop.f32.mrf.mxu1  ;;  %v1221_v45 = vadd.f32 %v5373_v22, %v1220_v51  ;;  %3370 = vrot.lane.b32.xlu2 %v2872_v60, %s4392_s13  ;;  %2936 = vst.msk [vmem:[%s4648_s12 + $0xc0] sm:$0xf] %vm2887_vm2, %v2807_v59  ;;  %3240 = vrot.lane.b32.xlu0 %v2807_v59, %s4392_s13  ;;  %v2745_v7 = vld [vmem:[#allocation2 + $0x390] sm:$0xff] }
 0x237   : > { %v1945_v58 = vadd.f32 %v1849_v12, %v1686_v2  ;;  %v1816_v36 = vld [vmem:[#allocation2 + $0x198] sm:$0xff]  ;;  %2072 = vst.msk [vmem:[#allocation2 + $0x398] sm:$0xff] %vm1410_vm1, %v1976_v33  ;;  %v2873_v61 = vpack.c.bf16 %v2745_v7, %v2745_v7  ;;  %v1882_v2 = vld [vmem:[#allocation2 + $0x3a8] sm:$0xff] }
 0x238   : > { %v1912_v57 = vadd.f32 %v1816_v36, %v6594_v14  ;;  %1463 = vst.msk [vmem:[#allocation2 + $0x1a0] sm:$0xff] %vm1410_vm1, %v1221_v45  ;;  %4172 = vmatmul.msk.bf16.gmra.mxu0 %vm888_vm0, %v5000_v17  ;;  %4240 = vmatmul.msk.bf16.gmra.mxu1 %vm888_vm0, %v5000_v17  ;;  %v3213_v43 = vpop.permute.xlu1 %3212  ;;  %v1851_v14 = vld [vmem:[#allocation2 + $0x2b0] sm:$0xff] }
 0x239   : > { %v2393_v55 = vld [vmem:[#allocation2 + $0x190] sm:$0xff]  ;;  %2041 = vst.msk [vmem:[#allocation2 + $0x2a0] sm:$0xff] %vm1410_vm1, %v1945_v58  ;;  %4302 = vmatmul.msk.bf16.gmra.mxu3 %vm888_vm0, %v4998_v15 }
 0x23a   : > { %4294 = vmatmul.msk.bf16.gmra.mxu2 %vm888_vm0, %v6595_v19  ;;  %2008 = vst.msk [vmem:[#allocation2 + $0x198] sm:$0xff] %vm1410_vm1, %v1912_v57  ;;  %v2489_v27 = vadd.f32 %v2393_v55, %v2228_v46 }
 0x23b   : > { %3562 = vst.msk [vmem:[%s4933_s16 + $0x88] sm:$0xf] %vm2887_vm2, %v3213_v43  ;;  %v2680_v30 = vld [vmem:[#allocation2 + $0x188] sm:$0xff] }
 0x23c   : > { %2585 = vst.msk [vmem:[#allocation2 + $0x190] sm:$0xff] %vm1410_vm1, %v2489_v27  ;;  %v1766_v17 = vpop.f32.mrf.mxu3  ;;  %v2808_v47 = vpack.c.bf16 %v2680_v30, %v2680_v30  ;;  %v3765_v25 = vsel %vm3662_vm3, %v2680_v30, 0.0 }
 0x23d   : > { %v2233_v15 = vpop.f32.mrf.mxu2  ;;  %v1977_v18 = vadd.f32 %v1881_v31, %v1766_v17  ;;  %v1222_v26 = vpop.f32.mrf.mxu0  ;;  %v3766_v50 = vadd.f32 %v3765_v25, %v3764_v8  ;;  %3002 = vst.msk [vmem:[%s4648_s12 + $0x1c8] sm:$0xf] %vm2887_vm2, %v2873_v61  ;;  %v6598_v31 = vld [vmem:[#allocation18_spill] sm:$0xff] }
 0x23e   : > { %v1688_v0 = vpop.f32.mrf.mxu1  ;;  %v1223_v46 = vadd.f32 %v5373_v22, %v1222_v26  ;;  %2937 = vst.msk [vmem:[%s4648_s12 + $0xc4] sm:$0xf] %vm2887_vm2, %v2808_v47  ;;  %3242 = vrot.lane.b32.xlu1 %v2808_v47, %s4392_s13  ;;  %3372 = vrot.lane.b32.xlu0 %v2873_v61, %s4392_s13  ;;  %v2746_v40 = vld [vmem:[#allocation2 + $0x398] sm:$0xff]  ;;  %v6597_v61 = vld [vmem:[#allocation16_spill] sm:$0xff]  ;;  %v6599_v47 = vld [vmem:[#allocation5_spill] sm:$0xff] }
 0x23f   : > { %v1946_v56 = vadd.f32 %v1850_v10, %v1688_v0  ;;  %v1817_v60 = vld [vmem:[#allocation2 + $0x1a0] sm:$0xff]  ;;  %2073 = vst.msk [vmem:[#allocation2 + $0x3a0] sm:$0xff] %vm1410_vm1, %v1977_v18  ;;  %v2874_v59 = vpack.c.bf16 %v2746_v40, %v2746_v40  ;;  %v1883_v0 = vld [vmem:[#allocation2 + $0x3b0] sm:$0xff] }
 0x240   : > { %v1913_v20 = vadd.f32 %v1817_v60, %v6596_v63  ;;  %1464 = vst.msk [vmem:[#allocation2 + $0x1a8] sm:$0xff] %vm1410_vm1, %v1223_v46  ;;  %v3221_v1 = vpop.permute.xlu2 %3220  ;;  %v1852_v63 = vld [vmem:[#allocation2 + $0x2b8] sm:$0xff] }
 0x241   : > { %v2394_v3 = vld [vmem:[#allocation2 + $0x198] sm:$0xff]  ;;  %2042 = vst.msk [vmem:[#allocation2 + $0x2a8] sm:$0xff] %vm1410_vm1, %v1946_v56 }
 0x242   : > { %2009 = vst.msk [vmem:[#allocation2 + $0x1a0] sm:$0xff] %vm1410_vm1, %v1913_v20  ;;  %v2490_v16 = vadd.f32 %v2394_v3, %v2230_v37 }
 0x243   : > { %3566 = vst.msk [vmem:[%s4933_s16 + $0x98] sm:$0xf] %vm2887_vm2, %v3221_v1  ;;  %v2681_v33 = vld [vmem:[#allocation2 + $0x190] sm:$0xff] }
 0x244   : > { %2586 = vst.msk [vmem:[#allocation2 + $0x198] sm:$0xff] %vm1410_vm1, %v2490_v16  ;;  %v1768_v51 = vpop.f32.mrf.mxu3  ;;  %v2809_v12 = vpack.c.bf16 %v2681_v33, %v2681_v33  ;;  %v3767_v8 = vsel %vm3662_vm3, %v2681_v33, 0.0  ;;  %v6600_v16 = vld [vmem:[#allocation17_spill] sm:$0xff] }
 0x245   : > { %v2235_v45 = vpop.f32.mrf.mxu2  ;;  %v1978_v58 = vadd.f32 %v1882_v2, %v1768_v51  ;;  %v1225_v7 = vpop.f32.mrf.mxu0  ;;  %v3768_v57 = vadd.f32 %v3767_v8, %v3766_v50  ;;  %3003 = vst.msk [vmem:[%s4648_s12 + $0x1cc] sm:$0xf] %vm2887_vm2, %v2874_v59 }
 0x246   : > { %v1691_v36 = vpop.f32.mrf.mxu1  ;;  %v1226_v37 = vadd.f32 %v5373_v22, %v1225_v7  ;;  %2938 = vst.msk [vmem:[%s4648_s12 + $0xc8] sm:$0xf] %vm2887_vm2, %v2809_v12  ;;  %3244 = vrot.lane.b32.xlu2 %v2809_v12, %s4392_s13  ;;  %3374 = vrot.lane.b32.xlu1 %v2874_v59, %s4392_s13  ;;  %v2747_v55 = vld [vmem:[#allocation2 + $0x3a0] sm:$0xff] }
 0x247   : > { %v1947_v43 = vadd.f32 %v1851_v14, %v1691_v36  ;;  %v1818_v19 = vld [vmem:[#allocation2 + $0x1a8] sm:$0xff]  ;;  %2074 = vst.msk [vmem:[#allocation2 + $0x3a8] sm:$0xff] %vm1410_vm1, %v1978_v58  ;;  %v2875_v25 = vpack.c.bf16 %v2747_v55, %v2747_v55  ;;  %v1884_v36 = vld [vmem:[#allocation2 + $0x3b8] sm:$0xff] }
 0x248   : > { %v1914_v27 = vadd.f32 %v1818_v19, %v6597_v61  ;;  %1465 = vst.msk [vmem:[#allocation2 + $0x1b0] sm:$0xff] %vm1410_vm1, %v1226_v37  ;;  %4173 = vmatmul.msk.bf16.gmra.mxu0 %vm888_vm0, %v5040_v54  ;;  %4241 = vmatmul.msk.bf16.gmra.mxu1 %vm888_vm0, %v5040_v54  ;;  %v3217_v30 = vpop.permute.xlu0 %3216  ;;  %v1853_v61 = vld [vmem:[#allocation2 + $0x2c0] sm:$0xff] }
 0x249   : > { %v2395_v17 = vld [vmem:[#allocation2 + $0x1a0] sm:$0xff]  ;;  %2043 = vst.msk [vmem:[#allocation2 + $0x2b0] sm:$0xff] %vm1410_vm1, %v1947_v43  ;;  %4303 = vmatmul.msk.bf16.gmra.mxu3 %vm888_vm0, %v6598_v31 }
 0x24a   : > { %4295 = vmatmul.msk.bf16.gmra.mxu2 %vm888_vm0, %v6599_v47  ;;  %2010 = vst.msk [vmem:[#allocation2 + $0x1a8] sm:$0xff] %vm1410_vm1, %v1914_v27  ;;  %v2491_v18 = vadd.f32 %v2395_v17, %v2233_v15  ;;  %v6601_v47 = vld [vmem:[#allocation19_spill] sm:$0xff] }
 0x24b   : > { %3564 = vst.msk [vmem:[%s4933_s16 + $0x90] sm:$0xf] %vm2887_vm2, %v3217_v30  ;;  %v2682_v26 = vld [vmem:[#allocation2 + $0x198] sm:$0xff] }
 0x24c   : > { %2587 = vst.msk [vmem:[#allocation2 + $0x1a0] sm:$0xff] %vm1410_vm1, %v2491_v18  ;;  %v1771_v54 = vpop.f32.mrf.mxu3  ;;  %v2810_v10 = vpack.c.bf16 %v2682_v26, %v2682_v26  ;;  %v3769_v50 = vsel %vm3662_vm3, %v2682_v26, 0.0 }
 0x24d   : > { %v2238_v46 = vpop.f32.mrf.mxu2  ;;  %v1979_v56 = vadd.f32 %v1883_v0, %v1771_v54  ;;  %v1227_v40 = vpop.f32.mrf.mxu0  ;;  %3004 = vst.msk [vmem:[%s4648_s12 + $0x1d0] sm:$0xf] %vm2887_vm2, %v2875_v25  ;;  %v3770_v20 = vadd.f32 %v3769_v50, %v3768_v57  ;;  %v6602_v54 = vld [vmem:[#allocation21_spill] sm:$0xff]  ;;  %v6603_v0 = vld [vmem:[#allocation6_spill] sm:$0xff] }
 0x24e   : > { %v1693_v60 = vpop.f32.mrf.mxu1  ;;  %v1228_v15 = vadd.f32 %v5373_v22, %v1227_v40  ;;  %3376 = vrot.lane.b32.xlu2 %v2875_v25, %s4392_s13  ;;  %2939 = vst.msk [vmem:[%s4648_s12 + $0xcc] sm:$0xf] %vm2887_vm2, %v2810_v10  ;;  %3246 = vrot.lane.b32.xlu0 %v2810_v10, %s4392_s13  ;;  %v2748_v3 = vld [vmem:[#allocation2 + $0x3a8] sm:$0xff]  ;;  %v1885_v40 = vld [vmem:[#allocation2 + $0x3c0] sm:$0xff] }
 0x24f   : > { %v1948_v1 = vadd.f32 %v1852_v63, %v1693_v60  ;;  %v1819_v59 = vld [vmem:[#allocation2 + $0x1b0] sm:$0xff]  ;;  %2075 = vst.msk [vmem:[#allocation2 + $0x3b0] sm:$0xff] %vm1410_vm1, %v1979_v56  ;;  %v2876_v12 = vpack.c.bf16 %v2748_v3, %v2748_v3 }
 0x250   : > { %v1915_v33 = vadd.f32 %v1819_v59, %v6600_v16  ;;  %1466 = vst.msk [vmem:[#allocation2 + $0x1b8] sm:$0xff] %vm1410_vm1, %v1228_v15  ;;  %v3219_v51 = vpop.permute.xlu1 %3218  ;;  %v1854_v59 = vld [vmem:[#allocation2 + $0x2c8] sm:$0xff] }
 0x251   : > { %v2396_v2 = vld [vmem:[#allocation2 + $0x1a8] sm:$0xff]  ;;  %2044 = vst.msk [vmem:[#allocation2 + $0x2b8] sm:$0xff] %vm1410_vm1, %v1948_v1 }
 0x252   : > { %2011 = vst.msk [vmem:[#allocation2 + $0x1b0] sm:$0xff] %vm1410_vm1, %v1915_v33  ;;  %v2492_v8 = vadd.f32 %v2396_v2, %v2235_v45 }
 0x253   : > { %3565 = vst.msk [vmem:[%s4933_s16 + $0x94] sm:$0xf] %vm2887_vm2, %v3219_v51  ;;  %v2683_v58 = vld [vmem:[#allocation2 + $0x1a0] sm:$0xff] }
 0x254   : > { %2588 = vst.msk [vmem:[#allocation2 + $0x1a8] sm:$0xff] %vm1410_vm1, %v2492_v8  ;;  %v1773_v7 = vpop.f32.mrf.mxu3  ;;  %v2811_v14 = vpack.c.bf16 %v2683_v58, %v2683_v58  ;;  %v3771_v57 = vsel %vm3662_vm3, %v2683_v58, 0.0 }
 0x255   : > { %v2240_v37 = vpop.f32.mrf.mxu2  ;;  %v1980_v43 = vadd.f32 %v1884_v36, %v1773_v7  ;;  %v1230_v55 = vpop.f32.mrf.mxu0  ;;  %v3772_v27 = vadd.f32 %v3771_v57, %v3770_v20  ;;  %3005 = vst.msk [vmem:[%s4648_s12 + $0x1d4] sm:$0xf] %vm2887_vm2, %v2876_v12 }
 0x256   : > { %v1696_v19 = vpop.f32.mrf.mxu1  ;;  %v1231_v45 = vadd.f32 %v5373_v22, %v1230_v55  ;;  %2940 = vst.msk [vmem:[%s4648_s12 + $0xd0] sm:$0xf] %vm2887_vm2, %v2811_v14  ;;  %3248 = vrot.lane.b32.xlu1 %v2811_v14, %s4392_s13  ;;  %3378 = vrot.lane.b32.xlu0 %v2876_v12, %s4392_s13  ;;  %v2749_v17 = vld [vmem:[#allocation2 + $0x3b0] sm:$0xff]  ;;  %v6604_v12 = vld [vmem:[#allocation20_spill] sm:$0xff] }
 0x257   : > { %v1949_v30 = vadd.f32 %v1853_v61, %v1696_v19  ;;  %v1820_v31 = vld [vmem:[#allocation2 + $0x1b8] sm:$0xff]  ;;  %2076 = vst.msk [vmem:[#allocation2 + $0x3b8] sm:$0xff] %vm1410_vm1, %v1980_v43  ;;  %v2877_v10 = vpack.c.bf16 %v2749_v17, %v2749_v17  ;;  %v1886_v43 = vld [vmem:[#allocation2 + $0x3c8] sm:$0xff]  ;;  %v1855_v17 = vld [vmem:[#allocation2 + $0x2d0] sm:$0xff] }
 0x258   : > { %v1916_v25 = vadd.f32 %v1820_v31, %v6601_v47  ;;  %1467 = vst.msk [vmem:[#allocation2 + $0x1c0] sm:$0xff] %vm1410_vm1, %v1231_v45  ;;  %4174 = vmatmul.msk.bf16.gmra.mxu0 %vm888_vm0, %v5082_v4  ;;  %4242 = vmatmul.msk.bf16.gmra.mxu1 %vm888_vm0, %v5082_v4  ;;  %v3227_v18 = vpop.permute.xlu2 %3226 }
 0x259   : > { %v2397_v26 = vld [vmem:[#allocation2 + $0x1b0] sm:$0xff]  ;;  %2045 = vst.msk [vmem:[#allocation2 + $0x2c0] sm:$0xff] %vm1410_vm1, %v1949_v30  ;;  %4304 = vmatmul.msk.bf16.gmra.mxu3 %vm888_vm0, %v6602_v54  ;;  %v6605_v54 = vld [vmem:[#allocation22_spill] sm:$0xff] }
 0x25a   : > { %4296 = vmatmul.msk.bf16.gmra.mxu2 %vm888_vm0, %v6603_v0  ;;  %2012 = vst.msk [vmem:[#allocation2 + $0x1b8] sm:$0xff] %vm1410_vm1, %v1916_v25  ;;  %v2493_v50 = vadd.f32 %v2397_v26, %v2238_v46 }
 0x25b   : > { %3569 = vst.msk [vmem:[%s4933_s16 + $0xa4] sm:$0xf] %vm2887_vm2, %v3227_v18  ;;  %v2684_v56 = vld [vmem:[#allocation2 + $0x1a8] sm:$0xff] }
 0x25c   : > { %2589 = vst.msk [vmem:[#allocation2 + $0x1b0] sm:$0xff] %vm1410_vm1, %v2493_v50  ;;  %v1776_v4 = vpop.f32.mrf.mxu3  ;;  %v2812_v60 = vpack.c.bf16 %v2684_v56, %v2684_v56  ;;  %v3773_v63 = vsel %vm3662_vm3, %v2684_v56, 0.0  ;;  %v6606_v56 = vld [vmem:[#allocation24_spill] sm:$0xff] }
 0x25d   : > { %v2243_v20 = vpop.f32.mrf.mxu2  ;;  %v1981_v15 = vadd.f32 %v1885_v40, %v1776_v4  ;;  %v1232_v1 = vpop.f32.mrf.mxu0  ;;  %v3774_v16 = vadd.f32 %v3773_v63, %v3772_v27  ;;  %3006 = vst.msk [vmem:[%s4648_s12 + $0x1d8] sm:$0xf] %vm2887_vm2, %v2877_v10  ;;  %v6607_v4 = vld [vmem:[#allocation7_spill] sm:$0xff] }
 0x25e   : > { %v1698_v3 = vpop.f32.mrf.mxu1  ;;  %v1233_v46 = vadd.f32 %v5373_v22, %v1232_v1  ;;  %2941 = vst.msk [vmem:[%s4648_s12 + $0xd4] sm:$0xf] %vm2887_vm2, %v2812_v60  ;;  %3250 = vrot.lane.b32.xlu2 %v2812_v60, %s4392_s13  ;;  %3380 = vrot.lane.b32.xlu1 %v2877_v10, %s4392_s13  ;;  %v2750_v51 = vld [vmem:[#allocation2 + $0x3b8] sm:$0xff] }
 0x25f   : > { %v1950_v33 = vadd.f32 %v1854_v59, %v1698_v3  ;;  %v1821_v2 = vld [vmem:[#allocation2 + $0x1c0] sm:$0xff]  ;;  %2077 = vst.msk [vmem:[#allocation2 + $0x3c0] sm:$0xff] %vm1410_vm1, %v1981_v15  ;;  %v2878_v22 = vpack.c.bf16 %v2750_v51, %v2750_v51  ;;  %v1887_v15 = vld [vmem:[#allocation2 + $0x3d0] sm:$0xff]  ;;  %v1856_v51 = vld [vmem:[#allocation2 + $0x2d8] sm:$0xff] }
 0x260   : > { %v1917_v8 = vadd.f32 %v1821_v2, %v6604_v12  ;;  %1468 = vst.msk [vmem:[#allocation2 + $0x1c8] sm:$0xff] %vm1410_vm1, %v1233_v46  ;;  %v3223_v58 = vpop.permute.xlu0 %3222 }
 0x261   : > { %v2398_v7 = vld [vmem:[#allocation2 + $0x1b8] sm:$0xff]  ;;  %2046 = vst.msk [vmem:[#allocation2 + $0x2c8] sm:$0xff] %vm1410_vm1, %v1950_v33 }
 0x262   : > { %2013 = vst.msk [vmem:[#allocation2 + $0x1c0] sm:$0xff] %vm1410_vm1, %v1917_v8  ;;  %v2494_v36 = vadd.f32 %v2398_v7, %v2240_v37  ;;  %v5737_v37 = vld [vmem:[%s6545_s2] ss:$0 sm:$0xff] }
 0x263   : > { %3567 = vst.msk [vmem:[%s4933_s16 + $0x9c] sm:$0xf] %vm2887_vm2, %v3223_v58  ;;  %v2685_v14 = vld [vmem:[#allocation2 + $0x1b0] sm:$0xff]  ;;  %v6608_v7 = vld [vmem:[#allocation23_spill] sm:$0xff] }
 0x264   : > { %2590 = vst.msk [vmem:[#allocation2 + $0x1b8] sm:$0xff] %vm1410_vm1, %v2494_v36  ;;  %v1778_v57 = vpop.f32.mrf.mxu3  ;;  %v2813_v55 = vpack.c.bf16 %v2685_v14, %v2685_v14  ;;  %v3775_v19 = vsel %vm3662_vm3, %v2685_v14, 0.0 }
 0x265   : > { %v2245_v61 = vpop.f32.mrf.mxu2  ;;  %v1982_v27 = vadd.f32 %v1886_v43, %v1778_v57  ;;  %v1235_v45 = vpop.f32.mrf.mxu0  ;;  %3007 = vst.msk [vmem:[%s4648_s12 + $0x1dc] sm:$0xf] %vm2887_vm2, %v2878_v22  ;;  %v3776_v31 = vadd.f32 %v3775_v19, %v3774_v16 }
 0x266   : > { %v1701_v30 = vpop.f32.mrf.mxu1  ;;  %v1236_v47 = vadd.f32 %v5737_v37, %v1235_v45  ;;  %3382 = vrot.lane.b32.xlu2 %v2878_v22, %s4392_s13  ;;  %2942 = vst.msk [vmem:[%s4648_s12 + $0xd8] sm:$0xf] %vm2887_vm2, %v2813_v55  ;;  %3252 = vrot.lane.b32.xlu0 %v2813_v55, %s4392_s13  ;;  %v2751_v18 = vld [vmem:[#allocation2 + $0x3c0] sm:$0xff] }
 0x267   : > { %v1951_v25 = vadd.f32 %v1855_v17, %v1701_v30  ;;  %v1822_v26 = vld [vmem:[#allocation2 + $0x1c8] sm:$0xff]  ;;  %2078 = vst.msk [vmem:[#allocation2 + $0x3c8] sm:$0xff] %vm1410_vm1, %v1982_v27  ;;  %v2879_v40 = vpack.c.bf16 %v2751_v18, %v2751_v18  ;;  %v1888_v27 = vld [vmem:[#allocation2 + $0x3d8] sm:$0xff]  ;;  %v1857_v18 = vld [vmem:[#allocation2 + $0x2e0] sm:$0xff] }
 0x268   : > { %v1918_v0 = vadd.f32 %v1822_v26, %v6605_v54  ;;  %1469 = vst.msk [vmem:[#allocation2 + $0x1d0] sm:$0xff] %vm1410_vm1, %v1236_v47  ;;  %4175 = vmatmul.msk.bf16.gmra.mxu0 %vm888_vm0, %v5124_v23  ;;  %4243 = vmatmul.msk.bf16.gmra.mxu1 %vm888_vm0, %v5124_v23  ;;  %v3225_v10 = vpop.permute.xlu1 %3224 }
 0x269   : > { %v2399_v50 = vld [vmem:[#allocation2 + $0x1c0] sm:$0xff]  ;;  %2047 = vst.msk [vmem:[#allocation2 + $0x2d0] sm:$0xff] %vm1410_vm1, %v1951_v25  ;;  %4305 = vmatmul.msk.bf16.gmra.mxu3 %vm888_vm0, %v6606_v56 }
 0x26a   : > { %4297 = vmatmul.msk.bf16.gmra.mxu2 %vm888_vm0, %v6607_v4  ;;  %2014 = vst.msk [vmem:[#allocation2 + $0x1c8] sm:$0xff] %vm1410_vm1, %v1918_v0  ;;  %v2495_v60 = vadd.f32 %v2399_v50, %v2243_v20  ;;  %v6609_v50 = vld [vmem:[#allocation25_spill] sm:$0xff] }
 0x26b   : > { %3568 = vst.msk [vmem:[%s4933_s16 + $0xa0] sm:$0xf] %vm2887_vm2, %v3225_v10  ;;  %v2686_v63 = vld [vmem:[#allocation2 + $0x1b8] sm:$0xff] }
 0x26c   : > { %2591 = vst.msk [vmem:[#allocation2 + $0x1c0] sm:$0xff] %vm1410_vm1, %v2495_v60  ;;  %v1781_v23 = vpop.f32.mrf.mxu3  ;;  %v2814_v1 = vpack.c.bf16 %v2686_v63, %v2686_v63  ;;  %v3777_v3 = vsel %vm3662_vm3, %v2686_v63, 0.0  ;;  %v6610_v60 = vld [vmem:[#allocation27_spill] sm:$0xff]  ;;  %v6611_v63 = vld [vmem:[#allocation8_spill] sm:$0xff] }
 0x26d   : > { %v2248_v59 = vpop.f32.mrf.mxu2  ;;  %v1983_v16 = vadd.f32 %v1887_v15, %v1781_v23  ;;  %v1237_v46 = vpop.f32.mrf.mxu0  ;;  %v3778_v2 = vadd.f32 %v3777_v3, %v3776_v31  ;;  %3008 = vst.msk [vmem:[%s4648_s12 + $0x1e0] sm:$0xf] %vm2887_vm2, %v2879_v40  ;;  %v1889_v3 = vld [vmem:[#allocation2 + $0x3e0] sm:$0xff] }
 0x26e   : > { %v1703_v33 = vpop.f32.mrf.mxu1  ;;  %v1238_v20 = vadd.f32 %v5737_v37, %v1237_v46  ;;  %2943 = vst.msk [vmem:[%s4648_s12 + $0xdc] sm:$0xf] %vm2887_vm2, %v2814_v1  ;;  %3254 = vrot.lane.b32.xlu1 %v2814_v1, %s4392_s13  ;;  %3384 = vrot.lane.b32.xlu0 %v2879_v40, %s4392_s13  ;;  %v2752_v8 = vld [vmem:[#allocation2 + $0x3c8] sm:$0xff] }
 0x26f   : > { %v1952_v12 = vadd.f32 %v1856_v51, %v1703_v33  ;;  %v1823_v58 = vld [vmem:[#allocation2 + $0x1d0] sm:$0xff]  ;;  %2079 = vst.msk [vmem:[#allocation2 + $0x3d0] sm:$0xff] %vm1410_vm1, %v1983_v16  ;;  %v2880_v57 = vpack.c.bf16 %v2752_v8, %v2752_v8 }
 0x270   : > { %v1919_v22 = vadd.f32 %v1823_v58, %v6608_v7  ;;  %1470 = vst.msk [vmem:[#allocation2 + $0x1d8] sm:$0xff] %vm1410_vm1, %v1238_v20  ;;  %v3233_v36 = vpop.permute.xlu2 %3232 }
 0x271   : > { %v2400_v14 = vld [vmem:[#allocation2 + $0x1c8] sm:$0xff]  ;;  %2048 = vst.msk [vmem:[#allocation2 + $0x2d8] sm:$0xff] %vm1410_vm1, %v1952_v12 }
 0x272   : > { %2015 = vst.msk [vmem:[#allocation2 + $0x1d0] sm:$0xff] %vm1410_vm1, %v1919_v22  ;;  %v2496_v43 = vadd.f32 %v2400_v14, %v2245_v61  ;;  %v1858_v12 = vld [vmem:[#allocation2 + $0x2e8] sm:$0xff] }
 0x273   : > { %3572 = vst.msk [vmem:[%s4933_s16 + $0xb0] sm:$0xf] %vm2887_vm2, %v3233_v36  ;;  %v2687_v55 = vld [vmem:[#allocation2 + $0x1c0] sm:$0xff]  ;;  %v6612_v36 = vld [vmem:[#allocation26_spill] sm:$0xff] }
 0x274   : > { %2592 = vst.msk [vmem:[#allocation2 + $0x1c8] sm:$0xff] %vm1410_vm1, %v2496_v43  ;;  %v1783_v19 = vpop.f32.mrf.mxu3  ;;  %v2815_v45 = vpack.c.bf16 %v2687_v55, %v2687_v55  ;;  %v3779_v30 = vsel %vm3662_vm3, %v2687_v55, 0.0 }
 0x275   : > { %v2250_v17 = vpop.f32.mrf.mxu2  ;;  %v1984_v31 = vadd.f32 %v1888_v27, %v1783_v19  ;;  %v1240_v47 = vpop.f32.mrf.mxu0  ;;  %v3780_v26 = vadd.f32 %v3779_v30, %v3778_v2  ;;  %3009 = vst.msk [vmem:[%s4648_s12 + $0x1e4] sm:$0xf] %vm2887_vm2, %v2880_v57  ;;  %v1890_v30 = vld [vmem:[#allocation2 + $0x3e8] sm:$0xff] }
 0x276   : > { %v1706_v25 = vpop.f32.mrf.mxu1  ;;  %v1241_v61 = vadd.f32 %v5737_v37, %v1240_v47  ;;  %2944 = vst.msk [vmem:[%s4648_s12 + $0xe0] sm:$0xf] %vm2887_vm2, %v2815_v45  ;;  %3256 = vrot.lane.b32.xlu2 %v2815_v45, %s4392_s13  ;;  %3386 = vrot.lane.b32.xlu1 %v2880_v57, %s4392_s13  ;;  %v2753_v0 = vld [vmem:[#allocation2 + $0x3d0] sm:$0xff] }
 0x277   : > { %v1953_v54 = vadd.f32 %v1857_v18, %v1706_v25  ;;  %v1824_v10 = vld [vmem:[#allocation2 + $0x1d8] sm:$0xff]  ;;  %2080 = vst.msk [vmem:[#allocation2 + $0x3d8] sm:$0xff] %vm1410_vm1, %v1984_v31  ;;  %v2881_v23 = vpack.c.bf16 %v2753_v0, %v2753_v0 }
 0x278   : > { %v1920_v56 = vadd.f32 %v1824_v10, %v6609_v50  ;;  %1471 = vst.msk [vmem:[#allocation2 + $0x1e0] sm:$0xff] %vm1410_vm1, %v1241_v61  ;;  %4176 = vmatmul.msk.bf16.gmra.mxu0 %vm888_vm0, %v5166_v29  ;;  %4244 = vmatmul.msk.bf16.gmra.mxu1 %vm888_vm0, %v5166_v29  ;;  %v3229_v4 = vpop.permute.xlu0 %3228 }
 0x279   : > { %v2401_v40 = vld [vmem:[#allocation2 + $0x1d0] sm:$0xff]  ;;  %2049 = vst.msk [vmem:[#allocation2 + $0x2e0] sm:$0xff] %vm1410_vm1, %v1953_v54  ;;  %4306 = vmatmul.msk.bf16.gmra.mxu3 %vm888_vm0, %v6610_v60 }
 0x27a   : > { %4298 = vmatmul.msk.bf16.gmra.mxu2 %vm888_vm0, %v6611_v63  ;;  %2016 = vst.msk [vmem:[#allocation2 + $0x1d8] sm:$0xff] %vm1410_vm1, %v1920_v56  ;;  %v2497_v15 = vadd.f32 %v2401_v40, %v2248_v59  ;;  %v1859_v54 = vld [vmem:[#allocation2 + $0x2f0] sm:$0xff] }
 0x27b   : > { %3570 = vst.msk [vmem:[%s4933_s16 + $0xa8] sm:$0xf] %vm2887_vm2, %v3229_v4  ;;  %v2688_v1 = vld [vmem:[#allocation2 + $0x1c8] sm:$0xff] }
 0x27c   : > { %2593 = vst.msk [vmem:[#allocation2 + $0x1d0] sm:$0xff] %vm1410_vm1, %v2497_v15  ;;  %v1786_v29 = vpop.f32.mrf.mxu3  ;;  %v2816_v16 = vpack.c.bf16 %v2688_v1, %v2688_v1  ;;  %v3781_v46 = vsel %vm3662_vm3, %v2688_v1, 0.0  ;;  %v6613_v4 = vld [vmem:[#allocation28_spill] sm:$0xff] }
 0x27d   : > { %v2253_v33 = vpop.f32.mrf.mxu2  ;;  %v1985_v51 = vadd.f32 %v1889_v3, %v1786_v29  ;;  %v1242_v2 = vpop.f32.mrf.mxu0  ;;  %3010 = vst.msk [vmem:[%s4648_s12 + $0x1e8] sm:$0xf] %vm2887_vm2, %v2881_v23  ;;  %v3782_v8 = vadd.f32 %v3781_v46, %v3780_v26  ;;  %v1891_v3 = vld [vmem:[#allocation2 + $0x3f0] sm:$0xff] }
 0x27e   : > { %v1708_v20 = vpop.f32.mrf.mxu1  ;;  %v1243_v59 = vadd.f32 %v5737_v37, %v1242_v2  ;;  %3388 = vrot.lane.b32.xlu2 %v2881_v23, %s4392_s13  ;;  %2945 = vst.msk [vmem:[%s4648_s12 + $0xe4] sm:$0xf] %vm2887_vm2, %v2816_v16  ;;  %3258 = vrot.lane.b32.xlu0 %v2816_v16, %s4392_s13  ;;  %v2754_v7 = vld [vmem:[#allocation2 + $0x3d8] sm:$0xff]  ;;  %v6614_v23 = vld [vmem:[#allocation9_spill] sm:$0xff] }
 0x27f   : > { %v1954_v58 = vadd.f32 %v1858_v12, %v1708_v20  ;;  %v1825_v22 = vld [vmem:[#allocation2 + $0x1e0] sm:$0xff]  ;;  %2081 = vst.msk [vmem:[#allocation2 + $0x3e0] sm:$0xff] %vm1410_vm1, %v1985_v51  ;;  %v2882_v55 = vpack.c.bf16 %v2754_v7, %v2754_v7  ;;  %v1860_v20 = vld [vmem:[#allocation2 + $0x2f8] sm:$0xff] }
 0x280   : > { %v1921_v14 = vadd.f32 %v1825_v22, %v6612_v36  ;;  %1472 = vst.msk [vmem:[#allocation2 + $0x1e8] sm:$0xff] %vm1410_vm1, %v1243_v59  ;;  %v3231_v57 = vpop.permute.xlu1 %3230 }
 0x281   : > { %v2402_v43 = vld [vmem:[#allocation2 + $0x1d8] sm:$0xff]  ;;  %2050 = vst.msk [vmem:[#allocation2 + $0x2e8] sm:$0xff] %vm1410_vm1, %v1954_v58 }
 0x282   : > { %2017 = vst.msk [vmem:[#allocation2 + $0x1e0] sm:$0xff] %vm1410_vm1, %v1921_v14  ;;  %v2498_v19 = vadd.f32 %v2402_v43, %v2250_v17 }
 0x283   : > { %3571 = vst.msk [vmem:[%s4933_s16 + $0xac] sm:$0xf] %vm2887_vm2, %v3231_v57  ;;  %v2689_v27 = vld [vmem:[#allocation2 + $0x1d0] sm:$0xff] }
 0x284   : > { %2594 = vst.msk [vmem:[#allocation2 + $0x1d8] sm:$0xff] %vm1410_vm1, %v2498_v19  ;;  %v1788_v45 = vpop.f32.mrf.mxu3  ;;  %v2817_v31 = vpack.c.bf16 %v2689_v27, %v2689_v27  ;;  %v3783_v47 = vsel %vm3662_vm3, %v2689_v27, 0.0  ;;  %v1892_v19 = vld [vmem:[#allocation2 + $0x3f8] sm:$0xff] }
 0x285   : > { %v2255_v25 = vpop.f32.mrf.mxu2  ;;  %v1986_v18 = vadd.f32 %v1890_v30, %v1788_v45  ;;  %v1245_v26 = vpop.f32.mrf.mxu0  ;;  %v3784_v0 = vadd.f32 %v3783_v47, %v3782_v8  ;;  %3011 = vst.msk [vmem:[%s4648_s12 + $0x1ec] sm:$0xf] %vm2887_vm2, %v2882_v55  ;;  %v1861_v47 = vld [vmem:[#allocation2 + $0x300] sm:$0xff] }
 0x286   : > { %v1711_v61 = vpop.f32.mrf.mxu1  ;;  %v1246_v17 = vadd.f32 %v5737_v37, %v1245_v26  ;;  %2946 = vst.msk [vmem:[%s4648_s12 + $0xe8] sm:$0xf] %vm2887_vm2, %v2817_v31  ;;  %3260 = vrot.lane.b32.xlu1 %v2817_v31, %s4392_s13  ;;  %3390 = vrot.lane.b32.xlu0 %v2882_v55, %s4392_s13  ;;  %v2755_v50 = vld [vmem:[#allocation2 + $0x3e0] sm:$0xff] }
 0x287   : > { %v1955_v10 = vadd.f32 %v1859_v54, %v1711_v61  ;;  %v1826_v56 = vld [vmem:[#allocation2 + $0x1e8] sm:$0xff]  ;;  %2082 = vst.msk [vmem:[#allocation2 + $0x3e8] sm:$0xff] %vm1410_vm1, %v1986_v18  ;;  %v2883_v15 = vpack.c.bf16 %v2755_v50, %v2755_v50 }
 0x288   : > { %v1922_v40 = vadd.f32 %v1826_v56, %v6613_v4  ;;  %1473 = vst.msk [vmem:[#allocation2 + $0x1f0] sm:$0xff] %vm1410_vm1, %v1246_v17  ;;  %4177 = vmatmul.msk.bf16.gmra.mxu0 %vm888_vm0, %v5208_v49  ;;  %4245 = vmatmul.msk.bf16.gmra.mxu1 %vm888_vm0, %v5208_v49  ;;  %v3239_v60 = vpop.permute.xlu2 %3238 }
 0x289   : > { %v2403_v63 = vld [vmem:[#allocation2 + $0x1e0] sm:$0xff]  ;;  %2051 = vst.msk [vmem:[#allocation2 + $0x2f0] sm:$0xff] %vm1410_vm1, %v1955_v10  ;;  %4307 = vmatmul.msk.bf16.gmra.mxu3 %vm888_vm0, %v5206_v24 }
 0x28a   : > { %4299 = vmatmul.msk.bf16.gmra.mxu2 %vm888_vm0, %v6614_v23  ;;  %2018 = vst.msk [vmem:[#allocation2 + $0x1e8] sm:$0xff] %vm1410_vm1, %v1922_v40  ;;  %v2499_v1 = vadd.f32 %v2403_v63, %v2253_v33 }
 0x28b   : > { %3575 = vst.msk [vmem:[%s4933_s16 + $0xbc] sm:$0xf] %vm2887_vm2, %v3239_v60  ;;  %v2690_v29 = vld [vmem:[#allocation2 + $0x1d8] sm:$0xff]  ;;  %v2423_v60 = vld [vmem:[#allocation2 + $0x280] sm:$0xff] }
 0x28c   : > { %2595 = vst.msk [vmem:[#allocation2 + $0x1e0] sm:$0xff] %vm1410_vm1, %v2499_v1  ;;  %v1791_v49 = vpop.f32.mrf.mxu3  ;;  %v2818_v16 = vpack.c.bf16 %v2690_v29, %v2690_v29  ;;  %v3785_v46 = vsel %vm3662_vm3, %v2690_v29, 0.0 }
 0x28d   : > { %v1987_v24 = vadd.f32 %v1891_v3, %v1791_v49  ;;  %v1247_v51 = vpop.f32.mrf.mxu0  ;;  %v3786_v12 = vadd.f32 %v3785_v46, %v3784_v0  ;;  %3012 = vst.msk [vmem:[%s4648_s12 + $0x1f0] sm:$0xf] %vm2887_vm2, %v2883_v15  ;;  %v2258_v59 = vpop.f32.mrf.mxu2  ;;  %v1862_v49 = vld [vmem:[#allocation2 + $0x308] sm:$0xff] }
 0x28e   : > { %v1713_v2 = vpop.f32.mrf.mxu1  ;;  %v1248_v33 = vadd.f32 %v5737_v37, %v1247_v51  ;;  %2947 = vst.msk [vmem:[%s4648_s12 + $0xec] sm:$0xf] %vm2887_vm2, %v2818_v16  ;;  %3262 = vrot.lane.b32.xlu2 %v2818_v16, %s4392_s13  ;;  %3392 = vrot.lane.b32.xlu1 %v2883_v15, %s4392_s13  ;;  %v2756_v61 = vld [vmem:[#allocation2 + $0x3e8] sm:$0xff] }
 0x28f   : > { %v1956_v8 = vadd.f32 %v1860_v20, %v1713_v2  ;;  %v1827_v58 = vld [vmem:[#allocation2 + $0x1f0] sm:$0xff]  ;;  %2083 = vst.msk [vmem:[#allocation2 + $0x3f0] sm:$0xff] %vm1410_vm1, %v1987_v24  ;;  %v5867_v56 = vpack.c.bf16 %v2756_v61, %v2756_v61 }
 0x290   : > { %v1923_v7 = vadd.f32 %v1827_v58, %v5204_v38  ;;  %1474 = vst.msk [vmem:[#allocation2 + $0x1f8] sm:$0xff] %vm1410_vm1, %v1248_v33  ;;  %v3371_v22 = vpop.permute.xlu2 %3370  ;;  %v3235_v57 = vpop.permute.xlu0 %3234 }
 0x291   : > { %v2404_v36 = vld [vmem:[#allocation2 + $0x1e8] sm:$0xff]  ;;  %2052 = vst.msk [vmem:[#allocation2 + $0x2f8] sm:$0xff] %vm1410_vm1, %v1956_v8 }
 0x292   : > { %2019 = vst.msk [vmem:[#allocation2 + $0x1f0] sm:$0xff] %vm1410_vm1, %v1923_v7  ;;  %v2500_v14 = vadd.f32 %v2404_v36, %v2255_v25 }
 0x293   : > { %3641 = vst.msk [vmem:[%s4933_s16 + $0x1c4] sm:$0xf] %vm2887_vm2, %v3371_v22  ;;  %v2691_v43 = vld [vmem:[#allocation2 + $0x1e0] sm:$0xff]  ;;  %v2424_v22 = vld [vmem:[#allocation2 + $0x288] sm:$0xff] }
 0x294   : > { %2596 = vst.msk [vmem:[#allocation2 + $0x1e8] sm:$0xff] %vm1410_vm1, %v2500_v14  ;;  %v1793_v55 = vpop.f32.mrf.mxu3  ;;  %v2819_v27 = vpack.c.bf16 %v2691_v43, %v2691_v43  ;;  %v3787_v38 = vsel %vm3662_vm3, %v2691_v43, 0.0 }
 0x295   : > { %3573 = vst.msk [vmem:[%s4933_s16 + $0xb4] sm:$0xf] %vm2887_vm2, %v3235_v57  ;;  %v1988_v45 = vadd.f32 %v1892_v19, %v1793_v55  ;;  %v1250_v30 = vpop.f32.mrf.mxu0  ;;  %v3788_v18 = vadd.f32 %v3787_v38, %v3786_v12  ;;  %v2260_v10 = vpop.f32.mrf.mxu2  ;;  %v3726_v57 = vrot.slane %v5273_v34, 4 }
 0x296   : > { %v1716_v31 = vpop.f32.mrf.mxu1  ;;  %v1251_v25 = vadd.f32 %v5737_v37, %v1250_v30  ;;  %2948 = vst.msk [vmem:[%s4648_s12 + $0xf0] sm:$0xf] %vm2887_vm2, %v2819_v27  ;;  %3264 = vrot.lane.b32.xlu0 %v2819_v27, %s4392_s13  ;;  %v1863_v27 = vld [vmem:[#allocation2 + $0x310] sm:$0xff] }
 0x297   : > { %v1957_v26 = vadd.f32 %v1861_v47, %v1716_v31  ;;  %v1828_v54 = vld [vmem:[#allocation2 + $0x1f8] sm:$0xff]  ;;  %2084 = vst.msk [vmem:[#allocation2 + $0x3f8] sm:$0xff] %vm1410_vm1, %v1988_v45 }
 0x298   : > { %v1924_v0 = vadd.f32 %v1828_v54, %v5229_v6  ;;  %1475 = vst.msk [vmem:[#allocation2 + $0x200] sm:$0xff] %vm1410_vm1, %v1251_v25  ;;  %v3237_v17 = vpop.permute.xlu1 %3236  ;;  %v3727_v25 = vadd.f32 %v3726_v57, %v5273_v34 }
 0x299   : > { %v2405_v50 = vld [vmem:[#allocation2 + $0x1f0] sm:$0xff]  ;;  %2053 = vst.msk [vmem:[#allocation2 + $0x300] sm:$0xff] %vm1410_vm1, %v1957_v26 }
 0x29a   : > { %2020 = vst.msk [vmem:[#allocation2 + $0x1f8] sm:$0xff] %vm1410_vm1, %v1924_v0  ;;  %v2501_v4 = vadd.f32 %v2405_v50, %v2258_v59 }
 0x29b   : > { %3574 = vst.msk [vmem:[%s4933_s16 + $0xb8] sm:$0xf] %vm2887_vm2, %v3237_v17  ;;  %v2692_v40 = vld [vmem:[#allocation2 + $0x1e8] sm:$0xff] }
 0x29c   : > { %2597 = vst.msk [vmem:[#allocation2 + $0x1f0] sm:$0xff] %vm1410_vm1, %v2501_v4  ;;  %v2303_v6 = vpop.f32.mrf.mxu3  ;;  %v2820_v63 = vpack.c.bf16 %v2692_v40, %v2692_v40  ;;  %v3789_v23 = vsel %vm3662_vm3, %v2692_v40, 0.0 }
 0x29d   : > { %v2519_v15 = vadd.f32 %v2423_v60, %v2303_v6  ;;  %v1252_v1 = vpop.f32.mrf.mxu0  ;;  %v3790_v3 = vadd.f32 %v3789_v23, %v3788_v18  ;;  %3013 = vst.msk [vmem:[%s4648_s12 + $0x1f4] sm:$0xf] %vm2887_vm2, %v5867_v56  ;;  %v2263_v58 = vpop.f32.mrf.mxu2  ;;  %v2425_v60 = vld [vmem:[#allocation2 + $0x290] sm:$0xff] }
 0x29e   : > { %v1718_v29 = vpop.f32.mrf.mxu1  ;;  %v1253_v16 = vadd.f32 %v5737_v37, %v1252_v1  ;;  %2949 = vst.msk [vmem:[%s4648_s12 + $0xf4] sm:$0xf] %vm2887_vm2, %v2820_v63  ;;  %3266 = vrot.lane.b32.xlu1 %v2820_v63, %s4392_s13  ;;  %v3728_v1 = vrot.slane %v3727_v25, 2 }
 0x29f   : > { %v1958_v46 = vadd.f32 %v1862_v49, %v1718_v29  ;;  %v1829_v24 = vld [vmem:[#allocation2 + $0x200] sm:$0xff]  ;;  %2615 = vst.msk [vmem:[#allocation2 + $0x280] sm:$0xff] %vm1410_vm1, %v2519_v15 }
 0x2a0   : > { %v1925_v51 = vadd.f32 %v1829_v24, %v5242_v44  ;;  %1476 = vst.msk [vmem:[#allocation2 + $0x208] sm:$0xff] %vm1410_vm1, %v1253_v16  ;;  %v3245_v2 = vpop.permute.xlu2 %3244  ;;  %v2727_v20 = vld [vmem:[#allocation2 + $0x300] sm:$0xff]  ;;  %v3369_v59 = vpop.permute.xlu1 %3368  ;;  %v1864_v24 = vld [vmem:[#allocation2 + $0x318] sm:$0xff] }
 0x2a1   : > { %v2406_v12 = vld [vmem:[#allocation2 + $0x1f8] sm:$0xff]  ;;  %2054 = vst.msk [vmem:[#allocation2 + $0x308] sm:$0xff] %vm1410_vm1, %v1958_v46  ;;  %v2855_v33 = vpack.c.bf16 %v2727_v20, %v2727_v20  ;;  %v3870_v61 = vsel %vm3662_vm3, %v2727_v20, 0.0 }
 0x2a2   : > { %2021 = vst.msk [vmem:[#allocation2 + $0x200] sm:$0xff] %vm1410_vm1, %v1925_v51  ;;  %v2502_v8 = vadd.f32 %v2406_v12, %v2260_v10 }
 0x2a3   : > { %3578 = vst.msk [vmem:[%s4933_s16 + $0xc8] sm:$0xf] %vm2887_vm2, %v3245_v2  ;;  %3336 = vrot.lane.b32.xlu0 %v2855_v33, %s4392_s13  ;;  %v2693_v44 = vld [vmem:[#allocation2 + $0x1f0] sm:$0xff] }
 0x2a4   : > { %2598 = vst.msk [vmem:[#allocation2 + $0x1f8] sm:$0xff] %vm1410_vm1, %v2502_v8  ;;  %v2305_v7 = vpop.f32.mrf.mxu3  ;;  %v2821_v36 = vpack.c.bf16 %v2693_v44, %v2693_v44  ;;  %v3791_v14 = vsel %vm3662_vm3, %v2693_v44, 0.0  ;;  %v3729_v8 = vadd.f32 %v3728_v1, %v3727_v25 }
 0x2a5   : > { %3640 = vst.msk [vmem:[%s4933_s16 + $0x1c0] sm:$0xf] %vm2887_vm2, %v3369_v59  ;;  %v2520_v43 = vadd.f32 %v2424_v22, %v2305_v7  ;;  %v1255_v55 = vpop.f32.mrf.mxu0  ;;  %v3792_v38 = vadd.f32 %v3791_v14, %v3790_v3  ;;  %v2265_v40 = vpop.f32.mrf.mxu2 }
 0x2a6   : > { %v1721_v19 = vpop.f32.mrf.mxu1  ;;  %2984 = vst.msk [vmem:[%s4648_s12 + $0x180] sm:$0xf] %vm2887_vm2, %v2855_v33  ;;  %v1256_v45 = vadd.f32 %v5737_v37, %v1255_v55  ;;  %3268 = vrot.lane.b32.xlu2 %v2821_v36, %s4392_s13  ;;  %v2711_v17 = vld [vmem:[#allocation2 + $0x280] sm:$0xff] }
 0x2a7   : > { %v1959_v30 = vadd.f32 %v1863_v27, %v1721_v19  ;;  %v1830_v31 = vld [vmem:[#allocation2 + $0x208] sm:$0xff]  ;;  %2616 = vst.msk [vmem:[#allocation2 + $0x288] sm:$0xff] %vm1410_vm1, %v2520_v43  ;;  %v2839_v63 = vpack.c.bf16 %v2711_v17, %v2711_v17  ;;  %v2426_v19 = vld [vmem:[#allocation2 + $0x298] sm:$0xff]  ;;  %v1865_v17 = vld [vmem:[#allocation2 + $0x320] sm:$0xff] }
 0x2a8   : > { %v1926_v47 = vadd.f32 %v1830_v31, %v5263_v13  ;;  %1477 = vst.msk [vmem:[#allocation2 + $0x210] sm:$0xff] %vm1410_vm1, %v1256_v45  ;;  %v2728_v18 = vld [vmem:[#allocation2 + $0x308] sm:$0xff]  ;;  %v3377_v50 = vpop.permute.xlu2 %3376  ;;  %v3241_v13 = vpop.permute.xlu0 %3240  ;;  %v3730_v45 = vrot.slane %v3729_v8, 1 }
 0x2a9   : > { %v2407_v26 = vld [vmem:[#allocation2 + $0x200] sm:$0xff]  ;;  %2055 = vst.msk [vmem:[#allocation2 + $0x310] sm:$0xff] %vm1410_vm1, %v1959_v30  ;;  %v2856_v54 = vpack.c.bf16 %v2728_v18, %v2728_v18  ;;  %v3871_v0 = vsel %vm3662_vm3, %v2728_v18, 0.0 }
 0x2aa   : > { %2022 = vst.msk [vmem:[#allocation2 + $0x208] sm:$0xff] %vm1410_vm1, %v1926_v47  ;;  %v2503_v10 = vadd.f32 %v2407_v26, %v2263_v58  ;;  %v3872_v4 = vadd.f32 %v3871_v0, %v3870_v61 }
 0x2ab   : > { %2950 = vst.msk [vmem:[%s4648_s12 + $0xf8] sm:$0xf] %vm2887_vm2, %v2821_v36  ;;  %3338 = vrot.lane.b32.xlu1 %v2856_v54, %s4392_s13  ;;  %v2694_v34 = vld [vmem:[#allocation2 + $0x1f8] sm:$0xff] }
 0x2ac   : > { %2599 = vst.msk [vmem:[#allocation2 + $0x200] sm:$0xff] %vm1410_vm1, %v2503_v10  ;;  %v2308_v6 = vpop.f32.mrf.mxu3  ;;  %v2822_v23 = vpack.c.bf16 %v2694_v34, %v2694_v34  ;;  %v3793_v15 = vsel %vm3662_vm3, %v2694_v34, 0.0  ;;  %v3731_v10 = vadd.f32 %v3730_v45, %v3729_v8 }
 0x2ad   : > { %3644 = vst.msk [vmem:[%s4933_s16 + $0x1d0] sm:$0xf] %vm2887_vm2, %v3377_v50  ;;  %v2521_v29 = vadd.f32 %v2425_v60, %v2308_v6  ;;  %v1257_v49 = vpop.f32.mrf.mxu0  ;;  %v3794_v16 = vadd.f32 %v3793_v15, %v3792_v38  ;;  %v2268_v26 = vpop.f32.mrf.mxu2 }
 0x2ae   : > { %v1723_v3 = vpop.f32.mrf.mxu1  ;;  %3576 = vst.msk [vmem:[%s4933_s16 + $0xc0] sm:$0xf] %vm2887_vm2, %v3241_v13  ;;  %v1258_v46 = vadd.f32 %v5737_v37, %v1257_v49  ;;  %3304 = vrot.lane.b32.xlu2 %v2839_v63, %s4392_s13  ;;  %3270 = vrot.lane.b32.xlu0 %v2822_v23, %s4392_s13  ;;  %v2712_v36 = vld [vmem:[#allocation2 + $0x288] sm:$0xff] }
 0x2af   : > { %v1831_v51 = vld [vmem:[#allocation2 + $0x210] sm:$0xff]  ;;  %2985 = vst.msk [vmem:[%s4648_s12 + $0x184] sm:$0xf] %vm2887_vm2, %v2856_v54  ;;  %v1960_v2 = vadd.f32 %v1864_v24, %v1723_v3  ;;  %v3795_v20 = vrot.slane %v3794_v16, 4  ;;  %v2840_v25 = vpack.c.bf16 %v2712_v36, %v2712_v36 }
 0x2b0   : > { %v1927_v12 = vadd.f32 %v1831_v51, %v5279_v53  ;;  %2617 = vst.msk [vmem:[#allocation2 + $0x290] sm:$0xff] %vm1410_vm1, %v2521_v29  ;;  %v2729_v33 = vld [vmem:[#allocation2 + $0x310] sm:$0xff]  ;;  %v3243_v53 = vpop.permute.xlu1 %3242  ;;  %v3373_v43 = vpop.permute.xlu0 %3372 }
 0x2b1   : > { %v2408_v59 = vld [vmem:[#allocation2 + $0x208] sm:$0xff]  ;;  %1478 = vst.msk [vmem:[#allocation2 + $0x218] sm:$0xff] %vm1410_vm1, %v1258_v46  ;;  %v3796_v58 = vadd.f32 %v3795_v20, %v3794_v16  ;;  %v3873_v44 = vsel %vm3662_vm3, %v2729_v33, 0.0  ;;  %v2857_v27 = vpack.c.bf16 %v2729_v33, %v2729_v33  ;;  %v2427_v20 = vld [vmem:[#allocation2 + $0x2a0] sm:$0xff] }
 0x2b2   : > { %2023 = vst.msk [vmem:[#allocation2 + $0x210] sm:$0xff] %vm1410_vm1, %v1927_v12  ;;  %v2504_v7 = vadd.f32 %v2408_v59, %v2265_v40  ;;  %v3874_v22 = vadd.f32 %v3873_v44, %v3872_v4 }
 0x2b3   : > { %2056 = vst.msk [vmem:[#allocation2 + $0x318] sm:$0xff] %vm1410_vm1, %v1960_v2  ;;  %v3797_v14 = vrot.slane %v3796_v58, 2  ;;  %v2695_v57 = vld [vmem:[#allocation2 + $0x200] sm:$0xff] }
 0x2b4   : > { %2600 = vst.msk [vmem:[#allocation2 + $0x208] sm:$0xff] %vm1410_vm1, %v2504_v7  ;;  %v2310_v55 = vpop.f32.mrf.mxu3  ;;  %v2823_v38 = vpack.c.bf16 %v2695_v57, %v2695_v57 }
 0x2b5   : > { %2968 = vst.msk [vmem:[%s4648_s12 + $0x140] sm:$0xf] %vm2887_vm2, %v2839_v63  ;;  %v3798_v30 = vadd.f32 %v3797_v14, %v3796_v58  ;;  %v2522_v31 = vadd.f32 %v2426_v19, %v2310_v55  ;;  %v1260_v47 = vpop.f32.mrf.mxu0  ;;  %v2270_v59 = vpop.f32.mrf.mxu2  ;;  %v1866_v14 = vld [vmem:[#allocation2 + $0x328] sm:$0xff] }
 0x2b6   : > { %v1726_v18 = vpop.f32.mrf.mxu1  ;;  %2951 = vst.msk [vmem:[%s4648_s12 + $0xfc] sm:$0xf] %vm2887_vm2, %v2822_v23  ;;  %v1261_v61 = vadd.f32 %v5737_v37, %v1260_v47  ;;  %3340 = vrot.lane.b32.xlu2 %v2857_v27, %s4392_s13  ;;  %3272 = vrot.lane.b32.xlu1 %v2823_v38, %s4392_s13  ;;  %v3801_v23 = vsel %vm3662_vm3, %v2695_v57, 0.0 }
 0x2b7   : > { %v3799_v54 = vrot.slane %v3798_v30, 1  ;;  %3577 = vst.msk [vmem:[%s4933_s16 + $0xc4] sm:$0xf] %vm2887_vm2, %v3243_v53  ;;  %3306 = vrot.lane.b32.xlu0 %v2840_v25, %s4392_s13  ;;  %v1961_v34 = vadd.f32 %v1865_v17, %v1726_v18  ;;  %v2713_v40 = vld [vmem:[#allocation2 + $0x290] sm:$0xff] }
 0x2b8   : > { %v1832_v0 = vld [vmem:[#allocation2 + $0x218] sm:$0xff]  ;;  %3642 = vst.msk [vmem:[%s4933_s16 + $0x1c8] sm:$0xf] %vm2887_vm2, %v3373_v43  ;;  %v2841_v3 = vpack.c.bf16 %v2713_v40, %v2713_v40  ;;  %v3251_v2 = vpop.permute.xlu2 %3250  ;;  %v3375_v33 = vpop.permute.xlu1 %3374 }
 0x2b9   : > { %v1928_v50 = vadd.f32 %v1832_v0, %v5298_v39  ;;  %v3800_v13 = vadd.f32 %v3799_v54, %v3798_v30  ;;  %v2409_v4 = vld [vmem:[#allocation2 + $0x210] sm:$0xff]  ;;  %2618 = vst.msk [vmem:[#allocation2 + $0x298] sm:$0xff] %vm1410_vm1, %v2522_v31 }
 0x2ba   : > { %v2505_v6 = vadd.f32 %v2409_v4, %v2268_v26  ;;  %1479 = vst.msk [vmem:[#allocation2 + $0x220] sm:$0xff] %vm1410_vm1, %v1261_v61  ;;  %v2730_v60 = vld [vmem:[#allocation2 + $0x318] sm:$0xff]  ;;  %v2428_v26 = vld [vmem:[#allocation2 + $0x2a8] sm:$0xff] }
 0x2bb   : > { %2024 = vst.msk [vmem:[#allocation2 + $0x218] sm:$0xff] %vm1410_vm1, %v1928_v50  ;;  %v5943_v63 = vsel %vm3943_vm4, %v3800_v13, %v3731_v10  ;;  %v2696_v15 = vld [vmem:[#allocation2 + $0x208] sm:$0xff]  ;;  %v3875_v39 = vsel %vm3662_vm3, %v2730_v60, 0.0  ;;  %v2858_v51 = vpack.c.bf16 %v2730_v60, %v2730_v60 }
 0x2bc   : > { %2601 = vst.msk [vmem:[#allocation2 + $0x210] sm:$0xff] %vm1410_vm1, %v2505_v6  ;;  %v2313_v1 = vpop.f32.mrf.mxu3  ;;  %v2824_v29 = vpack.c.bf16 %v2696_v15, %v2696_v15  ;;  %v3802_v49 = vsel %vm3662_vm3, %v2696_v15, 0.0  ;;  %v3876_v16 = vadd.f32 %v3875_v39, %v3874_v22 }
 0x2bd   : > { %2057 = vst.msk [vmem:[#allocation2 + $0x320] sm:$0xff] %vm1410_vm1, %v1961_v34  ;;  %v1262_v46 = vpop.f32.mrf.mxu0  ;;  %v3803_v24 = vadd.f32 %v3802_v49, %v3801_v23  ;;  %v2523_v8 = vadd.f32 %v2427_v20, %v2313_v1  ;;  %v2273_v17 = vpop.f32.mrf.mxu2  ;;  %v1867_v34 = vld [vmem:[#allocation2 + $0x330] sm:$0xff] }
 0x2be   : > { %2986 = vst.msk [vmem:[%s4648_s12 + $0x188] sm:$0xf] %vm2887_vm2, %v2857_v27  ;;  %v1728_v12 = vpop.f32.mrf.mxu1  ;;  %3274 = vrot.lane.b32.xlu2 %v2824_v29, %s4392_s13  ;;  %3308 = vrot.lane.b32.xlu1 %v2841_v3, %s4392_s13  ;;  %v1263_v36 = vadd.f32 %v5737_v37, %v1262_v46 }
 0x2bf   : > { %2952 = vst.msk [vmem:[%s4648_s12 + $0x100] sm:$0xf] %vm2887_vm2, %v2823_v38  ;;  %3342 = vrot.lane.b32.xlu0 %v2858_v51, %s4392_s13  ;;  %v1962_v57 = vadd.f32 %v1866_v14, %v1728_v12 }
 0x2c0   : > { %2969 = vst.msk [vmem:[%s4648_s12 + $0x144] sm:$0xf] %vm2887_vm2, %v2840_v25  ;;  %v2714_v44 = vld [vmem:[#allocation2 + $0x298] sm:$0xff]  ;;  %v3383_v25 = vpop.permute.xlu2 %3382  ;;  %v3247_v54 = vpop.permute.xlu0 %3246 }
 0x2c1   : > { %v1833_v58 = vld [vmem:[#allocation2 + $0x220] sm:$0xff]  ;;  %3581 = vst.msk [vmem:[%s4933_s16 + $0xd4] sm:$0xf] %vm2887_vm2, %v3251_v2  ;;  %v2842_v55 = vpack.c.bf16 %v2714_v44, %v2714_v44  ;;  %v2429_v2 = vld [vmem:[#allocation2 + $0x2b0] sm:$0xff] }
 0x2c2   : > { %v1929_v7 = vadd.f32 %v1833_v58, %v5309_v41  ;;  %3643 = vst.msk [vmem:[%s4933_s16 + $0x1cc] sm:$0xf] %vm2887_vm2, %v3375_v33  ;;  %v2410_v22 = vld [vmem:[#allocation2 + $0x218] sm:$0xff] }
 0x2c3   : > { %v2506_v53 = vadd.f32 %v2410_v22, %v2270_v59  ;;  %2619 = vst.msk [vmem:[#allocation2 + $0x2a0] sm:$0xff] %vm1410_vm1, %v2523_v8  ;;  %v2697_v43 = vld [vmem:[#allocation2 + $0x210] sm:$0xff] }
 0x2c4   : > { %2025 = vst.msk [vmem:[#allocation2 + $0x220] sm:$0xff] %vm1410_vm1, %v1929_v7  ;;  %v2731_v19 = vld [vmem:[#allocation2 + $0x320] sm:$0xff]  ;;  %v2825_v27 = vpack.c.bf16 %v2697_v43, %v2697_v43  ;;  %v3804_v38 = vsel %vm3662_vm3, %v2697_v43, 0.0  ;;  %v2315_v41 = vpop.f32.mrf.mxu3 }
 0x2c5   : > { %2602 = vst.msk [vmem:[#allocation2 + $0x218] sm:$0xff] %vm1410_vm1, %v2506_v53  ;;  %v2859_v45 = vpack.c.bf16 %v2731_v19, %v2731_v19  ;;  %v3877_v30 = vsel %vm3662_vm3, %v2731_v19, 0.0  ;;  %v3805_v31 = vadd.f32 %v3804_v38, %v3803_v24  ;;  %v1265_v47 = vpop.f32.mrf.mxu0  ;;  %v2524_v0 = vadd.f32 %v2428_v26, %v2315_v41  ;;  %v2275_v8 = vpop.f32.mrf.mxu2 }
 0x2c6   : > { %1480 = vst.msk [vmem:[#allocation2 + $0x228] sm:$0xff] %vm1410_vm1, %v1263_v36  ;;  %3310 = vrot.lane.b32.xlu2 %v2842_v55, %s4392_s13  ;;  %v3878_v18 = vadd.f32 %v3877_v30, %v3876_v16  ;;  %v1731_v61 = vpop.f32.mrf.mxu1  ;;  %v1266_v13 = vadd.f32 %v5737_v37, %v1265_v47  ;;  %v1868_v36 = vld [vmem:[#allocation2 + $0x338] sm:$0xff] }
 0x2c7   : > { %2058 = vst.msk [vmem:[#allocation2 + $0x328] sm:$0xff] %vm1410_vm1, %v1962_v57  ;;  %3344 = vrot.lane.b32.xlu1 %v2859_v45, %s4392_s13  ;;  %3276 = vrot.lane.b32.xlu0 %v2825_v27, %s4392_s13  ;;  %v1963_v60 = vadd.f32 %v1867_v34, %v1731_v61 }
 0x2c8   : > { %2953 = vst.msk [vmem:[%s4648_s12 + $0x104] sm:$0xf] %vm2887_vm2, %v2824_v29  ;;  %v3379_v12 = vpop.permute.xlu0 %3378 }
 0x2c9   : > { %2970 = vst.msk [vmem:[%s4648_s12 + $0x148] sm:$0xf] %vm2887_vm2, %v2841_v3 }
 0x2ca   : > { %2987 = vst.msk [vmem:[%s4648_s12 + $0x18c] sm:$0xf] %vm2887_vm2, %v2858_v51  ;;  %v5981_v10 = vld [vmem:[#allocation2 + $0x2a0] sm:$0xff]  ;;  %v3249_v51 = vpop.permute.xlu1 %3248 }
 0x2cb   : > { %3647 = vst.msk [vmem:[%s4933_s16 + $0x1dc] sm:$0xf] %vm2887_vm2, %v3383_v25  ;;  %v2411_v50 = vld [vmem:[#allocation2 + $0x220] sm:$0xff]  ;;  %v2843_v39 = vpack.c.bf16 %v5981_v10, %v5981_v10 }
 0x2cc   : > { %3579 = vst.msk [vmem:[%s4933_s16 + $0xcc] sm:$0xf] %vm2887_vm2, %v3247_v54  ;;  %v2507_v4 = vadd.f32 %v2411_v50, %v2273_v17  ;;  %v2698_v40 = vld [vmem:[#allocation2 + $0x218] sm:$0xff]  ;;  %v2318_v3 = vpop.f32.mrf.mxu3 }
 0x2cd   : > { %v1834_v6 = vld [vmem:[#allocation2 + $0x228] sm:$0xff]  ;;  %2620 = vst.msk [vmem:[#allocation2 + $0x2a8] sm:$0xff] %vm1410_vm1, %v2524_v0  ;;  %v2826_v23 = vpack.c.bf16 %v2698_v40, %v2698_v40  ;;  %v3806_v15 = vsel %vm3662_vm3, %v2698_v40, 0.0  ;;  %v2525_v33 = vadd.f32 %v2429_v2, %v2318_v3  ;;  %v2278_v54 = vpop.f32.mrf.mxu2  ;;  %v1869_v40 = vld [vmem:[#allocation2 + $0x340] sm:$0xff] }
 0x2ce   : > { %v1930_v1 = vadd.f32 %v1834_v6, %v5333_v42  ;;  %2603 = vst.msk [vmem:[#allocation2 + $0x220] sm:$0xff] %vm1410_vm1, %v2507_v4  ;;  %v2732_v29 = vld [vmem:[#allocation2 + $0x328] sm:$0xff]  ;;  %v3807_v49 = vadd.f32 %v3806_v15, %v3805_v31  ;;  %v1267_v42 = vpop.f32.mrf.mxu0  ;;  %v1733_v20 = vpop.f32.mrf.mxu1 }
 0x2cf   : > { %1481 = vst.msk [vmem:[#allocation2 + $0x230] sm:$0xff] %vm1410_vm1, %v1266_v13  ;;  %v2860_v16 = vpack.c.bf16 %v2732_v29, %v2732_v29  ;;  %v3879_v46 = vsel %vm3662_vm3, %v2732_v29, 0.0  ;;  %3278 = vrot.lane.b32.xlu1 %v2826_v23, %s4392_s13  ;;  %3312 = vrot.lane.b32.xlu0 %v2843_v39, %s4392_s13  ;;  %v1268_v59 = vadd.f32 %v5737_v37, %v1267_v42  ;;  %v2431_v42 = vld [vmem:[#allocation2 + $0x2c0] sm:$0xff] }
 0x2d0   : > { %2026 = vst.msk [vmem:[#allocation2 + $0x228] sm:$0xff] %vm1410_vm1, %v1930_v1  ;;  %v3880_v24 = vadd.f32 %v3879_v46, %v3878_v18  ;;  %v3257_v47 = vpop.permute.xlu2 %3256  ;;  %v2430_v18 = vld [vmem:[#allocation2 + $0x2b8] sm:$0xff] }
 0x2d1   : > { %2059 = vst.msk [vmem:[#allocation2 + $0x330] sm:$0xff] %vm1410_vm1, %v1963_v60  ;;  %3346 = vrot.lane.b32.xlu2 %v2860_v16, %s4392_s13 }
 0x2d2   : > { %2971 = vst.msk [vmem:[%s4648_s12 + $0x14c] sm:$0xf] %vm2887_vm2, %v2842_v55  ;;  %v1964_v55 = vadd.f32 %v1868_v36, %v1733_v20  ;;  %v3381_v26 = vpop.permute.xlu1 %3380 }
 0x2d3   : > { %2988 = vst.msk [vmem:[%s4648_s12 + $0x190] sm:$0xf] %vm2887_vm2, %v2859_v45 }
 0x2d4   : > { %2954 = vst.msk [vmem:[%s4648_s12 + $0x108] sm:$0xf] %vm2887_vm2, %v2825_v27  ;;  %v6008_v58 = vld [vmem:[#allocation2 + $0x2a8] sm:$0xff]  ;;  %v2320_v41 = vpop.f32.mrf.mxu3 }
 0x2d5   : > { %3580 = vst.msk [vmem:[%s4933_s16 + $0xd0] sm:$0xf] %vm2887_vm2, %v3249_v51  ;;  %v2699_v44 = vld [vmem:[#allocation2 + $0x220] sm:$0xff]  ;;  %v6014_v7 = vpack.c.bf16 %v6008_v58, %v6008_v58  ;;  %v2526_v61 = vadd.f32 %v2430_v18, %v2320_v41  ;;  %v2280_v20 = vpop.f32.mrf.mxu2 }
 0x2d6   : > { %v1835_v22 = vld [vmem:[#allocation2 + $0x230] sm:$0xff]  ;;  %3645 = vst.msk [vmem:[%s4933_s16 + $0x1d4] sm:$0xf] %vm2887_vm2, %v3379_v12  ;;  %v2827_v14 = vpack.c.bf16 %v2699_v44, %v2699_v44  ;;  %v3808_v53 = vsel %vm3662_vm3, %v2699_v44, 0.0  ;;  %v1270_v30 = vpop.f32.mrf.mxu0  ;;  %v1736_v25 = vpop.f32.mrf.mxu1 }
 0x2d7   : > { %v1931_v57 = vadd.f32 %v1835_v22, %v5348_v32  ;;  %v2412_v43 = vld [vmem:[#allocation2 + $0x228] sm:$0xff]  ;;  %2621 = vst.msk [vmem:[#allocation2 + $0x2b0] sm:$0xff] %vm1410_vm1, %v2525_v33  ;;  %v3809_v19 = vadd.f32 %v3808_v53, %v3807_v49  ;;  %3314 = vrot.lane.b32.xlu1 %v6014_v7, %s4392_s13  ;;  %v1271_v34 = vadd.f32 %v5737_v37, %v1270_v30 }
 0x2d8   : > { %v2508_v27 = vadd.f32 %v2412_v43, %v2275_v8  ;;  %1482 = vst.msk [vmem:[#allocation2 + $0x238] sm:$0xff] %vm1410_vm1, %v1268_v59  ;;  %v2733_v38 = vld [vmem:[#allocation2 + $0x330] sm:$0xff]  ;;  %v1965_v60 = vadd.f32 %v1869_v40, %v1736_v25  ;;  %v3389_v46 = vpop.permute.xlu2 %3388  ;;  %v3253_v51 = vpop.permute.xlu0 %3252  ;;  %v6073_v8 = vld [vmem:[%s6545_s2] ss:$0 sm:$0xff] }
 0x2d9   : > { %2027 = vst.msk [vmem:[#allocation2 + $0x230] sm:$0xff] %vm1410_vm1, %v1931_v57  ;;  %3280 = vrot.lane.b32.xlu2 %v2827_v14, %s4392_s13  ;;  %v2861_v32 = vpack.c.bf16 %v2733_v38, %v2733_v38  ;;  %v3881_v45 = vsel %vm3662_vm3, %v2733_v38, 0.0 }
 0x2da   : > { %2604 = vst.msk [vmem:[#allocation2 + $0x228] sm:$0xff] %vm1410_vm1, %v2508_v27  ;;  %v3882_v31 = vadd.f32 %v3881_v45, %v3880_v24 }
 0x2db   : > { %2060 = vst.msk [vmem:[#allocation2 + $0x338] sm:$0xff] %vm1410_vm1, %v1964_v55  ;;  %3348 = vrot.lane.b32.xlu0 %v2861_v32, %s4392_s13 }
 0x2dc   : > { %2989 = vst.msk [vmem:[%s4648_s12 + $0x194] sm:$0xf] %vm2887_vm2, %v2860_v16  ;;  %v2323_v37 = vpop.f32.mrf.mxu3 }
 0x2dd   : > { %2955 = vst.msk [vmem:[%s4648_s12 + $0x10c] sm:$0xf] %vm2887_vm2, %v2826_v23  ;;  %v2527_v2 = vadd.f32 %v2431_v42, %v2323_v37 }
 0x2de   : > { %2972 = vst.msk [vmem:[%s4648_s12 + $0x150] sm:$0xf] %vm2887_vm2, %v2843_v39  ;;  %v6036_v0 = vld [vmem:[#allocation2 + $0x2b0] sm:$0xff]  ;;  %v1272_v3 = vpop.f32.mrf.mxu0  ;;  %v1738_v24 = vpop.f32.mrf.mxu1 }
 0x2df   : > { %v1836_v17 = vld [vmem:[#allocation2 + $0x238] sm:$0xff]  ;;  %3584 = vst.msk [vmem:[%s4933_s16 + $0xe0] sm:$0xf] %vm2887_vm2, %v3257_v47  ;;  %v6042_v50 = vpack.c.bf16 %v6036_v0, %v6036_v0  ;;  %v1273_v59 = vadd.f32 %v6073_v8, %v1272_v3 }
 0x2e0   : > { %v1932_v13 = vadd.f32 %v1836_v17, %v5376_v35  ;;  %3646 = vst.msk [vmem:[%s4933_s16 + $0x1d8] sm:$0xf] %vm2887_vm2, %v3381_v26  ;;  %v2413_v4 = vld [vmem:[#allocation2 + $0x230] sm:$0xff]  ;;  %v3255_v30 = vpop.permute.xlu1 %3254  ;;  %v3385_v18 = vpop.permute.xlu0 %3384 }
 0x2e1   : > { %v2509_v6 = vadd.f32 %v2413_v4, %v2278_v54  ;;  %2622 = vst.msk [vmem:[#allocation2 + $0x2b8] sm:$0xff] %vm1410_vm1, %v2526_v61  ;;  %3316 = vrot.lane.b32.xlu2 %v6042_v50, %s4392_s13  ;;  %v2700_v23 = vld [vmem:[#allocation2 + $0x228] sm:$0xff]  ;;  %v2283_v26 = vpop.f32.mrf.mxu2  ;;  %v1871_v4 = vld [vmem:[#allocation2 + $0x350] sm:$0xff] }
 0x2e2   : > { %2028 = vst.msk [vmem:[#allocation2 + $0x238] sm:$0xff] %vm1410_vm1, %v1932_v13  ;;  %v2734_v15 = vld [vmem:[#allocation2 + $0x338] sm:$0xff]  ;;  %v2828_v39 = vpack.c.bf16 %v2700_v23, %v2700_v23  ;;  %v3810_v35 = vsel %vm3662_vm3, %v2700_v23, 0.0 }
 0x2e3   : > { %2605 = vst.msk [vmem:[#allocation2 + $0x230] sm:$0xff] %vm1410_vm1, %v2509_v6  ;;  %v2862_v1 = vpack.c.bf16 %v2734_v15, %v2734_v15  ;;  %v3883_v29 = vsel %vm3662_vm3, %v2734_v15, 0.0  ;;  %v3811_v49 = vadd.f32 %v3810_v35, %v3809_v19 }
 0x2e4   : > { %1483 = vst.msk [vmem:[#allocation2 + $0x240] sm:$0xff] %vm1410_vm1, %v1271_v34  ;;  %v3884_v16 = vadd.f32 %v3883_v29, %v3882_v31  ;;  %3282 = vrot.lane.b32.xlu0 %v2828_v39, %s4392_s13  ;;  %v2325_v38 = vpop.f32.mrf.mxu3  ;;  %v2432_v31 = vld [vmem:[#allocation2 + $0x2c8] sm:$0xff] }
 0x2e5   : > { %2061 = vst.msk [vmem:[#allocation2 + $0x340] sm:$0xff] %vm1410_vm1, %v1965_v60  ;;  %3350 = vrot.lane.b32.xlu1 %v2862_v1, %s4392_s13  ;;  %v2528_v25 = vadd.f32 %v2432_v31, %v2325_v38 }
 0x2e6   : > { %2956 = vst.msk [vmem:[%s4648_s12 + $0x110] sm:$0xf] %vm2887_vm2, %v2827_v14  ;;  %v1741_v47 = vpop.f32.mrf.mxu1 }
 0x2e7   : > { %2973 = vst.msk [vmem:[%s4648_s12 + $0x154] sm:$0xf] %vm2887_vm2, %v6014_v7  ;;  %v1870_v7 = vld [vmem:[#allocation2 + $0x348] sm:$0xff]  ;;  %v1967_v60 = vadd.f32 %v1871_v4, %v1741_v47 }
 0x2e8   : > { %2990 = vst.msk [vmem:[%s4648_s12 + $0x198] sm:$0xf] %vm2887_vm2, %v2861_v32  ;;  %v6066_v12 = vld [vmem:[#allocation2 + $0x2b8] sm:$0xff]  ;;  %v1966_v53 = vadd.f32 %v1870_v7, %v1738_v24  ;;  %v3263_v29 = vpop.permute.xlu2 %3262 }
 0x2e9   : > { %3650 = vst.msk [vmem:[%s4933_s16 + $0x1e8] sm:$0xf] %vm2887_vm2, %v3389_v46  ;;  %v2414_v33 = vld [vmem:[#allocation2 + $0x238] sm:$0xff]  ;;  %v6080_v36 = vpack.c.bf16 %v6066_v12, %v6066_v12  ;;  %v2285_v42 = vpop.f32.mrf.mxu2 }
 0x2ea   : > { %3582 = vst.msk [vmem:[%s4933_s16 + $0xd8] sm:$0xf] %vm2887_vm2, %v3253_v51  ;;  %v2510_v44 = vadd.f32 %v2414_v33, %v2280_v20  ;;  %v2701_v22 = vld [vmem:[#allocation2 + $0x230] sm:$0xff] }
 0x2eb   : > { %v1837_v14 = vld [vmem:[#allocation2 + $0x240] sm:$0xff]  ;;  %2623 = vst.msk [vmem:[#allocation2 + $0x2c0] sm:$0xff] %vm1410_vm1, %v2527_v2  ;;  %v2829_v57 = vpack.c.bf16 %v2701_v22, %v2701_v22  ;;  %v3812_v43 = vsel %vm3662_vm3, %v2701_v22, 0.0 }
 0x2ec   : > { %v1933_v55 = vadd.f32 %v1837_v14, %v5391_v48  ;;  %2606 = vst.msk [vmem:[#allocation2 + $0x238] sm:$0xff] %vm1410_vm1, %v2510_v44  ;;  %v2735_v19 = vld [vmem:[#allocation2 + $0x340] sm:$0xff]  ;;  %v6086_v27 = vadd.f32 %v3812_v43, %v3811_v49  ;;  %3318 = vrot.lane.b32.xlu0 %v6080_v36, %s4392_s13  ;;  %v1275_v48 = vpop.f32.mrf.mxu0  ;;  %v2433_v49 = vld [vmem:[#allocation2 + $0x2d0] sm:$0xff]  ;;  %v1872_v44 = vld [vmem:[#allocation2 + $0x358] sm:$0xff] }
 0x2ed   : > { %1484 = vst.msk [vmem:[#allocation2 + $0x248] sm:$0xff] %vm1410_vm1, %v1273_v59  ;;  %v2863_v41 = vpack.c.bf16 %v2735_v19, %v2735_v19  ;;  %v3885_v32 = vsel %vm3662_vm3, %v2735_v19, 0.0  ;;  %3284 = vrot.lane.b32.xlu1 %v2829_v57, %s4392_s13  ;;  %v1276_v61 = vadd.f32 %v6073_v8, %v1275_v48 }
 0x2ee   : > { %2029 = vst.msk [vmem:[#allocation2 + $0x240] sm:$0xff] %vm1410_vm1, %v1933_v55  ;;  %v3886_v45 = vadd.f32 %v3885_v32, %v3884_v16  ;;  %v1743_v3 = vpop.f32.mrf.mxu1  ;;  %v3387_v16 = vpop.permute.xlu1 %3386  ;;  %v2434_v55 = vld [vmem:[#allocation2 + $0x2d8] sm:$0xff] }
 0x2ef   : > { %2062 = vst.msk [vmem:[#allocation2 + $0x348] sm:$0xff] %vm1410_vm1, %v1966_v53  ;;  %3352 = vrot.lane.b32.xlu2 %v2863_v41, %s4392_s13  ;;  %v1968_v22 = vadd.f32 %v1872_v44, %v1743_v3  ;;  %v1874_v3 = vld [vmem:[#allocation2 + $0x368] sm:$0xff] }
 0x2f0   : > { %2974 = vst.msk [vmem:[%s4648_s12 + $0x158] sm:$0xf] %vm2887_vm2, %v6042_v50  ;;  %v3259_v19 = vpop.permute.xlu0 %3258 }
 0x2f1   : > { %2991 = vst.msk [vmem:[%s4648_s12 + $0x19c] sm:$0xf] %vm2887_vm2, %v2862_v1  ;;  %v2288_v48 = vpop.f32.mrf.mxu2 }
 0x2f2   : > { %2957 = vst.msk [vmem:[%s4648_s12 + $0x114] sm:$0xf] %vm2887_vm2, %v2828_v39  ;;  %v6104_v54 = vld [vmem:[#allocation2 + $0x2c0] sm:$0xff]  ;;  %v2328_v39 = vpop.f32.mrf.mxu3 }
 0x2f3   : > { %3583 = vst.msk [vmem:[%s4933_s16 + $0xdc] sm:$0xf] %vm2887_vm2, %v3255_v30  ;;  %v6108_v17 = vld [vmem:[#allocation2 + $0x238] sm:$0xff]  ;;  %v2847_v50 = vpack.c.bf16 %v6104_v54, %v6104_v54  ;;  %v2529_v46 = vadd.f32 %v2433_v49, %v2328_v39 }
 0x2f4   : > { %v1838_v13 = vld [vmem:[#allocation2 + $0x248] sm:$0xff]  ;;  %3648 = vst.msk [vmem:[%s4933_s16 + $0x1e0] sm:$0xf] %vm2887_vm2, %v3385_v18  ;;  %v2830_v34 = vpack.c.bf16 %v6108_v17, %v6108_v17  ;;  %v1277_v37 = vpop.f32.mrf.mxu0 }
 0x2f5   : > { %v1934_v40 = vadd.f32 %v1838_v13, %v5414_v9  ;;  %v2415_v6 = vld [vmem:[#allocation2 + $0x240] sm:$0xff]  ;;  %2624 = vst.msk [vmem:[#allocation2 + $0x2c8] sm:$0xff] %vm1410_vm1, %v2528_v25  ;;  %3320 = vrot.lane.b32.xlu1 %v2847_v50, %s4392_s13  ;;  %v1278_v59 = vadd.f32 %v6073_v8, %v1277_v37 }
 0x2f6   : > { %v2511_v23 = vadd.f32 %v2415_v6, %v2283_v26  ;;  %1485 = vst.msk [vmem:[#allocation2 + $0x250] sm:$0xff] %vm1410_vm1, %v1276_v61  ;;  %v2736_v15 = vld [vmem:[#allocation2 + $0x348] sm:$0xff] }
 0x2f7   : > { %2030 = vst.msk [vmem:[#allocation2 + $0x248] sm:$0xff] %vm1410_vm1, %v1934_v40  ;;  %3286 = vrot.lane.b32.xlu2 %v2830_v34, %s4392_s13  ;;  %v2864_v35 = vpack.c.bf16 %v2736_v15, %v2736_v15  ;;  %v3887_v9 = vsel %vm3662_vm3, %v2736_v15, 0.0 }
 0x2f8   : > { %2607 = vst.msk [vmem:[#allocation2 + $0x240] sm:$0xff] %vm1410_vm1, %v2511_v23  ;;  %v6124_v1 = vadd.f32 %v3887_v9, %v3886_v45  ;;  %v1873_v45 = vld [vmem:[#allocation2 + $0x360] sm:$0xff]  ;;  %v3391_v15 = vpop.permute.xlu0 %3390 }
 0x2f9   : > { %2063 = vst.msk [vmem:[#allocation2 + $0x350] sm:$0xff] %vm1410_vm1, %v1967_v60  ;;  %3354 = vrot.lane.b32.xlu0 %v2864_v35, %s4392_s13  ;;  %v3261_v60 = vpop.permute.xlu1 %3260  ;;  %v2435_v23 = vld [vmem:[#allocation2 + $0x2e0] sm:$0xff] }
 0x2fa   : > { %2992 = vst.msk [vmem:[%s4648_s12 + $0x1a0] sm:$0xf] %vm2887_vm2, %v2863_v41  ;;  %v2330_v53 = vpop.f32.mrf.mxu3  ;;  %v1746_v41 = vpop.f32.mrf.mxu1 }
 0x2fb   : > { %2958 = vst.msk [vmem:[%s4648_s12 + $0x118] sm:$0xf] %vm2887_vm2, %v2829_v57  ;;  %v2530_v38 = vadd.f32 %v2434_v55, %v2330_v53  ;;  %v1969_v47 = vadd.f32 %v1873_v45, %v1746_v41  ;;  %v1875_v45 = vld [vmem:[#allocation2 + $0x370] sm:$0xff] }
 0x2fc   : > { %2975 = vst.msk [vmem:[%s4648_s12 + $0x15c] sm:$0xf] %vm2887_vm2, %v6080_v36  ;;  %v6135_v24 = vld [vmem:[#allocation2 + $0x2c8] sm:$0xff]  ;;  %v1280_v43 = vpop.f32.mrf.mxu0 }
 0x2fd   : > { %v1839_v51 = vld [vmem:[#allocation2 + $0x250] sm:$0xff]  ;;  %3587 = vst.msk [vmem:[%s4933_s16 + $0xec] sm:$0xf] %vm2887_vm2, %v3263_v29  ;;  %v2848_v2 = vpack.c.bf16 %v6135_v24, %v6135_v24  ;;  %v1281_v32 = vadd.f32 %v6073_v8, %v1280_v43  ;;  %v2290_v29 = vpop.f32.mrf.mxu2 }
 0x2fe   : > { %v1935_v20 = vadd.f32 %v1839_v51, %v5429_v28  ;;  %3649 = vst.msk [vmem:[%s4933_s16 + $0x1e4] sm:$0xf] %vm2887_vm2, %v3387_v16  ;;  %v2416_v33 = vld [vmem:[#allocation2 + $0x248] sm:$0xff] }
 0x2ff   : > { %v2512_v7 = vadd.f32 %v2416_v33, %v2285_v42  ;;  %2625 = vst.msk [vmem:[#allocation2 + $0x2d0] sm:$0xff] %vm1410_vm1, %v2529_v46  ;;  %3322 = vrot.lane.b32.xlu2 %v2848_v2, %s4392_s13  ;;  %v6147_v36 = vld [vmem:[#allocation2 + $0x240] sm:$0xff] }
 0x300   : > { %2031 = vst.msk [vmem:[#allocation2 + $0x250] sm:$0xff] %vm1410_vm1, %v1935_v20  ;;  %v6150_v14 = vld [vmem:[#allocation2 + $0x350] sm:$0xff]  ;;  %v2831_v28 = vpack.c.bf16 %v6147_v36, %v6147_v36 }
 0x301   : > { %2608 = vst.msk [vmem:[#allocation2 + $0x248] sm:$0xff] %vm1410_vm1, %v2512_v7  ;;  %v2865_v57 = vpack.c.bf16 %v6150_v14, %v6150_v14  ;;  %v3393_v53 = vpop.permute.xlu1 %3392 }
 0x302   : > { %1486 = vst.msk [vmem:[#allocation2 + $0x258] sm:$0xff] %vm1410_vm1, %v1278_v59  ;;  %3288 = vrot.lane.b32.xlu0 %v2831_v28, %s4392_s13 }
 0x303   : > { %2064 = vst.msk [vmem:[#allocation2 + $0x358] sm:$0xff] %vm1410_vm1, %v1968_v22  ;;  %3356 = vrot.lane.b32.xlu1 %v2865_v57, %s4392_s13 }
 0x304   : > { %2959 = vst.msk [vmem:[%s4648_s12 + $0x11c] sm:$0xf] %vm2887_vm2, %v2830_v34  ;;  %v2333_v34 = vpop.f32.mrf.mxu3  ;;  %v1282_v6 = vpop.f32.mrf.mxu0 }
 0x305   : > { %2976 = vst.msk [vmem:[%s4648_s12 + $0x160] sm:$0xf] %vm2887_vm2, %v2847_v50  ;;  %v2531_v39 = vadd.f32 %v2435_v23, %v2333_v34  ;;  %v1283_v49 = vadd.f32 %v6073_v8, %v1282_v6  ;;  %v2437_v6 = vld [vmem:[#allocation2 + $0x2f0] sm:$0xff] }
 0x306   : > { %2993 = vst.msk [vmem:[%s4648_s12 + $0x1a4] sm:$0xf] %vm2887_vm2, %v2864_v35  ;;  %v6168_v30 = vld [vmem:[#allocation2 + $0x2d0] sm:$0xff]  ;;  %v1748_v35 = vpop.f32.mrf.mxu1 }
 0x307   : > { %3585 = vst.msk [vmem:[%s4933_s16 + $0xe4] sm:$0xf] %vm2887_vm2, %v3259_v19  ;;  %v2417_v31 = vld [vmem:[#allocation2 + $0x250] sm:$0xff]  ;;  %v2849_v26 = vpack.c.bf16 %v6168_v30, %v6168_v30  ;;  %v1970_v46 = vadd.f32 %v1874_v3, %v1748_v35  ;;  %v2293_v19 = vpop.f32.mrf.mxu2 }
 0x308   : > { %v2513_v18 = vadd.f32 %v2417_v31, %v2288_v48  ;;  %2626 = vst.msk [vmem:[#allocation2 + $0x2d8] sm:$0xff] %vm1410_vm1, %v2530_v38  ;;  %v6173_v25 = vld [vmem:[#allocation2 + $0x248] sm:$0xff] }
 0x309   : > { %v1840_v61 = vld [vmem:[#allocation2 + $0x258] sm:$0xff]  ;;  %1487 = vst.msk [vmem:[#allocation2 + $0x260] sm:$0xff] %vm1410_vm1, %v1281_v32  ;;  %v2832_v50 = vpack.c.bf16 %v6173_v25, %v6173_v25 }
 0x30a   : > { %v1936_v13 = vadd.f32 %v1840_v61, %v5452_v11  ;;  %2609 = vst.msk [vmem:[#allocation2 + $0x250] sm:$0xff] %vm1410_vm1, %v2513_v18  ;;  %v6182_v4 = vld [vmem:[#allocation2 + $0x358] sm:$0xff]  ;;  %3324 = vrot.lane.b32.xlu0 %v2849_v26, %s4392_s13  ;;  %v3269_v11 = vpop.permute.xlu2 %3268 }
 0x30b   : > { %2065 = vst.msk [vmem:[#allocation2 + $0x360] sm:$0xff] %vm1410_vm1, %v1969_v47  ;;  %v2866_v40 = vpack.c.bf16 %v6182_v4, %v6182_v4  ;;  %3290 = vrot.lane.b32.xlu1 %v2832_v50, %s4392_s13 }
 0x30c   : > { %2032 = vst.msk [vmem:[#allocation2 + $0x258] sm:$0xff] %vm1410_vm1, %v1936_v13  ;;  %v2335_v44 = vpop.f32.mrf.mxu3  ;;  %v1285_v7 = vpop.f32.mrf.mxu0 }
 0x30d   : > { %2977 = vst.msk [vmem:[%s4648_s12 + $0x164] sm:$0xf] %vm2887_vm2, %v2848_v2  ;;  %3358 = vrot.lane.b32.xlu2 %v2866_v40, %s4392_s13  ;;  %v1286_v48 = vadd.f32 %v6073_v8, %v1285_v7 }
 0x30e   : > { %2994 = vst.msk [vmem:[%s4648_s12 + $0x1a8] sm:$0xf] %vm2887_vm2, %v2865_v57  ;;  %v1751_v43 = vpop.f32.mrf.mxu1 }
 0x30f   : > { %2960 = vst.msk [vmem:[%s4648_s12 + $0x120] sm:$0xf] %vm2887_vm2, %v2831_v28  ;;  %v6197_v9 = vld [vmem:[#allocation2 + $0x2d8] sm:$0xff]  ;;  %v2436_v28 = vld [vmem:[#allocation2 + $0x2e8] sm:$0xff]  ;;  %v1971_v18 = vadd.f32 %v1875_v45, %v1751_v43  ;;  %v2295_v35 = vpop.f32.mrf.mxu2 }
 0x310   : > { %v1841_v37 = vld [vmem:[#allocation2 + $0x260] sm:$0xff]  ;;  %3586 = vst.msk [vmem:[%s4933_s16 + $0xe8] sm:$0xf] %vm2887_vm2, %v3261_v60  ;;  %v2850_v51 = vpack.c.bf16 %v6197_v9, %v6197_v9  ;;  %v2532_v57 = vadd.f32 %v2436_v28, %v2335_v44  ;;  %v2438_v28 = vld [vmem:[#allocation2 + $0x2f8] sm:$0xff] }
 0x311   : > { %v1937_v16 = vadd.f32 %v1841_v37, %v5467_v52  ;;  %3651 = vst.msk [vmem:[%s4933_s16 + $0x1ec] sm:$0xf] %vm2887_vm2, %v3391_v15  ;;  %v6205_v42 = vld [vmem:[#allocation2 + $0x250] sm:$0xff] }
 0x312   : > { %2627 = vst.msk [vmem:[#allocation2 + $0x2e0] sm:$0xff] %vm1410_vm1, %v2531_v39  ;;  %v2833_v2 = vpack.c.bf16 %v6205_v42, %v6205_v42  ;;  %v6212_v20 = vld [vmem:[#allocation2 + $0x360] sm:$0xff]  ;;  %v3305_v22 = vpop.permute.xlu2 %3304 }
 0x313   : > { %2033 = vst.msk [vmem:[#allocation2 + $0x260] sm:$0xff] %vm1410_vm1, %v1937_v16  ;;  %v2418_v52 = vld [vmem:[#allocation2 + $0x258] sm:$0xff]  ;;  %3326 = vrot.lane.b32.xlu1 %v2850_v51, %s4392_s13  ;;  %v2867_v33 = vpack.c.bf16 %v6212_v20, %v6212_v20  ;;  %v3889_v16 = vsel %vm3662_vm3, %v6150_v14, 0.0  ;;  %v3891_v14 = vsel %vm3662_vm3, %v6182_v4, 0.0  ;;  %v3893_v7 = vsel %vm3662_vm3, %v6212_v20, 0.0 }
 0x314   : > { %v2514_v59 = vadd.f32 %v2418_v52, %v2290_v29  ;;  %1488 = vst.msk [vmem:[#allocation2 + $0x268] sm:$0xff] %vm1410_vm1, %v1283_v49  ;;  %v1287_v34 = vpop.f32.mrf.mxu0  ;;  %v1876_v49 = vld [vmem:[#allocation2 + $0x378] sm:$0xff] }
 0x315   : > { %2066 = vst.msk [vmem:[#allocation2 + $0x368] sm:$0xff] %vm1410_vm1, %v1970_v46  ;;  %3292 = vrot.lane.b32.xlu2 %v2833_v2, %s4392_s13  ;;  %3360 = vrot.lane.b32.xlu0 %v2867_v33, %s4392_s13  ;;  %v1288_v23 = vadd.f32 %v6073_v8, %v1287_v34 }
 0x316   : > { %2610 = vst.msk [vmem:[#allocation2 + $0x258] sm:$0xff] %vm1410_vm1, %v2514_v59  ;;  %v1753_v15 = vpop.f32.mrf.mxu1 }
 0x317   : > { %2995 = vst.msk [vmem:[%s4648_s12 + $0x1ac] sm:$0xf] %vm2887_vm2, %v2866_v40 }
 0x318   : > { %2961 = vst.msk [vmem:[%s4648_s12 + $0x124] sm:$0xf] %vm2887_vm2, %v2832_v50 }
 0x319   : > { %2978 = vst.msk [vmem:[%s4648_s12 + $0x168] sm:$0xf] %vm2887_vm2, %v2849_v26  ;;  %v6229_v55 = vld [vmem:[#allocation2 + $0x2e0] sm:$0xff] }
 0x31a   : > { %3590 = vst.msk [vmem:[%s4933_s16 + $0xf8] sm:$0xf] %vm2887_vm2, %v3269_v11  ;;  %v2419_v38 = vld [vmem:[#allocation2 + $0x260] sm:$0xff]  ;;  %v2851_v31 = vpack.c.bf16 %v6229_v55, %v6229_v55  ;;  %v3341_v40 = vpop.permute.xlu2 %3340  ;;  %v3265_v11 = vpop.permute.xlu0 %3264 }
 0x31b   : > { %v1842_v41 = vld [vmem:[#allocation2 + $0x268] sm:$0xff]  ;;  %3652 = vst.msk [vmem:[%s4933_s16 + $0x1f0] sm:$0xf] %vm2887_vm2, %v3393_v53  ;;  %v2515_v32 = vadd.f32 %v2419_v38, %v2293_v19  ;;  %v3267_v53 = vpop.permute.xlu1 %3266  ;;  %v2298_v38 = vpop.f32.mrf.mxu2 }
 0x31c   : > { %v1938_v47 = vadd.f32 %v1842_v41, %v5490_v5  ;;  %2628 = vst.msk [vmem:[#allocation2 + $0x2e8] sm:$0xff] %vm1410_vm1, %v2532_v57  ;;  %v2740_v26 = vld [vmem:[#allocation2 + $0x368] sm:$0xff]  ;;  %v2338_v5 = vpop.f32.mrf.mxu3 }
 0x31d   : > { %2611 = vst.msk [vmem:[#allocation2 + $0x260] sm:$0xff] %vm1410_vm1, %v2515_v32  ;;  %3328 = vrot.lane.b32.xlu2 %v2851_v31, %s4392_s13  ;;  %v2868_v61 = vpack.c.bf16 %v2740_v26, %v2740_v26  ;;  %v6242_v50 = vld [vmem:[#allocation2 + $0x258] sm:$0xff]  ;;  %v2533_v60 = vadd.f32 %v2437_v6, %v2338_v5  ;;  %v3816_v6 = vsel %vm3662_vm3, %v6147_v36, 0.0 }
 0x31e   : > { %2034 = vst.msk [vmem:[#allocation2 + $0x268] sm:$0xff] %vm1410_vm1, %v1938_v47  ;;  %v2834_v13 = vpack.c.bf16 %v6242_v50, %v6242_v50 }
 0x31f   : > { %1489 = vst.msk [vmem:[#allocation2 + $0x270] sm:$0xff] %vm1410_vm1, %v1286_v48  ;;  %3362 = vrot.lane.b32.xlu1 %v2868_v61, %s4392_s13 }
 0x320   : > { %2067 = vst.msk [vmem:[#allocation2 + $0x370] sm:$0xff] %vm1410_vm1, %v1971_v18  ;;  %3294 = vrot.lane.b32.xlu0 %v2834_v13, %s4392_s13 }
 0x321   : > { %2962 = vst.msk [vmem:[%s4648_s12 + $0x128] sm:$0xf] %vm2887_vm2, %v2833_v2 }
 0x322   : > { %2979 = vst.msk [vmem:[%s4648_s12 + $0x16c] sm:$0xf] %vm2887_vm2, %v2850_v51  ;;  %v1972_v51 = vadd.f32 %v1876_v49, %v1753_v15  ;;  %v3275_v4 = vpop.permute.xlu2 %3274  ;;  %v3337_v41 = vpop.permute.xlu0 %3336  ;;  %v4351_v49 = vld [vmem:[#allocation2 + $0x388] sm:$0xff] }
 0x323   : > { %2996 = vst.msk [vmem:[%s4648_s12 + $0x1b0] sm:$0xf] %vm2887_vm2, %v2867_v33  ;;  %v6258_v39 = vld [vmem:[#allocation2 + $0x2e8] sm:$0xff]  ;;  %v3339_v36 = vpop.permute.xlu1 %3338 }
 0x324   : > { %3608 = vst.msk [vmem:[%s4933_s16 + $0x140] sm:$0xf] %vm2887_vm2, %v3305_v22  ;;  %v6262_v37 = vld [vmem:[#allocation2 + $0x260] sm:$0xff]  ;;  %v6275_v2 = vpack.c.bf16 %v6258_v39, %v6258_v39  ;;  %v2340_v44 = vpop.f32.mrf.mxu3 }
 0x325   : > { %3588 = vst.msk [vmem:[%s4933_s16 + $0xf0] sm:$0xf] %vm2887_vm2, %v3265_v11  ;;  %v2420_v29 = vld [vmem:[#allocation2 + $0x268] sm:$0xff]  ;;  %v6268_v3 = vpack.c.bf16 %v6262_v37, %v6262_v37  ;;  %v2534_v57 = vadd.f32 %v2438_v28, %v2340_v44  ;;  %v4350_v11 = vld [vmem:[#allocation2 + $0x380] sm:$0xff] }
 0x326   : > { %v1843_v8 = vld [vmem:[#allocation2 + $0x270] sm:$0xff]  ;;  %v2516_v46 = vadd.f32 %v2420_v29, %v2295_v35  ;;  %2629 = vst.msk [vmem:[#allocation2 + $0x2f0] sm:$0xff] %vm1410_vm1, %v2533_v60  ;;  %v3901_v60 = vsel %vm3662_vm3, %v4350_v11, 0.0  ;;  %v3818_v35 = vsel %vm3662_vm3, %v6173_v25, 0.0 }
 0x327   : > { %v1939_v52 = vadd.f32 %v1843_v8, %v5505_v21  ;;  %1490 = vst.msk [vmem:[#allocation2 + $0x278] sm:$0xff] %vm1410_vm1, %v1288_v23  ;;  %v2741_v33 = vld [vmem:[#allocation2 + $0x370] sm:$0xff]  ;;  %3296 = vrot.lane.b32.xlu1 %v6268_v3, %s4392_s13  ;;  %v3890_v21 = vadd.f32 %v3889_v16, %v6124_v1  ;;  %v3895_v1 = vsel %vm3662_vm3, %v2740_v26, 0.0  ;;  %v3903_v16 = vsel %vm3662_vm3, %v4351_v49, 0.0  ;;  %v4358_v49 = vld [vmem:[#allocation2 + $0x3c0] sm:$0xff] }
 0x328   : > { %2612 = vst.msk [vmem:[#allocation2 + $0x268] sm:$0xff] %vm1410_vm1, %v2516_v46  ;;  %v2869_v59 = vpack.c.bf16 %v2741_v33, %v2741_v33  ;;  %3330 = vrot.lane.b32.xlu0 %v6275_v2, %s4392_s13  ;;  %v3897_v32 = vsel %vm3662_vm3, %v2741_v33, 0.0  ;;  %v3820_v46 = vsel %vm3662_vm3, %v6205_v42, 0.0  ;;  %v3822_v42 = vsel %vm3662_vm3, %v6242_v50, 0.0 }
 0x329   : > { %2035 = vst.msk [vmem:[#allocation2 + $0x270] sm:$0xff] %vm1410_vm1, %v1939_v52  ;;  %v3892_v22 = vadd.f32 %v3891_v14, %v3890_v21  ;;  %v2300_v14 = vpop.f32.mrf.mxu2 }
 0x32a   : > { %2068 = vst.msk [vmem:[#allocation2 + $0x378] sm:$0xff] %vm1410_vm1, %v1972_v51  ;;  %3364 = vrot.lane.b32.xlu2 %v2869_v59, %s4392_s13  ;;  %v3311_v15 = vpop.permute.xlu2 %3310  ;;  %v4352_v51 = vld [vmem:[#allocation2 + $0x390] sm:$0xff] }
 0x32b   : > { %2980 = vst.msk [vmem:[%s4648_s12 + $0x170] sm:$0xf] %vm2887_vm2, %v2851_v31  ;;  %v3894_v43 = vadd.f32 %v3893_v7, %v3892_v22  ;;  %v3905_v52 = vsel %vm3662_vm3, %v4352_v51, 0.0  ;;  %v4353_v7 = vld [vmem:[#allocation2 + $0x398] sm:$0xff] }
 0x32c   : > { %2997 = vst.msk [vmem:[%s4648_s12 + $0x1b4] sm:$0xf] %vm2887_vm2, %v2868_v61  ;;  %v3814_v61 = vsel %vm3662_vm3, %v6108_v17, 0.0 }
 0x32d   : > { %2963 = vst.msk [vmem:[%s4648_s12 + $0x12c] sm:$0xf] %vm2887_vm2, %v2834_v13  ;;  %v6299_v20 = vld [vmem:[#allocation2 + $0x2f0] sm:$0xff]  ;;  %v3896_v31 = vadd.f32 %v3895_v1, %v3894_v43  ;;  %v3815_v23 = vadd.f32 %v3814_v61, %v6086_v27  ;;  %v3271_v27 = vpop.permute.xlu0 %3270  ;;  %v3824_v1 = vsel %vm3662_vm3, %v6262_v37, 0.0  ;;  %v6372_v61 = vld [vmem:[#allocation2 + $0x3f8] sm:$0xff] }
 0x32e   : > { %v1844_v19 = vld [vmem:[#allocation2 + $0x278] sm:$0xff]  ;;  %3626 = vst.msk [vmem:[%s4933_s16 + $0x188] sm:$0xf] %vm2887_vm2, %v3341_v40  ;;  %v2853_v48 = vpack.c.bf16 %v6299_v20, %v6299_v20  ;;  %v6364_v37 = vld [vmem:[#allocation2 + $0x3f0] sm:$0xff] }
 0x32f   : > { %v1940_v45 = vadd.f32 %v1844_v19, %v5526_v62  ;;  %3589 = vst.msk [vmem:[%s4933_s16 + $0xf4] sm:$0xf] %vm2887_vm2, %v3267_v53  ;;  %v2708_v47 = vld [vmem:[#allocation2 + $0x268] sm:$0xff]  ;;  %v3898_v5 = vadd.f32 %v3897_v32, %v3896_v31  ;;  %v3817_v8 = vadd.f32 %v3816_v6, %v3815_v23 }
 0x330   : > { %v2421_v18 = vld [vmem:[#allocation2 + $0x270] sm:$0xff]  ;;  %2630 = vst.msk [vmem:[#allocation2 + $0x2f8] sm:$0xff] %vm1410_vm1, %v2534_v57  ;;  %v2836_v26 = vpack.c.bf16 %v2708_v47, %v2708_v47  ;;  %3332 = vrot.lane.b32.xlu1 %v2853_v48, %s4392_s13  ;;  %v4354_v57 = vld [vmem:[#allocation2 + $0x3a0] sm:$0xff]  ;;  %v4355_v32 = vld [vmem:[#allocation2 + $0x3a8] sm:$0xff] }
 0x331   : > { %2036 = vst.msk [vmem:[#allocation2 + $0x278] sm:$0xff] %vm1410_vm1, %v1940_v45  ;;  %v2517_v13 = vadd.f32 %v2421_v18, %v2298_v38  ;;  %v2742_v62 = vld [vmem:[#allocation2 + $0x378] sm:$0xff]  ;;  %v3819_v33 = vadd.f32 %v3818_v35, %v3817_v8  ;;  %v3909_v43 = vsel %vm3662_vm3, %v4354_v57, 0.0  ;;  %v3826_v38 = vsel %vm3662_vm3, %v2708_v47, 0.0 }
 0x332   : > { %3624 = vst.msk [vmem:[%s4933_s16 + $0x180] sm:$0xf] %vm2887_vm2, %v3337_v41  ;;  %3298 = vrot.lane.b32.xlu2 %v2836_v26, %s4392_s13  ;;  %v2870_v34 = vpack.c.bf16 %v2742_v62, %v2742_v62  ;;  %v3899_v40 = vsel %vm3662_vm3, %v2742_v62, 0.0  ;;  %v3347_v31 = vpop.permute.xlu2 %3346 }
 0x333   : > { %2613 = vst.msk [vmem:[#allocation2 + $0x270] sm:$0xff] %vm1410_vm1, %v2517_v13  ;;  %v3900_v17 = vadd.f32 %v3899_v40, %v3898_v5  ;;  %v3821_v22 = vadd.f32 %v3820_v46, %v3819_v33  ;;  %v4356_v13 = vld [vmem:[#allocation2 + $0x3b0] sm:$0xff]  ;;  %v2885_v40 = vpack.c.bf16 %v6364_v37, %v6364_v37  ;;  %v4361_v33 = vld [vmem:[#allocation2 + $0x288] sm:$0xff] }
 0x334   : > { %2998 = vst.msk [vmem:[%s4648_s12 + $0x1b8] sm:$0xf] %vm2887_vm2, %v2869_v59  ;;  %3366 = vrot.lane.b32.xlu0 %v2870_v34, %s4392_s13  ;;  %v3913_v5 = vsel %vm3662_vm3, %v4356_v13, 0.0 }
 0x335   : > { %2964 = vst.msk [vmem:[%s4648_s12 + $0x130] sm:$0xf] %vm2887_vm2, %v6268_v3  ;;  %v3902_v29 = vadd.f32 %v3901_v60, %v3900_v17  ;;  %v3823_v19 = vadd.f32 %v3822_v42, %v3821_v22  ;;  %v4357_v17 = vld [vmem:[#allocation2 + $0x3b8] sm:$0xff] }
 0x336   : > { %2981 = vst.msk [vmem:[%s4648_s12 + $0x174] sm:$0xf] %vm2887_vm2, %v6275_v2  ;;  %v3915_v11 = vsel %vm3662_vm3, %v4357_v17, 0.0  ;;  %v4364_v22 = vld [vmem:[#allocation2 + $0x3d8] sm:$0xff]  ;;  %v3848_v17 = vsel %vm3662_vm3, %v6104_v54, 0.0 }
 0x337   : > { %3593 = vst.msk [vmem:[%s4933_s16 + $0x104] sm:$0xf] %vm2887_vm2, %v3275_v4  ;;  %v3904_v25 = vadd.f32 %v3903_v16, %v3902_v29  ;;  %v6339_v3 = vld [vmem:[#allocation2 + $0x2f8] sm:$0xff]  ;;  %v3907_v4 = vsel %vm3662_vm3, %v4353_v7, 0.0  ;;  %v3825_v45 = vadd.f32 %v3824_v1, %v3823_v19  ;;  %v3917_v16 = vsel %vm3662_vm3, %v4358_v49, 0.0 }
 0x338   : > { %v2422_v59 = vld [vmem:[#allocation2 + $0x278] sm:$0xff]  ;;  %3625 = vst.msk [vmem:[%s4933_s16 + $0x184] sm:$0xf] %vm2887_vm2, %v3339_v36  ;;  %v2854_v2 = vpack.c.bf16 %v6339_v3, %v6339_v3 }
 0x339   : > { %v2518_v21 = vadd.f32 %v2422_v59, %v2300_v14  ;;  %2965 = vst.msk [vmem:[%s4648_s12 + $0x134] sm:$0xf] %vm2887_vm2, %v2836_v26  ;;  %v3906_v44 = vadd.f32 %v3905_v52, %v3904_v25  ;;  %v3273_v26 = vpop.permute.xlu1 %3272  ;;  %v3827_v62 = vadd.f32 %v3826_v38, %v3825_v45  ;;  %v4360_v25 = vld [vmem:[#allocation2 + $0x3c8] sm:$0xff]  ;;  %v3834_v14 = vsel %vm3662_vm3, %v4361_v33, 0.0 }
 0x33a   : > { %2982 = vst.msk [vmem:[%s4648_s12 + $0x178] sm:$0xf] %vm2887_vm2, %v2853_v48  ;;  %3334 = vrot.lane.b32.xlu2 %v2854_v2, %s4392_s13  ;;  %v2709_v28 = vld [vmem:[#allocation2 + $0x270] sm:$0xff]  ;;  %v3911_v48 = vsel %vm3662_vm3, %v4355_v32, 0.0  ;;  %v3919_v51 = vsel %vm3662_vm3, %v4360_v25, 0.0  ;;  %v3281_v13 = vpop.permute.xlu2 %3280 }
 0x33b   : > { %2614 = vst.msk [vmem:[#allocation2 + $0x278] sm:$0xff] %vm1410_vm1, %v2518_v21  ;;  %v3908_v50 = vadd.f32 %v3907_v4, %v3906_v44  ;;  %v2837_v53 = vpack.c.bf16 %v2709_v28, %v2709_v28  ;;  %v3828_v47 = vsel %vm3662_vm3, %v2709_v28, 0.0  ;;  %v4363_v44 = vld [vmem:[#allocation2 + $0x290] sm:$0xff]  ;;  %v3923_v28 = vsel %vm3662_vm3, %v4364_v22, 0.0 }
 0x33c   : > { %2999 = vst.msk [vmem:[%s4648_s12 + $0x1bc] sm:$0xf] %vm2887_vm2, %v2870_v34  ;;  %v3307_v34 = vpop.permute.xlu0 %3306  ;;  %v3829_v60 = vadd.f32 %v3828_v47, %v3827_v62  ;;  %v3836_v7 = vsel %vm3662_vm3, %v4363_v44, 0.0 }
 0x33d   : > { %v3910_v41 = vadd.f32 %v3909_v43, %v3908_v50  ;;  %3611 = vst.msk [vmem:[%s4933_s16 + $0x14c] sm:$0xf] %vm2887_vm2, %v3311_v15  ;;  %3300 = vrot.lane.b32.xlu0 %v2837_v53, %s4392_s13  ;;  %v2886_v15 = vpack.c.bf16 %v6372_v61, %v6372_v61  ;;  %v4365_v50 = vld [vmem:[#allocation2 + $0x298] sm:$0xff]  ;;  %v4366_v43 = vld [vmem:[#allocation2 + $0x3e0] sm:$0xff] }
 0x33e   : > { %3591 = vst.msk [vmem:[%s4933_s16 + $0xfc] sm:$0xf] %vm2887_vm2, %v3271_v27  ;;  %v4359_v27 = vld [vmem:[#allocation2 + $0x280] sm:$0xff]  ;;  %v3925_v19 = vsel %vm3662_vm3, %v4366_v43, 0.0 }
 0x33f   : > { %v3912_v18 = vadd.f32 %v3911_v48, %v3910_v41  ;;  %2983 = vst.msk [vmem:[%s4648_s12 + $0x17c] sm:$0xf] %vm2887_vm2, %v2854_v2  ;;  %v4362_v2 = vld [vmem:[#allocation2 + $0x3d0] sm:$0xff]  ;;  %v3840_v41 = vsel %vm3662_vm3, %v5981_v10, 0.0  ;;  %v4367_v48 = vld [vmem:[#allocation2 + $0x3e8] sm:$0xff]  ;;  %v3844_v10 = vsel %vm3662_vm3, %v6036_v0, 0.0 }
 0x340   : > { %2966 = vst.msk [vmem:[%s4648_s12 + $0x138] sm:$0xf] %vm2887_vm2, %v2837_v53  ;;  %v3921_v42 = vsel %vm3662_vm3, %v4362_v2, 0.0  ;;  %v3838_v53 = vsel %vm3662_vm3, %v4365_v50, 0.0  ;;  %v3927_v45 = vsel %vm3662_vm3, %v4367_v48, 0.0  ;;  %v3929_v0 = vsel %vm3662_vm3, %v6364_v37, 0.0 }
 0x341   : > { %3629 = vst.msk [vmem:[%s4933_s16 + $0x194] sm:$0xf] %vm2887_vm2, %v3347_v31  ;;  %v3914_v6 = vadd.f32 %v3913_v5, %v3912_v18  ;;  %v3842_v18 = vsel %vm3662_vm3, %v6008_v58, 0.0  ;;  %v3309_v5 = vpop.permute.xlu1 %3308  ;;  %v3846_v58 = vsel %vm3662_vm3, %v6066_v12, 0.0  ;;  %v3850_v12 = vsel %vm3662_vm3, %v6135_v24, 0.0 }
 0x342   : > { %3592 = vst.msk [vmem:[%s4933_s16 + $0x100] sm:$0xf] %vm2887_vm2, %v3273_v26  ;;  %3394 = vrot.lane.b32.xlu2 %v5867_v56, %s4392_s13  ;;  %v2710_v23 = vld [vmem:[#allocation2 + $0x278] sm:$0xff]  ;;  %v3832_v56 = vsel %vm3662_vm3, %v4359_v27, 0.0  ;;  %v3852_v37 = vsel %vm3662_vm3, %v6168_v30, 0.0  ;;  %v3854_v24 = vsel %vm3662_vm3, %v6197_v9, 0.0 }
 0x343   : > { %3609 = vst.msk [vmem:[%s4933_s16 + $0x144] sm:$0xf] %vm2887_vm2, %v3307_v34  ;;  %v3916_v35 = vadd.f32 %v3915_v11, %v3914_v6  ;;  %v2838_v36 = vpack.c.bf16 %v2710_v23, %v2710_v23  ;;  %v3830_v29 = vsel %vm3662_vm3, %v2710_v23, 0.0  ;;  %v4393_v6 = vmov 0.0  }
 0x344   : > { %v3831_v8 = vadd.f32 %v3830_v29, %v3829_v60  ;;  %3014 = vst.msk [vmem:[%s4648_s12 + $0x1f8] sm:$0xf] %vm2887_vm2, %v2885_v40  ;;  %v3343_v62 = vpop.permute.xlu0 %3342  ;;  %v3858_v27 = vsel %vm3662_vm3, %v6258_v39, 0.0 }
 0x345   : > { %v3918_v46 = vadd.f32 %v3917_v16, %v3916_v35  ;;  %2967 = vst.msk [vmem:[%s4648_s12 + $0x13c] sm:$0xf] %vm2887_vm2, %v2838_v36  ;;  %3302 = vrot.lane.b32.xlu1 %v2838_v36, %s4392_s13  ;;  %3396 = vrot.lane.b32.xlu0 %v2885_v40, %s4392_s13  ;;  %v3317_v35 = vpop.permute.xlu2 %3316  ;;  %v3856_v16 = vsel %vm3662_vm3, %v6229_v55, 0.0  ;;  %v3862_v55 = vsel %vm3662_vm3, %v6339_v3, 0.0 }
 0x346   : > { %v3833_v52 = vadd.f32 %v3832_v56, %v3831_v8  ;;  %3015 = vst.msk [vmem:[%s4648_s12 + $0x1fc] sm:$0xf] %vm2887_vm2, %v2886_v15 }
 0x347   : > { %v3920_v59 = vadd.f32 %v3919_v51, %v3918_v46  ;;  %3596 = vst.msk [vmem:[%s4933_s16 + $0x110] sm:$0xf] %vm2887_vm2, %v3281_v13  ;;  %v3860_v51 = vsel %vm3662_vm3, %v6299_v20, 0.0 }
 0x348   : > { %v3835_v21 = vadd.f32 %v3834_v14, %v3833_v52  ;;  %3610 = vst.msk [vmem:[%s4933_s16 + $0x148] sm:$0xf] %vm2887_vm2, %v3309_v5 }
 0x349   : > { %v3922_v4 = vadd.f32 %v3921_v42, %v3920_v59  ;;  %3627 = vst.msk [vmem:[%s4933_s16 + $0x18c] sm:$0xf] %vm2887_vm2, %v3343_v62  ;;  %v3345_v36 = vpop.permute.xlu1 %3344 }
 0x34a   : > { %v3837_v1 = vadd.f32 %v3836_v7, %v3835_v21  ;;  %3660 = vst.msk [vmem:[%s6422_s7] sm:$0xf] %vm2887_vm2, %v4393_v6 }
 0x34b   : > { %v3924_v57 = vadd.f32 %v3923_v28, %v3922_v4  ;;  %3614 = vst.msk [vmem:[%s4933_s16 + $0x158] sm:$0xf] %vm2887_vm2, %v3317_v35 }
 0x34c   : > { %v3839_v38 = vadd.f32 %v3838_v53, %v3837_v1  ;;  %v3277_v49 = vpop.permute.xlu0 %3276  ;;  %3628 = vst.msk [vmem:[%s4933_s16 + $0x190] sm:$0xf] %vm2887_vm2, %v3345_v36 }
 0x34d   : > { %v3926_v32 = vadd.f32 %v3925_v19, %v3924_v57  ;;  %3398 = vrot.lane.b32.xlu1 %v2886_v15, %s4392_s13  ;;  %v3931_v15 = vsel %vm3662_vm3, %v6372_v61, 0.0  ;;  %3594 = vst.msk [vmem:[%s4933_s16 + $0x108] sm:$0xf] %vm2887_vm2, %v3277_v49  ;;  %v3353_v46 = vpop.permute.xlu2 %3352 }
 0x34e   : > { %v3841_v31 = vadd.f32 %v3840_v41, %v3839_v38  ;;  %3632 = vst.msk [vmem:[%s4933_s16 + $0x1a0] sm:$0xf] %vm2887_vm2, %v3353_v46 }
 0x34f   : > { %v3928_v47 = vadd.f32 %v3927_v45, %v3926_v32 }
 0x350   : > { %v3843_v26 = vadd.f32 %v3842_v18, %v3841_v31 }
 0x351   : > { %v3930_v11 = vadd.f32 %v3929_v0, %v3928_v47  ;;  %v3279_v25 = vpop.permute.xlu1 %3278  ;;  %v3661_v53 = vld [vmem:[%s6422_s7] sm:$0xf] }
 0x352   : > { %v3845_v34 = vadd.f32 %v3844_v10, %v3843_v26  ;;  %3595 = vst.msk [vmem:[%s4933_s16 + $0x10c] sm:$0xf] %vm2887_vm2, %v3279_v25 }
 0x353   : > { %v3932_v29 = vadd.f32 %v3931_v15, %v3930_v11 }
 0x354   : > { %v3847_v40 = vadd.f32 %v3846_v58, %v3845_v34  ;;  %v3313_v52 = vpop.permute.xlu0 %3312 }
 0x355   : > { %v3933_v30 = vrot.slane %v3932_v29, 4  ;;  %3612 = vst.msk [vmem:[%s4933_s16 + $0x150] sm:$0xf] %vm2887_vm2, %v3313_v52  ;;  %v3287_v42 = vpop.permute.xlu2 %3286 }
 0x356   : > { %v3849_v60 = vadd.f32 %v3848_v17, %v3847_v40  ;;  %3599 = vst.msk [vmem:[%s4933_s16 + $0x11c] sm:$0xf] %vm2887_vm2, %v3287_v42 }
 0x357   : > { %v3934_v9 = vadd.f32 %v3933_v30, %v3932_v29 }
 0x358   : > { %v3851_v23 = vadd.f32 %v3850_v12, %v3849_v60 }
 0x359   : > { %v3935_v14 = vrot.slane %v3934_v9, 2  ;;  %v3315_v20 = vpop.permute.xlu1 %3314 }
 0x35a   : > { %v3853_v54 = vadd.f32 %v3852_v37, %v3851_v23  ;;  %3613 = vst.msk [vmem:[%s4933_s16 + $0x154] sm:$0xf] %vm2887_vm2, %v3315_v20 }
 0x35b   : > { %v3936_v21 = vadd.f32 %v3935_v14, %v3934_v9 }
 0x35c   : > { %v3855_v61 = vadd.f32 %v3854_v24, %v3853_v54  ;;  %v3349_v44 = vpop.permute.xlu0 %3348 }
 0x35d   : > { %3630 = vst.msk [vmem:[%s4933_s16 + $0x198] sm:$0xf] %vm2887_vm2, %v3349_v44  ;;  %v3937_v4 = vrot.slane %v3936_v21, 1  ;;  %v3323_v1 = vpop.permute.xlu2 %3322 }
 0x35e   : > { %v3857_v8 = vadd.f32 %v3856_v16, %v3855_v61  ;;  %3617 = vst.msk [vmem:[%s4933_s16 + $0x164] sm:$0xf] %vm2887_vm2, %v3323_v1 }
 0x35f   : > { %v3938_v57 = vadd.f32 %v3937_v4, %v3936_v21 }
 0x360   : > { %v3859_v56 = vadd.f32 %v3858_v27, %v3857_v8 }
 0x361   : > { %v3351_v50 = vpop.permute.xlu1 %3350 }
 0x362   : > { %v3861_v33 = vadd.f32 %v3860_v51, %v3859_v56  ;;  %3631 = vst.msk [vmem:[%s4933_s16 + $0x19c] sm:$0xf] %vm2887_vm2, %v3351_v50 }
 0x364   : > { %v3863_v39 = vadd.f32 %v3862_v55, %v3861_v33  ;;  %v3283_v43 = vpop.permute.xlu0 %3282 }
 0x365   : > { %3597 = vst.msk [vmem:[%s4933_s16 + $0x114] sm:$0xf] %vm2887_vm2, %v3283_v43 }
 0x366   : > { %v3864_v59 = vrot.slane %v3863_v39, 4 }
 0x367   : > { %v3359_v32 = vpop.permute.xlu2 %3358 }
 0x368   : > { %v3865_v2 = vadd.f32 %v3864_v59, %v3863_v39  ;;  %3635 = vst.msk [vmem:[%s4933_s16 + $0x1ac] sm:$0xf] %vm2887_vm2, %v3359_v32 }
 0x369   : > { %v3285_v48 = vpop.permute.xlu1 %3284 }
 0x36a   : > { %v3866_v7 = vrot.slane %v3865_v2, 2  ;;  %3598 = vst.msk [vmem:[%s4933_s16 + $0x118] sm:$0xf] %vm2887_vm2, %v3285_v48 }
 0x36c   : > { %v3867_v3 = vadd.f32 %v3866_v7, %v3865_v2  ;;  %v3319_v45 = vpop.permute.xlu0 %3318 }
 0x36d   : > { %3615 = vst.msk [vmem:[%s4933_s16 + $0x15c] sm:$0xf] %vm2887_vm2, %v3319_v45 }
 0x36e   : > { %v3868_v22 = vrot.slane %v3867_v3, 1 }
 0x370   : > { %v3869_v28 = vadd.f32 %v3868_v22, %v3867_v3 }
 0x371   : > { %v3321_v31 = vpop.permute.xlu1 %3320 }
 0x372   : > { %v3946_v19 = vsel %vm3945_vm5, %v3869_v28, %v5943_v63  ;;  %v3293_v63 = vpop.permute.xlu2 %3292  ;;  %3616 = vst.msk [vmem:[%s4933_s16 + $0x160] sm:$0xf] %vm2887_vm2, %v3321_v31 }
 0x373   : > { %v3948_v38 = vsel %vm3947_vm6, %v3938_v57, %v3946_v19  ;;  %3602 = vst.msk [vmem:[%s4933_s16 + $0x128] sm:$0xf] %vm2887_vm2, %v3293_v63 }
 0x374   : > { %v3950_v41 = vadd.f32 %v3948_v38, %v3661_v53  ;;  %v3355_v18 = vpop.permute.xlu0 %3354 }
 0x375   : > { %3633 = vst.msk [vmem:[%s4933_s16 + $0x1a4] sm:$0xf] %vm2887_vm2, %v3355_v18 }
 0x376   : > { %3951 = vst.msk [vmem:[%s6422_s7] sm:$0xf] %vm2887_vm2, %v3950_v41 }
 0x379   : > { %v3357_v26 = vpop.permute.xlu1 %3356 }
 0x37a   : > { %v3329_v47 = vpop.permute.xlu2 %3328  ;;  %3634 = vst.msk [vmem:[%s4933_s16 + $0x1a8] sm:$0xf] %vm2887_vm2, %v3357_v26 }
 0x37b   : > { %3620 = vst.msk [vmem:[%s4933_s16 + $0x170] sm:$0xf] %vm2887_vm2, %v3329_v47 }
 0x37c   : > { %v3289_v13 = vpop.permute.xlu0 %3288 }
 0x37d   : > { %3600 = vst.msk [vmem:[%s4933_s16 + $0x120] sm:$0xf] %vm2887_vm2, %v3289_v13 }
 0x381   : > { %v3291_v10 = vpop.permute.xlu1 %3290 }
 0x382   : > { %3601 = vst.msk [vmem:[%s4933_s16 + $0x124] sm:$0xf] %vm2887_vm2, %v3291_v10 }
 0x384   : > { %v3365_v5 = vpop.permute.xlu2 %3364  ;;  %v3325_v62 = vpop.permute.xlu0 %3324 }
 0x385   : > { %3638 = vst.msk [vmem:[%s4933_s16 + $0x1b8] sm:$0xf] %vm2887_vm2, %v3365_v5 }
 0x386   : > { %3618 = vst.msk [vmem:[%s4933_s16 + $0x168] sm:$0xf] %vm2887_vm2, %v3325_v62 }
 0x389   : > { %v3327_v58 = vpop.permute.xlu1 %3326 }
 0x38a   : > { %3619 = vst.msk [vmem:[%s4933_s16 + $0x16c] sm:$0xf] %vm2887_vm2, %v3327_v58 }
 0x38c   : > { %v3299_v34 = vpop.permute.xlu2 %3298  ;;  %v3361_v40 = vpop.permute.xlu0 %3360 }
 0x38d   : > { %3605 = vst.msk [vmem:[%s4933_s16 + $0x134] sm:$0xf] %vm2887_vm2, %v3299_v34 }
 0x38e   : > { %3636 = vst.msk [vmem:[%s4933_s16 + $0x1b0] sm:$0xf] %vm2887_vm2, %v3361_v40 }
 0x391   : > { %v3363_v6 = vpop.permute.xlu1 %3362 }
 0x392   : > { %3637 = vst.msk [vmem:[%s4933_s16 + $0x1b4] sm:$0xf] %vm2887_vm2, %v3363_v6 }
 0x394   : > { %v3335_v0 = vpop.permute.xlu2 %3334  ;;  %v3295_v17 = vpop.permute.xlu0 %3294 }
 0x395   : > { %3623 = vst.msk [vmem:[%s4933_s16 + $0x17c] sm:$0xf] %vm2887_vm2, %v3335_v0 }
 0x396   : > { %3603 = vst.msk [vmem:[%s4933_s16 + $0x12c] sm:$0xf] %vm2887_vm2, %v3295_v17 }
 0x399   : > { %v3297_v60 = vpop.permute.xlu1 %3296 }
 0x39a   : > { %3604 = vst.msk [vmem:[%s4933_s16 + $0x130] sm:$0xf] %vm2887_vm2, %v3297_v60 }
 0x39c   : > { %v3395_v11 = vpop.permute.xlu2 %3394  ;;  %v3331_v12 = vpop.permute.xlu0 %3330 }
 0x39d   : > { %3653 = vst.msk [vmem:[%s4933_s16 + $0x1f4] sm:$0xf] %vm2887_vm2, %v3395_v11 }
 0x39e   : > { %3621 = vst.msk [vmem:[%s4933_s16 + $0x174] sm:$0xf] %vm2887_vm2, %v3331_v12 }
 0x3a2   : > { %v3333_v23 = vpop.permute.xlu1 %3332 }
 0x3a3   : > { %3622 = vst.msk [vmem:[%s4933_s16 + $0x178] sm:$0xf] %vm2887_vm2, %v3333_v23 }
 0x3a6   : > { %v3367_v15 = vpop.permute.xlu0 %3366 }
 0x3a7   : > { %3639 = vst.msk [vmem:[%s4933_s16 + $0x1bc] sm:$0xf] %vm2887_vm2, %v3367_v15 }
 0x3af   : > { %v3301_v36 = vpop.permute.xlu0 %3300 }
 0x3b0   : > { %3606 = vst.msk [vmem:[%s4933_s16 + $0x138] sm:$0xf] %vm2887_vm2, %v3301_v36 }
 0x3b7   : > { %v3303_v35 = vpop.permute.xlu1 %3302  ;;  %v3397_v29 = vpop.permute.xlu0 %3396 }
 0x3b8   : > { %3607 = vst.msk [vmem:[%s4933_s16 + $0x13c] sm:$0xf] %vm2887_vm2, %v3303_v35 }
 0x3b9   : > { %3654 = vst.msk [vmem:[%s4933_s16 + $0x1f8] sm:$0xf] %vm2887_vm2, %v3397_v29 }
 0x3bf   : > { %v3399_v37 = vpop.permute.xlu1 %3398 }
 0x3c0   : > { %3655 = vst.msk [vmem:[%s4933_s16 + $0x1fc] sm:$0xf] %vm2887_vm2, %v3399_v37 }
 0x3c1 PF: > { %s16_s20 = sadd.s32 1, %s4390_s20   ;;  %s6615_s18 = smov %s4386_s19 }
 0x3c2   : > { %p13_p5 = scmp.ge.s32.totalorder %s16_s20, 4   ;;  %s6616_s19 = smov %s6618_s21 }
 0x3c4   :  { %15 = sbr.rel (!%p13_p5) target bundleno = 2 (0x2), region = 93 }

// kernel: _lambda_.5
= control target key start
LH: loop header
LB: loop body
LE: loop exit
PB: predicated region body
PF: predicated region fallthrough
CT: control target
= control target key end

     0   :  { %s3430_s12 = smov 0   ;;  %s3432_s13 = smov 0   ;;  %s4656_s0 = inlined_call_operand.vmem [shape: bf16[2,4,256,32], index: 0, kind: input, shape index: {}]   ;;  %s4657_s1 = inlined_call_operand.vmem [shape: bf16[3,32,16], index: 1, kind: input, shape index: {}]   ;;  %s4658_s2 = inlined_call_operand.vmem [shape: f32[1,16], index: 2, kind: input, shape index: {}]   ;;  %s4659_s3 = inlined_call_operand.vmem [shape: f32[2,4,256,16], index: 3, kind: output, shape index: {}]  }
   0x1   :  { %s3434_s14 = smov 0  }
   0x2 LB: > { %s25_s15 = sadd.s32 1, %s3404_s13  ;;  %p2786_p0 = scmp.ge.s32.totalorder %s3408_s14, 1  ;;  %s3408_s14 = sphi %s3434_s14, %s13_s14   ;;  %s3404_s13 = sphi %s3432_s13, %s4661_s13   ;;  %s3400_s12 = sphi %s3430_s12, %s4660_s12  }
   0x3   : > { %p27_p1 = scmp.ge.s32.totalorder %s25_s15, 2  ;;  %p158_p2 = scmp.lt.s32.totalorder %s3408_s14, 3 }
   0x5   : > { %s4663_s15 = smov (%p27_p1, %s25_s15), 0  ;;  %p159_p3 = pnand %p2786_p0, %p158_p2 }
   0x6   : > { %p191_p4 = scmp.lt.s32.totalorder (!%p159_p3), %s3400_s12, 1 }
   0x7   : > { %162 = sbr.rel (%p159_p3) target bundleno = 810 (0x32a), region = 32 }
   0xc   : > { %v3308_v0 = vld [vmem:[%s4657_s1 + $0x18] sm:$0xff]  ;;  %v3310_v1 = vld [vmem:[%s4657_s1 + $0x8] sm:$0xff]  ;;  %v3307_v3 = vld [vmem:[%s4657_s1 + $0x10] sm:$0xff]  ;;  %s4665_s12 = smov (!%p191_p4, %s3400_s12), 1  ;;  %vm680_vm0 = vcmask 261120   ;;  %vm1202_vm1 = vcmask 130048  }
   0xd   : > { %v3312_v2 = vld [vmem:[%s4657_s1 + $0x28] sm:$0xff]  ;;  %879 = vmatpush.bf16.msra.mxu0 %v3308_v0  ;;  %3313 = vmatpush.bf16.msra.mxu3 %v3308_v0  ;;  %v3309_v4 = vld [vmem:[%s4657_s1] sm:$0xff]  ;;  %s3241_s28 = sshll.u32 %s4665_s12, 9  ;;  %s3242_s7 = sshll.u32 %s4665_s12, 10 }
   0xe   : > { %1353 = vmatpush.bf16.msra.mxu1 %v3310_v1  ;;  %1908 = vmatpush.bf16.msra.mxu2 %v3312_v2  ;;  %v3311_v5 = vld [vmem:[%s4657_s1 + $0x20] sm:$0xff]  ;;  %s3472_s4 = scalar_lea.vmem %s4656_s0, %s3241_s28  ;;  %s3589_s10 = scalar_lea.vmem %s4659_s3, %s3242_s7 }
   0xf   : > { %v3243_v6 = vld [vmem:[%s3472_s4] sm:$0xff]  ;;  %v3244_v9 = vld [vmem:[%s3472_s4 + $0x8] sm:$0xff]  ;;  %v3245_v12 = vld [vmem:[%s3472_s4 + $0x10] sm:$0xff] }
  0x10   : > { %v3283_v7 = vld [vmem:[%s3472_s4 + $0x140] sm:$0xff]  ;;  %v3284_v10 = vld [vmem:[%s3472_s4 + $0x148] sm:$0xff]  ;;  %v3285_v13 = vld [vmem:[%s3472_s4 + $0x150] sm:$0xff] }
  0x11   : > { %880 = vmatpush.bf16.msra.mxu0 %v3307_v3  ;;  %3314 = vmatpush.bf16.msra.mxu3 %v3307_v3  ;;  %v3477_v8 = vld [vmem:[%s3472_s4 + $0x80] sm:$0xff]  ;;  %v3487_v11 = vld [vmem:[%s3472_s4 + $0x88] sm:$0xff]  ;;  %v3497_v14 = vld [vmem:[%s3472_s4 + $0x90] sm:$0xff] }
  0x12   : > { %1354 = vmatpush.bf16.msra.mxu1 %v3309_v4  ;;  %1909 = vmatpush.bf16.msra.mxu2 %v3311_v5  ;;  %v3246_v15 = vld [vmem:[%s3472_s4 + $0x18] sm:$0xff]  ;;  %v3247_v18 = vld [vmem:[%s3472_s4 + $0x20] sm:$0xff]  ;;  %v3248_v21 = vld [vmem:[%s3472_s4 + $0x28] sm:$0xff] }
  0x13   : > { %v3286_v16 = vld [vmem:[%s3472_s4 + $0x158] sm:$0xff]  ;;  %v3287_v19 = vld [vmem:[%s3472_s4 + $0x160] sm:$0xff]  ;;  %v3288_v22 = vld [vmem:[%s3472_s4 + $0x168] sm:$0xff] }
  0x14   : > { %3059 = vmatmul.msk.bf16.vlgmr.msra.gmra.mxu0 %vm680_vm0, %v3243_v6  ;;  %3099 = vmatmul.msk.bf16.vlgmr.msra.gmra.mxu3 %vm680_vm0, %v3283_v7  ;;  %v3507_v17 = vld [vmem:[%s3472_s4 + $0x98] sm:$0xff]  ;;  %v3517_v20 = vld [vmem:[%s3472_s4 + $0xa0] sm:$0xff]  ;;  %v3527_v23 = vld [vmem:[%s3472_s4 + $0xa8] sm:$0xff] }
  0x15   : > { %3315 = vmatpush.bf16.msrb.mxu3 %v3310_v1  ;;  %3131 = vmatmul.msk.bf16.vlgmr.msra.gmra.mxu1 %vm680_vm0, %v3243_v6  ;;  %v3249_v24 = vld [vmem:[%s3472_s4 + $0x30] sm:$0xff]  ;;  %v3250_v27 = vld [vmem:[%s3472_s4 + $0x38] sm:$0xff]  ;;  %v3557_v30 = vld [vmem:[%s4658_s2] ss:$0 sm:$0xff] }
  0x16   : > { %3191 = vmatmul.msk.bf16.vlgmr.msra.gmra.mxu2 %vm680_vm0, %v3477_v8  ;;  %v3289_v25 = vld [vmem:[%s3472_s4 + $0x170] sm:$0xff]  ;;  %v3290_v28 = vld [vmem:[%s3472_s4 + $0x178] sm:$0xff]  ;;  %v3251_v31 = vld [vmem:[%s3472_s4 + $0x40] sm:$0xff] }
  0x17   : > { %v3537_v26 = vld [vmem:[%s3472_s4 + $0xb0] sm:$0xff]  ;;  %v3547_v29 = vld [vmem:[%s3472_s4 + $0xb8] sm:$0xff]  ;;  %v3291_v32 = vld [vmem:[%s3472_s4 + $0x180] sm:$0xff] }
  0x18   : > { %v3267_v34 = vld [vmem:[%s3472_s4 + $0xc0] sm:$0xff]  ;;  %v3252_v48 = vld [vmem:[%s3472_s4 + $0x48] sm:$0xff]  ;;  %v3293_v6 = vld [vmem:[%s3472_s4 + $0x190] sm:$0xff] }
  0x19   : > { %3316 = vmatpush.bf16.msrb.mxu3 %v3309_v4  ;;  %v3292_v49 = vld [vmem:[%s3472_s4 + $0x188] sm:$0xff] }
  0x1a   : > { %v3268_v51 = vld [vmem:[%s3472_s4 + $0xc8] sm:$0xff] }
  0x1d   : > { %3317 = vmatpush.bf16.msra.mxu3 %v3312_v2 }
  0x21   : > { %3318 = vmatpush.bf16.msra.mxu3 %v3311_v5  ;;  %v3253_v5 = vld [vmem:[%s3472_s4 + $0x50] sm:$0xff] }
  0x24   : > { %3060 = vmatmul.msk.bf16.gmra.mxu0 %vm680_vm0, %v3244_v9  ;;  %3100 = vmatmul.msk.bf16.gmra.mxu3 %vm680_vm0, %v3284_v10 }
  0x25   : > { %3132 = vmatmul.msk.bf16.gmra.mxu1 %vm680_vm0, %v3244_v9  ;;  %v3269_v9 = vld [vmem:[%s3472_s4 + $0xd0] sm:$0xff] }
  0x26   : > { %3192 = vmatmul.msk.bf16.gmra.mxu2 %vm680_vm0, %v3487_v11 }
  0x34   : > { %3061 = vmatmul.msk.bf16.gmra.mxu0 %vm680_vm0, %v3245_v12  ;;  %3101 = vmatmul.msk.bf16.gmra.mxu3 %vm680_vm0, %v3285_v13 }
  0x35   : > { %3133 = vmatmul.msk.bf16.gmra.mxu1 %vm680_vm0, %v3245_v12 }
  0x36   : > { %3193 = vmatmul.msk.bf16.gmra.mxu2 %vm680_vm0, %v3497_v14 }
  0x44   : > { %3062 = vmatmul.msk.bf16.gmra.mxu0 %vm680_vm0, %v3246_v15  ;;  %3102 = vmatmul.msk.bf16.gmra.mxu3 %vm680_vm0, %v3286_v16 }
  0x45   : > { %3134 = vmatmul.msk.bf16.gmra.mxu1 %vm680_vm0, %v3246_v15 }
  0x46   : > { %3194 = vmatmul.msk.bf16.gmra.mxu2 %vm680_vm0, %v3507_v17 }
  0x54   : > { %3063 = vmatmul.msk.bf16.gmra.mxu0 %vm680_vm0, %v3247_v18  ;;  %3103 = vmatmul.msk.bf16.gmra.mxu3 %vm680_vm0, %v3287_v19 }
  0x55   : > { %3135 = vmatmul.msk.bf16.gmra.mxu1 %vm680_vm0, %v3247_v18 }
  0x56   : > { %3195 = vmatmul.msk.bf16.gmra.mxu2 %vm680_vm0, %v3517_v20 }
  0x64   : > { %3064 = vmatmul.msk.bf16.gmra.mxu0 %vm680_vm0, %v3248_v21  ;;  %3104 = vmatmul.msk.bf16.gmra.mxu3 %vm680_vm0, %v3288_v22 }
  0x65   : > { %3136 = vmatmul.msk.bf16.gmra.mxu1 %vm680_vm0, %v3248_v21 }
  0x66   : > { %3196 = vmatmul.msk.bf16.gmra.mxu2 %vm680_vm0, %v3527_v23 }
  0x74   : > { %3065 = vmatmul.msk.bf16.gmra.mxu0 %vm680_vm0, %v3249_v24  ;;  %3105 = vmatmul.msk.bf16.gmra.mxu3 %vm680_vm0, %v3289_v25 }
  0x75   : > { %3137 = vmatmul.msk.bf16.gmra.mxu1 %vm680_vm0, %v3249_v24 }
  0x76   : > { %3197 = vmatmul.msk.bf16.gmra.mxu2 %vm680_vm0, %v3537_v26 }
  0x84   : > { %3066 = vmatmul.msk.bf16.gmra.mxu0 %vm680_vm0, %v3250_v27  ;;  %3106 = vmatmul.msk.bf16.gmra.mxu3 %vm680_vm0, %v3290_v28 }
  0x85   : > { %3138 = vmatmul.msk.bf16.gmra.mxu1 %vm680_vm0, %v3250_v27 }
  0x86   : > { %3198 = vmatmul.msk.bf16.gmra.mxu2 %vm680_vm0, %v3547_v29 }
  0x91   : > { %v882_v33 = vpop.f32.mrf.mxu0 }
  0x92   : > { %v883_v35 = vadd.f32 %v3557_v30, %v882_v33  ;;  %v3563_v36 = vpop.f32.mrf.mxu1 }
  0x94   : > { %1203 = vst.msk [vmem:[#allocation2] sm:$0xff] %vm1202_vm1, %v883_v35  ;;  %3067 = vmatmul.msk.bf16.gmra.mxu0 %vm680_vm0, %v3251_v31  ;;  %3107 = vmatmul.msk.bf16.gmra.mxu3 %vm680_vm0, %v3291_v32  ;;  %v3254_v35 = vld [vmem:[%s3472_s4 + $0x58] sm:$0xff] }
  0x95   : > { %3139 = vmatmul.msk.bf16.gmra.mxu1 %vm680_vm0, %v3251_v31 }
  0x96   : > { %3199 = vmatmul.msk.bf16.gmra.mxu2 %vm680_vm0, %v3267_v34 }
  0x97   : > { %v1082_v37 = vpop.f32.mrf.mxu3 }
  0x98   : > { %v1083_v38 = vadd.f32 %v3557_v30, %v1082_v37  ;;  %v3294_v37 = vld [vmem:[%s3472_s4 + $0x198] sm:$0xff] }
  0x99   : > { %v1911_v39 = vpop.f32.mrf.mxu2  ;;  %v884_v40 = vpop.f32.mrf.mxu0 }
  0x9a   : > { %1283 = vst.msk [vmem:[#allocation2 + $0x280] sm:$0xff] %vm1202_vm1, %v1083_v38  ;;  %v885_v41 = vadd.f32 %v3557_v30, %v884_v40  ;;  %v3573_v42 = vpop.f32.mrf.mxu1 }
  0x9b   : > { %v2151_v43 = vld [vmem:[#allocation2] sm:$0xff] }
  0x9c   : > { %1204 = vst.msk [vmem:[#allocation2 + $0x8] sm:$0xff] %vm1202_vm1, %v885_v41  ;;  %v2247_v44 = vadd.f32 %v2151_v43, %v1911_v39  ;;  %v3270_v39 = vld [vmem:[%s3472_s4 + $0xd8] sm:$0xff] }
  0x9e   : > { %2343 = vst.msk [vmem:[#allocation2] sm:$0xff] %vm1202_vm1, %v2247_v44 }
  0x9f   : > { %v1084_v45 = vpop.f32.mrf.mxu3 }
  0xa0   : > { %v1085_v46 = vadd.f32 %v3557_v30, %v1084_v45 }
  0xa1   : > { %v1913_v47 = vpop.f32.mrf.mxu2  ;;  %v887_v50 = vpop.f32.mrf.mxu0 }
  0xa2   : > { %1284 = vst.msk [vmem:[#allocation2 + $0x288] sm:$0xff] %vm1202_vm1, %v1085_v46  ;;  %v888_v52 = vadd.f32 %v3557_v30, %v887_v50  ;;  %v3584_v53 = vpop.f32.mrf.mxu1 }
  0xa3   : > { %v2152_v54 = vld [vmem:[#allocation2 + $0x8] sm:$0xff] }
  0xa4   : > { %1205 = vst.msk [vmem:[#allocation2 + $0x10] sm:$0xff] %vm1202_vm1, %v888_v52  ;;  %v2248_v55 = vadd.f32 %v2152_v54, %v1913_v47  ;;  %3068 = vmatmul.msk.bf16.gmra.mxu0 %vm680_vm0, %v3252_v48  ;;  %3108 = vmatmul.msk.bf16.gmra.mxu3 %vm680_vm0, %v3292_v49 }
  0xa5   : > { %v2439_v56 = vld [vmem:[#allocation2] sm:$0xff]  ;;  %3140 = vmatmul.msk.bf16.gmra.mxu1 %vm680_vm0, %v3252_v48 }
  0xa6   : > { %3200 = vmatmul.msk.bf16.gmra.mxu2 %vm680_vm0, %v3268_v51  ;;  %2567 = vst.msk [vmem:[%s3589_s10] sm:$0xff] %vm1202_vm1, %v2439_v56 }
  0xa7   : > { %2344 = vst.msk [vmem:[#allocation2 + $0x8] sm:$0xff] %vm1202_vm1, %v2248_v55  ;;  %v1087_v57 = vpop.f32.mrf.mxu3 }
  0xa8   : > { %v1088_v58 = vadd.f32 %v3557_v30, %v1087_v57 }
  0xa9   : > { %v1916_v59 = vpop.f32.mrf.mxu2  ;;  %v889_v60 = vpop.f32.mrf.mxu0 }
  0xaa   : > { %1285 = vst.msk [vmem:[#allocation2 + $0x290] sm:$0xff] %vm1202_vm1, %v1088_v58  ;;  %v890_v61 = vadd.f32 %v3557_v30, %v889_v60  ;;  %v3602_v62 = vpop.f32.mrf.mxu1  ;;  %v3295_v60 = vld [vmem:[%s3472_s4 + $0x1a0] sm:$0xff] }
  0xab   : > { %v2153_v63 = vld [vmem:[#allocation2 + $0x10] sm:$0xff] }
  0xac   : > { %1206 = vst.msk [vmem:[#allocation2 + $0x18] sm:$0xff] %vm1202_vm1, %v890_v61  ;;  %v2249_v0 = vadd.f32 %v2153_v63, %v1916_v59  ;;  %v3255_v59 = vld [vmem:[%s3472_s4 + $0x60] sm:$0xff] }
  0xad   : > { %v3271_v63 = vld [vmem:[%s3472_s4 + $0xe0] sm:$0xff] }
  0xae   : > { %v2440_v1 = vld [vmem:[#allocation2 + $0x8] sm:$0xff]  ;;  %2345 = vst.msk [vmem:[#allocation2 + $0x10] sm:$0xff] %vm1202_vm1, %v2249_v0 }
  0xaf   : > { %2568 = vst.msk [vmem:[%s3589_s10 + $0x8] sm:$0xff] %vm1202_vm1, %v2440_v1  ;;  %v1089_v2 = vpop.f32.mrf.mxu3 }
  0xb0   : > { %v1090_v3 = vadd.f32 %v3557_v30, %v1089_v2 }
  0xb1   : > { %v1918_v4 = vpop.f32.mrf.mxu2  ;;  %v892_v7 = vpop.f32.mrf.mxu0 }
  0xb2   : > { %1286 = vst.msk [vmem:[#allocation2 + $0x298] sm:$0xff] %vm1202_vm1, %v1090_v3  ;;  %v893_v10 = vadd.f32 %v3557_v30, %v892_v7  ;;  %v3614_v12 = vpop.f32.mrf.mxu1 }
  0xb3   : > { %v2154_v13 = vld [vmem:[#allocation2 + $0x18] sm:$0xff] }
  0xb4   : > { %1207 = vst.msk [vmem:[#allocation2 + $0x20] sm:$0xff] %vm1202_vm1, %v893_v10  ;;  %v2250_v15 = vadd.f32 %v2154_v13, %v1918_v4  ;;  %3069 = vmatmul.msk.bf16.gmra.mxu0 %vm680_vm0, %v3253_v5  ;;  %3109 = vmatmul.msk.bf16.gmra.mxu3 %vm680_vm0, %v3293_v6 }
  0xb5   : > { %v2441_v16 = vld [vmem:[#allocation2 + $0x10] sm:$0xff]  ;;  %3141 = vmatmul.msk.bf16.gmra.mxu1 %vm680_vm0, %v3253_v5 }
  0xb6   : > { %3201 = vmatmul.msk.bf16.gmra.mxu2 %vm680_vm0, %v3269_v9  ;;  %2569 = vst.msk [vmem:[%s3589_s10 + $0x10] sm:$0xff] %vm1202_vm1, %v2441_v16 }
  0xb7   : > { %2346 = vst.msk [vmem:[#allocation2 + $0x18] sm:$0xff] %vm1202_vm1, %v2250_v15  ;;  %v1092_v18 = vpop.f32.mrf.mxu3 }
  0xb8   : > { %v1093_v19 = vadd.f32 %v3557_v30, %v1092_v18 }
  0xb9   : > { %v1921_v21 = vpop.f32.mrf.mxu2  ;;  %v894_v22 = vpop.f32.mrf.mxu0 }
  0xba   : > { %1287 = vst.msk [vmem:[#allocation2 + $0x2a0] sm:$0xff] %vm1202_vm1, %v1093_v19  ;;  %v895_v24 = vadd.f32 %v3557_v30, %v894_v22  ;;  %v3627_v25 = vpop.f32.mrf.mxu1 }
  0xbb   : > { %v2155_v27 = vld [vmem:[#allocation2 + $0x20] sm:$0xff] }
  0xbc   : > { %1208 = vst.msk [vmem:[#allocation2 + $0x28] sm:$0xff] %vm1202_vm1, %v895_v24  ;;  %v2251_v28 = vadd.f32 %v2155_v27, %v1921_v21  ;;  %v3256_v24 = vld [vmem:[%s3472_s4 + $0x68] sm:$0xff] }
  0xbd   : > { %v3296_v27 = vld [vmem:[%s3472_s4 + $0x1a8] sm:$0xff] }
  0xbe   : > { %v2442_v31 = vld [vmem:[#allocation2 + $0x18] sm:$0xff]  ;;  %2347 = vst.msk [vmem:[#allocation2 + $0x20] sm:$0xff] %vm1202_vm1, %v2251_v28 }
  0xbf   : > { %2570 = vst.msk [vmem:[%s3589_s10 + $0x18] sm:$0xff] %vm1202_vm1, %v2442_v31  ;;  %v1094_v32 = vpop.f32.mrf.mxu3  ;;  %v3272_v31 = vld [vmem:[%s3472_s4 + $0xe8] sm:$0xff] }
  0xc0   : > { %v1095_v33 = vadd.f32 %v3557_v30, %v1094_v32 }
  0xc1   : > { %v1923_v34 = vpop.f32.mrf.mxu2  ;;  %v897_v38 = vpop.f32.mrf.mxu0 }
  0xc2   : > { %1288 = vst.msk [vmem:[#allocation2 + $0x2a8] sm:$0xff] %vm1202_vm1, %v1095_v33  ;;  %v898_v40 = vadd.f32 %v3557_v30, %v897_v38  ;;  %v3639_v41 = vpop.f32.mrf.mxu1 }
  0xc3   : > { %v2156_v43 = vld [vmem:[#allocation2 + $0x28] sm:$0xff] }
  0xc4   : > { %1209 = vst.msk [vmem:[#allocation2 + $0x30] sm:$0xff] %vm1202_vm1, %v898_v40  ;;  %v2252_v44 = vadd.f32 %v2156_v43, %v1923_v34  ;;  %3070 = vmatmul.msk.bf16.gmra.mxu0 %vm680_vm0, %v3254_v35  ;;  %3110 = vmatmul.msk.bf16.gmra.mxu3 %vm680_vm0, %v3294_v37 }
  0xc5   : > { %v2443_v45 = vld [vmem:[#allocation2 + $0x20] sm:$0xff]  ;;  %3142 = vmatmul.msk.bf16.gmra.mxu1 %vm680_vm0, %v3254_v35 }
  0xc6   : > { %3202 = vmatmul.msk.bf16.gmra.mxu2 %vm680_vm0, %v3270_v39  ;;  %2571 = vst.msk [vmem:[%s3589_s10 + $0x20] sm:$0xff] %vm1202_vm1, %v2443_v45 }
  0xc7   : > { %2348 = vst.msk [vmem:[#allocation2 + $0x28] sm:$0xff] %vm1202_vm1, %v2252_v44  ;;  %v1097_v46 = vpop.f32.mrf.mxu3 }
  0xc8   : > { %v1098_v47 = vadd.f32 %v3557_v30, %v1097_v46 }
  0xc9   : > { %v1926_v48 = vpop.f32.mrf.mxu2  ;;  %v899_v49 = vpop.f32.mrf.mxu0 }
  0xca   : > { %1289 = vst.msk [vmem:[#allocation2 + $0x2b0] sm:$0xff] %vm1202_vm1, %v1098_v47  ;;  %v900_v50 = vadd.f32 %v3557_v30, %v899_v49  ;;  %v3652_v51 = vpop.f32.mrf.mxu1 }
  0xcb   : > { %v2157_v52 = vld [vmem:[#allocation2 + $0x30] sm:$0xff] }
  0xcc   : > { %1210 = vst.msk [vmem:[#allocation2 + $0x38] sm:$0xff] %vm1202_vm1, %v900_v50  ;;  %v2253_v54 = vadd.f32 %v2157_v52, %v1926_v48 }
  0xce   : > { %v2444_v55 = vld [vmem:[#allocation2 + $0x28] sm:$0xff]  ;;  %2349 = vst.msk [vmem:[#allocation2 + $0x30] sm:$0xff] %vm1202_vm1, %v2253_v54  ;;  %v3257_v54 = vld [vmem:[%s3472_s4 + $0x70] sm:$0xff] }
  0xcf   : > { %2572 = vst.msk [vmem:[%s3589_s10 + $0x28] sm:$0xff] %vm1202_vm1, %v2444_v55  ;;  %v1099_v56 = vpop.f32.mrf.mxu3  ;;  %v3297_v55 = vld [vmem:[%s3472_s4 + $0x1b0] sm:$0xff] }
  0xd0   : > { %v1100_v57 = vadd.f32 %v3557_v30, %v1099_v56 }
  0xd1   : > { %v1928_v58 = vpop.f32.mrf.mxu2  ;;  %v902_v61 = vpop.f32.mrf.mxu0 }
  0xd2   : > { %1290 = vst.msk [vmem:[#allocation2 + $0x2b8] sm:$0xff] %vm1202_vm1, %v1100_v57  ;;  %v903_v0 = vadd.f32 %v3557_v30, %v902_v61  ;;  %v3664_v1 = vpop.f32.mrf.mxu1  ;;  %v3273_v57 = vld [vmem:[%s3472_s4 + $0xf0] sm:$0xff] }
  0xd3   : > { %v2158_v2 = vld [vmem:[#allocation2 + $0x38] sm:$0xff] }
  0xd4   : > { %1211 = vst.msk [vmem:[#allocation2 + $0x40] sm:$0xff] %vm1202_vm1, %v903_v0  ;;  %v2254_v3 = vadd.f32 %v2158_v2, %v1928_v58  ;;  %3071 = vmatmul.msk.bf16.gmra.mxu0 %vm680_vm0, %v3255_v59  ;;  %3111 = vmatmul.msk.bf16.gmra.mxu3 %vm680_vm0, %v3295_v60 }
  0xd5   : > { %v2445_v4 = vld [vmem:[#allocation2 + $0x30] sm:$0xff]  ;;  %3143 = vmatmul.msk.bf16.gmra.mxu1 %vm680_vm0, %v3255_v59 }
  0xd6   : > { %3203 = vmatmul.msk.bf16.gmra.mxu2 %vm680_vm0, %v3271_v63  ;;  %2573 = vst.msk [vmem:[%s3589_s10 + $0x30] sm:$0xff] %vm1202_vm1, %v2445_v4 }
  0xd7   : > { %2350 = vst.msk [vmem:[#allocation2 + $0x38] sm:$0xff] %vm1202_vm1, %v2254_v3  ;;  %v1102_v5 = vpop.f32.mrf.mxu3 }
  0xd8   : > { %v1103_v6 = vadd.f32 %v3557_v30, %v1102_v5 }
  0xd9   : > { %v1931_v7 = vpop.f32.mrf.mxu2  ;;  %v904_v9 = vpop.f32.mrf.mxu0 }
  0xda   : > { %1291 = vst.msk [vmem:[#allocation2 + $0x2c0] sm:$0xff] %vm1202_vm1, %v1103_v6  ;;  %v905_v10 = vadd.f32 %v3557_v30, %v904_v9  ;;  %v3677_v13 = vpop.f32.mrf.mxu1 }
  0xdb   : > { %v2159_v15 = vld [vmem:[#allocation2 + $0x40] sm:$0xff] }
  0xdc   : > { %1212 = vst.msk [vmem:[#allocation2 + $0x48] sm:$0xff] %vm1202_vm1, %v905_v10  ;;  %v2255_v16 = vadd.f32 %v2159_v15, %v1931_v7 }
  0xde   : > { %v2446_v18 = vld [vmem:[#allocation2 + $0x38] sm:$0xff]  ;;  %2351 = vst.msk [vmem:[#allocation2 + $0x40] sm:$0xff] %vm1202_vm1, %v2255_v16 }
  0xdf   : > { %2574 = vst.msk [vmem:[%s3589_s10 + $0x38] sm:$0xff] %vm1202_vm1, %v2446_v18  ;;  %v1104_v19 = vpop.f32.mrf.mxu3 }
  0xe0   : > { %v1105_v21 = vadd.f32 %v3557_v30, %v1104_v19  ;;  %v3258_v19 = vld [vmem:[%s3472_s4 + $0x78] sm:$0xff] }
  0xe1   : > { %v1933_v22 = vpop.f32.mrf.mxu2  ;;  %v907_v28 = vpop.f32.mrf.mxu0 }
  0xe2   : > { %1292 = vst.msk [vmem:[#allocation2 + $0x2c8] sm:$0xff] %vm1202_vm1, %v1105_v21  ;;  %v908_v32 = vadd.f32 %v3557_v30, %v907_v28  ;;  %v3689_v33 = vpop.f32.mrf.mxu1  ;;  %v3298_v21 = vld [vmem:[%s3472_s4 + $0x1b8] sm:$0xff] }
  0xe3   : > { %v2160_v34 = vld [vmem:[#allocation2 + $0x48] sm:$0xff] }
  0xe4   : > { %1213 = vst.msk [vmem:[#allocation2 + $0x50] sm:$0xff] %vm1202_vm1, %v908_v32  ;;  %v2256_v35 = vadd.f32 %v2160_v34, %v1933_v22  ;;  %3072 = vmatmul.msk.bf16.gmra.mxu0 %vm680_vm0, %v3256_v24  ;;  %3112 = vmatmul.msk.bf16.gmra.mxu3 %vm680_vm0, %v3296_v27 }
  0xe5   : > { %v2447_v37 = vld [vmem:[#allocation2 + $0x40] sm:$0xff]  ;;  %3144 = vmatmul.msk.bf16.gmra.mxu1 %vm680_vm0, %v3256_v24  ;;  %v3274_v24 = vld [vmem:[%s3472_s4 + $0xf8] sm:$0xff] }
  0xe6   : > { %3204 = vmatmul.msk.bf16.gmra.mxu2 %vm680_vm0, %v3272_v31  ;;  %2575 = vst.msk [vmem:[%s3589_s10 + $0x40] sm:$0xff] %vm1202_vm1, %v2447_v37 }
  0xe7   : > { %2352 = vst.msk [vmem:[#allocation2 + $0x48] sm:$0xff] %vm1202_vm1, %v2256_v35  ;;  %v1107_v38 = vpop.f32.mrf.mxu3 }
  0xe8   : > { %v1108_v39 = vadd.f32 %v3557_v30, %v1107_v38 }
  0xe9   : > { %v1936_v40 = vpop.f32.mrf.mxu2  ;;  %v909_v43 = vpop.f32.mrf.mxu0 }
  0xea   : > { %1293 = vst.msk [vmem:[#allocation2 + $0x2d0] sm:$0xff] %vm1202_vm1, %v1108_v39  ;;  %v910_v44 = vadd.f32 %v3557_v30, %v909_v43  ;;  %v3702_v45 = vpop.f32.mrf.mxu1 }
  0xeb   : > { %v2161_v46 = vld [vmem:[#allocation2 + $0x50] sm:$0xff] }
  0xec   : > { %1214 = vst.msk [vmem:[#allocation2 + $0x58] sm:$0xff] %vm1202_vm1, %v910_v44  ;;  %v2257_v47 = vadd.f32 %v2161_v46, %v1936_v40 }
  0xee   : > { %v2448_v48 = vld [vmem:[#allocation2 + $0x48] sm:$0xff]  ;;  %2353 = vst.msk [vmem:[#allocation2 + $0x50] sm:$0xff] %vm1202_vm1, %v2257_v47 }
  0xef   : > { %2576 = vst.msk [vmem:[%s3589_s10 + $0x48] sm:$0xff] %vm1202_vm1, %v2448_v48  ;;  %v1109_v49 = vpop.f32.mrf.mxu3 }
  0xf0   : > { %v1110_v50 = vadd.f32 %v3557_v30, %v1109_v49 }
  0xf1   : > { %v1938_v52 = vpop.f32.mrf.mxu2  ;;  %v912_v56 = vpop.f32.mrf.mxu0 }
  0xf2   : > { %1294 = vst.msk [vmem:[#allocation2 + $0x2d8] sm:$0xff] %vm1202_vm1, %v1110_v50  ;;  %v913_v58 = vadd.f32 %v3557_v30, %v912_v56  ;;  %v3714_v59 = vpop.f32.mrf.mxu1 }
  0xf3   : > { %v2162_v60 = vld [vmem:[#allocation2 + $0x58] sm:$0xff] }
  0xf4   : > { %1215 = vst.msk [vmem:[#allocation2 + $0x60] sm:$0xff] %vm1202_vm1, %v913_v58  ;;  %v2258_v61 = vadd.f32 %v2162_v60, %v1938_v52  ;;  %3073 = vmatmul.msk.bf16.gmra.mxu0 %vm680_vm0, %v3257_v54  ;;  %3113 = vmatmul.msk.bf16.gmra.mxu3 %vm680_vm0, %v3297_v55  ;;  %v3299_v52 = vld [vmem:[%s3472_s4 + $0x1c0] sm:$0xff] }
  0xf5   : > { %v2449_v63 = vld [vmem:[#allocation2 + $0x50] sm:$0xff]  ;;  %3145 = vmatmul.msk.bf16.gmra.mxu1 %vm680_vm0, %v3257_v54  ;;  %v3275_v55 = vld [vmem:[%s3472_s4 + $0x100] sm:$0xff] }
  0xf6   : > { %3205 = vmatmul.msk.bf16.gmra.mxu2 %vm680_vm0, %v3273_v57  ;;  %2577 = vst.msk [vmem:[%s3589_s10 + $0x50] sm:$0xff] %vm1202_vm1, %v2449_v63 }
  0xf7   : > { %2354 = vst.msk [vmem:[#allocation2 + $0x58] sm:$0xff] %vm1202_vm1, %v2258_v61  ;;  %v1112_v0 = vpop.f32.mrf.mxu3 }
  0xf8   : > { %v1113_v2 = vadd.f32 %v3557_v30, %v1112_v0 }
  0xf9   : > { %v1941_v3 = vpop.f32.mrf.mxu2  ;;  %v914_v4 = vpop.f32.mrf.mxu0 }
  0xfa   : > { %1295 = vst.msk [vmem:[#allocation2 + $0x2e0] sm:$0xff] %vm1202_vm1, %v1113_v2  ;;  %v915_v5 = vadd.f32 %v3557_v30, %v914_v4  ;;  %v3727_v6 = vpop.f32.mrf.mxu1 }
  0xfb   : > { %v2163_v7 = vld [vmem:[#allocation2 + $0x60] sm:$0xff] }
  0xfc   : > { %1216 = vst.msk [vmem:[#allocation2 + $0x68] sm:$0xff] %vm1202_vm1, %v915_v5  ;;  %v2259_v9 = vadd.f32 %v2163_v7, %v1941_v3 }
  0xfe   : > { %v2450_v10 = vld [vmem:[#allocation2 + $0x58] sm:$0xff]  ;;  %2355 = vst.msk [vmem:[#allocation2 + $0x60] sm:$0xff] %vm1202_vm1, %v2259_v9 }
  0xff   : > { %2578 = vst.msk [vmem:[%s3589_s10 + $0x58] sm:$0xff] %vm1202_vm1, %v2450_v10  ;;  %v1114_v15 = vpop.f32.mrf.mxu3 }
 0x100   : > { %v1115_v16 = vadd.f32 %v3557_v30, %v1114_v15 }
 0x101   : > { %v1943_v18 = vpop.f32.mrf.mxu2  ;;  %v917_v22 = vpop.f32.mrf.mxu0 }
 0x102   : > { %1296 = vst.msk [vmem:[#allocation2 + $0x2e8] sm:$0xff] %vm1202_vm1, %v1115_v16  ;;  %v918_v27 = vadd.f32 %v3557_v30, %v917_v22  ;;  %v3739_v28 = vpop.f32.mrf.mxu1 }
 0x103   : > { %v2164_v31 = vld [vmem:[#allocation2 + $0x68] sm:$0xff] }
 0x104   : > { %1217 = vst.msk [vmem:[#allocation2 + $0x70] sm:$0xff] %vm1202_vm1, %v918_v27  ;;  %v2260_v32 = vadd.f32 %v2164_v31, %v1943_v18  ;;  %3074 = vmatmul.msk.bf16.gmra.mxu0 %vm680_vm0, %v3258_v19  ;;  %3114 = vmatmul.msk.bf16.gmra.mxu3 %vm680_vm0, %v3298_v21  ;;  %v3300_v18 = vld [vmem:[%s3472_s4 + $0x1c8] sm:$0xff] }
 0x105   : > { %v2451_v34 = vld [vmem:[#allocation2 + $0x60] sm:$0xff]  ;;  %3146 = vmatmul.msk.bf16.gmra.mxu1 %vm680_vm0, %v3258_v19  ;;  %v3276_v21 = vld [vmem:[%s3472_s4 + $0x108] sm:$0xff] }
 0x106   : > { %3206 = vmatmul.msk.bf16.gmra.mxu2 %vm680_vm0, %v3274_v24  ;;  %2579 = vst.msk [vmem:[%s3589_s10 + $0x60] sm:$0xff] %vm1202_vm1, %v2451_v34 }
 0x107   : > { %2356 = vst.msk [vmem:[#allocation2 + $0x68] sm:$0xff] %vm1202_vm1, %v2260_v32  ;;  %v1117_v35 = vpop.f32.mrf.mxu3 }
 0x108   : > { %v1118_v37 = vadd.f32 %v3557_v30, %v1117_v35 }
 0x109   : > { %v1946_v38 = vpop.f32.mrf.mxu2  ;;  %v919_v39 = vpop.f32.mrf.mxu0 }
 0x10a   : > { %1297 = vst.msk [vmem:[#allocation2 + $0x2f0] sm:$0xff] %vm1202_vm1, %v1118_v37  ;;  %v920_v40 = vadd.f32 %v3557_v30, %v919_v39  ;;  %v3752_v43 = vpop.f32.mrf.mxu1 }
 0x10b   : > { %v2165_v44 = vld [vmem:[#allocation2 + $0x70] sm:$0xff] }
 0x10c   : > { %1218 = vst.msk [vmem:[#allocation2 + $0x78] sm:$0xff] %vm1202_vm1, %v920_v40  ;;  %v2261_v46 = vadd.f32 %v2165_v44, %v1946_v38 }
 0x10e   : > { %v2452_v47 = vld [vmem:[#allocation2 + $0x68] sm:$0xff]  ;;  %2357 = vst.msk [vmem:[#allocation2 + $0x70] sm:$0xff] %vm1202_vm1, %v2261_v46 }
 0x10f   : > { %2580 = vst.msk [vmem:[%s3589_s10 + $0x68] sm:$0xff] %vm1202_vm1, %v2452_v47  ;;  %v1119_v48 = vpop.f32.mrf.mxu3 }
 0x110   : > { %v1120_v49 = vadd.f32 %v3557_v30, %v1119_v48 }
 0x111   : > { %v1948_v50 = vpop.f32.mrf.mxu2  ;;  %v922_v54 = vpop.f32.mrf.mxu0 }
 0x112   : > { %1298 = vst.msk [vmem:[#allocation2 + $0x2f8] sm:$0xff] %vm1202_vm1, %v1120_v49  ;;  %v923_v56 = vadd.f32 %v3557_v30, %v922_v54  ;;  %v3763_v57 = vpop.f32.mrf.mxu1  ;;  %v3277_v54 = vld [vmem:[%s3472_s4 + $0x110] sm:$0xff] }
 0x113   : > { %v2166_v58 = vld [vmem:[#allocation2 + $0x78] sm:$0xff] }
 0x114   : > { %1219 = vst.msk [vmem:[#allocation2 + $0x80] sm:$0xff] %vm1202_vm1, %v923_v56  ;;  %v2262_v60 = vadd.f32 %v2166_v58, %v1948_v50  ;;  %3075 = vmatmul.msk.bf16.gmra.mxu0 %vm680_vm0, %v3477_v8  ;;  %3115 = vmatmul.msk.bf16.gmra.mxu3 %vm680_vm0, %v3299_v52  ;;  %v3301_v50 = vld [vmem:[%s3472_s4 + $0x1d0] sm:$0xff] }
 0x115   : > { %v2453_v61 = vld [vmem:[#allocation2 + $0x70] sm:$0xff]  ;;  %3147 = vmatmul.msk.bf16.gmra.mxu1 %vm680_vm0, %v3477_v8 }
 0x116   : > { %3207 = vmatmul.msk.bf16.gmra.mxu2 %vm680_vm0, %v3275_v55  ;;  %2581 = vst.msk [vmem:[%s3589_s10 + $0x70] sm:$0xff] %vm1202_vm1, %v2453_v61 }
 0x117   : > { %2358 = vst.msk [vmem:[#allocation2 + $0x78] sm:$0xff] %vm1202_vm1, %v2262_v60  ;;  %v1122_v63 = vpop.f32.mrf.mxu3 }
 0x118   : > { %v1123_v0 = vadd.f32 %v3557_v30, %v1122_v63 }
 0x119   : > { %v1951_v2 = vpop.f32.mrf.mxu2  ;;  %v924_v3 = vpop.f32.mrf.mxu0 }
 0x11a   : > { %1299 = vst.msk [vmem:[#allocation2 + $0x300] sm:$0xff] %vm1202_vm1, %v1123_v0  ;;  %v925_v4 = vadd.f32 %v3557_v30, %v924_v3  ;;  %v3778_v5 = vpop.f32.mrf.mxu1 }
 0x11b   : > { %v2167_v8 = vld [vmem:[#allocation2 + $0x80] sm:$0xff] }
 0x11c   : > { %1220 = vst.msk [vmem:[#allocation2 + $0x88] sm:$0xff] %vm1202_vm1, %v925_v4  ;;  %v2263_v7 = vadd.f32 %v2167_v8, %v1951_v2 }
 0x11e   : > { %v2454_v9 = vld [vmem:[#allocation2 + $0x78] sm:$0xff]  ;;  %2359 = vst.msk [vmem:[#allocation2 + $0x80] sm:$0xff] %vm1202_vm1, %v2263_v7 }
 0x11f   : > { %2582 = vst.msk [vmem:[%s3589_s10 + $0x78] sm:$0xff] %vm1202_vm1, %v2454_v9  ;;  %v1124_v10 = vpop.f32.mrf.mxu3 }
 0x120   : > { %v1125_v15 = vadd.f32 %v3557_v30, %v1124_v10 }
 0x121   : > { %v1953_v16 = vpop.f32.mrf.mxu2  ;;  %v927_v19 = vpop.f32.mrf.mxu0 }
 0x122   : > { %1300 = vst.msk [vmem:[#allocation2 + $0x308] sm:$0xff] %vm1202_vm1, %v1125_v15  ;;  %v928_v22 = vadd.f32 %v3557_v30, %v927_v19  ;;  %v3789_v24 = vpop.f32.mrf.mxu1 }
 0x123   : > { %v2168_v27 = vld [vmem:[#allocation2 + $0x88] sm:$0xff] }
 0x124   : > { %1221 = vst.msk [vmem:[#allocation2 + $0x90] sm:$0xff] %vm1202_vm1, %v928_v22  ;;  %v2264_v31 = vadd.f32 %v2168_v27, %v1953_v16  ;;  %3076 = vmatmul.msk.bf16.gmra.mxu0 %vm680_vm0, %v3487_v11  ;;  %3116 = vmatmul.msk.bf16.gmra.mxu3 %vm680_vm0, %v3300_v18  ;;  %v3302_v18 = vld [vmem:[%s3472_s4 + $0x1d8] sm:$0xff] }
 0x125   : > { %v2455_v32 = vld [vmem:[#allocation2 + $0x80] sm:$0xff]  ;;  %3148 = vmatmul.msk.bf16.gmra.mxu1 %vm680_vm0, %v3487_v11 }
 0x126   : > { %3208 = vmatmul.msk.bf16.gmra.mxu2 %vm680_vm0, %v3276_v21  ;;  %2583 = vst.msk [vmem:[%s3589_s10 + $0x80] sm:$0xff] %vm1202_vm1, %v2455_v32  ;;  %v3278_v21 = vld [vmem:[%s3472_s4 + $0x118] sm:$0xff] }
 0x127   : > { %2360 = vst.msk [vmem:[#allocation2 + $0x88] sm:$0xff] %vm1202_vm1, %v2264_v31  ;;  %v1127_v34 = vpop.f32.mrf.mxu3 }
 0x128   : > { %v1128_v35 = vadd.f32 %v3557_v30, %v1127_v34 }
 0x129   : > { %v1956_v37 = vpop.f32.mrf.mxu2  ;;  %v929_v38 = vpop.f32.mrf.mxu0 }
 0x12a   : > { %1301 = vst.msk [vmem:[#allocation2 + $0x310] sm:$0xff] %vm1202_vm1, %v1128_v35  ;;  %v930_v39 = vadd.f32 %v3557_v30, %v929_v38  ;;  %v3804_v40 = vpop.f32.mrf.mxu1 }
 0x12b   : > { %v2169_v11 = vld [vmem:[#allocation2 + $0x90] sm:$0xff] }
 0x12c   : > { %1222 = vst.msk [vmem:[#allocation2 + $0x98] sm:$0xff] %vm1202_vm1, %v930_v39  ;;  %v2265_v44 = vadd.f32 %v2169_v11, %v1956_v37 }
 0x12e   : > { %v2456_v46 = vld [vmem:[#allocation2 + $0x88] sm:$0xff]  ;;  %2361 = vst.msk [vmem:[#allocation2 + $0x90] sm:$0xff] %vm1202_vm1, %v2265_v44 }
 0x12f   : > { %2584 = vst.msk [vmem:[%s3589_s10 + $0x88] sm:$0xff] %vm1202_vm1, %v2456_v46  ;;  %v1129_v47 = vpop.f32.mrf.mxu3 }
 0x130   : > { %v1130_v48 = vadd.f32 %v3557_v30, %v1129_v47 }
 0x131   : > { %v1958_v49 = vpop.f32.mrf.mxu2  ;;  %v932_v52 = vpop.f32.mrf.mxu0 }
 0x132   : > { %1302 = vst.msk [vmem:[#allocation2 + $0x318] sm:$0xff] %vm1202_vm1, %v1130_v48  ;;  %v933_v55 = vadd.f32 %v3557_v30, %v932_v52  ;;  %v3815_v56 = vpop.f32.mrf.mxu1  ;;  %v3303_v52 = vld [vmem:[%s3472_s4 + $0x1e0] sm:$0xff] }
 0x133   : > { %v2170_v58 = vld [vmem:[#allocation2 + $0x98] sm:$0xff] }
 0x134   : > { %1223 = vst.msk [vmem:[#allocation2 + $0xa0] sm:$0xff] %vm1202_vm1, %v933_v55  ;;  %v2266_v60 = vadd.f32 %v2170_v58, %v1958_v49  ;;  %3077 = vmatmul.msk.bf16.gmra.mxu0 %vm680_vm0, %v3497_v14  ;;  %3117 = vmatmul.msk.bf16.gmra.mxu3 %vm680_vm0, %v3301_v50  ;;  %v3279_v55 = vld [vmem:[%s3472_s4 + $0x120] sm:$0xff] }
 0x135   : > { %v2457_v61 = vld [vmem:[#allocation2 + $0x90] sm:$0xff]  ;;  %3149 = vmatmul.msk.bf16.gmra.mxu1 %vm680_vm0, %v3497_v14 }
 0x136   : > { %3209 = vmatmul.msk.bf16.gmra.mxu2 %vm680_vm0, %v3277_v54  ;;  %2585 = vst.msk [vmem:[%s3589_s10 + $0x90] sm:$0xff] %vm1202_vm1, %v2457_v61 }
 0x137   : > { %2362 = vst.msk [vmem:[#allocation2 + $0x98] sm:$0xff] %vm1202_vm1, %v2266_v60  ;;  %v1132_v63 = vpop.f32.mrf.mxu3 }
 0x138   : > { %v1133_v0 = vadd.f32 %v3557_v30, %v1132_v63 }
 0x139   : > { %v1961_v2 = vpop.f32.mrf.mxu2  ;;  %v934_v3 = vpop.f32.mrf.mxu0 }
 0x13a   : > { %1303 = vst.msk [vmem:[#allocation2 + $0x320] sm:$0xff] %vm1202_vm1, %v1133_v0  ;;  %v935_v4 = vadd.f32 %v3557_v30, %v934_v3  ;;  %v3830_v8 = vpop.f32.mrf.mxu1 }
 0x13b   : > { %v2171_v14 = vld [vmem:[#allocation2 + $0xa0] sm:$0xff] }
 0x13c   : > { %1224 = vst.msk [vmem:[#allocation2 + $0xa8] sm:$0xff] %vm1202_vm1, %v935_v4  ;;  %v2267_v7 = vadd.f32 %v2171_v14, %v1961_v2 }
 0x13e   : > { %v2458_v9 = vld [vmem:[#allocation2 + $0x98] sm:$0xff]  ;;  %2363 = vst.msk [vmem:[#allocation2 + $0xa0] sm:$0xff] %vm1202_vm1, %v2267_v7 }
 0x13f   : > { %2586 = vst.msk [vmem:[%s3589_s10 + $0x98] sm:$0xff] %vm1202_vm1, %v2458_v9  ;;  %v1134_v10 = vpop.f32.mrf.mxu3 }
 0x140   : > { %v1135_v15 = vadd.f32 %v3557_v30, %v1134_v10 }
 0x141   : > { %v1963_v16 = vpop.f32.mrf.mxu2  ;;  %v937_v19 = vpop.f32.mrf.mxu0 }
 0x142   : > { %1304 = vst.msk [vmem:[#allocation2 + $0x328] sm:$0xff] %vm1202_vm1, %v1135_v15  ;;  %v938_v22 = vadd.f32 %v3557_v30, %v937_v19  ;;  %v3841_v27 = vpop.f32.mrf.mxu1 }
 0x143   : > { %v2172_v31 = vld [vmem:[#allocation2 + $0xa8] sm:$0xff] }
 0x144   : > { %1225 = vst.msk [vmem:[#allocation2 + $0xb0] sm:$0xff] %vm1202_vm1, %v938_v22  ;;  %v2268_v32 = vadd.f32 %v2172_v31, %v1963_v16  ;;  %3078 = vmatmul.msk.bf16.gmra.mxu0 %vm680_vm0, %v3507_v17  ;;  %3118 = vmatmul.msk.bf16.gmra.mxu3 %vm680_vm0, %v3302_v18  ;;  %v3280_v31 = vld [vmem:[%s3472_s4 + $0x128] sm:$0xff] }
 0x145   : > { %v2459_v34 = vld [vmem:[#allocation2 + $0xa0] sm:$0xff]  ;;  %3150 = vmatmul.msk.bf16.gmra.mxu1 %vm680_vm0, %v3507_v17 }
 0x146   : > { %3210 = vmatmul.msk.bf16.gmra.mxu2 %vm680_vm0, %v3278_v21  ;;  %2587 = vst.msk [vmem:[%s3589_s10 + $0xa0] sm:$0xff] %vm1202_vm1, %v2459_v34  ;;  %v3304_v21 = vld [vmem:[%s3472_s4 + $0x1e8] sm:$0xff] }
 0x147   : > { %2364 = vst.msk [vmem:[#allocation2 + $0xa8] sm:$0xff] %vm1202_vm1, %v2268_v32  ;;  %v1137_v35 = vpop.f32.mrf.mxu3 }
 0x148   : > { %v1138_v37 = vadd.f32 %v3557_v30, %v1137_v35 }
 0x149   : > { %v1966_v38 = vpop.f32.mrf.mxu2  ;;  %v939_v39 = vpop.f32.mrf.mxu0 }
 0x14a   : > { %1305 = vst.msk [vmem:[#allocation2 + $0x330] sm:$0xff] %vm1202_vm1, %v1138_v37  ;;  %v940_v11 = vadd.f32 %v3557_v30, %v939_v39  ;;  %v3856_v44 = vpop.f32.mrf.mxu1 }
 0x14b   : > { %v2173_v17 = vld [vmem:[#allocation2 + $0xb0] sm:$0xff] }
 0x14c   : > { %1226 = vst.msk [vmem:[#allocation2 + $0xb8] sm:$0xff] %vm1202_vm1, %v940_v11  ;;  %v2269_v46 = vadd.f32 %v2173_v17, %v1966_v38 }
 0x14e   : > { %v2460_v47 = vld [vmem:[#allocation2 + $0xa8] sm:$0xff]  ;;  %2365 = vst.msk [vmem:[#allocation2 + $0xb0] sm:$0xff] %vm1202_vm1, %v2269_v46 }
 0x14f   : > { %2588 = vst.msk [vmem:[%s3589_s10 + $0xa8] sm:$0xff] %vm1202_vm1, %v2460_v47  ;;  %v1139_v48 = vpop.f32.mrf.mxu3 }
 0x150   : > { %v1140_v49 = vadd.f32 %v3557_v30, %v1139_v48 }
 0x151   : > { %v1968_v50 = vpop.f32.mrf.mxu2  ;;  %v942_v54 = vpop.f32.mrf.mxu0 }
 0x152   : > { %1306 = vst.msk [vmem:[#allocation2 + $0x338] sm:$0xff] %vm1202_vm1, %v1140_v49  ;;  %v943_v58 = vadd.f32 %v3557_v30, %v942_v54  ;;  %v3867_v60 = vpop.f32.mrf.mxu1 }
 0x153   : > { %v2174_v61 = vld [vmem:[#allocation2 + $0xb8] sm:$0xff] }
 0x154   : > { %1227 = vst.msk [vmem:[#allocation2 + $0xc0] sm:$0xff] %vm1202_vm1, %v943_v58  ;;  %v2270_v63 = vadd.f32 %v2174_v61, %v1968_v50  ;;  %3079 = vmatmul.msk.bf16.gmra.mxu0 %vm680_vm0, %v3517_v20  ;;  %3119 = vmatmul.msk.bf16.gmra.mxu3 %vm680_vm0, %v3303_v52  ;;  %v3305_v58 = vld [vmem:[%s3472_s4 + $0x1f0] sm:$0xff] }
 0x155   : > { %v2461_v0 = vld [vmem:[#allocation2 + $0xb0] sm:$0xff]  ;;  %3151 = vmatmul.msk.bf16.gmra.mxu1 %vm680_vm0, %v3517_v20 }
 0x156   : > { %3211 = vmatmul.msk.bf16.gmra.mxu2 %vm680_vm0, %v3279_v55  ;;  %2589 = vst.msk [vmem:[%s3589_s10 + $0xb0] sm:$0xff] %vm1202_vm1, %v2461_v0 }
 0x157   : > { %2366 = vst.msk [vmem:[#allocation2 + $0xb8] sm:$0xff] %vm1202_vm1, %v2270_v63  ;;  %v1142_v2 = vpop.f32.mrf.mxu3  ;;  %v3281_v63 = vld [vmem:[%s3472_s4 + $0x130] sm:$0xff] }
 0x158   : > { %v1143_v3 = vadd.f32 %v3557_v30, %v1142_v2 }
 0x159   : > { %v1971_v4 = vpop.f32.mrf.mxu2  ;;  %v944_v14 = vpop.f32.mrf.mxu0 }
 0x15a   : > { %1307 = vst.msk [vmem:[#allocation2 + $0x340] sm:$0xff] %vm1202_vm1, %v1143_v3  ;;  %v945_v7 = vadd.f32 %v3557_v30, %v944_v14  ;;  %v3882_v9 = vpop.f32.mrf.mxu1 }
 0x15b   : > { %v2175_v20 = vld [vmem:[#allocation2 + $0xc0] sm:$0xff] }
 0x15c   : > { %1228 = vst.msk [vmem:[#allocation2 + $0xc8] sm:$0xff] %vm1202_vm1, %v945_v7  ;;  %v2271_v10 = vadd.f32 %v2175_v20, %v1971_v4 }
 0x15e   : > { %v2462_v15 = vld [vmem:[#allocation2 + $0xb8] sm:$0xff]  ;;  %2367 = vst.msk [vmem:[#allocation2 + $0xc0] sm:$0xff] %vm1202_vm1, %v2271_v10 }
 0x15f   : > { %2590 = vst.msk [vmem:[%s3589_s10 + $0xb8] sm:$0xff] %vm1202_vm1, %v2462_v15  ;;  %v1144_v16 = vpop.f32.mrf.mxu3 }
 0x160   : > { %v1145_v18 = vadd.f32 %v3557_v30, %v1144_v16 }
 0x161   : > { %v1973_v19 = vpop.f32.mrf.mxu2  ;;  %v947_v22 = vpop.f32.mrf.mxu0 }
 0x162   : > { %1308 = vst.msk [vmem:[#allocation2 + $0x348] sm:$0xff] %vm1202_vm1, %v1145_v18  ;;  %v948_v32 = vadd.f32 %v3557_v30, %v947_v22  ;;  %v3893_v34 = vpop.f32.mrf.mxu1 }
 0x163   : > { %v2176_v35 = vld [vmem:[#allocation2 + $0xc8] sm:$0xff] }
 0x164   : > { %1229 = vst.msk [vmem:[#allocation2 + $0xd0] sm:$0xff] %vm1202_vm1, %v948_v32  ;;  %v2272_v37 = vadd.f32 %v2176_v35, %v1973_v19  ;;  %3080 = vmatmul.msk.bf16.gmra.mxu0 %vm680_vm0, %v3527_v23  ;;  %3120 = vmatmul.msk.bf16.gmra.mxu3 %vm680_vm0, %v3304_v21  ;;  %v3306_v35 = vld [vmem:[%s3472_s4 + $0x1f8] sm:$0xff] }
 0x165   : > { %v2463_v38 = vld [vmem:[#allocation2 + $0xc0] sm:$0xff]  ;;  %3152 = vmatmul.msk.bf16.gmra.mxu1 %vm680_vm0, %v3527_v23 }
 0x166   : > { %3212 = vmatmul.msk.bf16.gmra.mxu2 %vm680_vm0, %v3280_v31  ;;  %2591 = vst.msk [vmem:[%s3589_s10 + $0xc0] sm:$0xff] %vm1202_vm1, %v2463_v38  ;;  %v3282_v38 = vld [vmem:[%s3472_s4 + $0x138] sm:$0xff] }
 0x167   : > { %2368 = vst.msk [vmem:[#allocation2 + $0xc8] sm:$0xff] %vm1202_vm1, %v2272_v37  ;;  %v1147_v39 = vpop.f32.mrf.mxu3 }
 0x168   : > { %v1148_v11 = vadd.f32 %v3557_v30, %v1147_v39 }
 0x169   : > { %v1976_v17 = vpop.f32.mrf.mxu2  ;;  %v949_v46 = vpop.f32.mrf.mxu0 }
 0x16a   : > { %1309 = vst.msk [vmem:[#allocation2 + $0x350] sm:$0xff] %vm1202_vm1, %v1148_v11  ;;  %v950_v47 = vadd.f32 %v3557_v30, %v949_v46  ;;  %v3908_v48 = vpop.f32.mrf.mxu1 }
 0x16b   : > { %v2177_v23 = vld [vmem:[#allocation2 + $0xd0] sm:$0xff] }
 0x16c   : > { %1230 = vst.msk [vmem:[#allocation2 + $0xd8] sm:$0xff] %vm1202_vm1, %v950_v47  ;;  %v2273_v49 = vadd.f32 %v2177_v23, %v1976_v17 }
 0x16e   : > { %v2464_v50 = vld [vmem:[#allocation2 + $0xc8] sm:$0xff]  ;;  %2369 = vst.msk [vmem:[#allocation2 + $0xd0] sm:$0xff] %vm1202_vm1, %v2273_v49 }
 0x16f   : > { %2592 = vst.msk [vmem:[%s3589_s10 + $0xc8] sm:$0xff] %vm1202_vm1, %v2464_v50  ;;  %v1149_v52 = vpop.f32.mrf.mxu3 }
 0x170   : > { %v1150_v54 = vadd.f32 %v3557_v30, %v1149_v52 }
 0x171   : > { %v1978_v55 = vpop.f32.mrf.mxu2  ;;  %v952_v61 = vpop.f32.mrf.mxu0 }
 0x172   : > { %1310 = vst.msk [vmem:[#allocation2 + $0x358] sm:$0xff] %vm1202_vm1, %v1150_v54  ;;  %v953_v0 = vadd.f32 %v3557_v30, %v952_v61  ;;  %v3919_v2 = vpop.f32.mrf.mxu1 }
 0x173   : > { %v2178_v3 = vld [vmem:[#allocation2 + $0xd8] sm:$0xff] }
 0x174   : > { %1231 = vst.msk [vmem:[#allocation2 + $0xe0] sm:$0xff] %vm1202_vm1, %v953_v0  ;;  %v2274_v4 = vadd.f32 %v2178_v3, %v1978_v55  ;;  %3081 = vmatmul.msk.bf16.gmra.mxu0 %vm680_vm0, %v3537_v26  ;;  %3121 = vmatmul.msk.bf16.gmra.mxu3 %vm680_vm0, %v3305_v58  ;;  %v3969_v0 = vld [vmem:[%s4658_s2] ss:$0 sm:$0xff] }
 0x175   : > { %v2465_v14 = vld [vmem:[#allocation2 + $0xd0] sm:$0xff]  ;;  %3153 = vmatmul.msk.bf16.gmra.mxu1 %vm680_vm0, %v3537_v26 }
 0x176   : > { %3213 = vmatmul.msk.bf16.gmra.mxu2 %vm680_vm0, %v3281_v63  ;;  %2593 = vst.msk [vmem:[%s3589_s10 + $0xd0] sm:$0xff] %vm1202_vm1, %v2465_v14 }
 0x177   : > { %2370 = vst.msk [vmem:[#allocation2 + $0xd8] sm:$0xff] %vm1202_vm1, %v2274_v4  ;;  %v1152_v7 = vpop.f32.mrf.mxu3 }
 0x178   : > { %v1153_v20 = vadd.f32 %v3557_v30, %v1152_v7 }
 0x179   : > { %v1981_v10 = vpop.f32.mrf.mxu2  ;;  %v954_v15 = vpop.f32.mrf.mxu0 }
 0x17a   : > { %1311 = vst.msk [vmem:[#allocation2 + $0x360] sm:$0xff] %vm1202_vm1, %v1153_v20  ;;  %v955_v16 = vadd.f32 %v3557_v30, %v954_v15  ;;  %v3934_v18 = vpop.f32.mrf.mxu1  ;;  %v3345_v15 = vld [vmem:[%s3472_s4 + $0xc0] sm:$0xff] }
 0x17b   : > { %v2179_v26 = vld [vmem:[#allocation2 + $0xe0] sm:$0xff] }
 0x17c   : > { %1232 = vst.msk [vmem:[#allocation2 + $0xe8] sm:$0xff] %vm1202_vm1, %v955_v16  ;;  %v2275_v19 = vadd.f32 %v2179_v26, %v1981_v10  ;;  %v3346_v16 = vld [vmem:[%s3472_s4 + $0x140] sm:$0xff] }
 0x17e   : > { %v2466_v21 = vld [vmem:[#allocation2 + $0xd8] sm:$0xff]  ;;  %2371 = vst.msk [vmem:[#allocation2 + $0xe0] sm:$0xff] %vm1202_vm1, %v2275_v19 }
 0x17f   : > { %2594 = vst.msk [vmem:[%s3589_s10 + $0xd8] sm:$0xff] %vm1202_vm1, %v2466_v21  ;;  %v1154_v22 = vpop.f32.mrf.mxu3 }
 0x180   : > { %v1155_v31 = vadd.f32 %v3557_v30, %v1154_v22 }
 0x181   : > { %v1983_v32 = vpop.f32.mrf.mxu2  ;;  %v957_v37 = vpop.f32.mrf.mxu0 }
 0x182   : > { %1312 = vst.msk [vmem:[#allocation2 + $0x368] sm:$0xff] %vm1202_vm1, %v1155_v31  ;;  %v958_v39 = vadd.f32 %v3557_v30, %v957_v37  ;;  %v3945_v11 = vpop.f32.mrf.mxu1 }
 0x183   : > { %v2180_v17 = vld [vmem:[#allocation2 + $0xe8] sm:$0xff] }
 0x184   : > { %1233 = vst.msk [vmem:[#allocation2 + $0xf0] sm:$0xff] %vm1202_vm1, %v958_v39  ;;  %v2276_v46 = vadd.f32 %v2180_v17, %v1983_v32  ;;  %3082 = vmatmul.msk.bf16.gmra.mxu0 %vm680_vm0, %v3547_v29  ;;  %3122 = vmatmul.msk.bf16.gmra.mxu3 %vm680_vm0, %v3306_v35 }
 0x185   : > { %v2467_v47 = vld [vmem:[#allocation2 + $0xe0] sm:$0xff]  ;;  %3154 = vmatmul.msk.bf16.gmra.mxu1 %vm680_vm0, %v3547_v29 }
 0x186   : > { %3214 = vmatmul.msk.bf16.gmra.mxu2 %vm680_vm0, %v3282_v38  ;;  %2595 = vst.msk [vmem:[%s3589_s10 + $0xe0] sm:$0xff] %vm1202_vm1, %v2467_v47 }
 0x187   : > { %2372 = vst.msk [vmem:[#allocation2 + $0xe8] sm:$0xff] %vm1202_vm1, %v2276_v46  ;;  %v1157_v23 = vpop.f32.mrf.mxu3 }
 0x188   : > { %v1158_v49 = vadd.f32 %v3557_v30, %v1157_v23 }
 0x189   : > { %v1986_v50 = vpop.f32.mrf.mxu2  ;;  %v959_v52 = vpop.f32.mrf.mxu0 }
 0x18a   : > { %1313 = vst.msk [vmem:[#allocation2 + $0x370] sm:$0xff] %vm1202_vm1, %v1158_v49  ;;  %v960_v54 = vadd.f32 %v3557_v30, %v959_v52  ;;  %v3960_v55 = vpop.f32.mrf.mxu1 }
 0x18b   : > { %v2181_v58 = vld [vmem:[#allocation2 + $0xf0] sm:$0xff] }
 0x18c   : > { %1234 = vst.msk [vmem:[#allocation2 + $0xf8] sm:$0xff] %vm1202_vm1, %v960_v54  ;;  %v2277_v29 = vadd.f32 %v2181_v58, %v1986_v50  ;;  %v3347_v54 = vld [vmem:[%s3472_s4 + $0xc8] sm:$0xff] }
 0x18d   : > { %v3348_v58 = vld [vmem:[%s3472_s4 + $0x148] sm:$0xff] }
 0x18e   : > { %v2468_v61 = vld [vmem:[#allocation2 + $0xe8] sm:$0xff]  ;;  %2373 = vst.msk [vmem:[#allocation2 + $0xf0] sm:$0xff] %vm1202_vm1, %v2277_v29 }
 0x18f   : > { %2596 = vst.msk [vmem:[%s3589_s10 + $0xe8] sm:$0xff] %vm1202_vm1, %v2468_v61  ;;  %v1159_v63 = vpop.f32.mrf.mxu3 }
 0x190   : > { %v1160_v30 = vadd.f32 %v3969_v0, %v1159_v63 }
 0x191   : > { %v1988_v3 = vpop.f32.mrf.mxu2  ;;  %v962_v4 = vpop.f32.mrf.mxu0 }
 0x192   : > { %1314 = vst.msk [vmem:[#allocation2 + $0x378] sm:$0xff] %vm1202_vm1, %v1160_v30  ;;  %v963_v14 = vadd.f32 %v3969_v0, %v962_v4  ;;  %v3974_v7 = vpop.f32.mrf.mxu1 }
 0x193   : > { %v2182_v20 = vld [vmem:[#allocation2 + $0xf8] sm:$0xff] }
 0x194   : > { %1235 = vst.msk [vmem:[#allocation2 + $0x100] sm:$0xff] %vm1202_vm1, %v963_v14  ;;  %v2278_v10 = vadd.f32 %v2182_v20, %v1988_v3  ;;  %3083 = vmatmul.msk.bf16.gmra.mxu0 %vm680_vm0, %v3345_v15  ;;  %3171 = vmatmul.msk.bf16.vlgmr.msrb.gmra.mxu3 %vm680_vm0, %v3346_v16 }
 0x195   : > { %v2469_v26 = vld [vmem:[#allocation2 + $0xf0] sm:$0xff]  ;;  %3155 = vmatmul.msk.bf16.gmra.mxu1 %vm680_vm0, %v3345_v15 }
 0x196   : > { %3215 = vmatmul.msk.bf16.gmra.mxu2 %vm680_vm0, %v3346_v16  ;;  %2597 = vst.msk [vmem:[%s3589_s10 + $0xf0] sm:$0xff] %vm1202_vm1, %v2469_v26 }
 0x197   : > { %2374 = vst.msk [vmem:[#allocation2 + $0xf8] sm:$0xff] %vm1202_vm1, %v2278_v10  ;;  %v1162_v19 = vpop.f32.mrf.mxu3 }
 0x198   : > { %v1163_v21 = vadd.f32 %v3969_v0, %v1162_v19 }
 0x199   : > { %v1991_v22 = vpop.f32.mrf.mxu2  ;;  %v964_v31 = vpop.f32.mrf.mxu0 }
 0x19a   : > { %1315 = vst.msk [vmem:[#allocation2 + $0x380] sm:$0xff] %vm1202_vm1, %v1163_v21  ;;  %v965_v32 = vadd.f32 %v3969_v0, %v964_v31  ;;  %v3989_v35 = vpop.f32.mrf.mxu1 }
 0x19b   : > { %v1597_v37 = vld [vmem:[#allocation2 + $0x100] sm:$0xff] }
 0x19c   : > { %v1693_v38 = vadd.f32 %v1597_v37, %v3563_v36  ;;  %1236 = vst.msk [vmem:[#allocation2 + $0x108] sm:$0xff] %vm1202_vm1, %v965_v32 }
 0x19e   : > { %1789 = vst.msk [vmem:[#allocation2 + $0x100] sm:$0xff] %vm1202_vm1, %v1693_v38  ;;  %v2470_v39 = vld [vmem:[#allocation2 + $0xf8] sm:$0xff] }
 0x19f   : > { %2598 = vst.msk [vmem:[%s3589_s10 + $0xf8] sm:$0xff] %vm1202_vm1, %v2470_v39  ;;  %v1164_v17 = vpop.f32.mrf.mxu3  ;;  %v3349_v39 = vld [vmem:[%s3472_s4 + $0xd0] sm:$0xff] }
 0x1a0   : > { %v1165_v46 = vadd.f32 %v3969_v0, %v1164_v17  ;;  %v3350_v17 = vld [vmem:[%s3472_s4 + $0x150] sm:$0xff] }
 0x1a1   : > { %v1993_v47 = vpop.f32.mrf.mxu2  ;;  %v967_v23 = vpop.f32.mrf.mxu0 }
 0x1a2   : > { %1316 = vst.msk [vmem:[#allocation2 + $0x388] sm:$0xff] %vm1202_vm1, %v1165_v46  ;;  %v968_v49 = vadd.f32 %v3969_v0, %v967_v23  ;;  %v3999_v50 = vpop.f32.mrf.mxu1 }
 0x1a3   : > { %v1598_v36 = vld [vmem:[#allocation2 + $0x108] sm:$0xff] }
 0x1a4   : > { %v1694_v52 = vadd.f32 %v1598_v36, %v3573_v42  ;;  %1237 = vst.msk [vmem:[#allocation2 + $0x110] sm:$0xff] %vm1202_vm1, %v968_v49  ;;  %3084 = vmatmul.msk.bf16.gmra.mxu0 %vm680_vm0, %v3347_v54  ;;  %3172 = vmatmul.msk.bf16.gmra.mxu3 %vm680_vm0, %v3348_v58 }
 0x1a5   : > { %v2183_v29 = vld [vmem:[#allocation2 + $0x100] sm:$0xff]  ;;  %3156 = vmatmul.msk.bf16.gmra.mxu1 %vm680_vm0, %v3347_v54 }
 0x1a6   : > { %3216 = vmatmul.msk.bf16.gmra.mxu2 %vm680_vm0, %v3348_v58  ;;  %1790 = vst.msk [vmem:[#allocation2 + $0x108] sm:$0xff] %vm1202_vm1, %v1694_v52  ;;  %v2279_v61 = vadd.f32 %v2183_v29, %v1991_v22 }
 0x1a7   : > { %v1167_v63 = vpop.f32.mrf.mxu3 }
 0x1a8   : > { %2375 = vst.msk [vmem:[#allocation2 + $0x100] sm:$0xff] %vm1202_vm1, %v2279_v61  ;;  %v1168_v42 = vadd.f32 %v3969_v0, %v1167_v63 }
 0x1a9   : > { %v1996_v30 = vpop.f32.mrf.mxu2  ;;  %v969_v3 = vpop.f32.mrf.mxu0 }
 0x1aa   : > { %1317 = vst.msk [vmem:[#allocation2 + $0x390] sm:$0xff] %vm1202_vm1, %v1168_v42  ;;  %v970_v4 = vadd.f32 %v3969_v0, %v969_v3  ;;  %v4014_v14 = vpop.f32.mrf.mxu1 }
 0x1ab   : > { %v1599_v20 = vld [vmem:[#allocation2 + $0x110] sm:$0xff] }
 0x1ac   : > { %v1695_v10 = vadd.f32 %v1599_v20, %v3584_v53  ;;  %1238 = vst.msk [vmem:[#allocation2 + $0x118] sm:$0xff] %vm1202_vm1, %v970_v4 }
 0x1ad   : > { %v2184_v15 = vld [vmem:[#allocation2 + $0x108] sm:$0xff] }
 0x1ae   : > { %1791 = vst.msk [vmem:[#allocation2 + $0x110] sm:$0xff] %vm1202_vm1, %v1695_v10  ;;  %v2280_v16 = vadd.f32 %v2184_v15, %v1993_v47 }
 0x1af   : > { %v2471_v26 = vld [vmem:[#allocation2 + $0x100] sm:$0xff]  ;;  %v1169_v19 = vpop.f32.mrf.mxu3 }
 0x1b0   : > { %2599 = vst.msk [vmem:[%s3589_s10 + $0x100] sm:$0xff] %vm1202_vm1, %v2471_v26  ;;  %v1170_v21 = vadd.f32 %v3969_v0, %v1169_v19  ;;  %v3351_v19 = vld [vmem:[%s3472_s4 + $0xd8] sm:$0xff] }
 0x1b1   : > { %v1998_v22 = vpop.f32.mrf.mxu2  ;;  %2376 = vst.msk [vmem:[#allocation2 + $0x108] sm:$0xff] %vm1202_vm1, %v2280_v16  ;;  %v972_v31 = vpop.f32.mrf.mxu0 }
 0x1b2   : > { %1318 = vst.msk [vmem:[#allocation2 + $0x398] sm:$0xff] %vm1202_vm1, %v1170_v21  ;;  %v973_v53 = vadd.f32 %v3969_v0, %v972_v31  ;;  %v4025_v32 = vpop.f32.mrf.mxu1  ;;  %v3352_v21 = vld [vmem:[%s3472_s4 + $0x158] sm:$0xff] }
 0x1b3   : > { %v1600_v37 = vld [vmem:[#allocation2 + $0x118] sm:$0xff] }
 0x1b4   : > { %v1696_v38 = vadd.f32 %v1600_v37, %v3602_v62  ;;  %1239 = vst.msk [vmem:[#allocation2 + $0x120] sm:$0xff] %vm1202_vm1, %v973_v53  ;;  %3085 = vmatmul.msk.bf16.gmra.mxu0 %vm680_vm0, %v3349_v39  ;;  %3173 = vmatmul.msk.bf16.gmra.mxu3 %vm680_vm0, %v3350_v17 }
 0x1b5   : > { %v2185_v46 = vld [vmem:[#allocation2 + $0x110] sm:$0xff]  ;;  %3157 = vmatmul.msk.bf16.gmra.mxu1 %vm680_vm0, %v3349_v39 }
 0x1b6   : > { %3217 = vmatmul.msk.bf16.gmra.mxu2 %vm680_vm0, %v3350_v17  ;;  %1792 = vst.msk [vmem:[#allocation2 + $0x118] sm:$0xff] %vm1202_vm1, %v1696_v38  ;;  %v2281_v47 = vadd.f32 %v2185_v46, %v1996_v30 }
 0x1b7   : > { %v1172_v23 = vpop.f32.mrf.mxu3 }
 0x1b8   : > { %v2472_v49 = vld [vmem:[#allocation2 + $0x108] sm:$0xff]  ;;  %2377 = vst.msk [vmem:[#allocation2 + $0x110] sm:$0xff] %vm1202_vm1, %v2281_v47  ;;  %v1173_v62 = vadd.f32 %v3969_v0, %v1172_v23 }
 0x1b9   : > { %v2001_v36 = vpop.f32.mrf.mxu2  ;;  %2600 = vst.msk [vmem:[%s3589_s10 + $0x108] sm:$0xff] %vm1202_vm1, %v2472_v49  ;;  %v974_v52 = vpop.f32.mrf.mxu0 }
 0x1ba   : > { %1319 = vst.msk [vmem:[#allocation2 + $0x3a0] sm:$0xff] %vm1202_vm1, %v1173_v62  ;;  %v975_v54 = vadd.f32 %v3969_v0, %v974_v52  ;;  %v4042_v58 = vpop.f32.mrf.mxu1 }
 0x1bb   : > { %v1601_v29 = vld [vmem:[#allocation2 + $0x120] sm:$0xff] }
 0x1bc   : > { %v1697_v61 = vadd.f32 %v1601_v29, %v3614_v12  ;;  %1240 = vst.msk [vmem:[#allocation2 + $0x128] sm:$0xff] %vm1202_vm1, %v975_v54 }
 0x1bd   : > { %v2186_v63 = vld [vmem:[#allocation2 + $0x118] sm:$0xff] }
 0x1be   : > { %1793 = vst.msk [vmem:[#allocation2 + $0x120] sm:$0xff] %vm1202_vm1, %v1697_v61  ;;  %v2282_v42 = vadd.f32 %v2186_v63, %v1998_v22 }
 0x1bf   : > { %v2473_v30 = vld [vmem:[#allocation2 + $0x110] sm:$0xff]  ;;  %v1174_v3 = vpop.f32.mrf.mxu3 }
 0x1c0   : > { %2601 = vst.msk [vmem:[%s3589_s10 + $0x110] sm:$0xff] %vm1202_vm1, %v2473_v30  ;;  %v1175_v4 = vadd.f32 %v3969_v0, %v1174_v3  ;;  %v3353_v3 = vld [vmem:[%s3472_s4 + $0xe0] sm:$0xff] }
 0x1c1   : > { %v2003_v20 = vpop.f32.mrf.mxu2  ;;  %2378 = vst.msk [vmem:[#allocation2 + $0x118] sm:$0xff] %vm1202_vm1, %v2282_v42  ;;  %v977_v10 = vpop.f32.mrf.mxu0 }
 0x1c2   : > { %1320 = vst.msk [vmem:[#allocation2 + $0x3a8] sm:$0xff] %vm1202_vm1, %v1175_v4  ;;  %v978_v12 = vadd.f32 %v3969_v0, %v977_v10  ;;  %v4053_v15 = vpop.f32.mrf.mxu1  ;;  %v3354_v4 = vld [vmem:[%s3472_s4 + $0x160] sm:$0xff] }
 0x1c3   : > { %v1602_v16 = vld [vmem:[#allocation2 + $0x128] sm:$0xff] }
 0x1c4   : > { %v1698_v26 = vadd.f32 %v1602_v16, %v3627_v25  ;;  %1241 = vst.msk [vmem:[#allocation2 + $0x130] sm:$0xff] %vm1202_vm1, %v978_v12  ;;  %3086 = vmatmul.msk.bf16.gmra.mxu0 %vm680_vm0, %v3351_v19  ;;  %3174 = vmatmul.msk.bf16.gmra.mxu3 %vm680_vm0, %v3352_v21 }
 0x1c5   : > { %v2187_v22 = vld [vmem:[#allocation2 + $0x120] sm:$0xff]  ;;  %3158 = vmatmul.msk.bf16.gmra.mxu1 %vm680_vm0, %v3351_v19 }
 0x1c6   : > { %3218 = vmatmul.msk.bf16.gmra.mxu2 %vm680_vm0, %v3352_v21  ;;  %1794 = vst.msk [vmem:[#allocation2 + $0x128] sm:$0xff] %vm1202_vm1, %v1698_v26  ;;  %v2283_v31 = vadd.f32 %v2187_v22, %v2001_v36 }
 0x1c7   : > { %v1177_v53 = vpop.f32.mrf.mxu3 }
 0x1c8   : > { %v2474_v37 = vld [vmem:[#allocation2 + $0x118] sm:$0xff]  ;;  %2379 = vst.msk [vmem:[#allocation2 + $0x120] sm:$0xff] %vm1202_vm1, %v2283_v31  ;;  %v1178_v25 = vadd.f32 %v3969_v0, %v1177_v53 }
 0x1c9   : > { %v2006_v38 = vpop.f32.mrf.mxu2  ;;  %2602 = vst.msk [vmem:[%s3589_s10 + $0x118] sm:$0xff] %vm1202_vm1, %v2474_v37  ;;  %v979_v39 = vpop.f32.mrf.mxu0 }
 0x1ca   : > { %1321 = vst.msk [vmem:[#allocation2 + $0x3b0] sm:$0xff] %vm1202_vm1, %v1178_v25  ;;  %v980_v17 = vadd.f32 %v3969_v0, %v979_v39  ;;  %v4070_v46 = vpop.f32.mrf.mxu1 }
 0x1cb   : > { %v1603_v47 = vld [vmem:[#allocation2 + $0x130] sm:$0xff] }
 0x1cc   : > { %v1699_v23 = vadd.f32 %v1603_v47, %v3639_v41  ;;  %1242 = vst.msk [vmem:[#allocation2 + $0x138] sm:$0xff] %vm1202_vm1, %v980_v17 }
 0x1cd   : > { %v2188_v49 = vld [vmem:[#allocation2 + $0x128] sm:$0xff] }
 0x1ce   : > { %1795 = vst.msk [vmem:[#allocation2 + $0x130] sm:$0xff] %vm1202_vm1, %v1699_v23  ;;  %v2284_v62 = vadd.f32 %v2188_v49, %v2003_v20 }
 0x1cf   : > { %v2475_v36 = vld [vmem:[#allocation2 + $0x120] sm:$0xff]  ;;  %v1179_v52 = vpop.f32.mrf.mxu3 }
 0x1d0   : > { %2603 = vst.msk [vmem:[%s3589_s10 + $0x120] sm:$0xff] %vm1202_vm1, %v2475_v36  ;;  %v1180_v54 = vadd.f32 %v3969_v0, %v1179_v52  ;;  %v3355_v52 = vld [vmem:[%s3472_s4 + $0xe8] sm:$0xff] }
 0x1d1   : > { %v2008_v29 = vpop.f32.mrf.mxu2  ;;  %2380 = vst.msk [vmem:[#allocation2 + $0x128] sm:$0xff] %vm1202_vm1, %v2284_v62  ;;  %v982_v61 = vpop.f32.mrf.mxu0 }
 0x1d2   : > { %1322 = vst.msk [vmem:[#allocation2 + $0x3b8] sm:$0xff] %vm1202_vm1, %v1180_v54  ;;  %v983_v41 = vadd.f32 %v3969_v0, %v982_v61  ;;  %v4081_v63 = vpop.f32.mrf.mxu1  ;;  %v3356_v54 = vld [vmem:[%s3472_s4 + $0x168] sm:$0xff] }
 0x1d3   : > { %v1604_v42 = vld [vmem:[#allocation2 + $0x138] sm:$0xff] }
 0x1d4   : > { %v1700_v30 = vadd.f32 %v1604_v42, %v3652_v51  ;;  %1243 = vst.msk [vmem:[#allocation2 + $0x140] sm:$0xff] %vm1202_vm1, %v983_v41  ;;  %3087 = vmatmul.msk.bf16.gmra.mxu0 %vm680_vm0, %v3353_v3  ;;  %3175 = vmatmul.msk.bf16.gmra.mxu3 %vm680_vm0, %v3354_v4 }
 0x1d5   : > { %v2189_v20 = vld [vmem:[#allocation2 + $0x130] sm:$0xff]  ;;  %3159 = vmatmul.msk.bf16.gmra.mxu1 %vm680_vm0, %v3353_v3 }
 0x1d6   : > { %3219 = vmatmul.msk.bf16.gmra.mxu2 %vm680_vm0, %v3354_v4  ;;  %1796 = vst.msk [vmem:[#allocation2 + $0x138] sm:$0xff] %vm1202_vm1, %v1700_v30  ;;  %v2285_v10 = vadd.f32 %v2189_v20, %v2006_v38 }
 0x1d7   : > { %v1182_v12 = vpop.f32.mrf.mxu3 }
 0x1d8   : > { %v2476_v16 = vld [vmem:[#allocation2 + $0x128] sm:$0xff]  ;;  %2381 = vst.msk [vmem:[#allocation2 + $0x130] sm:$0xff] %vm1202_vm1, %v2285_v10  ;;  %v1183_v51 = vadd.f32 %v3969_v0, %v1182_v12 }
 0x1d9   : > { %v2011_v26 = vpop.f32.mrf.mxu2  ;;  %2604 = vst.msk [vmem:[%s3589_s10 + $0x128] sm:$0xff] %vm1202_vm1, %v2476_v16  ;;  %v984_v19 = vpop.f32.mrf.mxu0 }
 0x1da   : > { %1323 = vst.msk [vmem:[#allocation2 + $0x3c0] sm:$0xff] %vm1202_vm1, %v1183_v51  ;;  %v985_v21 = vadd.f32 %v3969_v0, %v984_v19  ;;  %v4098_v22 = vpop.f32.mrf.mxu1 }
 0x1db   : > { %v1605_v31 = vld [vmem:[#allocation2 + $0x140] sm:$0xff] }
 0x1dc   : > { %v1701_v53 = vadd.f32 %v1605_v31, %v3664_v1  ;;  %1244 = vst.msk [vmem:[#allocation2 + $0x148] sm:$0xff] %vm1202_vm1, %v985_v21 }
 0x1dd   : > { %v2190_v37 = vld [vmem:[#allocation2 + $0x138] sm:$0xff] }
 0x1de   : > { %1797 = vst.msk [vmem:[#allocation2 + $0x140] sm:$0xff] %vm1202_vm1, %v1701_v53  ;;  %v2286_v25 = vadd.f32 %v2190_v37, %v2008_v29 }
 0x1df   : > { %v2477_v38 = vld [vmem:[#allocation2 + $0x130] sm:$0xff]  ;;  %v1184_v39 = vpop.f32.mrf.mxu3 }
 0x1e0   : > { %2605 = vst.msk [vmem:[%s3589_s10 + $0x130] sm:$0xff] %vm1202_vm1, %v2477_v38  ;;  %v1185_v17 = vadd.f32 %v3969_v0, %v1184_v39  ;;  %v3357_v39 = vld [vmem:[%s3472_s4 + $0xf0] sm:$0xff] }
 0x1e1   : > { %v2013_v47 = vpop.f32.mrf.mxu2  ;;  %2382 = vst.msk [vmem:[#allocation2 + $0x138] sm:$0xff] %vm1202_vm1, %v2286_v25  ;;  %v987_v23 = vpop.f32.mrf.mxu0 }
 0x1e2   : > { %1324 = vst.msk [vmem:[#allocation2 + $0x3c8] sm:$0xff] %vm1202_vm1, %v1185_v17  ;;  %v988_v1 = vadd.f32 %v3969_v0, %v987_v23  ;;  %v4109_v49 = vpop.f32.mrf.mxu1  ;;  %v3358_v17 = vld [vmem:[%s3472_s4 + $0x170] sm:$0xff] }
 0x1e3   : > { %v1606_v62 = vld [vmem:[#allocation2 + $0x148] sm:$0xff] }
 0x1e4   : > { %v1702_v36 = vadd.f32 %v1606_v62, %v3677_v13  ;;  %1245 = vst.msk [vmem:[#allocation2 + $0x150] sm:$0xff] %vm1202_vm1, %v988_v1  ;;  %3088 = vmatmul.msk.bf16.gmra.mxu0 %vm680_vm0, %v3355_v52  ;;  %3176 = vmatmul.msk.bf16.gmra.mxu3 %vm680_vm0, %v3356_v54 }
 0x1e5   : > { %v2191_v29 = vld [vmem:[#allocation2 + $0x140] sm:$0xff]  ;;  %3160 = vmatmul.msk.bf16.gmra.mxu1 %vm680_vm0, %v3355_v52 }
 0x1e6   : > { %3220 = vmatmul.msk.bf16.gmra.mxu2 %vm680_vm0, %v3356_v54  ;;  %1798 = vst.msk [vmem:[#allocation2 + $0x148] sm:$0xff] %vm1202_vm1, %v1702_v36  ;;  %v2287_v61 = vadd.f32 %v2191_v29, %v2011_v26 }
 0x1e7   : > { %v1187_v41 = vpop.f32.mrf.mxu3 }
 0x1e8   : > { %v2478_v42 = vld [vmem:[#allocation2 + $0x138] sm:$0xff]  ;;  %2383 = vst.msk [vmem:[#allocation2 + $0x140] sm:$0xff] %vm1202_vm1, %v2287_v61  ;;  %v1188_v13 = vadd.f32 %v3969_v0, %v1187_v41 }
 0x1e9   : > { %v2016_v30 = vpop.f32.mrf.mxu2  ;;  %2606 = vst.msk [vmem:[%s3589_s10 + $0x138] sm:$0xff] %vm1202_vm1, %v2478_v42  ;;  %v989_v3 = vpop.f32.mrf.mxu0 }
 0x1ea   : > { %1325 = vst.msk [vmem:[#allocation2 + $0x3d0] sm:$0xff] %vm1202_vm1, %v1188_v13  ;;  %v990_v4 = vadd.f32 %v3969_v0, %v989_v3  ;;  %v4126_v20 = vpop.f32.mrf.mxu1 }
 0x1eb   : > { %v1607_v10 = vld [vmem:[#allocation2 + $0x150] sm:$0xff] }
 0x1ec   : > { %v1703_v12 = vadd.f32 %v1607_v10, %v3689_v33  ;;  %1246 = vst.msk [vmem:[#allocation2 + $0x158] sm:$0xff] %vm1202_vm1, %v990_v4 }
 0x1ed   : > { %v2192_v16 = vld [vmem:[#allocation2 + $0x148] sm:$0xff] }
 0x1ee   : > { %1799 = vst.msk [vmem:[#allocation2 + $0x150] sm:$0xff] %vm1202_vm1, %v1703_v12  ;;  %v2288_v51 = vadd.f32 %v2192_v16, %v2013_v47 }
 0x1ef   : > { %v2479_v26 = vld [vmem:[#allocation2 + $0x140] sm:$0xff]  ;;  %v1189_v19 = vpop.f32.mrf.mxu3 }
 0x1f0   : > { %2607 = vst.msk [vmem:[%s3589_s10 + $0x140] sm:$0xff] %vm1202_vm1, %v2479_v26  ;;  %v1190_v21 = vadd.f32 %v3969_v0, %v1189_v19  ;;  %v3359_v19 = vld [vmem:[%s3472_s4 + $0xf8] sm:$0xff] }
 0x1f1   : > { %v2018_v31 = vpop.f32.mrf.mxu2  ;;  %2384 = vst.msk [vmem:[#allocation2 + $0x148] sm:$0xff] %vm1202_vm1, %v2288_v51  ;;  %v992_v53 = vpop.f32.mrf.mxu0 }
 0x1f2   : > { %1326 = vst.msk [vmem:[#allocation2 + $0x3d8] sm:$0xff] %vm1202_vm1, %v1190_v21  ;;  %v993_v33 = vadd.f32 %v3969_v0, %v992_v53  ;;  %v4137_v37 = vpop.f32.mrf.mxu1  ;;  %v3360_v21 = vld [vmem:[%s3472_s4 + $0x178] sm:$0xff] }
 0x1f3   : > { %v1608_v25 = vld [vmem:[#allocation2 + $0x158] sm:$0xff] }
 0x1f4   : > { %v1704_v38 = vadd.f32 %v1608_v25, %v3702_v45  ;;  %1247 = vst.msk [vmem:[#allocation2 + $0x160] sm:$0xff] %vm1202_vm1, %v993_v33  ;;  %3089 = vmatmul.msk.bf16.gmra.mxu0 %vm680_vm0, %v3357_v39  ;;  %3177 = vmatmul.msk.bf16.gmra.mxu3 %vm680_vm0, %v3358_v17 }
 0x1f5   : > { %v2193_v47 = vld [vmem:[#allocation2 + $0x150] sm:$0xff]  ;;  %3161 = vmatmul.msk.bf16.gmra.mxu1 %vm680_vm0, %v3357_v39 }
 0x1f6   : > { %3221 = vmatmul.msk.bf16.gmra.mxu2 %vm680_vm0, %v3358_v17  ;;  %1800 = vst.msk [vmem:[#allocation2 + $0x158] sm:$0xff] %vm1202_vm1, %v1704_v38  ;;  %v2289_v23 = vadd.f32 %v2193_v47, %v2016_v30 }
 0x1f7   : > { %v1192_v1 = vpop.f32.mrf.mxu3 }
 0x1f8   : > { %v2480_v62 = vld [vmem:[#allocation2 + $0x148] sm:$0xff]  ;;  %2385 = vst.msk [vmem:[#allocation2 + $0x150] sm:$0xff] %vm1202_vm1, %v2289_v23  ;;  %v1193_v45 = vadd.f32 %v3969_v0, %v1192_v1 }
 0x1f9   : > { %v2021_v36 = vpop.f32.mrf.mxu2  ;;  %2608 = vst.msk [vmem:[%s3589_s10 + $0x148] sm:$0xff] %vm1202_vm1, %v2480_v62  ;;  %v994_v52 = vpop.f32.mrf.mxu0 }
 0x1fa   : > { %1327 = vst.msk [vmem:[#allocation2 + $0x3e0] sm:$0xff] %vm1202_vm1, %v1193_v45  ;;  %v995_v54 = vadd.f32 %v3969_v0, %v994_v52  ;;  %v4154_v29 = vpop.f32.mrf.mxu1 }
 0x1fb   : > { %v1609_v61 = vld [vmem:[#allocation2 + $0x160] sm:$0xff] }
 0x1fc   : > { %v1705_v41 = vadd.f32 %v1609_v61, %v3714_v59  ;;  %1248 = vst.msk [vmem:[#allocation2 + $0x168] sm:$0xff] %vm1202_vm1, %v995_v54 }
 0x1fd   : > { %v2194_v42 = vld [vmem:[#allocation2 + $0x158] sm:$0xff] }
 0x1fe   : > { %1801 = vst.msk [vmem:[#allocation2 + $0x160] sm:$0xff] %vm1202_vm1, %v1705_v41  ;;  %v2290_v13 = vadd.f32 %v2194_v42, %v2018_v31 }
 0x1ff   : > { %v2481_v30 = vld [vmem:[#allocation2 + $0x150] sm:$0xff]  ;;  %v1194_v3 = vpop.f32.mrf.mxu3 }
 0x200   : > { %2609 = vst.msk [vmem:[%s3589_s10 + $0x150] sm:$0xff] %vm1202_vm1, %v2481_v30  ;;  %v1195_v4 = vadd.f32 %v3969_v0, %v1194_v3 }
 0x201   : > { %v2023_v10 = vpop.f32.mrf.mxu2  ;;  %2386 = vst.msk [vmem:[#allocation2 + $0x158] sm:$0xff] %vm1202_vm1, %v2290_v13  ;;  %v997_v12 = vpop.f32.mrf.mxu0  ;;  %v1645_v13 = vld [vmem:[#allocation2 + $0x280] sm:$0xff] }
 0x202   : > { %1328 = vst.msk [vmem:[#allocation2 + $0x3e8] sm:$0xff] %vm1202_vm1, %v1195_v4  ;;  %v998_v59 = vadd.f32 %v3969_v0, %v997_v12  ;;  %v4165_v16 = vpop.f32.mrf.mxu1  ;;  %v3362_v12 = vld [vmem:[%s3472_s4 + $0x1c0] sm:$0xff] }
 0x203   : > { %v1610_v51 = vld [vmem:[#allocation2 + $0x168] sm:$0xff] }
 0x204   : > { %v1706_v26 = vadd.f32 %v1610_v51, %v3727_v6  ;;  %1249 = vst.msk [vmem:[#allocation2 + $0x170] sm:$0xff] %vm1202_vm1, %v998_v59  ;;  %3090 = vmatmul.msk.bf16.gmra.mxu0 %vm680_vm0, %v3359_v19  ;;  %3178 = vmatmul.msk.bf16.gmra.mxu3 %vm680_vm0, %v3360_v21  ;;  %v3363_v51 = vld [vmem:[%s3472_s4 + $0x180] sm:$0xff] }
 0x205   : > { %v2195_v31 = vld [vmem:[#allocation2 + $0x160] sm:$0xff]  ;;  %3162 = vmatmul.msk.bf16.gmra.mxu1 %vm680_vm0, %v3359_v19 }
 0x206   : > { %3222 = vmatmul.msk.bf16.gmra.mxu2 %vm680_vm0, %v3360_v21  ;;  %1802 = vst.msk [vmem:[#allocation2 + $0x168] sm:$0xff] %vm1202_vm1, %v1706_v26  ;;  %v2291_v53 = vadd.f32 %v2195_v31, %v2021_v36  ;;  %v1677_v19 = vld [vmem:[#allocation2 + $0x380] sm:$0xff] }
 0x207   : > { %v1197_v33 = vpop.f32.mrf.mxu3 }
 0x208   : > { %v2482_v25 = vld [vmem:[#allocation2 + $0x158] sm:$0xff]  ;;  %2387 = vst.msk [vmem:[#allocation2 + $0x160] sm:$0xff] %vm1202_vm1, %v2291_v53  ;;  %v1198_v6 = vadd.f32 %v3969_v0, %v1197_v33 }
 0x209   : > { %v2026_v38 = vpop.f32.mrf.mxu2  ;;  %2610 = vst.msk [vmem:[%s3589_s10 + $0x158] sm:$0xff] %vm1202_vm1, %v2482_v25  ;;  %v999_v39 = vpop.f32.mrf.mxu0 }
 0x20a   : > { %1329 = vst.msk [vmem:[#allocation2 + $0x3f0] sm:$0xff] %vm1202_vm1, %v1198_v6  ;;  %v1000_v17 = vadd.f32 %v3969_v0, %v999_v39  ;;  %v4182_v47 = vpop.f32.mrf.mxu1  ;;  %v1646_v39 = vld [vmem:[#allocation2 + $0x288] sm:$0xff] }
 0x20b   : > { %v1611_v23 = vld [vmem:[#allocation2 + $0x170] sm:$0xff] }
 0x20c   : > { %v1707_v1 = vadd.f32 %v1611_v23, %v3739_v28  ;;  %1250 = vst.msk [vmem:[#allocation2 + $0x178] sm:$0xff] %vm1202_vm1, %v1000_v17 }
 0x20d   : > { %v2196_v62 = vld [vmem:[#allocation2 + $0x168] sm:$0xff] }
 0x20e   : > { %1803 = vst.msk [vmem:[#allocation2 + $0x170] sm:$0xff] %vm1202_vm1, %v1707_v1  ;;  %v2292_v45 = vadd.f32 %v2196_v62, %v2023_v10  ;;  %v3361_v10 = vld [vmem:[%s3472_s4 + $0x100] sm:$0xff] }
 0x20f   : > { %v2483_v36 = vld [vmem:[#allocation2 + $0x160] sm:$0xff]  ;;  %v1199_v52 = vpop.f32.mrf.mxu3 }
 0x210   : > { %2611 = vst.msk [vmem:[%s3589_s10 + $0x160] sm:$0xff] %vm1202_vm1, %v2483_v36  ;;  %v1200_v54 = vadd.f32 %v3969_v0, %v1199_v52  ;;  %v1678_v52 = vld [vmem:[#allocation2 + $0x388] sm:$0xff] }
 0x211   : > { %v2028_v61 = vpop.f32.mrf.mxu2  ;;  %2388 = vst.msk [vmem:[#allocation2 + $0x168] sm:$0xff] %vm1202_vm1, %v2292_v45  ;;  %v1002_v41 = vpop.f32.mrf.mxu0 }
 0x212   : > { %1330 = vst.msk [vmem:[#allocation2 + $0x3f8] sm:$0xff] %vm1202_vm1, %v1200_v54  ;;  %v1003_v28 = vadd.f32 %v3969_v0, %v1002_v41  ;;  %v1476_v42 = vpop.f32.mrf.mxu1 }
 0x213   : > { %v1612_v30 = vld [vmem:[#allocation2 + $0x178] sm:$0xff]  ;;  %v1741_v3 = vadd.f32 %v1645_v13, %v1476_v42 }
 0x214   : > { %v1708_v4 = vadd.f32 %v1612_v30, %v3752_v43  ;;  %1251 = vst.msk [vmem:[#allocation2 + $0x180] sm:$0xff] %vm1202_vm1, %v1003_v28  ;;  %3091 = vmatmul.msk.bf16.gmra.mxu0 %vm680_vm0, %v3361_v10  ;;  %3231 = vmatmul.msk.bf16.vlgmr.msra.gmra.mxu3 %vm680_vm0, %v3362_v12  ;;  %v3365_v12 = vld [vmem:[%s3472_s4 + $0x1c8] sm:$0xff] }
 0x215   : > { %v2197_v59 = vld [vmem:[#allocation2 + $0x170] sm:$0xff]  ;;  %1837 = vst.msk [vmem:[#allocation2 + $0x280] sm:$0xff] %vm1202_vm1, %v1741_v3  ;;  %3163 = vmatmul.msk.bf16.gmra.mxu1 %vm680_vm0, %v3361_v10  ;;  %v3364_v10 = vld [vmem:[%s3472_s4 + $0x108] sm:$0xff] }
 0x216   : > { %3223 = vmatmul.msk.bf16.gmra.mxu2 %vm680_vm0, %v3363_v51  ;;  %1804 = vst.msk [vmem:[#allocation2 + $0x178] sm:$0xff] %vm1202_vm1, %v1708_v4  ;;  %v2293_v43 = vadd.f32 %v2197_v59, %v2026_v38  ;;  %v3366_v51 = vld [vmem:[%s3472_s4 + $0x188] sm:$0xff] }
 0x217   : > { %v1556_v26 = vpop.f32.mrf.mxu3 }
 0x218   : > { %v2484_v21 = vld [vmem:[#allocation2 + $0x168] sm:$0xff]  ;;  %2389 = vst.msk [vmem:[#allocation2 + $0x170] sm:$0xff] %vm1202_vm1, %v2293_v43  ;;  %v1773_v31 = vadd.f32 %v1677_v19, %v1556_v26  ;;  %v1679_v26 = vld [vmem:[#allocation2 + $0x390] sm:$0xff] }
 0x219   : > { %v2031_v53 = vpop.f32.mrf.mxu2  ;;  %2612 = vst.msk [vmem:[%s3589_s10 + $0x168] sm:$0xff] %vm1202_vm1, %v2484_v21  ;;  %v1004_v33 = vpop.f32.mrf.mxu0 }
 0x21a   : > { %1869 = vst.msk [vmem:[#allocation2 + $0x380] sm:$0xff] %vm1202_vm1, %v1773_v31  ;;  %v1005_v25 = vadd.f32 %v3969_v0, %v1004_v33  ;;  %v1478_v6 = vpop.f32.mrf.mxu1 }
 0x21b   : > { %v1613_v17 = vld [vmem:[#allocation2 + $0x180] sm:$0xff]  ;;  %v1742_v23 = vadd.f32 %v1646_v39, %v1478_v6 }
 0x21c   : > { %v1709_v38 = vadd.f32 %v1613_v17, %v3763_v57  ;;  %1252 = vst.msk [vmem:[#allocation2 + $0x188] sm:$0xff] %vm1202_vm1, %v1005_v25  ;;  %v1648_v17 = vld [vmem:[#allocation2 + $0x298] sm:$0xff] }
 0x21d   : > { %v2198_v1 = vld [vmem:[#allocation2 + $0x178] sm:$0xff]  ;;  %1838 = vst.msk [vmem:[#allocation2 + $0x288] sm:$0xff] %vm1202_vm1, %v1742_v23 }
 0x21e   : > { %1805 = vst.msk [vmem:[#allocation2 + $0x180] sm:$0xff] %vm1202_vm1, %v1709_v38  ;;  %v2294_v62 = vadd.f32 %v2198_v1, %v2028_v61  ;;  %v1647_v61 = vld [vmem:[#allocation2 + $0x290] sm:$0xff] }
 0x21f   : > { %v2485_v45 = vld [vmem:[#allocation2 + $0x170] sm:$0xff]  ;;  %v1558_v36 = vpop.f32.mrf.mxu3 }
 0x220   : > { %2613 = vst.msk [vmem:[%s3589_s10 + $0x170] sm:$0xff] %vm1202_vm1, %v2485_v45  ;;  %v1774_v54 = vadd.f32 %v1678_v52, %v1558_v36  ;;  %v1680_v52 = vld [vmem:[#allocation2 + $0x398] sm:$0xff] }
 0x221   : > { %v2033_v41 = vpop.f32.mrf.mxu2  ;;  %2390 = vst.msk [vmem:[#allocation2 + $0x178] sm:$0xff] %vm1202_vm1, %v2294_v62  ;;  %v2551_v57 = vld [vmem:[#allocation2 + $0x380] sm:$0xff]  ;;  %v1007_v28 = vpop.f32.mrf.mxu0 }
 0x222   : > { %2679 = vst.msk [vmem:[%s3589_s10 + $0x380] sm:$0xff] %vm1202_vm1, %v2551_v57  ;;  %v1008_v42 = vadd.f32 %v3969_v0, %v1007_v28  ;;  %v1481_v13 = vpop.f32.mrf.mxu1 }
 0x223   : > { %v1614_v30 = vld [vmem:[#allocation2 + $0x188] sm:$0xff]  ;;  %1870 = vst.msk [vmem:[#allocation2 + $0x388] sm:$0xff] %vm1202_vm1, %v1774_v54  ;;  %v1743_v3 = vadd.f32 %v1647_v61, %v1481_v13 }
 0x224   : > { %v1710_v4 = vadd.f32 %v1614_v30, %v3778_v5  ;;  %1253 = vst.msk [vmem:[#allocation2 + $0x190] sm:$0xff] %vm1202_vm1, %v1008_v42  ;;  %3092 = vmatmul.msk.bf16.gmra.mxu0 %vm680_vm0, %v3364_v10  ;;  %3232 = vmatmul.msk.bf16.gmra.mxu3 %vm680_vm0, %v3365_v12 }
 0x225   : > { %v2199_v59 = vld [vmem:[#allocation2 + $0x180] sm:$0xff]  ;;  %1839 = vst.msk [vmem:[#allocation2 + $0x290] sm:$0xff] %vm1202_vm1, %v1743_v3  ;;  %3164 = vmatmul.msk.bf16.gmra.mxu1 %vm680_vm0, %v3364_v10  ;;  %v3368_v10 = vld [vmem:[%s3472_s4 + $0x1d0] sm:$0xff] }
 0x226   : > { %3224 = vmatmul.msk.bf16.gmra.mxu2 %vm680_vm0, %v3366_v51  ;;  %1806 = vst.msk [vmem:[#allocation2 + $0x188] sm:$0xff] %vm1202_vm1, %v1710_v4  ;;  %v2295_v5 = vadd.f32 %v2199_v59, %v2031_v53  ;;  %v3367_v4 = vld [vmem:[%s3472_s4 + $0x110] sm:$0xff] }
 0x227   : > { %v1561_v43 = vpop.f32.mrf.mxu3  ;;  %v3369_v59 = vld [vmem:[%s3472_s4 + $0x190] sm:$0xff] }
 0x228   : > { %v2486_v19 = vld [vmem:[#allocation2 + $0x178] sm:$0xff]  ;;  %2391 = vst.msk [vmem:[#allocation2 + $0x180] sm:$0xff] %vm1202_vm1, %v2295_v5  ;;  %v1775_v21 = vadd.f32 %v1679_v26, %v1561_v43  ;;  %v1681_v5 = vld [vmem:[#allocation2 + $0x3a0] sm:$0xff] }
 0x229   : > { %v2036_v31 = vpop.f32.mrf.mxu2  ;;  %2614 = vst.msk [vmem:[%s3589_s10 + $0x178] sm:$0xff] %vm1202_vm1, %v2486_v19  ;;  %v1009_v33 = vpop.f32.mrf.mxu0 }
 0x22a   : > { %v2552_v25 = vld [vmem:[#allocation2 + $0x388] sm:$0xff]  ;;  %1871 = vst.msk [vmem:[#allocation2 + $0x390] sm:$0xff] %vm1202_vm1, %v1775_v21  ;;  %v1010_v6 = vadd.f32 %v3969_v0, %v1009_v33  ;;  %v1483_v39 = vpop.f32.mrf.mxu1 }
 0x22b   : > { %2680 = vst.msk [vmem:[%s3589_s10 + $0x388] sm:$0xff] %vm1202_vm1, %v2552_v25  ;;  %v1615_v53 = vld [vmem:[#allocation2 + $0x190] sm:$0xff]  ;;  %v1744_v23 = vadd.f32 %v1648_v17, %v1483_v39  ;;  %v1650_v39 = vld [vmem:[#allocation2 + $0x2a8] sm:$0xff] }
 0x22c   : > { %v1711_v38 = vadd.f32 %v1615_v53, %v3789_v24  ;;  %1254 = vst.msk [vmem:[#allocation2 + $0x198] sm:$0xff] %vm1202_vm1, %v1010_v6 }
 0x22d   : > { %v2200_v1 = vld [vmem:[#allocation2 + $0x188] sm:$0xff]  ;;  %1840 = vst.msk [vmem:[#allocation2 + $0x298] sm:$0xff] %vm1202_vm1, %v1744_v23 }
 0x22e   : > { %1807 = vst.msk [vmem:[#allocation2 + $0x190] sm:$0xff] %vm1202_vm1, %v1711_v38  ;;  %v2296_v62 = vadd.f32 %v2200_v1, %v2033_v41  ;;  %v1649_v41 = vld [vmem:[#allocation2 + $0x2a0] sm:$0xff] }
 0x22f   : > { %v2487_v45 = vld [vmem:[#allocation2 + $0x180] sm:$0xff]  ;;  %v1563_v36 = vpop.f32.mrf.mxu3 }
 0x230   : > { %2615 = vst.msk [vmem:[%s3589_s10 + $0x180] sm:$0xff] %vm1202_vm1, %v2487_v45  ;;  %v1776_v54 = vadd.f32 %v1680_v52, %v1563_v36  ;;  %v1682_v45 = vld [vmem:[#allocation2 + $0x3a8] sm:$0xff] }
 0x231   : > { %v2038_v57 = vpop.f32.mrf.mxu2  ;;  %2392 = vst.msk [vmem:[#allocation2 + $0x188] sm:$0xff] %vm1202_vm1, %v2296_v62  ;;  %v2553_v24 = vld [vmem:[#allocation2 + $0x390] sm:$0xff]  ;;  %v1012_v28 = vpop.f32.mrf.mxu0 }
 0x232   : > { %2681 = vst.msk [vmem:[%s3589_s10 + $0x390] sm:$0xff] %vm1202_vm1, %v2553_v24  ;;  %v1013_v42 = vadd.f32 %v3969_v0, %v1012_v28  ;;  %v1486_v13 = vpop.f32.mrf.mxu1 }
 0x233   : > { %v1616_v61 = vld [vmem:[#allocation2 + $0x198] sm:$0xff]  ;;  %1872 = vst.msk [vmem:[#allocation2 + $0x398] sm:$0xff] %vm1202_vm1, %v1776_v54  ;;  %v1745_v30 = vadd.f32 %v1649_v41, %v1486_v13 }
 0x234   : > { %v1712_v3 = vadd.f32 %v1616_v61, %v3804_v40  ;;  %1255 = vst.msk [vmem:[#allocation2 + $0x1a0] sm:$0xff] %vm1202_vm1, %v1013_v42  ;;  %3093 = vmatmul.msk.bf16.gmra.mxu0 %vm680_vm0, %v3367_v4  ;;  %3233 = vmatmul.msk.bf16.gmra.mxu3 %vm680_vm0, %v3368_v10  ;;  %v3370_v61 = vld [vmem:[%s3472_s4 + $0x118] sm:$0xff] }
 0x235   : > { %v2201_v12 = vld [vmem:[#allocation2 + $0x190] sm:$0xff]  ;;  %1841 = vst.msk [vmem:[#allocation2 + $0x2a0] sm:$0xff] %vm1202_vm1, %v1745_v30  ;;  %3165 = vmatmul.msk.bf16.gmra.mxu1 %vm680_vm0, %v3367_v4  ;;  %v3371_v30 = vld [vmem:[%s3472_s4 + $0x1d8] sm:$0xff] }
 0x236   : > { %3225 = vmatmul.msk.bf16.gmra.mxu2 %vm680_vm0, %v3369_v59  ;;  %1808 = vst.msk [vmem:[#allocation2 + $0x198] sm:$0xff] %vm1202_vm1, %v1712_v3  ;;  %v2297_v40 = vadd.f32 %v2201_v12, %v2036_v31  ;;  %v3372_v4 = vld [vmem:[%s3472_s4 + $0x198] sm:$0xff]  ;;  %v1683_v12 = vld [vmem:[#allocation2 + $0x3b0] sm:$0xff] }
 0x237   : > { %v1566_v51 = vpop.f32.mrf.mxu3 }
 0x238   : > { %v2488_v43 = vld [vmem:[#allocation2 + $0x188] sm:$0xff]  ;;  %2393 = vst.msk [vmem:[#allocation2 + $0x190] sm:$0xff] %vm1202_vm1, %v2297_v40  ;;  %v1777_v26 = vadd.f32 %v1681_v5, %v1566_v51 }
 0x239   : > { %v2041_v19 = vpop.f32.mrf.mxu2  ;;  %2616 = vst.msk [vmem:[%s3589_s10 + $0x188] sm:$0xff] %vm1202_vm1, %v2488_v43  ;;  %v1014_v21 = vpop.f32.mrf.mxu0 }
 0x23a   : > { %v2554_v33 = vld [vmem:[#allocation2 + $0x398] sm:$0xff]  ;;  %1873 = vst.msk [vmem:[#allocation2 + $0x3a0] sm:$0xff] %vm1202_vm1, %v1777_v26  ;;  %v1015_v25 = vadd.f32 %v3969_v0, %v1014_v21  ;;  %v1488_v6 = vpop.f32.mrf.mxu1 }
 0x23b   : > { %2682 = vst.msk [vmem:[%s3589_s10 + $0x398] sm:$0xff] %vm1202_vm1, %v2554_v33  ;;  %v1617_v31 = vld [vmem:[#allocation2 + $0x1a0] sm:$0xff]  ;;  %v1746_v17 = vadd.f32 %v1650_v39, %v1488_v6  ;;  %v1652_v33 = vld [vmem:[#allocation2 + $0x2b8] sm:$0xff] }
 0x23c   : > { %v1713_v53 = vadd.f32 %v1617_v31, %v3815_v56  ;;  %1256 = vst.msk [vmem:[#allocation2 + $0x1a8] sm:$0xff] %vm1202_vm1, %v1015_v25 }
 0x23d   : > { %v2202_v23 = vld [vmem:[#allocation2 + $0x198] sm:$0xff]  ;;  %1842 = vst.msk [vmem:[#allocation2 + $0x2a8] sm:$0xff] %vm1202_vm1, %v1746_v17 }
 0x23e   : > { %1809 = vst.msk [vmem:[#allocation2 + $0x1a0] sm:$0xff] %vm1202_vm1, %v1713_v53  ;;  %v2298_v38 = vadd.f32 %v2202_v23, %v2038_v57  ;;  %v1651_v57 = vld [vmem:[#allocation2 + $0x2b0] sm:$0xff]  ;;  %v1684_v23 = vld [vmem:[#allocation2 + $0x3b8] sm:$0xff] }
 0x23f   : > { %v2489_v1 = vld [vmem:[#allocation2 + $0x190] sm:$0xff]  ;;  %v1568_v62 = vpop.f32.mrf.mxu3 }
 0x240   : > { %2617 = vst.msk [vmem:[%s3589_s10 + $0x190] sm:$0xff] %vm1202_vm1, %v2489_v1  ;;  %v1778_v36 = vadd.f32 %v1682_v45, %v1568_v62 }
 0x241   : > { %v2043_v52 = vpop.f32.mrf.mxu2  ;;  %2394 = vst.msk [vmem:[#allocation2 + $0x198] sm:$0xff] %vm1202_vm1, %v2298_v38  ;;  %v2555_v56 = vld [vmem:[#allocation2 + $0x3a0] sm:$0xff]  ;;  %v1017_v54 = vpop.f32.mrf.mxu0 }
 0x242   : > { %2683 = vst.msk [vmem:[%s3589_s10 + $0x3a0] sm:$0xff] %vm1202_vm1, %v2555_v56  ;;  %v1018_v24 = vadd.f32 %v3969_v0, %v1017_v54  ;;  %v1491_v28 = vpop.f32.mrf.mxu1 }
 0x243   : > { %v1618_v42 = vld [vmem:[#allocation2 + $0x1a8] sm:$0xff]  ;;  %1874 = vst.msk [vmem:[#allocation2 + $0x3a8] sm:$0xff] %vm1202_vm1, %v1778_v36  ;;  %v1747_v13 = vadd.f32 %v1651_v57, %v1491_v28  ;;  %v3373_v28 = vld [vmem:[%s3472_s4 + $0x120] sm:$0xff] }
 0x244   : > { %v1714_v41 = vadd.f32 %v1618_v42, %v3830_v8  ;;  %1257 = vst.msk [vmem:[#allocation2 + $0x1b0] sm:$0xff] %vm1202_vm1, %v1018_v24  ;;  %3094 = vmatmul.msk.bf16.gmra.mxu0 %vm680_vm0, %v3370_v61  ;;  %3234 = vmatmul.msk.bf16.gmra.mxu3 %vm680_vm0, %v3371_v30  ;;  %v3374_v57 = vld [vmem:[%s3472_s4 + $0x1e0] sm:$0xff] }
 0x245   : > { %v2203_v3 = vld [vmem:[#allocation2 + $0x1a0] sm:$0xff]  ;;  %1843 = vst.msk [vmem:[#allocation2 + $0x2b0] sm:$0xff] %vm1202_vm1, %v1747_v13  ;;  %3166 = vmatmul.msk.bf16.gmra.mxu1 %vm680_vm0, %v3370_v61 }
 0x246   : > { %3226 = vmatmul.msk.bf16.gmra.mxu2 %vm680_vm0, %v3372_v4  ;;  %1810 = vst.msk [vmem:[#allocation2 + $0x1a8] sm:$0xff] %vm1202_vm1, %v1714_v41  ;;  %v2299_v8 = vadd.f32 %v2203_v3, %v2041_v19  ;;  %v3375_v13 = vld [vmem:[%s3472_s4 + $0x1a0] sm:$0xff] }
 0x247   : > { %v1571_v10 = vpop.f32.mrf.mxu3  ;;  %v1685_v61 = vld [vmem:[#allocation2 + $0x3c0] sm:$0xff] }
 0x248   : > { %v2490_v59 = vld [vmem:[#allocation2 + $0x198] sm:$0xff]  ;;  %2395 = vst.msk [vmem:[#allocation2 + $0x1a0] sm:$0xff] %vm1202_vm1, %v2299_v8  ;;  %v1779_v40 = vadd.f32 %v1683_v12, %v1571_v10 }
 0x249   : > { %v2046_v51 = vpop.f32.mrf.mxu2  ;;  %2618 = vst.msk [vmem:[%s3589_s10 + $0x198] sm:$0xff] %vm1202_vm1, %v2490_v59  ;;  %v1019_v5 = vpop.f32.mrf.mxu0 }
 0x24a   : > { %v2556_v43 = vld [vmem:[#allocation2 + $0x3a8] sm:$0xff]  ;;  %1875 = vst.msk [vmem:[#allocation2 + $0x3b0] sm:$0xff] %vm1202_vm1, %v1779_v40  ;;  %v1020_v26 = vadd.f32 %v3969_v0, %v1019_v5  ;;  %v1493_v21 = vpop.f32.mrf.mxu1 }
 0x24b   : > { %2684 = vst.msk [vmem:[%s3589_s10 + $0x3a8] sm:$0xff] %vm1202_vm1, %v2556_v43  ;;  %v1619_v19 = vld [vmem:[#allocation2 + $0x1b0] sm:$0xff]  ;;  %v1748_v25 = vadd.f32 %v1652_v33, %v1493_v21  ;;  %v1654_v40 = vld [vmem:[#allocation2 + $0x2c8] sm:$0xff] }
 0x24c   : > { %v1715_v6 = vadd.f32 %v1619_v19, %v3841_v27  ;;  %1258 = vst.msk [vmem:[#allocation2 + $0x1b8] sm:$0xff] %vm1202_vm1, %v1020_v26 }
 0x24d   : > { %v2204_v39 = vld [vmem:[#allocation2 + $0x1a8] sm:$0xff]  ;;  %1844 = vst.msk [vmem:[#allocation2 + $0x2b8] sm:$0xff] %vm1202_vm1, %v1748_v25 }
 0x24e   : > { %1811 = vst.msk [vmem:[#allocation2 + $0x1b0] sm:$0xff] %vm1202_vm1, %v1715_v6  ;;  %v2300_v31 = vadd.f32 %v2204_v39, %v2043_v52  ;;  %v1653_v52 = vld [vmem:[#allocation2 + $0x2c0] sm:$0xff] }
 0x24f   : > { %v2491_v17 = vld [vmem:[#allocation2 + $0x1a0] sm:$0xff]  ;;  %v1573_v53 = vpop.f32.mrf.mxu3 }
 0x250   : > { %2619 = vst.msk [vmem:[%s3589_s10 + $0x1a0] sm:$0xff] %vm1202_vm1, %v2491_v17  ;;  %v1780_v38 = vadd.f32 %v1684_v23, %v1573_v53  ;;  %v1655_v23 = vld [vmem:[#allocation2 + $0x2d0] sm:$0xff] }
 0x251   : > { %v2048_v1 = vpop.f32.mrf.mxu2  ;;  %2396 = vst.msk [vmem:[#allocation2 + $0x1a8] sm:$0xff] %vm1202_vm1, %v2300_v31  ;;  %v2557_v27 = vld [vmem:[#allocation2 + $0x3b0] sm:$0xff]  ;;  %v1022_v62 = vpop.f32.mrf.mxu0  ;;  %v4337_v31 = vld [vmem:[%s4658_s2] ss:$0 sm:$0xff] }
 0x252   : > { %2685 = vst.msk [vmem:[%s3589_s10 + $0x3b0] sm:$0xff] %vm1202_vm1, %v2557_v27  ;;  %v1023_v45 = vadd.f32 %v3969_v0, %v1022_v62  ;;  %v1496_v36 = vpop.f32.mrf.mxu1  ;;  %v3377_v62 = vld [vmem:[%s3472_s4 + $0x128] sm:$0xff] }
 0x253   : > { %v1620_v56 = vld [vmem:[#allocation2 + $0x1b8] sm:$0xff]  ;;  %1876 = vst.msk [vmem:[#allocation2 + $0x3b8] sm:$0xff] %vm1202_vm1, %v1780_v38  ;;  %v1749_v54 = vadd.f32 %v1653_v52, %v1496_v36  ;;  %v3379_v52 = vld [vmem:[%s3472_s4 + $0x1a8] sm:$0xff] }
 0x254   : > { %v1716_v24 = vadd.f32 %v1620_v56, %v3856_v44  ;;  %1259 = vst.msk [vmem:[#allocation2 + $0x1c0] sm:$0xff] %vm1202_vm1, %v1023_v45  ;;  %3095 = vmatmul.msk.bf16.gmra.mxu0 %vm680_vm0, %v3373_v28  ;;  %3235 = vmatmul.msk.bf16.gmra.mxu3 %vm680_vm0, %v3374_v57  ;;  %v3378_v45 = vld [vmem:[%s3472_s4 + $0x1e8] sm:$0xff] }
 0x255   : > { %v2205_v42 = vld [vmem:[#allocation2 + $0x1b0] sm:$0xff]  ;;  %1845 = vst.msk [vmem:[#allocation2 + $0x2c0] sm:$0xff] %vm1202_vm1, %v1749_v54  ;;  %3167 = vmatmul.msk.bf16.gmra.mxu1 %vm680_vm0, %v3373_v28 }
 0x256   : > { %3227 = vmatmul.msk.bf16.gmra.mxu2 %vm680_vm0, %v3375_v13  ;;  %1812 = vst.msk [vmem:[#allocation2 + $0x1b8] sm:$0xff] %vm1202_vm1, %v1716_v24  ;;  %v2301_v44 = vadd.f32 %v2205_v42, %v2046_v51  ;;  %v1687_v54 = vld [vmem:[#allocation2 + $0x3d0] sm:$0xff] }
 0x257   : > { %v1576_v41 = vpop.f32.mrf.mxu3 }
 0x258   : > { %v2492_v30 = vld [vmem:[#allocation2 + $0x1a8] sm:$0xff]  ;;  %2397 = vst.msk [vmem:[#allocation2 + $0x1b0] sm:$0xff] %vm1202_vm1, %v2301_v44  ;;  %v1781_v3 = vadd.f32 %v1685_v61, %v1576_v41  ;;  %v1656_v61 = vld [vmem:[#allocation2 + $0x2d8] sm:$0xff] }
 0x259   : > { %v2051_v4 = vpop.f32.mrf.mxu2  ;;  %2620 = vst.msk [vmem:[%s3589_s10 + $0x1a8] sm:$0xff] %vm1202_vm1, %v2492_v30  ;;  %v1024_v8 = vpop.f32.mrf.mxu0 }
 0x25a   : > { %v2558_v10 = vld [vmem:[#allocation2 + $0x3b8] sm:$0xff]  ;;  %1877 = vst.msk [vmem:[#allocation2 + $0x3c0] sm:$0xff] %vm1202_vm1, %v1781_v3  ;;  %v1025_v12 = vadd.f32 %v3969_v0, %v1024_v8  ;;  %v1498_v59 = vpop.f32.mrf.mxu1  ;;  %v1686_v0 = vld [vmem:[#allocation2 + $0x3c8] sm:$0xff] }
 0x25b   : > { %2686 = vst.msk [vmem:[%s3589_s10 + $0x3b8] sm:$0xff] %vm1202_vm1, %v2558_v10  ;;  %v1621_v51 = vld [vmem:[#allocation2 + $0x1c0] sm:$0xff]  ;;  %v1750_v5 = vadd.f32 %v1654_v40, %v1498_v59  ;;  %v1688_v40 = vld [vmem:[#allocation2 + $0x3d8] sm:$0xff] }
 0x25c   : > { %v1717_v43 = vadd.f32 %v1621_v51, %v3867_v60  ;;  %1260 = vst.msk [vmem:[#allocation2 + $0x1c8] sm:$0xff] %vm1202_vm1, %v1025_v12 }
 0x25d   : > { %v2206_v26 = vld [vmem:[#allocation2 + $0x1b8] sm:$0xff]  ;;  %1846 = vst.msk [vmem:[#allocation2 + $0x2c8] sm:$0xff] %vm1202_vm1, %v1750_v5 }
 0x25e   : > { %1813 = vst.msk [vmem:[#allocation2 + $0x1c0] sm:$0xff] %vm1202_vm1, %v1717_v43  ;;  %v2302_v21 = vadd.f32 %v2206_v26, %v2048_v1 }
 0x25f   : > { %v2493_v33 = vld [vmem:[#allocation2 + $0x1b0] sm:$0xff]  ;;  %v1578_v19 = vpop.f32.mrf.mxu3 }
 0x260   : > { %2621 = vst.msk [vmem:[%s3589_s10 + $0x1b0] sm:$0xff] %vm1202_vm1, %v2493_v33  ;;  %v1782_v25 = vadd.f32 %v1686_v0, %v1578_v19  ;;  %v1657_v33 = vld [vmem:[#allocation2 + $0x2e0] sm:$0xff] }
 0x261   : > { %v2053_v6 = vpop.f32.mrf.mxu2  ;;  %2398 = vst.msk [vmem:[#allocation2 + $0x1b8] sm:$0xff] %vm1202_vm1, %v2302_v21  ;;  %v2559_v60 = vld [vmem:[#allocation2 + $0x3c0] sm:$0xff]  ;;  %v1027_v39 = vpop.f32.mrf.mxu0 }
 0x262   : > { %2687 = vst.msk [vmem:[%s3589_s10 + $0x3c0] sm:$0xff] %vm1202_vm1, %v2559_v60  ;;  %v1028_v17 = vadd.f32 %v4337_v31, %v1027_v39  ;;  %v1501_v53 = vpop.f32.mrf.mxu1  ;;  %v3381_v60 = vld [vmem:[%s3472_s4 + $0x1f0] sm:$0xff] }
 0x263   : > { %v1622_v38 = vld [vmem:[#allocation2 + $0x1c8] sm:$0xff]  ;;  %1878 = vst.msk [vmem:[#allocation2 + $0x3c8] sm:$0xff] %vm1202_vm1, %v1782_v25  ;;  %v1751_v1 = vadd.f32 %v1655_v23, %v1501_v53  ;;  %v1689_v23 = vld [vmem:[#allocation2 + $0x3e0] sm:$0xff] }
 0x264   : > { %v1718_v27 = vadd.f32 %v1622_v38, %v3882_v9  ;;  %1261 = vst.msk [vmem:[#allocation2 + $0x1d0] sm:$0xff] %vm1202_vm1, %v1028_v17  ;;  %3096 = vmatmul.msk.bf16.gmra.mxu0 %vm680_vm0, %v3377_v62  ;;  %3236 = vmatmul.msk.bf16.gmra.mxu3 %vm680_vm0, %v3378_v45  ;;  %v3382_v17 = vld [vmem:[%s3472_s4 + $0x1b0] sm:$0xff] }
 0x265   : > { %v2207_v36 = vld [vmem:[#allocation2 + $0x1c0] sm:$0xff]  ;;  %1847 = vst.msk [vmem:[#allocation2 + $0x2d0] sm:$0xff] %vm1202_vm1, %v1751_v1  ;;  %3168 = vmatmul.msk.bf16.gmra.mxu1 %vm680_vm0, %v3377_v62 }
 0x266   : > { %3228 = vmatmul.msk.bf16.gmra.mxu2 %vm680_vm0, %v3379_v52  ;;  %1814 = vst.msk [vmem:[#allocation2 + $0x1c8] sm:$0xff] %vm1202_vm1, %v1718_v27  ;;  %v2303_v9 = vadd.f32 %v2207_v36, %v2051_v4 }
 0x267   : > { %v1581_v56 = vpop.f32.mrf.mxu3 }
 0x268   : > { %v2494_v24 = vld [vmem:[#allocation2 + $0x1b8] sm:$0xff]  ;;  %2399 = vst.msk [vmem:[#allocation2 + $0x1c0] sm:$0xff] %vm1202_vm1, %v2303_v9  ;;  %v1783_v28 = vadd.f32 %v1687_v54, %v1581_v56  ;;  %v1658_v9 = vld [vmem:[#allocation2 + $0x2e8] sm:$0xff] }
 0x269   : > { %v2056_v57 = vpop.f32.mrf.mxu2  ;;  %2622 = vst.msk [vmem:[%s3589_s10 + $0x1b8] sm:$0xff] %vm1202_vm1, %v2494_v24  ;;  %v1029_v42 = vpop.f32.mrf.mxu0 }
 0x26a   : > { %v2560_v13 = vld [vmem:[#allocation2 + $0x3c8] sm:$0xff]  ;;  %1879 = vst.msk [vmem:[#allocation2 + $0x3d0] sm:$0xff] %vm1202_vm1, %v1783_v28  ;;  %v1030_v44 = vadd.f32 %v4337_v31, %v1029_v42  ;;  %v1503_v41 = vpop.f32.mrf.mxu1 }
 0x26b   : > { %2688 = vst.msk [vmem:[%s3589_s10 + $0x3c8] sm:$0xff] %vm1202_vm1, %v2560_v13  ;;  %v1623_v30 = vld [vmem:[#allocation2 + $0x1d0] sm:$0xff]  ;;  %v1752_v3 = vadd.f32 %v1656_v61, %v1503_v41 }
 0x26c   : > { %v1719_v4 = vadd.f32 %v1623_v30, %v3893_v34  ;;  %1262 = vst.msk [vmem:[#allocation2 + $0x1d8] sm:$0xff] %vm1202_vm1, %v1030_v44  ;;  %v1690_v44 = vld [vmem:[#allocation2 + $0x3e8] sm:$0xff] }
 0x26d   : > { %v2208_v8 = vld [vmem:[#allocation2 + $0x1c8] sm:$0xff]  ;;  %1848 = vst.msk [vmem:[#allocation2 + $0x2d8] sm:$0xff] %vm1202_vm1, %v1752_v3 }
 0x26e   : > { %1815 = vst.msk [vmem:[#allocation2 + $0x1d0] sm:$0xff] %vm1202_vm1, %v1719_v4  ;;  %v2304_v10 = vadd.f32 %v2208_v8, %v2053_v6  ;;  %v3380_v6 = vld [vmem:[%s3472_s4 + $0x130] sm:$0xff] }
 0x26f   : > { %v2495_v12 = vld [vmem:[#allocation2 + $0x1c0] sm:$0xff]  ;;  %v1583_v59 = vpop.f32.mrf.mxu3  ;;  %v1659_v8 = vld [vmem:[#allocation2 + $0x2f0] sm:$0xff] }
 0x270   : > { %2623 = vst.msk [vmem:[%s3589_s10 + $0x1c0] sm:$0xff] %vm1202_vm1, %v2495_v12  ;;  %v1784_v51 = vadd.f32 %v1688_v40, %v1583_v59  ;;  %v3383_v40 = vld [vmem:[%s3472_s4 + $0x138] sm:$0xff] }
 0x271   : > { %v2058_v5 = vpop.f32.mrf.mxu2  ;;  %2400 = vst.msk [vmem:[#allocation2 + $0x1c8] sm:$0xff] %vm1202_vm1, %v2304_v10  ;;  %v2561_v34 = vld [vmem:[#allocation2 + $0x3d0] sm:$0xff]  ;;  %v1032_v43 = vpop.f32.mrf.mxu0 }
 0x272   : > { %2689 = vst.msk [vmem:[%s3589_s10 + $0x3d0] sm:$0xff] %vm1202_vm1, %v2561_v34  ;;  %v1033_v26 = vadd.f32 %v4337_v31, %v1032_v43  ;;  %v1506_v21 = vpop.f32.mrf.mxu1  ;;  %v3385_v34 = vld [vmem:[%s3472_s4 + $0x1b8] sm:$0xff] }
 0x273   : > { %v1624_v19 = vld [vmem:[#allocation2 + $0x1d8] sm:$0xff]  ;;  %1880 = vst.msk [vmem:[#allocation2 + $0x3d8] sm:$0xff] %vm1202_vm1, %v1784_v51  ;;  %v1753_v0 = vadd.f32 %v1657_v33, %v1506_v21 }
 0x274   : > { %v1720_v25 = vadd.f32 %v1624_v19, %v3908_v48  ;;  %1263 = vst.msk [vmem:[#allocation2 + $0x1e0] sm:$0xff] %vm1202_vm1, %v1033_v26  ;;  %3097 = vmatmul.msk.bf16.gmra.mxu0 %vm680_vm0, %v3380_v6  ;;  %3237 = vmatmul.msk.bf16.gmra.mxu3 %vm680_vm0, %v3381_v60  ;;  %v3384_v51 = vld [vmem:[%s3472_s4 + $0x1f8] sm:$0xff]  ;;  %v1691_v26 = vld [vmem:[#allocation2 + $0x3f0] sm:$0xff] }
 0x275   : > { %v2209_v39 = vld [vmem:[#allocation2 + $0x1d0] sm:$0xff]  ;;  %1849 = vst.msk [vmem:[#allocation2 + $0x2e0] sm:$0xff] %vm1202_vm1, %v1753_v0  ;;  %3169 = vmatmul.msk.bf16.gmra.mxu1 %vm680_vm0, %v3380_v6 }
 0x276   : > { %3229 = vmatmul.msk.bf16.gmra.mxu2 %vm680_vm0, %v3382_v17  ;;  %1816 = vst.msk [vmem:[#allocation2 + $0x1d8] sm:$0xff] %vm1202_vm1, %v1720_v25  ;;  %v2305_v48 = vadd.f32 %v2209_v39, %v2056_v57  ;;  %v1660_v39 = vld [vmem:[#allocation2 + $0x2f8] sm:$0xff] }
 0x277   : > { %v1586_v53 = vpop.f32.mrf.mxu3 }
 0x278   : > { %v2496_v38 = vld [vmem:[#allocation2 + $0x1c8] sm:$0xff]  ;;  %2401 = vst.msk [vmem:[#allocation2 + $0x1d0] sm:$0xff] %vm1202_vm1, %v2305_v48  ;;  %v1785_v1 = vadd.f32 %v1689_v23, %v1586_v53 }
 0x279   : > { %v2061_v27 = vpop.f32.mrf.mxu2  ;;  %2624 = vst.msk [vmem:[%s3589_s10 + $0x1c8] sm:$0xff] %vm1202_vm1, %v2496_v38  ;;  %v1034_v62 = vpop.f32.mrf.mxu0 }
 0x27a   : > { %v2562_v45 = vld [vmem:[#allocation2 + $0x3d8] sm:$0xff]  ;;  %1881 = vst.msk [vmem:[#allocation2 + $0x3e0] sm:$0xff] %vm1202_vm1, %v1785_v1  ;;  %v1035_v36 = vadd.f32 %v4337_v31, %v1034_v62  ;;  %v1508_v52 = vpop.f32.mrf.mxu1 }
 0x27b   : > { %2690 = vst.msk [vmem:[%s3589_s10 + $0x3d8] sm:$0xff] %vm1202_vm1, %v2562_v45  ;;  %v1625_v56 = vld [vmem:[#allocation2 + $0x1e0] sm:$0xff]  ;;  %v1754_v54 = vadd.f32 %v1658_v9, %v1508_v52  ;;  %v1692_v62 = vld [vmem:[#allocation2 + $0x3f8] sm:$0xff] }
 0x27c   : > { %v1721_v24 = vadd.f32 %v1625_v56, %v3919_v2  ;;  %1264 = vst.msk [vmem:[#allocation2 + $0x1e8] sm:$0xff] %vm1202_vm1, %v1035_v36 }
 0x27d   : > { %v2210_v28 = vld [vmem:[#allocation2 + $0x1d8] sm:$0xff]  ;;  %1850 = vst.msk [vmem:[#allocation2 + $0x2e8] sm:$0xff] %vm1202_vm1, %v1754_v54  ;;  %v1661_v54 = vld [vmem:[#allocation2 + $0x300] sm:$0xff] }
 0x27e   : > { %1817 = vst.msk [vmem:[#allocation2 + $0x1e0] sm:$0xff] %vm1202_vm1, %v1721_v24  ;;  %v2306_v57 = vadd.f32 %v2210_v28, %v2058_v5 }
 0x27f   : > { %v2497_v42 = vld [vmem:[#allocation2 + $0x1d0] sm:$0xff]  ;;  %v1588_v13 = vpop.f32.mrf.mxu3 }
 0x280   : > { %2625 = vst.msk [vmem:[%s3589_s10 + $0x1d0] sm:$0xff] %vm1202_vm1, %v2497_v42  ;;  %v1786_v41 = vadd.f32 %v1690_v44, %v1588_v13 }
 0x281   : > { %v2063_v61 = vpop.f32.mrf.mxu2  ;;  %2402 = vst.msk [vmem:[#allocation2 + $0x1d8] sm:$0xff] %vm1202_vm1, %v2306_v57  ;;  %v2563_v2 = vld [vmem:[#allocation2 + $0x3e0] sm:$0xff]  ;;  %v1037_v30 = vpop.f32.mrf.mxu0 }
 0x282   : > { %2691 = vst.msk [vmem:[%s3589_s10 + $0x3e0] sm:$0xff] %vm1202_vm1, %v2563_v2  ;;  %v1038_v3 = vadd.f32 %v4337_v31, %v1037_v30  ;;  %v1511_v4 = vpop.f32.mrf.mxu1 }
 0x283   : > { %v1626_v10 = vld [vmem:[#allocation2 + $0x1e8] sm:$0xff]  ;;  %1882 = vst.msk [vmem:[#allocation2 + $0x3e8] sm:$0xff] %vm1202_vm1, %v1786_v41  ;;  %v1755_v12 = vadd.f32 %v1659_v8, %v1511_v4  ;;  %v2231_v41 = vld [vmem:[#allocation2 + $0x280] sm:$0xff] }
 0x284   : > { %v1722_v59 = vadd.f32 %v1626_v10, %v3934_v18  ;;  %1265 = vst.msk [vmem:[#allocation2 + $0x1f0] sm:$0xff] %vm1202_vm1, %v1038_v3  ;;  %3098 = vmatmul.msk.bf16.gmra.mxu0 %vm680_vm0, %v3383_v40  ;;  %3238 = vmatmul.msk.bf16.gmra.mxu3 %vm680_vm0, %v3384_v51  ;;  %v1662_v10 = vld [vmem:[#allocation2 + $0x308] sm:$0xff] }
 0x285   : > { %v2211_v5 = vld [vmem:[#allocation2 + $0x1e0] sm:$0xff]  ;;  %1851 = vst.msk [vmem:[#allocation2 + $0x2f0] sm:$0xff] %vm1202_vm1, %v1755_v12  ;;  %3170 = vmatmul.msk.bf16.gmra.mxu1 %vm680_vm0, %v3383_v40 }
 0x286   : > { %3230 = vmatmul.msk.bf16.gmra.mxu2 %vm680_vm0, %v3385_v34  ;;  %1818 = vst.msk [vmem:[#allocation2 + $0x1e8] sm:$0xff] %vm1202_vm1, %v1722_v59  ;;  %v2307_v18 = vadd.f32 %v2211_v5, %v2061_v27 }
 0x287   : > { %v1591_v43 = vpop.f32.mrf.mxu3 }
 0x288   : > { %v2498_v21 = vld [vmem:[#allocation2 + $0x1d8] sm:$0xff]  ;;  %2403 = vst.msk [vmem:[#allocation2 + $0x1e0] sm:$0xff] %vm1202_vm1, %v2307_v18  ;;  %v1787_v33 = vadd.f32 %v1691_v26, %v1591_v43  ;;  %v2232_v26 = vld [vmem:[#allocation2 + $0x288] sm:$0xff] }
 0x289   : > { %v2066_v19 = vpop.f32.mrf.mxu2  ;;  %2626 = vst.msk [vmem:[%s3589_s10 + $0x1d8] sm:$0xff] %vm1202_vm1, %v2498_v21  ;;  %v1039_v0 = vpop.f32.mrf.mxu0 }
 0x28a   : > { %v2564_v25 = vld [vmem:[#allocation2 + $0x3e8] sm:$0xff]  ;;  %1883 = vst.msk [vmem:[#allocation2 + $0x3f0] sm:$0xff] %vm1202_vm1, %v1787_v33  ;;  %v1040_v6 = vadd.f32 %v4337_v31, %v1039_v0  ;;  %v1513_v60 = vpop.f32.mrf.mxu1 }
 0x28b   : > { %2692 = vst.msk [vmem:[%s3589_s10 + $0x3e8] sm:$0xff] %vm1202_vm1, %v2564_v25  ;;  %v1627_v17 = vld [vmem:[#allocation2 + $0x1f0] sm:$0xff]  ;;  %v1756_v48 = vadd.f32 %v1660_v39, %v1513_v60 }
 0x28c   : > { %v1723_v53 = vadd.f32 %v1627_v17, %v3945_v11  ;;  %1266 = vst.msk [vmem:[#allocation2 + $0x1f8] sm:$0xff] %vm1202_vm1, %v1040_v6  ;;  %v1663_v6 = vld [vmem:[#allocation2 + $0x310] sm:$0xff] }
 0x28d   : > { %v2212_v23 = vld [vmem:[#allocation2 + $0x1e8] sm:$0xff]  ;;  %1852 = vst.msk [vmem:[#allocation2 + $0x2f8] sm:$0xff] %vm1202_vm1, %v1756_v48 }
 0x28e   : > { %1819 = vst.msk [vmem:[#allocation2 + $0x1f0] sm:$0xff] %vm1202_vm1, %v1723_v53  ;;  %v2308_v38 = vadd.f32 %v2212_v23, %v2063_v61 }
 0x28f   : > { %v2499_v1 = vld [vmem:[#allocation2 + $0x1e0] sm:$0xff]  ;;  %v1593_v27 = vpop.f32.mrf.mxu3 }
 0x290   : > { %2627 = vst.msk [vmem:[%s3589_s10 + $0x1e0] sm:$0xff] %vm1202_vm1, %v2499_v1  ;;  %v1788_v45 = vadd.f32 %v1692_v62, %v1593_v27  ;;  %v2233_v1 = vld [vmem:[#allocation2 + $0x290] sm:$0xff] }
 0x291   : > { %v2068_v36 = vpop.f32.mrf.mxu2  ;;  %2404 = vst.msk [vmem:[#allocation2 + $0x1e8] sm:$0xff] %vm1202_vm1, %v2308_v38  ;;  %v2565_v52 = vld [vmem:[#allocation2 + $0x3f0] sm:$0xff]  ;;  %v1042_v9 = vpop.f32.mrf.mxu0 }
 0x292   : > { %2693 = vst.msk [vmem:[%s3589_s10 + $0x3f0] sm:$0xff] %vm1202_vm1, %v2565_v52  ;;  %v1043_v11 = vadd.f32 %v4337_v31, %v1042_v9  ;;  %v1516_v56 = vpop.f32.mrf.mxu1 }
 0x293   : > { %v1628_v24 = vld [vmem:[#allocation2 + $0x1f8] sm:$0xff]  ;;  %1884 = vst.msk [vmem:[#allocation2 + $0x3f8] sm:$0xff] %vm1202_vm1, %v1788_v45  ;;  %v1757_v28 = vadd.f32 %v1661_v54, %v1516_v56 }
 0x294   : > { %v1724_v57 = vadd.f32 %v1628_v24, %v3960_v55  ;;  %1267 = vst.msk [vmem:[#allocation2 + $0x200] sm:$0xff] %vm1202_vm1, %v1043_v11  ;;  %v1664_v11 = vld [vmem:[#allocation2 + $0x318] sm:$0xff] }
 0x295   : > { %v2213_v42 = vld [vmem:[#allocation2 + $0x1f0] sm:$0xff]  ;;  %1853 = vst.msk [vmem:[#allocation2 + $0x300] sm:$0xff] %vm1202_vm1, %v1757_v28 }
 0x296   : > { %1820 = vst.msk [vmem:[#allocation2 + $0x1f8] sm:$0xff] %vm1202_vm1, %v1724_v57  ;;  %v2309_v13 = vadd.f32 %v2213_v42, %v2066_v19 }
 0x297   : > { %v2111_v44 = vpop.f32.mrf.mxu3 }
 0x298   : > { %v2500_v61 = vld [vmem:[#allocation2 + $0x1e8] sm:$0xff]  ;;  %2405 = vst.msk [vmem:[#allocation2 + $0x1f0] sm:$0xff] %vm1202_vm1, %v2309_v13  ;;  %v2327_v2 = vadd.f32 %v2231_v41, %v2111_v44  ;;  %v2234_v41 = vld [vmem:[#allocation2 + $0x298] sm:$0xff] }
 0x299   : > { %v2071_v30 = vpop.f32.mrf.mxu2  ;;  %2628 = vst.msk [vmem:[%s3589_s10 + $0x1e8] sm:$0xff] %vm1202_vm1, %v2500_v61  ;;  %v1044_v55 = vpop.f32.mrf.mxu0 }
 0x29a   : > { %v2566_v3 = vld [vmem:[#allocation2 + $0x3f8] sm:$0xff]  ;;  %2423 = vst.msk [vmem:[#allocation2 + $0x280] sm:$0xff] %vm1202_vm1, %v2327_v2  ;;  %v1045_v4 = vadd.f32 %v4337_v31, %v1044_v55  ;;  %v1518_v8 = vpop.f32.mrf.mxu1 }
 0x29b   : > { %2694 = vst.msk [vmem:[%s3589_s10 + $0x3f8] sm:$0xff] %vm1202_vm1, %v2566_v3  ;;  %v1629_v12 = vld [vmem:[#allocation2 + $0x200] sm:$0xff]  ;;  %v1758_v59 = vadd.f32 %v1662_v10, %v1518_v8 }
 0x29c   : > { %v1725_v40 = vadd.f32 %v1629_v12, %v3974_v7  ;;  %v2535_v51 = vld [vmem:[#allocation2 + $0x300] sm:$0xff]  ;;  %1268 = vst.msk [vmem:[#allocation2 + $0x208] sm:$0xff] %vm1202_vm1, %v1045_v4 }
 0x29d   : > { %2663 = vst.msk [vmem:[%s3589_s10 + $0x300] sm:$0xff] %vm1202_vm1, %v2535_v51  ;;  %v2214_v5 = vld [vmem:[#allocation2 + $0x1f8] sm:$0xff]  ;;  %v1665_v4 = vld [vmem:[#allocation2 + $0x320] sm:$0xff] }
 0x29e   : > { %1821 = vst.msk [vmem:[#allocation2 + $0x200] sm:$0xff] %vm1202_vm1, %v1725_v40  ;;  %v2310_v34 = vadd.f32 %v2214_v5, %v2068_v36 }
 0x29f   : > { %v2501_v18 = vld [vmem:[#allocation2 + $0x1f0] sm:$0xff]  ;;  %1854 = vst.msk [vmem:[#allocation2 + $0x308] sm:$0xff] %vm1202_vm1, %v1758_v59  ;;  %v2113_v43 = vpop.f32.mrf.mxu3 }
 0x2a0   : > { %2629 = vst.msk [vmem:[%s3589_s10 + $0x1f0] sm:$0xff] %vm1202_vm1, %v2501_v18  ;;  %v2328_v21 = vadd.f32 %v2232_v26, %v2113_v43 }
 0x2a1   : > { %v2073_v33 = vpop.f32.mrf.mxu2  ;;  %2406 = vst.msk [vmem:[#allocation2 + $0x1f8] sm:$0xff] %vm1202_vm1, %v2310_v34  ;;  %v2519_v7 = vld [vmem:[#allocation2 + $0x280] sm:$0xff]  ;;  %v1047_v19 = vpop.f32.mrf.mxu0 }
 0x2a2   : > { %2647 = vst.msk [vmem:[%s3589_s10 + $0x280] sm:$0xff] %vm1202_vm1, %v2519_v7  ;;  %v1048_v0 = vadd.f32 %v4337_v31, %v1047_v19  ;;  %v1521_v25 = vpop.f32.mrf.mxu1  ;;  %v2235_v34 = vld [vmem:[#allocation2 + $0x2a0] sm:$0xff]  ;;  %v1666_v19 = vld [vmem:[#allocation2 + $0x328] sm:$0xff] }
 0x2a3   : > { %v1630_v60 = vld [vmem:[#allocation2 + $0x208] sm:$0xff]  ;;  %2424 = vst.msk [vmem:[#allocation2 + $0x288] sm:$0xff] %vm1202_vm1, %v2328_v21  ;;  %v1759_v39 = vadd.f32 %v1663_v6, %v1521_v25 }
 0x2a4   : > { %v1726_v17 = vadd.f32 %v1630_v60, %v3989_v35  ;;  %1269 = vst.msk [vmem:[#allocation2 + $0x210] sm:$0xff] %vm1202_vm1, %v1048_v0 }
 0x2a5   : > { %v2215_v48 = vld [vmem:[#allocation2 + $0x200] sm:$0xff]  ;;  %1855 = vst.msk [vmem:[#allocation2 + $0x310] sm:$0xff] %vm1202_vm1, %v1759_v39 }
 0x2a6   : > { %1822 = vst.msk [vmem:[#allocation2 + $0x208] sm:$0xff] %vm1202_vm1, %v1726_v17  ;;  %v2536_v53 = vld [vmem:[#allocation2 + $0x308] sm:$0xff]  ;;  %v2311_v23 = vadd.f32 %v2215_v48, %v2071_v30 }
 0x2a7   : > { %2664 = vst.msk [vmem:[%s3589_s10 + $0x308] sm:$0xff] %vm1202_vm1, %v2536_v53  ;;  %v2116_v38 = vpop.f32.mrf.mxu3 }
 0x2a8   : > { %v2502_v27 = vld [vmem:[#allocation2 + $0x1f8] sm:$0xff]  ;;  %2407 = vst.msk [vmem:[#allocation2 + $0x200] sm:$0xff] %vm1202_vm1, %v2311_v23  ;;  %v2329_v62 = vadd.f32 %v2233_v1, %v2116_v38  ;;  %v2236_v23 = vld [vmem:[#allocation2 + $0x2a8] sm:$0xff] }
 0x2a9   : > { %v2076_v35 = vpop.f32.mrf.mxu2  ;;  %2630 = vst.msk [vmem:[%s3589_s10 + $0x1f8] sm:$0xff] %vm1202_vm1, %v2502_v27  ;;  %v1049_v45 = vpop.f32.mrf.mxu0 }
 0x2aa   : > { %v2520_v36 = vld [vmem:[#allocation2 + $0x288] sm:$0xff]  ;;  %2425 = vst.msk [vmem:[#allocation2 + $0x290] sm:$0xff] %vm1202_vm1, %v2329_v62  ;;  %v1050_v52 = vadd.f32 %v4337_v31, %v1049_v45  ;;  %v1523_v9 = vpop.f32.mrf.mxu1  ;;  %v1667_v45 = vld [vmem:[#allocation2 + $0x330] sm:$0xff] }
 0x2ab   : > { %2648 = vst.msk [vmem:[%s3589_s10 + $0x288] sm:$0xff] %vm1202_vm1, %v2520_v36  ;;  %v1631_v56 = vld [vmem:[#allocation2 + $0x210] sm:$0xff]  ;;  %v1760_v54 = vadd.f32 %v1664_v11, %v1523_v9 }
 0x2ac   : > { %v1727_v24 = vadd.f32 %v1631_v56, %v3999_v50  ;;  %v2537_v28 = vld [vmem:[#allocation2 + $0x310] sm:$0xff]  ;;  %1270 = vst.msk [vmem:[#allocation2 + $0x218] sm:$0xff] %vm1202_vm1, %v1050_v52 }
 0x2ad   : > { %2665 = vst.msk [vmem:[%s3589_s10 + $0x310] sm:$0xff] %vm1202_vm1, %v2537_v28  ;;  %v2216_v57 = vld [vmem:[#allocation2 + $0x208] sm:$0xff]  ;;  %v2237_v28 = vld [vmem:[#allocation2 + $0x2b0] sm:$0xff] }
 0x2ae   : > { %1823 = vst.msk [vmem:[#allocation2 + $0x210] sm:$0xff] %vm1202_vm1, %v1727_v24  ;;  %v2312_v42 = vadd.f32 %v2216_v57, %v2073_v33 }
 0x2af   : > { %v2503_v13 = vld [vmem:[#allocation2 + $0x200] sm:$0xff]  ;;  %1856 = vst.msk [vmem:[#allocation2 + $0x318] sm:$0xff] %vm1202_vm1, %v1760_v54  ;;  %v2118_v44 = vpop.f32.mrf.mxu3 }
 0x2b0   : > { %2631 = vst.msk [vmem:[%s3589_s10 + $0x200] sm:$0xff] %vm1202_vm1, %v2503_v13  ;;  %v2330_v61 = vadd.f32 %v2234_v41, %v2118_v44 }
 0x2b1   : > { %v2078_v2 = vpop.f32.mrf.mxu2  ;;  %2408 = vst.msk [vmem:[#allocation2 + $0x208] sm:$0xff] %vm1202_vm1, %v2312_v42  ;;  %v2521_v50 = vld [vmem:[#allocation2 + $0x290] sm:$0xff]  ;;  %v1052_v30 = vpop.f32.mrf.mxu0 }
 0x2b2   : > { %2649 = vst.msk [vmem:[%s3589_s10 + $0x290] sm:$0xff] %vm1202_vm1, %v2521_v50  ;;  %v1053_v55 = vadd.f32 %v4337_v31, %v1052_v30  ;;  %v1526_v3 = vpop.f32.mrf.mxu1 }
 0x2b3   : > { %v1632_v8 = vld [vmem:[#allocation2 + $0x218] sm:$0xff]  ;;  %2426 = vst.msk [vmem:[#allocation2 + $0x298] sm:$0xff] %vm1202_vm1, %v2330_v61  ;;  %v1761_v10 = vadd.f32 %v1665_v4, %v1526_v3 }
 0x2b4   : > { %v1728_v12 = vadd.f32 %v1632_v8, %v4014_v14  ;;  %1271 = vst.msk [vmem:[#allocation2 + $0x220] sm:$0xff] %vm1202_vm1, %v1053_v55 }
 0x2b5   : > { %v2217_v59 = vld [vmem:[#allocation2 + $0x210] sm:$0xff]  ;;  %1857 = vst.msk [vmem:[#allocation2 + $0x320] sm:$0xff] %vm1202_vm1, %v1761_v10 }
 0x2b6   : > { %1824 = vst.msk [vmem:[#allocation2 + $0x218] sm:$0xff] %vm1202_vm1, %v1728_v12  ;;  %v2538_v40 = vld [vmem:[#allocation2 + $0x318] sm:$0xff]  ;;  %v2313_v51 = vadd.f32 %v2217_v59, %v2076_v35 }
 0x2b7   : > { %2666 = vst.msk [vmem:[%s3589_s10 + $0x318] sm:$0xff] %vm1202_vm1, %v2538_v40  ;;  %v2121_v5 = vpop.f32.mrf.mxu3  ;;  %v2238_v59 = vld [vmem:[#allocation2 + $0x2b8] sm:$0xff] }
 0x2b8   : > { %v2504_v18 = vld [vmem:[#allocation2 + $0x208] sm:$0xff]  ;;  %2409 = vst.msk [vmem:[#allocation2 + $0x210] sm:$0xff] %vm1202_vm1, %v2313_v51  ;;  %v2331_v43 = vadd.f32 %v2235_v34, %v2121_v5 }
 0x2b9   : > { %v2081_v14 = vpop.f32.mrf.mxu2  ;;  %2632 = vst.msk [vmem:[%s3589_s10 + $0x208] sm:$0xff] %vm1202_vm1, %v2504_v18  ;;  %v1054_v26 = vpop.f32.mrf.mxu0 }
 0x2ba   : > { %v2522_v21 = vld [vmem:[#allocation2 + $0x298] sm:$0xff]  ;;  %2427 = vst.msk [vmem:[#allocation2 + $0x2a0] sm:$0xff] %vm1202_vm1, %v2331_v43  ;;  %v1055_v33 = vadd.f32 %v4337_v31, %v1054_v26  ;;  %v1528_v7 = vpop.f32.mrf.mxu1  ;;  %v1669_v43 = vld [vmem:[#allocation2 + $0x340] sm:$0xff] }
 0x2bb   : > { %2650 = vst.msk [vmem:[%s3589_s10 + $0x298] sm:$0xff] %vm1202_vm1, %v2522_v21  ;;  %v1633_v0 = vld [vmem:[#allocation2 + $0x220] sm:$0xff]  ;;  %v1762_v25 = vadd.f32 %v1666_v19, %v1528_v7 }
 0x2bc   : > { %v1729_v6 = vadd.f32 %v1633_v0, %v4025_v32  ;;  %v2539_v60 = vld [vmem:[#allocation2 + $0x320] sm:$0xff]  ;;  %1272 = vst.msk [vmem:[#allocation2 + $0x228] sm:$0xff] %vm1202_vm1, %v1055_v33 }
 0x2bd   : > { %2667 = vst.msk [vmem:[%s3589_s10 + $0x320] sm:$0xff] %vm1202_vm1, %v2539_v60  ;;  %v2218_v39 = vld [vmem:[#allocation2 + $0x218] sm:$0xff] }
 0x2be   : > { %1825 = vst.msk [vmem:[#allocation2 + $0x220] sm:$0xff] %vm1202_vm1, %v1729_v6  ;;  %v2314_v17 = vadd.f32 %v2218_v39, %v2078_v2  ;;  %v1668_v2 = vld [vmem:[#allocation2 + $0x338] sm:$0xff] }
 0x2bf   : > { %v2505_v48 = vld [vmem:[#allocation2 + $0x210] sm:$0xff]  ;;  %1858 = vst.msk [vmem:[#allocation2 + $0x328] sm:$0xff] %vm1202_vm1, %v1762_v25  ;;  %v2123_v53 = vpop.f32.mrf.mxu3  ;;  %v2239_v25 = vld [vmem:[#allocation2 + $0x2c0] sm:$0xff] }
 0x2c0   : > { %2633 = vst.msk [vmem:[%s3589_s10 + $0x210] sm:$0xff] %vm1202_vm1, %v2505_v48  ;;  %v2332_v38 = vadd.f32 %v2236_v23, %v2123_v53  ;;  %v1670_v23 = vld [vmem:[#allocation2 + $0x348] sm:$0xff] }
 0x2c1   : > { %v2083_v1 = vpop.f32.mrf.mxu2  ;;  %2410 = vst.msk [vmem:[#allocation2 + $0x218] sm:$0xff] %vm1202_vm1, %v2314_v17  ;;  %v2523_v32 = vld [vmem:[#allocation2 + $0x2a0] sm:$0xff]  ;;  %v1057_v27 = vpop.f32.mrf.mxu0 }
 0x2c2   : > { %2651 = vst.msk [vmem:[%s3589_s10 + $0x2a0] sm:$0xff] %vm1202_vm1, %v2523_v32  ;;  %v1058_v62 = vadd.f32 %v4337_v31, %v1057_v27  ;;  %v1531_v35 = vpop.f32.mrf.mxu1 }
 0x2c3   : > { %v1634_v36 = vld [vmem:[#allocation2 + $0x228] sm:$0xff]  ;;  %2428 = vst.msk [vmem:[#allocation2 + $0x2a8] sm:$0xff] %vm1202_vm1, %v2332_v38  ;;  %v1763_v52 = vadd.f32 %v1667_v45, %v1531_v35 }
 0x2c4   : > { %v1730_v9 = vadd.f32 %v1634_v36, %v4042_v58  ;;  %1273 = vst.msk [vmem:[#allocation2 + $0x230] sm:$0xff] %vm1202_vm1, %v1058_v62 }
 0x2c5   : > { %v2219_v11 = vld [vmem:[#allocation2 + $0x220] sm:$0xff]  ;;  %1859 = vst.msk [vmem:[#allocation2 + $0x330] sm:$0xff] %vm1202_vm1, %v1763_v52  ;;  %v2240_v52 = vld [vmem:[#allocation2 + $0x2c8] sm:$0xff] }
 0x2c6   : > { %1826 = vst.msk [vmem:[#allocation2 + $0x228] sm:$0xff] %vm1202_vm1, %v1730_v9  ;;  %v2540_v56 = vld [vmem:[#allocation2 + $0x328] sm:$0xff]  ;;  %v2315_v54 = vadd.f32 %v2219_v11, %v2081_v14 }
 0x2c7   : > { %2668 = vst.msk [vmem:[%s3589_s10 + $0x328] sm:$0xff] %vm1202_vm1, %v2540_v56  ;;  %v2126_v24 = vpop.f32.mrf.mxu3 }
 0x2c8   : > { %v2506_v57 = vld [vmem:[#allocation2 + $0x218] sm:$0xff]  ;;  %2411 = vst.msk [vmem:[#allocation2 + $0x220] sm:$0xff] %vm1202_vm1, %v2315_v54  ;;  %v2333_v42 = vadd.f32 %v2237_v28, %v2126_v24  ;;  %v1671_v28 = vld [vmem:[#allocation2 + $0x350] sm:$0xff] }
 0x2c9   : > { %v2086_v58 = vpop.f32.mrf.mxu2  ;;  %2634 = vst.msk [vmem:[%s3589_s10 + $0x218] sm:$0xff] %vm1202_vm1, %v2506_v57  ;;  %v1059_v13 = vpop.f32.mrf.mxu0 }
 0x2ca   : > { %v2524_v44 = vld [vmem:[#allocation2 + $0x2a8] sm:$0xff]  ;;  %2429 = vst.msk [vmem:[#allocation2 + $0x2b0] sm:$0xff] %vm1202_vm1, %v2333_v42  ;;  %v1060_v41 = vadd.f32 %v4337_v31, %v1059_v13  ;;  %v1533_v61 = vpop.f32.mrf.mxu1 }
 0x2cb   : > { %2652 = vst.msk [vmem:[%s3589_s10 + $0x2a8] sm:$0xff] %vm1202_vm1, %v2524_v44  ;;  %v1635_v50 = vld [vmem:[#allocation2 + $0x230] sm:$0xff]  ;;  %v1764_v30 = vadd.f32 %v1668_v2, %v1533_v61 }
 0x2cc   : > { %v1731_v55 = vadd.f32 %v1635_v50, %v4053_v15  ;;  %v2541_v3 = vld [vmem:[#allocation2 + $0x330] sm:$0xff]  ;;  %1274 = vst.msk [vmem:[#allocation2 + $0x238] sm:$0xff] %vm1202_vm1, %v1060_v41 }
 0x2cd   : > { %2669 = vst.msk [vmem:[%s3589_s10 + $0x330] sm:$0xff] %vm1202_vm1, %v2541_v3  ;;  %v2220_v4 = vld [vmem:[#allocation2 + $0x228] sm:$0xff]  ;;  %v2241_v2 = vld [vmem:[#allocation2 + $0x2d0] sm:$0xff] }
 0x2ce   : > { %1827 = vst.msk [vmem:[#allocation2 + $0x230] sm:$0xff] %vm1202_vm1, %v1731_v55  ;;  %v2316_v8 = vadd.f32 %v2220_v4, %v2083_v1 }
 0x2cf   : > { %v2507_v10 = vld [vmem:[#allocation2 + $0x220] sm:$0xff]  ;;  %1860 = vst.msk [vmem:[#allocation2 + $0x338] sm:$0xff] %vm1202_vm1, %v1764_v30  ;;  %v2128_v12 = vpop.f32.mrf.mxu3 }
 0x2d0   : > { %2635 = vst.msk [vmem:[%s3589_s10 + $0x220] sm:$0xff] %vm1202_vm1, %v2507_v10  ;;  %v2334_v40 = vadd.f32 %v2238_v59, %v2128_v12 }
 0x2d1   : > { %v2088_v51 = vpop.f32.mrf.mxu2  ;;  %2412 = vst.msk [vmem:[#allocation2 + $0x228] sm:$0xff] %vm1202_vm1, %v2316_v8  ;;  %v2525_v15 = vld [vmem:[#allocation2 + $0x2b0] sm:$0xff]  ;;  %v1062_v5 = vpop.f32.mrf.mxu0  ;;  %v1672_v8 = vld [vmem:[#allocation2 + $0x358] sm:$0xff] }
 0x2d2   : > { %2653 = vst.msk [vmem:[%s3589_s10 + $0x2b0] sm:$0xff] %vm1202_vm1, %v2525_v15  ;;  %v1063_v34 = vadd.f32 %v4337_v31, %v1062_v5  ;;  %v1536_v18 = vpop.f32.mrf.mxu1 }
 0x2d3   : > { %v1636_v14 = vld [vmem:[#allocation2 + $0x238] sm:$0xff]  ;;  %2430 = vst.msk [vmem:[#allocation2 + $0x2b8] sm:$0xff] %vm1202_vm1, %v2334_v40  ;;  %v1765_v26 = vadd.f32 %v1669_v43, %v1536_v18 }
 0x2d4   : > { %v1732_v21 = vadd.f32 %v1636_v14, %v4070_v46  ;;  %1275 = vst.msk [vmem:[#allocation2 + $0x240] sm:$0xff] %vm1202_vm1, %v1063_v34  ;;  %v2242_v43 = vld [vmem:[#allocation2 + $0x2d8] sm:$0xff] }
 0x2d5   : > { %v2221_v33 = vld [vmem:[#allocation2 + $0x230] sm:$0xff]  ;;  %1861 = vst.msk [vmem:[#allocation2 + $0x340] sm:$0xff] %vm1202_vm1, %v1765_v26 }
 0x2d6   : > { %1828 = vst.msk [vmem:[#allocation2 + $0x238] sm:$0xff] %vm1202_vm1, %v1732_v21  ;;  %v2542_v7 = vld [vmem:[#allocation2 + $0x338] sm:$0xff]  ;;  %v2317_v19 = vadd.f32 %v2221_v33, %v2086_v58 }
 0x2d7   : > { %2670 = vst.msk [vmem:[%s3589_s10 + $0x338] sm:$0xff] %vm1202_vm1, %v2542_v7  ;;  %v2131_v0 = vpop.f32.mrf.mxu3  ;;  %v1673_v7 = vld [vmem:[#allocation2 + $0x360] sm:$0xff] }
 0x2d8   : > { %v2508_v6 = vld [vmem:[#allocation2 + $0x228] sm:$0xff]  ;;  %2413 = vst.msk [vmem:[#allocation2 + $0x230] sm:$0xff] %vm1202_vm1, %v2317_v19  ;;  %v2335_v60 = vadd.f32 %v2239_v25, %v2131_v0 }
 0x2d9   : > { %v2091_v46 = vpop.f32.mrf.mxu2  ;;  %2636 = vst.msk [vmem:[%s3589_s10 + $0x228] sm:$0xff] %vm1202_vm1, %v2508_v6  ;;  %v1064_v39 = vpop.f32.mrf.mxu0 }
 0x2da   : > { %v2526_v17 = vld [vmem:[#allocation2 + $0x2b8] sm:$0xff]  ;;  %2431 = vst.msk [vmem:[#allocation2 + $0x2c0] sm:$0xff] %vm1202_vm1, %v2335_v60  ;;  %v1065_v48 = vadd.f32 %v4337_v31, %v1064_v39  ;;  %v1538_v53 = vpop.f32.mrf.mxu1 }
 0x2db   : > { %2654 = vst.msk [vmem:[%s3589_s10 + $0x2b8] sm:$0xff] %vm1202_vm1, %v2526_v17  ;;  %v1637_v38 = vld [vmem:[#allocation2 + $0x240] sm:$0xff]  ;;  %v1766_v1 = vadd.f32 %v1670_v23, %v1538_v53 }
 0x2dc   : > { %v1733_v32 = vadd.f32 %v1637_v38, %v4081_v63  ;;  %v2543_v27 = vld [vmem:[#allocation2 + $0x340] sm:$0xff]  ;;  %1276 = vst.msk [vmem:[#allocation2 + $0x248] sm:$0xff] %vm1202_vm1, %v1065_v48 }
 0x2dd   : > { %2671 = vst.msk [vmem:[%s3589_s10 + $0x340] sm:$0xff] %vm1202_vm1, %v2543_v27  ;;  %v2222_v62 = vld [vmem:[#allocation2 + $0x238] sm:$0xff]  ;;  %v2243_v48 = vld [vmem:[#allocation2 + $0x2e0] sm:$0xff]  ;;  %v1674_v27 = vld [vmem:[#allocation2 + $0x368] sm:$0xff] }
 0x2de   : > { %1829 = vst.msk [vmem:[#allocation2 + $0x240] sm:$0xff] %vm1202_vm1, %v1733_v32  ;;  %v2318_v35 = vadd.f32 %v2222_v62, %v2088_v51 }
 0x2df   : > { %v2509_v45 = vld [vmem:[#allocation2 + $0x230] sm:$0xff]  ;;  %1862 = vst.msk [vmem:[#allocation2 + $0x348] sm:$0xff] %vm1202_vm1, %v1766_v1  ;;  %v2133_v36 = vpop.f32.mrf.mxu3 }
 0x2e0   : > { %2637 = vst.msk [vmem:[%s3589_s10 + $0x230] sm:$0xff] %vm1202_vm1, %v2509_v45  ;;  %v2336_v9 = vadd.f32 %v2240_v52, %v2133_v36 }
 0x2e1   : > { %2414 = vst.msk [vmem:[#allocation2 + $0x238] sm:$0xff] %vm1202_vm1, %v2318_v35  ;;  %v2527_v63 = vld [vmem:[#allocation2 + $0x2c0] sm:$0xff]  ;;  %v1067_v11 = vpop.f32.mrf.mxu0  ;;  %v2093_v56 = vpop.f32.mrf.mxu2 }
 0x2e2   : > { %2655 = vst.msk [vmem:[%s3589_s10 + $0x2c0] sm:$0xff] %vm1202_vm1, %v2527_v63  ;;  %v1068_v54 = vadd.f32 %v4337_v31, %v1067_v11  ;;  %v1541_v24 = vpop.f32.mrf.mxu1 }
 0x2e3   : > { %v1638_v57 = vld [vmem:[#allocation2 + $0x248] sm:$0xff]  ;;  %2432 = vst.msk [vmem:[#allocation2 + $0x2c8] sm:$0xff] %vm1202_vm1, %v2336_v9  ;;  %v1767_v42 = vadd.f32 %v1671_v28, %v1541_v24 }
 0x2e4   : > { %v1734_v58 = vadd.f32 %v1638_v57, %v4098_v22  ;;  %1277 = vst.msk [vmem:[#allocation2 + $0x250] sm:$0xff] %vm1202_vm1, %v1068_v54  ;;  %v2244_v54 = vld [vmem:[#allocation2 + $0x2e8] sm:$0xff] }
 0x2e5   : > { %v2223_v13 = vld [vmem:[#allocation2 + $0x240] sm:$0xff]  ;;  %1863 = vst.msk [vmem:[#allocation2 + $0x350] sm:$0xff] %vm1202_vm1, %v1767_v42 }
 0x2e6   : > { %1830 = vst.msk [vmem:[#allocation2 + $0x248] sm:$0xff] %vm1202_vm1, %v1734_v58  ;;  %v2544_v44 = vld [vmem:[#allocation2 + $0x348] sm:$0xff]  ;;  %v2319_v41 = vadd.f32 %v2223_v13, %v2091_v46  ;;  %v1675_v58 = vld [vmem:[#allocation2 + $0x370] sm:$0xff] }
 0x2e7   : > { %2672 = vst.msk [vmem:[%s3589_s10 + $0x348] sm:$0xff] %vm1202_vm1, %v2544_v44  ;;  %v2136_v61 = vpop.f32.mrf.mxu3 }
 0x2e8   : > { %v2510_v50 = vld [vmem:[#allocation2 + $0x238] sm:$0xff]  ;;  %2415 = vst.msk [vmem:[#allocation2 + $0x240] sm:$0xff] %vm1202_vm1, %v2319_v41  ;;  %v2337_v30 = vadd.f32 %v2241_v2, %v2136_v61 }
 0x2e9   : > { %2638 = vst.msk [vmem:[%s3589_s10 + $0x238] sm:$0xff] %vm1202_vm1, %v2510_v50  ;;  %v1069_v22 = vpop.f32.mrf.mxu0  ;;  %v2096_v59 = vpop.f32.mrf.mxu2 }
 0x2ea   : > { %v2528_v55 = vld [vmem:[#allocation2 + $0x2c8] sm:$0xff]  ;;  %2433 = vst.msk [vmem:[#allocation2 + $0x2d0] sm:$0xff] %vm1202_vm1, %v2337_v30  ;;  %v1070_v3 = vadd.f32 %v4337_v31, %v1069_v22  ;;  %v1543_v4 = vpop.f32.mrf.mxu1  ;;  %v2245_v22 = vld [vmem:[#allocation2 + $0x2f0] sm:$0xff] }
 0x2eb   : > { %2656 = vst.msk [vmem:[%s3589_s10 + $0x2c8] sm:$0xff] %vm1202_vm1, %v2528_v55  ;;  %v1639_v10 = vld [vmem:[#allocation2 + $0x250] sm:$0xff]  ;;  %v1768_v12 = vadd.f32 %v1672_v8, %v1543_v4 }
 0x2ec   : > { %v1735_v40 = vadd.f32 %v1639_v10, %v4109_v49  ;;  %v2545_v51 = vld [vmem:[#allocation2 + $0x350] sm:$0xff]  ;;  %1278 = vst.msk [vmem:[#allocation2 + $0x258] sm:$0xff] %vm1202_vm1, %v1070_v3 }
 0x2ed   : > { %2673 = vst.msk [vmem:[%s3589_s10 + $0x350] sm:$0xff] %vm1202_vm1, %v2545_v51  ;;  %v2224_v15 = vld [vmem:[#allocation2 + $0x248] sm:$0xff] }
 0x2ee   : > { %1831 = vst.msk [vmem:[#allocation2 + $0x250] sm:$0xff] %vm1202_vm1, %v1735_v40  ;;  %v2320_v5 = vadd.f32 %v2224_v15, %v2093_v56 }
 0x2ef   : > { %v2511_v34 = vld [vmem:[#allocation2 + $0x240] sm:$0xff]  ;;  %1864 = vst.msk [vmem:[#allocation2 + $0x358] sm:$0xff] %vm1202_vm1, %v1768_v12  ;;  %v2138_v18 = vpop.f32.mrf.mxu3 }
 0x2f0   : > { %2639 = vst.msk [vmem:[%s3589_s10 + $0x240] sm:$0xff] %vm1202_vm1, %v2511_v34  ;;  %v2338_v14 = vadd.f32 %v2242_v43, %v2138_v18 }
 0x2f1   : > { %2416 = vst.msk [vmem:[#allocation2 + $0x248] sm:$0xff] %vm1202_vm1, %v2320_v5  ;;  %v2529_v49 = vld [vmem:[#allocation2 + $0x2d0] sm:$0xff]  ;;  %v1072_v26 = vpop.f32.mrf.mxu0  ;;  %v2098_v60 = vpop.f32.mrf.mxu2 }
 0x2f2   : > { %2657 = vst.msk [vmem:[%s3589_s10 + $0x2d0] sm:$0xff] %vm1202_vm1, %v2529_v49  ;;  %v1073_v21 = vadd.f32 %v4337_v31, %v1072_v26  ;;  %v1546_v33 = vpop.f32.mrf.mxu1 }
 0x2f3   : > { %v1640_v19 = vld [vmem:[#allocation2 + $0x258] sm:$0xff]  ;;  %2434 = vst.msk [vmem:[#allocation2 + $0x2d8] sm:$0xff] %vm1202_vm1, %v2338_v14  ;;  %v1769_v0 = vadd.f32 %v1673_v7, %v1546_v33 }
 0x2f4   : > { %v1736_v25 = vadd.f32 %v1640_v19, %v4126_v20  ;;  %1279 = vst.msk [vmem:[#allocation2 + $0x260] sm:$0xff] %vm1202_vm1, %v1073_v21  ;;  %v2246_v14 = vld [vmem:[#allocation2 + $0x2f8] sm:$0xff] }
 0x2f5   : > { %v2225_v6 = vld [vmem:[#allocation2 + $0x250] sm:$0xff]  ;;  %1865 = vst.msk [vmem:[#allocation2 + $0x360] sm:$0xff] %vm1202_vm1, %v1769_v0 }
 0x2f6   : > { %1832 = vst.msk [vmem:[#allocation2 + $0x258] sm:$0xff] %vm1202_vm1, %v1736_v25  ;;  %v2546_v46 = vld [vmem:[#allocation2 + $0x358] sm:$0xff]  ;;  %v2321_v39 = vadd.f32 %v2225_v6, %v2096_v59 }
 0x2f7   : > { %2674 = vst.msk [vmem:[%s3589_s10 + $0x358] sm:$0xff] %vm1202_vm1, %v2546_v46  ;;  %v2141_v17 = vpop.f32.mrf.mxu3  ;;  %v1676_v59 = vld [vmem:[#allocation2 + $0x378] sm:$0xff] }
 0x2f8   : > { %v2512_v53 = vld [vmem:[#allocation2 + $0x248] sm:$0xff]  ;;  %2417 = vst.msk [vmem:[#allocation2 + $0x250] sm:$0xff] %vm1202_vm1, %v2321_v39  ;;  %v2339_v20 = vadd.f32 %v2243_v48, %v2141_v17 }
 0x2f9   : > { %2640 = vst.msk [vmem:[%s3589_s10 + $0x248] sm:$0xff] %vm1202_vm1, %v2512_v53  ;;  %v1074_v23 = vpop.f32.mrf.mxu0  ;;  %v2101_v11 = vpop.f32.mrf.mxu2 }
 0x2fa   : > { %v2530_v38 = vld [vmem:[#allocation2 + $0x2d8] sm:$0xff]  ;;  %2435 = vst.msk [vmem:[#allocation2 + $0x2e0] sm:$0xff] %vm1202_vm1, %v2339_v20  ;;  %v1075_v1 = vadd.f32 %v4337_v31, %v1074_v23  ;;  %v1548_v32 = vpop.f32.mrf.mxu1 }
 0x2fb   : > { %2658 = vst.msk [vmem:[%s3589_s10 + $0x2d8] sm:$0xff] %vm1202_vm1, %v2530_v38  ;;  %v1641_v62 = vld [vmem:[#allocation2 + $0x260] sm:$0xff]  ;;  %v1770_v35 = vadd.f32 %v1674_v27, %v1548_v32 }
 0x2fc   : > { %v1737_v45 = vadd.f32 %v1641_v62, %v4137_v37  ;;  %v2547_v36 = vld [vmem:[#allocation2 + $0x360] sm:$0xff]  ;;  %1280 = vst.msk [vmem:[#allocation2 + $0x268] sm:$0xff] %vm1202_vm1, %v1075_v1 }
 0x2fd   : > { %2675 = vst.msk [vmem:[%s3589_s10 + $0x360] sm:$0xff] %vm1202_vm1, %v2547_v36  ;;  %v2226_v52 = vld [vmem:[#allocation2 + $0x258] sm:$0xff] }
 0x2fe   : > { %1833 = vst.msk [vmem:[#allocation2 + $0x260] sm:$0xff] %vm1202_vm1, %v1737_v45  ;;  %v2322_v9 = vadd.f32 %v2226_v52, %v2098_v60 }
 0x2ff   : > { %v2513_v63 = vld [vmem:[#allocation2 + $0x250] sm:$0xff]  ;;  %1866 = vst.msk [vmem:[#allocation2 + $0x368] sm:$0xff] %vm1202_vm1, %v1770_v35  ;;  %v2143_v56 = vpop.f32.mrf.mxu3 }
 0x300   : > { %2641 = vst.msk [vmem:[%s3589_s10 + $0x250] sm:$0xff] %vm1202_vm1, %v2513_v63  ;;  %v2340_v24 = vadd.f32 %v2244_v54, %v2143_v56 }
 0x301   : > { %2418 = vst.msk [vmem:[#allocation2 + $0x258] sm:$0xff] %vm1202_vm1, %v2322_v9  ;;  %v2531_v37 = vld [vmem:[#allocation2 + $0x2e0] sm:$0xff]  ;;  %v1077_v28 = vpop.f32.mrf.mxu0 }
 0x302   : > { %2659 = vst.msk [vmem:[%s3589_s10 + $0x2e0] sm:$0xff] %vm1202_vm1, %v2531_v37  ;;  %v1078_v57 = vadd.f32 %v4337_v31, %v1077_v28  ;;  %v1551_v42 = vpop.f32.mrf.mxu1 }
 0x303   : > { %v1642_v13 = vld [vmem:[#allocation2 + $0x268] sm:$0xff]  ;;  %2436 = vst.msk [vmem:[#allocation2 + $0x2e8] sm:$0xff] %vm1202_vm1, %v2340_v24  ;;  %v1771_v44 = vadd.f32 %v1675_v58, %v1551_v42 }
 0x304   : > { %v1738_v41 = vadd.f32 %v1642_v13, %v4154_v29  ;;  %1281 = vst.msk [vmem:[#allocation2 + $0x270] sm:$0xff] %vm1202_vm1, %v1078_v57  ;;  %v2103_v29 = vpop.f32.mrf.mxu2 }
 0x305   : > { %v2227_v61 = vld [vmem:[#allocation2 + $0x260] sm:$0xff]  ;;  %1867 = vst.msk [vmem:[#allocation2 + $0x370] sm:$0xff] %vm1202_vm1, %v1771_v44 }
 0x306   : > { %1834 = vst.msk [vmem:[#allocation2 + $0x268] sm:$0xff] %vm1202_vm1, %v1738_v41  ;;  %v2548_v2 = vld [vmem:[#allocation2 + $0x368] sm:$0xff]  ;;  %v2323_v50 = vadd.f32 %v2227_v61, %v2101_v11 }
 0x307   : > { %2676 = vst.msk [vmem:[%s3589_s10 + $0x368] sm:$0xff] %vm1202_vm1, %v2548_v2  ;;  %v2146_v30 = vpop.f32.mrf.mxu3 }
 0x308   : > { %v2514_v55 = vld [vmem:[#allocation2 + $0x258] sm:$0xff]  ;;  %2419 = vst.msk [vmem:[#allocation2 + $0x260] sm:$0xff] %vm1202_vm1, %v2323_v50  ;;  %v2341_v3 = vadd.f32 %v2245_v22, %v2146_v30 }
 0x309   : > { %2642 = vst.msk [vmem:[%s3589_s10 + $0x258] sm:$0xff] %vm1202_vm1, %v2514_v55  ;;  %v1079_v4 = vpop.f32.mrf.mxu0 }
 0x30a   : > { %v2532_v8 = vld [vmem:[#allocation2 + $0x2e8] sm:$0xff]  ;;  %2437 = vst.msk [vmem:[#allocation2 + $0x2f0] sm:$0xff] %vm1202_vm1, %v2341_v3  ;;  %v1080_v10 = vadd.f32 %v4337_v31, %v1079_v4  ;;  %v1553_v12 = vpop.f32.mrf.mxu1 }
 0x30b   : > { %2660 = vst.msk [vmem:[%s3589_s10 + $0x2e8] sm:$0xff] %vm1202_vm1, %v2532_v8  ;;  %v1643_v40 = vld [vmem:[#allocation2 + $0x270] sm:$0xff]  ;;  %v1772_v51 = vadd.f32 %v1676_v59, %v1553_v12 }
 0x30c   : > { %v1739_v15 = vadd.f32 %v1643_v40, %v4165_v16  ;;  %v2549_v5 = vld [vmem:[#allocation2 + $0x370] sm:$0xff]  ;;  %1282 = vst.msk [vmem:[#allocation2 + $0x278] sm:$0xff] %vm1202_vm1, %v1080_v10  ;;  %v2106_v21 = vpop.f32.mrf.mxu2 }
 0x30d   : > { %2677 = vst.msk [vmem:[%s3589_s10 + $0x370] sm:$0xff] %vm1202_vm1, %v2549_v5  ;;  %v2228_v34 = vld [vmem:[#allocation2 + $0x268] sm:$0xff] }
 0x30e   : > { %1835 = vst.msk [vmem:[#allocation2 + $0x270] sm:$0xff] %vm1202_vm1, %v1739_v15  ;;  %v2324_v18 = vadd.f32 %v2228_v34, %v2103_v29 }
 0x30f   : > { %v2515_v31 = vld [vmem:[#allocation2 + $0x260] sm:$0xff]  ;;  %1868 = vst.msk [vmem:[#allocation2 + $0x378] sm:$0xff] %vm1202_vm1, %v1772_v51  ;;  %v2148_v43 = vpop.f32.mrf.mxu3 }
 0x310   : > { %2643 = vst.msk [vmem:[%s3589_s10 + $0x260] sm:$0xff] %vm1202_vm1, %v2515_v31  ;;  %v2342_v49 = vadd.f32 %v2246_v14, %v2148_v43 }
 0x311   : > { %2420 = vst.msk [vmem:[#allocation2 + $0x268] sm:$0xff] %vm1202_vm1, %v2324_v18  ;;  %v2533_v16 = vld [vmem:[#allocation2 + $0x2f0] sm:$0xff] }
 0x312   : > { %2661 = vst.msk [vmem:[%s3589_s10 + $0x2f0] sm:$0xff] %vm1202_vm1, %v2533_v16 }
 0x313   : > { %v1644_v26 = vld [vmem:[#allocation2 + $0x278] sm:$0xff]  ;;  %2438 = vst.msk [vmem:[#allocation2 + $0x2f8] sm:$0xff] %vm1202_vm1, %v2342_v49 }
 0x314   : > { %v1740_v33 = vadd.f32 %v1644_v26, %v4182_v47  ;;  %v2108_v60 = vpop.f32.mrf.mxu2 }
 0x315   : > { %v2229_v7 = vld [vmem:[#allocation2 + $0x270] sm:$0xff] }
 0x316   : > { %1836 = vst.msk [vmem:[#allocation2 + $0x278] sm:$0xff] %vm1202_vm1, %v1740_v33  ;;  %v2550_v19 = vld [vmem:[#allocation2 + $0x378] sm:$0xff]  ;;  %v2325_v0 = vadd.f32 %v2229_v7, %v2106_v21 }
 0x317   : > { %2678 = vst.msk [vmem:[%s3589_s10 + $0x378] sm:$0xff] %vm1202_vm1, %v2550_v19 }
 0x318   : > { %v2516_v25 = vld [vmem:[#allocation2 + $0x268] sm:$0xff]  ;;  %2421 = vst.msk [vmem:[#allocation2 + $0x270] sm:$0xff] %vm1202_vm1, %v2325_v0 }
 0x319   : > { %2644 = vst.msk [vmem:[%s3589_s10 + $0x268] sm:$0xff] %vm1202_vm1, %v2516_v25 }
 0x31a   : > { %v2534_v6 = vld [vmem:[#allocation2 + $0x2f8] sm:$0xff] }
 0x31b   : > { %2662 = vst.msk [vmem:[%s3589_s10 + $0x2f8] sm:$0xff] %vm1202_vm1, %v2534_v6 }
 0x31d   : > { %v2230_v46 = vld [vmem:[#allocation2 + $0x278] sm:$0xff] }
 0x31e   : > { %v2326_v39 = vadd.f32 %v2230_v46, %v2108_v60 }
 0x31f   : > { %v2517_v47 = vld [vmem:[#allocation2 + $0x270] sm:$0xff] }
 0x320   : > { %2645 = vst.msk [vmem:[%s3589_s10 + $0x270] sm:$0xff] %vm1202_vm1, %v2517_v47 }
 0x321   : > { %2422 = vst.msk [vmem:[#allocation2 + $0x278] sm:$0xff] %vm1202_vm1, %v2326_v39 }
 0x328   : > { %v2518_v17 = vld [vmem:[#allocation2 + $0x278] sm:$0xff] }
 0x329   : > { %2646 = vst.msk [vmem:[%s3589_s10 + $0x278] sm:$0xff] %vm1202_vm1, %v2518_v17 }
 0x32a PF: > { %s13_s14 = sadd.s32 1, %s3408_s14   ;;  %s4660_s12 = smov %s3404_s13 }
 0x32b   : > { %p10_p5 = scmp.ge.s32.totalorder %s13_s14, 4   ;;  %s4661_s13 = smov %s4663_s15 }
 0x32d   :  { %12 = sbr.rel (!%p10_p5) target bundleno = 2 (0x2), region = 65 }

</bundles_post_ra>
